<compile_context>
chip_gen: v7x
topology: tpu7x:2x2x1
jax: 0.10.0
libtpu: 0.0.40
codegen_flags: <defaults>
</compile_context>

<pallas_src>
import functools

import jax
import jax.numpy as jnp
import numpy as np
from jax.experimental import pallas as pl
from jax.experimental.pallas import tpu as pltpu

DIN = 128       # 4*20 = 80 input features, zero-padded to one lane-dense vreg row
H = 256         # LSTM hidden size
G = 4 * H       # gate width (i, f, g, o)


def _sigmoid(x):
    # One EUP op (tanh) instead of exp + divide; algebraically identical.
    return 0.5 * jnp.tanh(0.5 * x) + 0.5


# ----------------------------------------------------------------------------
# Fused kernel: encoder matmuls -> VMEM gate slab -> LSTM recurrence -> h_T
# ----------------------------------------------------------------------------
def _fused_kernel(F, Bp, x_ref, w1_ref, b1_ref, w2_ref, b2_ref,
                  wih_ref, bl_ref, whh_ref, o_ref, gates_scr):
    # ---- Frame encoder over all F*Bp frame-rows (frames/batch on sublanes,
    #      features on lanes): three lane-dense MXU matmuls. ----
    x = x_ref[...]                                            # (F*Bp, 128)
    # Spanning conv (2x5) on both muscle groups, folded into one (128,512)
    # weight: column w*32 + c  == conv1 output at width w, channel c.
    o1 = jnp.dot(x, w1_ref[...],
                 preferred_element_type=jnp.float32) + b1_ref[...]
    o1 = jnp.maximum(o1, 0.0)                                 # ReLU (F*Bp, 512)
    # AvgPool(1,2) + Conv2 (1x5) folded into one (512,256) weight; output
    # columns are channel-major (c_out*4 + w) == PyTorch x.view(B,-1) order.
    o2 = jnp.dot(o1, w2_ref[...],
                 preferred_element_type=jnp.float32) + b2_ref[...]
    o2 = jnp.maximum(o2, 0.0)                                 # ReLU (F*Bp, 256)
    # Hoisted LSTM input projection + (b_ih + b_hh): lane-dense (F*Bp, 1024).
    # (bf16 operands here with f32 accumulation would be a further v6e/v7x
    #  option; kept f32 so the f32 reference check stays tight.)
    gates_scr[...] = (jnp.dot(o2, wih_ref[...],
                              preferred_element_type=jnp.float32)
                      + bl_ref[...])

    # ---- LSTM recurrence: only h @ W_hh remains on the serial path. ----
    def step(t, carry):
        h, c = carry
        off = pl.multiple_of(t * Bp, Bp)
        g = gates_scr[pl.ds(off, Bp), :] + jnp.dot(
            h, whh_ref[...], preferred_element_type=jnp.float32)
        i_g = _sigmoid(g[:, 0:H])
        f_g = _sigmoid(g[:, H:2 * H])
        g_g = jnp.tanh(g[:, 2 * H:3 * H])
        o_g = _sigmoid(g[:, 3 * H:4 * H])
        c_new = f_g * c + i_g * g_g
        h_new = o_g * jnp.tanh(c_new)
        return (h_new, c_new)

    h0 = jnp.zeros((Bp, H), jnp.float32)
    c0 = jnp.zeros((Bp, H), jnp.float32)
    h_last, _ = jax.lax.fori_loop(0, F, step, (h0, c0), unroll=F <= 64)
    o_ref[...] = h_last


def scnn_forward_fused(x_flat, kp, F, Bp):
    """x_flat: (F*Bp, 128) time-major frame rows -> h_T: (Bp, 256)."""
    n_rows = F * Bp

    weight_bytes = 4 * sum(int(np.prod(kp[k].shape)) for k in
                           ("w1", "b1", "w2", "b2", "wih_t", "b_lstm", "whh_t"))
    vmem = (2 * weight_bytes            # (conservatively) double-buffered weights
            + 2 * n_rows * DIN * 4      # input block
            + 2 * Bp * H * 4            # output block
            + n_rows * G * 4            # gate scratch
            + (8 << 20))                # headroom for compiler temporaries
    vmem = int(min(vmem, 48 << 20))     # stay under v7x's 64 MiB physical VMEM

    kernel = functools.partial(_fused_kernel, F, Bp)
    return pl.pallas_call(
        kernel,
        out_shape=jax.ShapeDtypeStruct((Bp, H), jnp.float32),
        grid=(1,),
        in_specs=[
            pl.BlockSpec((n_rows, DIN), lambda i: (0, 0)),
            pl.BlockSpec(kp["w1"].shape, lambda i: (0, 0)),
            pl.BlockSpec(kp["b1"].shape, lambda i: (0, 0)),
            pl.BlockSpec(kp["w2"].shape, lambda i: (0, 0)),
            pl.BlockSpec(kp["b2"].shape, lambda i: (0, 0)),
            pl.BlockSpec(kp["wih_t"].shape, lambda i: (0, 0)),
            pl.BlockSpec(kp["b_lstm"].shape, lambda i: (0, 0)),
            pl.BlockSpec(kp["whh_t"].shape, lambda i: (0, 0)),
        ],
        out_specs=pl.BlockSpec((Bp, H), lambda i: (0, 0)),
        scratch_shapes=[pltpu.VMEM((n_rows, G), jnp.float32)],
        compiler_params=pltpu.CompilerParams(
            dimension_semantics=("arbitrary",),
            vmem_limit_bytes=vmem),
    )(x_flat, kp["w1"], kp["b1"], kp["w2"], kp["b2"],
      kp["wih_t"], kp["b_lstm"], kp["whh_t"])


# ----------------------------------------------------------------------------
# Parameters
# ----------------------------------------------------------------------------
def init_params(key):
    ks = jax.random.split(key, 10)
    s = 0.1
    return {
        "w1l": jax.random.normal(ks[0], (16, 1, 2, 5), jnp.float32) * s,
        "b1l": jax.random.normal(ks[1], (16,), jnp.float32) * s,
        "w1r": jax.random.normal(ks[2], (16, 1, 2, 5), jnp.float32) * s,
        "b1r": jax.random.normal(ks[3], (16,), jnp.float32) * s,
        "w2": jax.random.normal(ks[4], (64, 32, 1, 5), jnp.float32) * s,
        "b2": jax.random.normal(ks[5], (64,), jnp.float32) * s,
        "wih": jax.random.normal(ks[6], (1024, 256), jnp.float32) * s,
        "whh": jax.random.normal(ks[7], (1024, 256), jnp.float32) * s,
        "bih": jax.random.normal(ks[8], (1024,), jnp.float32) * s,
        "bhh": jax.random.normal(ks[9], (1024,), jnp.float32) * s,
    }


def prepare_kernel_params(p):
    """Fold conv1 / pool+conv2 into dense matmul weights (host-side, once)."""
    w1l = np.asarray(p["w1l"])
    w1r = np.asarray(p["w1r"])
    b1l = np.asarray(p["b1l"])
    b1r = np.asarray(p["b1r"])
    w2 = np.asarray(p["w2"])
    b2 = np.asarray(p["b2"])

    # conv1 as (DIN, 512): column w*32+c; rows index x[n, m*20 + f]
    w1_big = np.zeros((DIN, 16 * 32), np.float32)
    b1_big = np.zeros((1, 16 * 32), np.float32)
    for w in range(16):
        for c in range(16):
            for kh in range(2):
                for kw in range(5):
                    w1_big[kh * 20 + w + kw, w * 32 + c] = w1l[c, 0, kh, kw]
                    w1_big[(kh + 2) * 20 + w + kw, w * 32 + 16 + c] = \
                        w1r[c, 0, kh, kw]
        b1_big[0, w * 32:w * 32 + 16] = b1l
        b1_big[0, w * 32 + 16:w * 32 + 32] = b1r

    # avgpool(1,2) + conv2 as (512, 256): row w1*32+c_in, col c_out*4+w_out
    w2_big = np.zeros((16 * 32, 64 * 4), np.float32)
    b2_big = np.zeros((1, 64 * 4), np.float32)
    for c_out in range(64):
        for w_out in range(4):
            col = c_out * 4 + w_out
            b2_big[0, col] = b2[c_out]
            for kw in range(5):
                p_pos = w_out + kw
                for c_in in range(32):
                    tap = 0.5 * w2[c_out, c_in, 0, kw]
                    w2_big[(2 * p_pos) * 32 + c_in, col] += tap
                    w2_big[(2 * p_pos + 1) * 32 + c_in, col] += tap

    # LSTM: gates_x = feats @ wih_t + (bih+bhh); recurrence adds h @ whh_t.
    wih_t = np.asarray(p["wih"]).T                            # (256, 1024)
    whh_t = np.asarray(p["whh"]).T                            # (256, 1024)
    b_lstm = (np.asarray(p["bih"]) + np.asarray(p["bhh"])).reshape(1, 1024)

    return {
        "w1": jnp.asarray(w1_big), "b1": jnp.asarray(b1_big),
        "w2": jnp.asarray(w2_big), "b2": jnp.asarray(b2_big),
        "wih_t": jnp.asarray(wih_t), "b_lstm": jnp.asarray(b_lstm),
        "whh_t": jnp.asarray(whh_t),
    }


# ----------------------------------------------------------------------------
# Full model
# ----------------------------------------------------------------------------
@jax.jit
def frequency_domain_scnn(x, kp):
    B, F, M, FR = x.shape
    Bp = ((B + 7) // 8) * 8                                   # sublane multiple

    # Reorder/pad the TINY input (B*F*80 f32 ~ 5 KiB) to time-major
    # (F, Bp, 128) so the gate slab never needs an XLA transpose/pad and the
    # in-kernel recurrence reads contiguous Bp-row slabs.
    x_tm = jnp.transpose(x.reshape(B, F, M * FR), (1, 0, 2))  # (F, B, 80)
    x_tm = jnp.pad(x_tm, ((0, 0), (0, Bp - B), (0, DIN - M * FR)))
    x_flat = x_tm.reshape(F * Bp, DIN)                        # (F*Bp, 128)

    h_last = scnn_forward_fused(x_flat, kp, F, Bp)            # (Bp, 256)
    return h_last[:B]


# ----------------------------------------------------------------------------
# Pure-JAX reference (mirrors the PyTorch forward) for verification.
# ----------------------------------------------------------------------------
def ref_forward(x, p):
    B, F, M, FR = x.shape
    N = B * F
    xf = x.reshape(N, M, FR)

    def conv1(xg, w, b):  # xg (N,2,20), w (16,1,2,5)
        cols = []
        for wpos in range(16):
            patch = xg[:, :, wpos:wpos + 5]                   # (N,2,5)
            cols.append(jnp.einsum('nhw,ohw->no', patch, w[:, 0]) + b)
        return jnp.stack(cols, axis=-1)                       # (N,16,16)

    ol = conv1(xf[:, 0:2], p["w1l"], p["b1l"])
    orr = conv1(xf[:, 2:4], p["w1r"], p["b1r"])
    o1 = jax.nn.relu(jnp.concatenate([ol, orr], axis=1))      # (N,32,16)
    pooled = o1.reshape(N, 32, 8, 2).mean(-1)                 # (N,32,8)

    cols = []
    for wpos in range(4):
        patch = pooled[:, :, wpos:wpos + 5]                   # (N,32,5)
        cols.append(jnp.einsum('ncw,ocw->no', patch, p["w2"][:, :, 0, :])
                    + p["b2"])
    o2 = jax.nn.relu(jnp.stack(cols, axis=-1))                # (N,64,4)
    feats = o2.reshape(N, 256).reshape(B, F, 256)

    h = jnp.zeros((B, H), jnp.float32)
    c = jnp.zeros((B, H), jnp.float32)
    for t in range(F):
        gates = (feats[:, t] @ p["wih"].T + p["bih"]
                 + h @ p["whh"].T + p["bhh"])
        i = jax.nn.sigmoid(gates[:, 0:H])
        f = jax.nn.sigmoid(gates[:, H:2 * H])
        g = jnp.tanh(gates[:, 2 * H:3 * H])
        o = jax.nn.sigmoid(gates[:, 3 * H:4 * H])
        c = f * c + i * g
        h = o * jnp.tanh(c)
    return h


if __name__ == "__main__":
    key = jax.random.PRNGKey(0)
    k_x, k_p = jax.random.split(key)

    B, FRAMES = 2, 8
    x = jax.random.normal(k_x, (B, FRAMES, 4, 20), jnp.float32)

    params = init_params(k_p)
    kparams = prepare_kernel_params(params)

    out = jax.block_until_ready(frequency_domain_scnn(x, kparams))
    assert out.shape == (B, 256), out.shape

    ref = jax.block_until_ready(ref_forward(x, params))
    np.testing.assert_allclose(np.asarray(out), np.asarray(ref),
                               rtol=1e-3, atol=1e-4)

    print("KERNEL_OK")
</pallas_src>

<mosaic_0001>
module attributes {stable_mosaic.version = 11 : i64} {
  func.func @_fused_kernel(%arg0: i32, %arg1: memref<64x128xf32, #tpu.memory_space<vmem>>, %arg2: memref<128x512xf32, #tpu.memory_space<vmem>>, %arg3: memref<1x512xf32, #tpu.memory_space<vmem>>, %arg4: memref<512x256xf32, #tpu.memory_space<vmem>>, %arg5: memref<1x256xf32, #tpu.memory_space<vmem>>, %arg6: memref<256x1024xf32, #tpu.memory_space<vmem>>, %arg7: memref<1x1024xf32, #tpu.memory_space<vmem>>, %arg8: memref<256x1024xf32, #tpu.memory_space<vmem>>, %arg9: memref<8x256xf32, #tpu.memory_space<vmem>>, %arg10: memref<64x1024xf32, #tpu.memory_space<vmem>>) attributes {dimension_semantics = [#tpu.dimension_semantics<arbitrary>], iteration_bounds = array<i64: 1>, scalar_prefetch = 0 : i64, scratch_operands = 1 : i64, tpu.core_type = #tpu.core_type<tc>, window_params = [{pipeline_mode = #tpu.pipeline_mode<synchronous>, transform_indices = @transform_0, window_bounds = array<i64: 64, 128>}, {pipeline_mode = #tpu.pipeline_mode<synchronous>, transform_indices = @transform_1, window_bounds = array<i64: 128, 512>}, {pipeline_mode = #tpu.pipeline_mode<synchronous>, transform_indices = @transform_2, window_bounds = array<i64: 1, 512>}, {pipeline_mode = #tpu.pipeline_mode<synchronous>, transform_indices = @transform_3, window_bounds = array<i64: 512, 256>}, {pipeline_mode = #tpu.pipeline_mode<synchronous>, transform_indices = @transform_4, window_bounds = array<i64: 1, 256>}, {pipeline_mode = #tpu.pipeline_mode<synchronous>, transform_indices = @transform_5, window_bounds = array<i64: 256, 1024>}, {pipeline_mode = #tpu.pipeline_mode<synchronous>, transform_indices = @transform_6, window_bounds = array<i64: 1, 1024>}, {pipeline_mode = #tpu.pipeline_mode<synchronous>, transform_indices = @transform_7, window_bounds = array<i64: 256, 1024>}, {pipeline_mode = #tpu.pipeline_mode<synchronous>, transform_indices = @transform_8, window_bounds = array<i64: 8, 256>}]} {
    %c0 = arith.constant 0 : index
    %c0_0 = arith.constant 0 : index
    %0 = vector.load %arg1[%c0, %c0_0] : memref<64x128xf32, #tpu.memory_space<vmem>>, vector<64x128xf32>
    %c0_1 = arith.constant 0 : index
    %c0_2 = arith.constant 0 : index
    %1 = vector.load %arg2[%c0_1, %c0_2] : memref<128x512xf32, #tpu.memory_space<vmem>>, vector<128x512xf32>
    %cst = arith.constant dense<0.000000e+00> : vector<64x512xf32>
    %2 = tpu.matmul %0, %1, %cst {dimension_numbers = #tpu.dot_dimension_numbers<[1], [0], [0], [1], [0, 0, 1, 1], [], []>} : vector<64x128xf32>, vector<128x512xf32>, vector<64x512xf32> -> vector<64x512xf32>
    %c0_3 = arith.constant 0 : index
    %c0_4 = arith.constant 0 : index
    %3 = vector.load %arg3[%c0_3, %c0_4] : memref<1x512xf32, #tpu.memory_space<vmem>>, vector<1x512xf32>
    %4 = vector.broadcast %3 : vector<1x512xf32> to vector<64x512xf32>
    %5 = arith.addf %2, %4 : vector<64x512xf32>
    %cst_5 = arith.constant 0.000000e+00 : f32
    %6 = vector.broadcast %cst_5 : f32 to vector<64x512xf32>
    %7 = arith.maximumf %5, %6 : vector<64x512xf32>
    %c0_6 = arith.constant 0 : index
    %c0_7 = arith.constant 0 : index
    %8 = vector.load %arg4[%c0_6, %c0_7] : memref<512x256xf32, #tpu.memory_space<vmem>>, vector<512x256xf32>
    %cst_8 = arith.constant dense<0.000000e+00> : vector<64x256xf32>
    %9 = tpu.matmul %7, %8, %cst_8 {dimension_numbers = #tpu.dot_dimension_numbers<[1], [0], [0], [1], [0, 0, 1, 1], [], []>} : vector<64x512xf32>, vector<512x256xf32>, vector<64x256xf32> -> vector<64x256xf32>
    %c0_9 = arith.constant 0 : index
    %c0_10 = arith.constant 0 : index
    %10 = vector.load %arg5[%c0_9, %c0_10] : memref<1x256xf32, #tpu.memory_space<vmem>>, vector<1x256xf32>
    %11 = vector.broadcast %10 : vector<1x256xf32> to vector<64x256xf32>
    %12 = arith.addf %9, %11 : vector<64x256xf32>
    %cst_11 = arith.constant 0.000000e+00 : f32
    %13 = vector.broadcast %cst_11 : f32 to vector<64x256xf32>
    %14 = arith.maximumf %12, %13 : vector<64x256xf32>
    %c0_12 = arith.constant 0 : index
    %c0_13 = arith.constant 0 : index
    %15 = vector.load %arg6[%c0_12, %c0_13] : memref<256x1024xf32, #tpu.memory_space<vmem>>, vector<256x1024xf32>
    %cst_14 = arith.constant dense<0.000000e+00> : vector<64x1024xf32>
    %16 = tpu.matmul %14, %15, %cst_14 {dimension_numbers = #tpu.dot_dimension_numbers<[1], [0], [0], [1], [0, 0, 1, 1], [], []>} : vector<64x256xf32>, vector<256x1024xf32>, vector<64x1024xf32> -> vector<64x1024xf32>
    %c0_15 = arith.constant 0 : index
    %c0_16 = arith.constant 0 : index
    %17 = vector.load %arg7[%c0_15, %c0_16] : memref<1x1024xf32, #tpu.memory_space<vmem>>, vector<1x1024xf32>
    %18 = vector.broadcast %17 : vector<1x1024xf32> to vector<64x1024xf32>
    %19 = arith.addf %16, %18 : vector<64x1024xf32>
    %c0_17 = arith.constant 0 : index
    %c0_18 = arith.constant 0 : index
    %20 = vector.load %arg10[%c0_17, %c0_18] : memref<64x1024xf32, #tpu.memory_space<vmem>>, vector<64x1024xf32>
    tpu.vector_store %arg10[%c0_17, %c0_18], %19 {strides = array<i32>} : memref<64x1024xf32, #tpu.memory_space<vmem>>, vector<64x1024xf32>,
    %cst_19 = arith.constant 0.000000e+00 : f32
    %21 = vector.broadcast %cst_19 : f32 to vector<8x256xf32>
    %cst_20 = arith.constant 0.000000e+00 : f32
    %22 = vector.broadcast %cst_20 : f32 to vector<8x256xf32>
    %c0_i32 = arith.constant 0 : i32
    %c8_i32 = arith.constant 8 : i32
    %23 = arith.muli %c0_i32, %c8_i32 : i32
    %24 = tpu.assume_multiple %23, 8 : i32
    %25 = arith.index_cast %24 : i32 to index
    %c0_21 = arith.constant 0 : index
    %26 = vector.load %arg10[%25, %c0_21] : memref<64x1024xf32, #tpu.memory_space<vmem>>, vector<8x1024xf32>
    %c0_22 = arith.constant 0 : index
    %c0_23 = arith.constant 0 : index
    %27 = vector.load %arg8[%c0_22, %c0_23] : memref<256x1024xf32, #tpu.memory_space<vmem>>, vector<256x1024xf32>
    %cst_24 = arith.constant dense<0.000000e+00> : vector<8x1024xf32>
    %28 = tpu.matmul %21, %27, %cst_24 {dimension_numbers = #tpu.dot_dimension_numbers<[1], [0], [0], [1], [0, 0, 1, 1], [], []>} : vector<8x256xf32>, vector<256x1024xf32>, vector<8x1024xf32> -> vector<8x1024xf32>
    %29 = arith.addf %26, %28 : vector<8x1024xf32>
    %30 = vector.extract_strided_slice %29 {offsets = [0, 0], sizes = [8, 256], strides = [1, 1]} : vector<8x1024xf32> to vector<8x256xf32>
    %cst_25 = arith.constant 5.000000e-01 : f32
    %31 = vector.broadcast %cst_25 : f32 to vector<8x256xf32>
    %32 = arith.mulf %31, %30 : vector<8x256xf32>
    %33 = math.tanh %32 : vector<8x256xf32>
    %cst_26 = arith.constant 5.000000e-01 : f32
    %34 = vector.broadcast %cst_26 : f32 to vector<8x256xf32>
    %35 = arith.mulf %34, %33 : vector<8x256xf32>
    %cst_27 = arith.constant 5.000000e-01 : f32
    %36 = vector.broadcast %cst_27 : f32 to vector<8x256xf32>
    %37 = arith.addf %35, %36 : vector<8x256xf32>
    %38 = vector.extract_strided_slice %29 {offsets = [0, 256], sizes = [8, 256], strides = [1, 1]} : vector<8x1024xf32> to vector<8x256xf32>
    %cst_28 = arith.constant 5.000000e-01 : f32
    %39 = vector.broadcast %cst_28 : f32 to vector<8x256xf32>
    %40 = arith.mulf %39, %38 : vector<8x256xf32>
    %41 = math.tanh %40 : vector<8x256xf32>
    %cst_29 = arith.constant 5.000000e-01 : f32
    %42 = vector.broadcast %cst_29 : f32 to vector<8x256xf32>
    %43 = arith.mulf %42, %41 : vector<8x256xf32>
    %cst_30 = arith.constant 5.000000e-01 : f32
    %44 = vector.broadcast %cst_30 : f32 to vector<8x256xf32>
    %45 = arith.addf %43, %44 : vector<8x256xf32>
    %46 = vector.extract_strided_slice %29 {offsets = [0, 512], sizes = [8, 256], strides = [1, 1]} : vector<8x1024xf32> to vector<8x256xf32>
    %47 = math.tanh %46 : vector<8x256xf32>
    %48 = vector.extract_strided_slice %29 {offsets = [0, 768], sizes = [8, 256], strides = [1, 1]} : vector<8x1024xf32> to vector<8x256xf32>
    %cst_31 = arith.constant 5.000000e-01 : f32
    %49 = vector.broadcast %cst_31 : f32 to vector<8x256xf32>
    %50 = arith.mulf %49, %48 : vector<8x256xf32>
    %51 = math.tanh %50 : vector<8x256xf32>
    %cst_32 = arith.constant 5.000000e-01 : f32
    %52 = vector.broadcast %cst_32 : f32 to vector<8x256xf32>
    %53 = arith.mulf %52, %51 : vector<8x256xf32>
    %cst_33 = arith.constant 5.000000e-01 : f32
    %54 = vector.broadcast %cst_33 : f32 to vector<8x256xf32>
    %55 = arith.addf %53, %54 : vector<8x256xf32>
    %56 = arith.mulf %45, %22 : vector<8x256xf32>
    %57 = arith.mulf %37, %47 : vector<8x256xf32>
    %58 = arith.addf %56, %57 : vector<8x256xf32>
    %59 = math.tanh %58 : vector<8x256xf32>
    %60 = arith.mulf %55, %59 : vector<8x256xf32>
    %c1_i32 = arith.constant 1 : i32
    %c8_i32_34 = arith.constant 8 : i32
    %61 = arith.muli %c1_i32, %c8_i32_34 : i32
    %62 = tpu.assume_multiple %61, 8 : i32
    %63 = arith.index_cast %62 : i32 to index
    %c0_35 = arith.constant 0 : index
    %64 = vector.load %arg10[%63, %c0_35] : memref<64x1024xf32, #tpu.memory_space<vmem>>, vector<8x1024xf32>
    %c0_36 = arith.constant 0 : index
    %c0_37 = arith.constant 0 : index
    %65 = vector.load %arg8[%c0_36, %c0_37] : memref<256x1024xf32, #tpu.memory_space<vmem>>, vector<256x1024xf32>
    %cst_38 = arith.constant dense<0.000000e+00> : vector<8x1024xf32>
    %66 = tpu.matmul %60, %65, %cst_38 {dimension_numbers = #tpu.dot_dimension_numbers<[1], [0], [0], [1], [0, 0, 1, 1], [], []>} : vector<8x256xf32>, vector<256x1024xf32>, vector<8x1024xf32> -> vector<8x1024xf32>
    %67 = arith.addf %64, %66 : vector<8x1024xf32>
    %68 = vector.extract_strided_slice %67 {offsets = [0, 0], sizes = [8, 256], strides = [1, 1]} : vector<8x1024xf32> to vector<8x256xf32>
    %cst_39 = arith.constant 5.000000e-01 : f32
    %69 = vector.broadcast %cst_39 : f32 to vector<8x256xf32>
    %70 = arith.mulf %69, %68 : vector<8x256xf32>
    %71 = math.tanh %70 : vector<8x256xf32>
    %cst_40 = arith.constant 5.000000e-01 : f32
    %72 = vector.broadcast %cst_40 : f32 to vector<8x256xf32>
    %73 = arith.mulf %72, %71 : vector<8x256xf32>
    %cst_41 = arith.constant 5.000000e-01 : f32
    %74 = vector.broadcast %cst_41 : f32 to vector<8x256xf32>
    %75 = arith.addf %73, %74 : vector<8x256xf32>
    %76 = vector.extract_strided_slice %67 {offsets = [0, 256], sizes = [8, 256], strides = [1, 1]} : vector<8x1024xf32> to vector<8x256xf32>
    %cst_42 = arith.constant 5.000000e-01 : f32
    %77 = vector.broadcast %cst_42 : f32 to vector<8x256xf32>
    %78 = arith.mulf %77, %76 : vector<8x256xf32>
    %79 = math.tanh %78 : vector<8x256xf32>
    %cst_43 = arith.constant 5.000000e-01 : f32
    %80 = vector.broadcast %cst_43 : f32 to vector<8x256xf32>
    %81 = arith.mulf %80, %79 : vector<8x256xf32>
    %cst_44 = arith.constant 5.000000e-01 : f32
    %82 = vector.broadcast %cst_44 : f32 to vector<8x256xf32>
    %83 = arith.addf %81, %82 : vector<8x256xf32>
    %84 = vector.extract_strided_slice %67 {offsets = [0, 512], sizes = [8, 256], strides = [1, 1]} : vector<8x1024xf32> to vector<8x256xf32>
    %85 = math.tanh %84 : vector<8x256xf32>
    %86 = vector.extract_strided_slice %67 {offsets = [0, 768], sizes = [8, 256], strides = [1, 1]} : vector<8x1024xf32> to vector<8x256xf32>
    %cst_45 = arith.constant 5.000000e-01 : f32
    %87 = vector.broadcast %cst_45 : f32 to vector<8x256xf32>
    %88 = arith.mulf %87, %86 : vector<8x256xf32>
    %89 = math.tanh %88 : vector<8x256xf32>
    %cst_46 = arith.constant 5.000000e-01 : f32
    %90 = vector.broadcast %cst_46 : f32 to vector<8x256xf32>
    %91 = arith.mulf %90, %89 : vector<8x256xf32>
    %cst_47 = arith.constant 5.000000e-01 : f32
    %92 = vector.broadcast %cst_47 : f32 to vector<8x256xf32>
    %93 = arith.addf %91, %92 : vector<8x256xf32>
    %94 = arith.mulf %83, %58 : vector<8x256xf32>
    %95 = arith.mulf %75, %85 : vector<8x256xf32>
    %96 = arith.addf %94, %95 : vector<8x256xf32>
    %97 = math.tanh %96 : vector<8x256xf32>
    %98 = arith.mulf %93, %97 : vector<8x256xf32>
    %c2_i32 = arith.constant 2 : i32
    %c8_i32_48 = arith.constant 8 : i32
    %99 = arith.muli %c2_i32, %c8_i32_48 : i32
    %100 = tpu.assume_multiple %99, 8 : i32
    %101 = arith.index_cast %100 : i32 to index
    %c0_49 = arith.constant 0 : index
    %102 = vector.load %arg10[%101, %c0_49] : memref<64x1024xf32, #tpu.memory_space<vmem>>, vector<8x1024xf32>
    %c0_50 = arith.constant 0 : index
    %c0_51 = arith.constant 0 : index
    %103 = vector.load %arg8[%c0_50, %c0_51] : memref<256x1024xf32, #tpu.memory_space<vmem>>, vector<256x1024xf32>
    %cst_52 = arith.constant dense<0.000000e+00> : vector<8x1024xf32>
    %104 = tpu.matmul %98, %103, %cst_52 {dimension_numbers = #tpu.dot_dimension_numbers<[1], [0], [0], [1], [0, 0, 1, 1], [], []>} : vector<8x256xf32>, vector<256x1024xf32>, vector<8x1024xf32> -> vector<8x1024xf32>
    %105 = arith.addf %102, %104 : vector<8x1024xf32>
    %106 = vector.extract_strided_slice %105 {offsets = [0, 0], sizes = [8, 256], strides = [1, 1]} : vector<8x1024xf32> to vector<8x256xf32>
    %cst_53 = arith.constant 5.000000e-01 : f32
    %107 = vector.broadcast %cst_53 : f32 to vector<8x256xf32>
    %108 = arith.mulf %107, %106 : vector<8x256xf32>
    %109 = math.tanh %108 : vector<8x256xf32>
    %cst_54 = arith.constant 5.000000e-01 : f32
    %110 = vector.broadcast %cst_54 : f32 to vector<8x256xf32>
    %111 = arith.mulf %110, %109 : vector<8x256xf32>
    %cst_55 = arith.constant 5.000000e-01 : f32
    %112 = vector.broadcast %cst_55 : f32 to vector<8x256xf32>
    %113 = arith.addf %111, %112 : vector<8x256xf32>
    %114 = vector.extract_strided_slice %105 {offsets = [0, 256], sizes = [8, 256], strides = [1, 1]} : vector<8x1024xf32> to vector<8x256xf32>
    %cst_56 = arith.constant 5.000000e-01 : f32
    %115 = vector.broadcast %cst_56 : f32 to vector<8x256xf32>
    %116 = arith.mulf %115, %114 : vector<8x256xf32>
    %117 = math.tanh %116 : vector<8x256xf32>
    %cst_57 = arith.constant 5.000000e-01 : f32
    %118 = vector.broadcast %cst_57 : f32 to vector<8x256xf32>
    %119 = arith.mulf %118, %117 : vector<8x256xf32>
    %cst_58 = arith.constant 5.000000e-01 : f32
    %120 = vector.broadcast %cst_58 : f32 to vector<8x256xf32>
    %121 = arith.addf %119, %120 : vector<8x256xf32>
    %122 = vector.extract_strided_slice %105 {offsets = [0, 512], sizes = [8, 256], strides = [1, 1]} : vector<8x1024xf32> to vector<8x256xf32>
    %123 = math.tanh %122 : vector<8x256xf32>
    %124 = vector.extract_strided_slice %105 {offsets = [0, 768], sizes = [8, 256], strides = [1, 1]} : vector<8x1024xf32> to vector<8x256xf32>
    %cst_59 = arith.constant 5.000000e-01 : f32
    %125 = vector.broadcast %cst_59 : f32 to vector<8x256xf32>
    %126 = arith.mulf %125, %124 : vector<8x256xf32>
    %127 = math.tanh %126 : vector<8x256xf32>
    %cst_60 = arith.constant 5.000000e-01 : f32
    %128 = vector.broadcast %cst_60 : f32 to vector<8x256xf32>
    %129 = arith.mulf %128, %127 : vector<8x256xf32>
    %cst_61 = arith.constant 5.000000e-01 : f32
    %130 = vector.broadcast %cst_61 : f32 to vector<8x256xf32>
    %131 = arith.addf %129, %130 : vector<8x256xf32>
    %132 = arith.mulf %121, %96 : vector<8x256xf32>
    %133 = arith.mulf %113, %123 : vector<8x256xf32>
    %134 = arith.addf %132, %133 : vector<8x256xf32>
    %135 = math.tanh %134 : vector<8x256xf32>
    %136 = arith.mulf %131, %135 : vector<8x256xf32>
    %c3_i32 = arith.constant 3 : i32
    %c8_i32_62 = arith.constant 8 : i32
    %137 = arith.muli %c3_i32, %c8_i32_62 : i32
    %138 = tpu.assume_multiple %137, 8 : i32
    %139 = arith.index_cast %138 : i32 to index
    %c0_63 = arith.constant 0 : index
    %140 = vector.load %arg10[%139, %c0_63] : memref<64x1024xf32, #tpu.memory_space<vmem>>, vector<8x1024xf32>
    %c0_64 = arith.constant 0 : index
    %c0_65 = arith.constant 0 : index
    %141 = vector.load %arg8[%c0_64, %c0_65] : memref<256x1024xf32, #tpu.memory_space<vmem>>, vector<256x1024xf32>
    %cst_66 = arith.constant dense<0.000000e+00> : vector<8x1024xf32>
    %142 = tpu.matmul %136, %141, %cst_66 {dimension_numbers = #tpu.dot_dimension_numbers<[1], [0], [0], [1], [0, 0, 1, 1], [], []>} : vector<8x256xf32>, vector<256x1024xf32>, vector<8x1024xf32> -> vector<8x1024xf32>
    %143 = arith.addf %140, %142 : vector<8x1024xf32>
    %144 = vector.extract_strided_slice %143 {offsets = [0, 0], sizes = [8, 256], strides = [1, 1]} : vector<8x1024xf32> to vector<8x256xf32>
    %cst_67 = arith.constant 5.000000e-01 : f32
    %145 = vector.broadcast %cst_67 : f32 to vector<8x256xf32>
    %146 = arith.mulf %145, %144 : vector<8x256xf32>
    %147 = math.tanh %146 : vector<8x256xf32>
    %cst_68 = arith.constant 5.000000e-01 : f32
    %148 = vector.broadcast %cst_68 : f32 to vector<8x256xf32>
    %149 = arith.mulf %148, %147 : vector<8x256xf32>
    %cst_69 = arith.constant 5.000000e-01 : f32
    %150 = vector.broadcast %cst_69 : f32 to vector<8x256xf32>
    %151 = arith.addf %149, %150 : vector<8x256xf32>
    %152 = vector.extract_strided_slice %143 {offsets = [0, 256], sizes = [8, 256], strides = [1, 1]} : vector<8x1024xf32> to vector<8x256xf32>
    %cst_70 = arith.constant 5.000000e-01 : f32
    %153 = vector.broadcast %cst_70 : f32 to vector<8x256xf32>
    %154 = arith.mulf %153, %152 : vector<8x256xf32>
    %155 = math.tanh %154 : vector<8x256xf32>
    %cst_71 = arith.constant 5.000000e-01 : f32
    %156 = vector.broadcast %cst_71 : f32 to vector<8x256xf32>
    %157 = arith.mulf %156, %155 : vector<8x256xf32>
    %cst_72 = arith.constant 5.000000e-01 : f32
    %158 = vector.broadcast %cst_72 : f32 to vector<8x256xf32>
    %159 = arith.addf %157, %158 : vector<8x256xf32>
    %160 = vector.extract_strided_slice %143 {offsets = [0, 512], sizes = [8, 256], strides = [1, 1]} : vector<8x1024xf32> to vector<8x256xf32>
    %161 = math.tanh %160 : vector<8x256xf32>
    %162 = vector.extract_strided_slice %143 {offsets = [0, 768], sizes = [8, 256], strides = [1, 1]} : vector<8x1024xf32> to vector<8x256xf32>
    %cst_73 = arith.constant 5.000000e-01 : f32
    %163 = vector.broadcast %cst_73 : f32 to vector<8x256xf32>
    %164 = arith.mulf %163, %162 : vector<8x256xf32>
    %165 = math.tanh %164 : vector<8x256xf32>
    %cst_74 = arith.constant 5.000000e-01 : f32
    %166 = vector.broadcast %cst_74 : f32 to vector<8x256xf32>
    %167 = arith.mulf %166, %165 : vector<8x256xf32>
    %cst_75 = arith.constant 5.000000e-01 : f32
    %168 = vector.broadcast %cst_75 : f32 to vector<8x256xf32>
    %169 = arith.addf %167, %168 : vector<8x256xf32>
    %170 = arith.mulf %159, %134 : vector<8x256xf32>
    %171 = arith.mulf %151, %161 : vector<8x256xf32>
    %172 = arith.addf %170, %171 : vector<8x256xf32>
    %173 = math.tanh %172 : vector<8x256xf32>
    %174 = arith.mulf %169, %173 : vector<8x256xf32>
    %c4_i32 = arith.constant 4 : i32
    %c8_i32_76 = arith.constant 8 : i32
    %175 = arith.muli %c4_i32, %c8_i32_76 : i32
    %176 = tpu.assume_multiple %175, 8 : i32
    %177 = arith.index_cast %176 : i32 to index
    %c0_77 = arith.constant 0 : index
    %178 = vector.load %arg10[%177, %c0_77] : memref<64x1024xf32, #tpu.memory_space<vmem>>, vector<8x1024xf32>
    %c0_78 = arith.constant 0 : index
    %c0_79 = arith.constant 0 : index
    %179 = vector.load %arg8[%c0_78, %c0_79] : memref<256x1024xf32, #tpu.memory_space<vmem>>, vector<256x1024xf32>
    %cst_80 = arith.constant dense<0.000000e+00> : vector<8x1024xf32>
    %180 = tpu.matmul %174, %179, %cst_80 {dimension_numbers = #tpu.dot_dimension_numbers<[1], [0], [0], [1], [0, 0, 1, 1], [], []>} : vector<8x256xf32>, vector<256x1024xf32>, vector<8x1024xf32> -> vector<8x1024xf32>
    %181 = arith.addf %178, %180 : vector<8x1024xf32>
    %182 = vector.extract_strided_slice %181 {offsets = [0, 0], sizes = [8, 256], strides = [1, 1]} : vector<8x1024xf32> to vector<8x256xf32>
    %cst_81 = arith.constant 5.000000e-01 : f32
    %183 = vector.broadcast %cst_81 : f32 to vector<8x256xf32>
    %184 = arith.mulf %183, %182 : vector<8x256xf32>
    %185 = math.tanh %184 : vector<8x256xf32>
    %cst_82 = arith.constant 5.000000e-01 : f32
    %186 = vector.broadcast %cst_82 : f32 to vector<8x256xf32>
    %187 = arith.mulf %186, %185 : vector<8x256xf32>
    %cst_83 = arith.constant 5.000000e-01 : f32
    %188 = vector.broadcast %cst_83 : f32 to vector<8x256xf32>
    %189 = arith.addf %187, %188 : vector<8x256xf32>
    %190 = vector.extract_strided_slice %181 {offsets = [0, 256], sizes = [8, 256], strides = [1, 1]} : vector<8x1024xf32> to vector<8x256xf32>
    %cst_84 = arith.constant 5.000000e-01 : f32
    %191 = vector.broadcast %cst_84 : f32 to vector<8x256xf32>
    %192 = arith.mulf %191, %190 : vector<8x256xf32>
    %193 = math.tanh %192 : vector<8x256xf32>
    %cst_85 = arith.constant 5.000000e-01 : f32
    %194 = vector.broadcast %cst_85 : f32 to vector<8x256xf32>
    %195 = arith.mulf %194, %193 : vector<8x256xf32>
    %cst_86 = arith.constant 5.000000e-01 : f32
    %196 = vector.broadcast %cst_86 : f32 to vector<8x256xf32>
    %197 = arith.addf %195, %196 : vector<8x256xf32>
    %198 = vector.extract_strided_slice %181 {offsets = [0, 512], sizes = [8, 256], strides = [1, 1]} : vector<8x1024xf32> to vector<8x256xf32>
    %199 = math.tanh %198 : vector<8x256xf32>
    %200 = vector.extract_strided_slice %181 {offsets = [0, 768], sizes = [8, 256], strides = [1, 1]} : vector<8x1024xf32> to vector<8x256xf32>
    %cst_87 = arith.constant 5.000000e-01 : f32
    %201 = vector.broadcast %cst_87 : f32 to vector<8x256xf32>
    %202 = arith.mulf %201, %200 : vector<8x256xf32>
    %203 = math.tanh %202 : vector<8x256xf32>
    %cst_88 = arith.constant 5.000000e-01 : f32
    %204 = vector.broadcast %cst_88 : f32 to vector<8x256xf32>
    %205 = arith.mulf %204, %203 : vector<8x256xf32>
    %cst_89 = arith.constant 5.000000e-01 : f32
    %206 = vector.broadcast %cst_89 : f32 to vector<8x256xf32>
    %207 = arith.addf %205, %206 : vector<8x256xf32>
    %208 = arith.mulf %197, %172 : vector<8x256xf32>
    %209 = arith.mulf %189, %199 : vector<8x256xf32>
    %210 = arith.addf %208, %209 : vector<8x256xf32>
    %211 = math.tanh %210 : vector<8x256xf32>
    %212 = arith.mulf %207, %211 : vector<8x256xf32>
    %c5_i32 = arith.constant 5 : i32
    %c8_i32_90 = arith.constant 8 : i32
    %213 = arith.muli %c5_i32, %c8_i32_90 : i32
    %214 = tpu.assume_multiple %213, 8 : i32
    %215 = arith.index_cast %214 : i32 to index
    %c0_91 = arith.constant 0 : index
    %216 = vector.load %arg10[%215, %c0_91] : memref<64x1024xf32, #tpu.memory_space<vmem>>, vector<8x1024xf32>
    %c0_92 = arith.constant 0 : index
    %c0_93 = arith.constant 0 : index
    %217 = vector.load %arg8[%c0_92, %c0_93] : memref<256x1024xf32, #tpu.memory_space<vmem>>, vector<256x1024xf32>
    %cst_94 = arith.constant dense<0.000000e+00> : vector<8x1024xf32>
    %218 = tpu.matmul %212, %217, %cst_94 {dimension_numbers = #tpu.dot_dimension_numbers<[1], [0], [0], [1], [0, 0, 1, 1], [], []>} : vector<8x256xf32>, vector<256x1024xf32>, vector<8x1024xf32> -> vector<8x1024xf32>
    %219 = arith.addf %216, %218 : vector<8x1024xf32>
    %220 = vector.extract_strided_slice %219 {offsets = [0, 0], sizes = [8, 256], strides = [1, 1]} : vector<8x1024xf32> to vector<8x256xf32>
    %cst_95 = arith.constant 5.000000e-01 : f32
    %221 = vector.broadcast %cst_95 : f32 to vector<8x256xf32>
    %222 = arith.mulf %221, %220 : vector<8x256xf32>
    %223 = math.tanh %222 : vector<8x256xf32>
    %cst_96 = arith.constant 5.000000e-01 : f32
    %224 = vector.broadcast %cst_96 : f32 to vector<8x256xf32>
    %225 = arith.mulf %224, %223 : vector<8x256xf32>
    %cst_97 = arith.constant 5.000000e-01 : f32
    %226 = vector.broadcast %cst_97 : f32 to vector<8x256xf32>
    %227 = arith.addf %225, %226 : vector<8x256xf32>
    %228 = vector.extract_strided_slice %219 {offsets = [0, 256], sizes = [8, 256], strides = [1, 1]} : vector<8x1024xf32> to vector<8x256xf32>
    %cst_98 = arith.constant 5.000000e-01 : f32
    %229 = vector.broadcast %cst_98 : f32 to vector<8x256xf32>
    %230 = arith.mulf %229, %228 : vector<8x256xf32>
    %231 = math.tanh %230 : vector<8x256xf32>
    %cst_99 = arith.constant 5.000000e-01 : f32
    %232 = vector.broadcast %cst_99 : f32 to vector<8x256xf32>
    %233 = arith.mulf %232, %231 : vector<8x256xf32>
    %cst_100 = arith.constant 5.000000e-01 : f32
    %234 = vector.broadcast %cst_100 : f32 to vector<8x256xf32>
    %235 = arith.addf %233, %234 : vector<8x256xf32>
    %236 = vector.extract_strided_slice %219 {offsets = [0, 512], sizes = [8, 256], strides = [1, 1]} : vector<8x1024xf32> to vector<8x256xf32>
    %237 = math.tanh %236 : vector<8x256xf32>
    %238 = vector.extract_strided_slice %219 {offsets = [0, 768], sizes = [8, 256], strides = [1, 1]} : vector<8x1024xf32> to vector<8x256xf32>
    %cst_101 = arith.constant 5.000000e-01 : f32
    %239 = vector.broadcast %cst_101 : f32 to vector<8x256xf32>
    %240 = arith.mulf %239, %238 : vector<8x256xf32>
    %241 = math.tanh %240 : vector<8x256xf32>
    %cst_102 = arith.constant 5.000000e-01 : f32
    %242 = vector.broadcast %cst_102 : f32 to vector<8x256xf32>
    %243 = arith.mulf %242, %241 : vector<8x256xf32>
    %cst_103 = arith.constant 5.000000e-01 : f32
    %244 = vector.broadcast %cst_103 : f32 to vector<8x256xf32>
    %245 = arith.addf %243, %244 : vector<8x256xf32>
    %246 = arith.mulf %235, %210 : vector<8x256xf32>
    %247 = arith.mulf %227, %237 : vector<8x256xf32>
    %248 = arith.addf %246, %247 : vector<8x256xf32>
    %249 = math.tanh %248 : vector<8x256xf32>
    %250 = arith.mulf %245, %249 : vector<8x256xf32>
    %c6_i32 = arith.constant 6 : i32
    %c8_i32_104 = arith.constant 8 : i32
    %251 = arith.muli %c6_i32, %c8_i32_104 : i32
    %252 = tpu.assume_multiple %251, 8 : i32
    %253 = arith.index_cast %252 : i32 to index
    %c0_105 = arith.constant 0 : index
    %254 = vector.load %arg10[%253, %c0_105] : memref<64x1024xf32, #tpu.memory_space<vmem>>, vector<8x1024xf32>
    %c0_106 = arith.constant 0 : index
    %c0_107 = arith.constant 0 : index
    %255 = vector.load %arg8[%c0_106, %c0_107] : memref<256x1024xf32, #tpu.memory_space<vmem>>, vector<256x1024xf32>
    %cst_108 = arith.constant dense<0.000000e+00> : vector<8x1024xf32>
    %256 = tpu.matmul %250, %255, %cst_108 {dimension_numbers = #tpu.dot_dimension_numbers<[1], [0], [0], [1], [0, 0, 1, 1], [], []>} : vector<8x256xf32>, vector<256x1024xf32>, vector<8x1024xf32> -> vector<8x1024xf32>
    %257 = arith.addf %254, %256 : vector<8x1024xf32>
    %258 = vector.extract_strided_slice %257 {offsets = [0, 0], sizes = [8, 256], strides = [1, 1]} : vector<8x1024xf32> to vector<8x256xf32>
    %cst_109 = arith.constant 5.000000e-01 : f32
    %259 = vector.broadcast %cst_109 : f32 to vector<8x256xf32>
    %260 = arith.mulf %259, %258 : vector<8x256xf32>
    %261 = math.tanh %260 : vector<8x256xf32>
    %cst_110 = arith.constant 5.000000e-01 : f32
    %262 = vector.broadcast %cst_110 : f32 to vector<8x256xf32>
    %263 = arith.mulf %262, %261 : vector<8x256xf32>
    %cst_111 = arith.constant 5.000000e-01 : f32
    %264 = vector.broadcast %cst_111 : f32 to vector<8x256xf32>
    %265 = arith.addf %263, %264 : vector<8x256xf32>
    %266 = vector.extract_strided_slice %257 {offsets = [0, 256], sizes = [8, 256], strides = [1, 1]} : vector<8x1024xf32> to vector<8x256xf32>
    %cst_112 = arith.constant 5.000000e-01 : f32
    %267 = vector.broadcast %cst_112 : f32 to vector<8x256xf32>
    %268 = arith.mulf %267, %266 : vector<8x256xf32>
    %269 = math.tanh %268 : vector<8x256xf32>
    %cst_113 = arith.constant 5.000000e-01 : f32
    %270 = vector.broadcast %cst_113 : f32 to vector<8x256xf32>
    %271 = arith.mulf %270, %269 : vector<8x256xf32>
    %cst_114 = arith.constant 5.000000e-01 : f32
    %272 = vector.broadcast %cst_114 : f32 to vector<8x256xf32>
    %273 = arith.addf %271, %272 : vector<8x256xf32>
    %274 = vector.extract_strided_slice %257 {offsets = [0, 512], sizes = [8, 256], strides = [1, 1]} : vector<8x1024xf32> to vector<8x256xf32>
    %275 = math.tanh %274 : vector<8x256xf32>
    %276 = vector.extract_strided_slice %257 {offsets = [0, 768], sizes = [8, 256], strides = [1, 1]} : vector<8x1024xf32> to vector<8x256xf32>
    %cst_115 = arith.constant 5.000000e-01 : f32
    %277 = vector.broadcast %cst_115 : f32 to vector<8x256xf32>
    %278 = arith.mulf %277, %276 : vector<8x256xf32>
    %279 = math.tanh %278 : vector<8x256xf32>
    %cst_116 = arith.constant 5.000000e-01 : f32
    %280 = vector.broadcast %cst_116 : f32 to vector<8x256xf32>
    %281 = arith.mulf %280, %279 : vector<8x256xf32>
    %cst_117 = arith.constant 5.000000e-01 : f32
    %282 = vector.broadcast %cst_117 : f32 to vector<8x256xf32>
    %283 = arith.addf %281, %282 : vector<8x256xf32>
    %284 = arith.mulf %273, %248 : vector<8x256xf32>
    %285 = arith.mulf %265, %275 : vector<8x256xf32>
    %286 = arith.addf %284, %285 : vector<8x256xf32>
    %287 = math.tanh %286 : vector<8x256xf32>
    %288 = arith.mulf %283, %287 : vector<8x256xf32>
    %c7_i32 = arith.constant 7 : i32
    %c8_i32_118 = arith.constant 8 : i32
    %289 = arith.muli %c7_i32, %c8_i32_118 : i32
    %290 = tpu.assume_multiple %289, 8 : i32
    %291 = arith.index_cast %290 : i32 to index
    %c0_119 = arith.constant 0 : index
    %292 = vector.load %arg10[%291, %c0_119] : memref<64x1024xf32, #tpu.memory_space<vmem>>, vector<8x1024xf32>
    %c0_120 = arith.constant 0 : index
    %c0_121 = arith.constant 0 : index
    %293 = vector.load %arg8[%c0_120, %c0_121] : memref<256x1024xf32, #tpu.memory_space<vmem>>, vector<256x1024xf32>
    %cst_122 = arith.constant dense<0.000000e+00> : vector<8x1024xf32>
    %294 = tpu.matmul %288, %293, %cst_122 {dimension_numbers = #tpu.dot_dimension_numbers<[1], [0], [0], [1], [0, 0, 1, 1], [], []>} : vector<8x256xf32>, vector<256x1024xf32>, vector<8x1024xf32> -> vector<8x1024xf32>
    %295 = arith.addf %292, %294 : vector<8x1024xf32>
    %296 = vector.extract_strided_slice %295 {offsets = [0, 0], sizes = [8, 256], strides = [1, 1]} : vector<8x1024xf32> to vector<8x256xf32>
    %cst_123 = arith.constant 5.000000e-01 : f32
    %297 = vector.broadcast %cst_123 : f32 to vector<8x256xf32>
    %298 = arith.mulf %297, %296 : vector<8x256xf32>
    %299 = math.tanh %298 : vector<8x256xf32>
    %cst_124 = arith.constant 5.000000e-01 : f32
    %300 = vector.broadcast %cst_124 : f32 to vector<8x256xf32>
    %301 = arith.mulf %300, %299 : vector<8x256xf32>
    %cst_125 = arith.constant 5.000000e-01 : f32
    %302 = vector.broadcast %cst_125 : f32 to vector<8x256xf32>
    %303 = arith.addf %301, %302 : vector<8x256xf32>
    %304 = vector.extract_strided_slice %295 {offsets = [0, 256], sizes = [8, 256], strides = [1, 1]} : vector<8x1024xf32> to vector<8x256xf32>
    %cst_126 = arith.constant 5.000000e-01 : f32
    %305 = vector.broadcast %cst_126 : f32 to vector<8x256xf32>
    %306 = arith.mulf %305, %304 : vector<8x256xf32>
    %307 = math.tanh %306 : vector<8x256xf32>
    %cst_127 = arith.constant 5.000000e-01 : f32
    %308 = vector.broadcast %cst_127 : f32 to vector<8x256xf32>
    %309 = arith.mulf %308, %307 : vector<8x256xf32>
    %cst_128 = arith.constant 5.000000e-01 : f32
    %310 = vector.broadcast %cst_128 : f32 to vector<8x256xf32>
    %311 = arith.addf %309, %310 : vector<8x256xf32>
    %312 = vector.extract_strided_slice %295 {offsets = [0, 512], sizes = [8, 256], strides = [1, 1]} : vector<8x1024xf32> to vector<8x256xf32>
    %313 = math.tanh %312 : vector<8x256xf32>
    %314 = vector.extract_strided_slice %295 {offsets = [0, 768], sizes = [8, 256], strides = [1, 1]} : vector<8x1024xf32> to vector<8x256xf32>
    %cst_129 = arith.constant 5.000000e-01 : f32
    %315 = vector.broadcast %cst_129 : f32 to vector<8x256xf32>
    %316 = arith.mulf %315, %314 : vector<8x256xf32>
    %317 = math.tanh %316 : vector<8x256xf32>
    %cst_130 = arith.constant 5.000000e-01 : f32
    %318 = vector.broadcast %cst_130 : f32 to vector<8x256xf32>
    %319 = arith.mulf %318, %317 : vector<8x256xf32>
    %cst_131 = arith.constant 5.000000e-01 : f32
    %320 = vector.broadcast %cst_131 : f32 to vector<8x256xf32>
    %321 = arith.addf %319, %320 : vector<8x256xf32>
    %322 = arith.mulf %311, %286 : vector<8x256xf32>
    %323 = arith.mulf %303, %313 : vector<8x256xf32>
    %324 = arith.addf %322, %323 : vector<8x256xf32>
    %325 = math.tanh %324 : vector<8x256xf32>
    %326 = arith.mulf %321, %325 : vector<8x256xf32>
    %c8_i32_132 = arith.constant 8 : i32
    %c0_133 = arith.constant 0 : index
    %c0_134 = arith.constant 0 : index
    %327 = vector.load %arg9[%c0_133, %c0_134] : memref<8x256xf32, #tpu.memory_space<vmem>>, vector<8x256xf32>
    tpu.vector_store %arg9[%c0_133, %c0_134], %326 {strides = array<i32>} : memref<8x256xf32, #tpu.memory_space<vmem>>, vector<8x256xf32>,
    return
  }
  func.func @transform_0(%arg0: i32) -> (i32, i32) {
    %c0_i32 = arith.constant 0 : i32
    %c0_i32_0 = arith.constant 0 : i32
    %c0_i32_1 = arith.constant 0 : i32
    return %c0_i32, %c0_i32_0 : i32, i32
  }
  func.func @transform_1(%arg0: i32) -> (i32, i32) {
    %c0_i32 = arith.constant 0 : i32
    %c0_i32_0 = arith.constant 0 : i32
    %c0_i32_1 = arith.constant 0 : i32
    return %c0_i32, %c0_i32_0 : i32, i32
  }
  func.func @transform_2(%arg0: i32) -> (i32, i32) {
    %c0_i32 = arith.constant 0 : i32
    %c0_i32_0 = arith.constant 0 : i32
    %c0_i32_1 = arith.constant 0 : i32
    return %c0_i32, %c0_i32_0 : i32, i32
  }
  func.func @transform_3(%arg0: i32) -> (i32, i32) {
    %c0_i32 = arith.constant 0 : i32
    %c0_i32_0 = arith.constant 0 : i32
    %c0_i32_1 = arith.constant 0 : i32
    return %c0_i32, %c0_i32_0 : i32, i32
  }
  func.func @transform_4(%arg0: i32) -> (i32, i32) {
    %c0_i32 = arith.constant 0 : i32
    %c0_i32_0 = arith.constant 0 : i32
    %c0_i32_1 = arith.constant 0 : i32
    return %c0_i32, %c0_i32_0 : i32, i32
  }
  func.func @transform_5(%arg0: i32) -> (i32, i32) {
    %c0_i32 = arith.constant 0 : i32
    %c0_i32_0 = arith.constant 0 : i32
    %c0_i32_1 = arith.constant 0 : i32
    return %c0_i32, %c0_i32_0 : i32, i32
  }
  func.func @transform_6(%arg0: i32) -> (i32, i32) {
    %c0_i32 = arith.constant 0 : i32
    %c0_i32_0 = arith.constant 0 : i32
    %c0_i32_1 = arith.constant 0 : i32
    return %c0_i32, %c0_i32_0 : i32, i32
  }
  func.func @transform_7(%arg0: i32) -> (i32, i32) {
    %c0_i32 = arith.constant 0 : i32
    %c0_i32_0 = arith.constant 0 : i32
    %c0_i32_1 = arith.constant 0 : i32
    return %c0_i32, %c0_i32_0 : i32, i32
  }
  func.func @transform_8(%arg0: i32) -> (i32, i32) {
    %c0_i32 = arith.constant 0 : i32
    %c0_i32_0 = arith.constant 0 : i32
    %c0_i32_1 = arith.constant 0 : i32
    return %c0_i32, %c0_i32_0 : i32, i32
  }
}

</mosaic_0001>

<bundles_post_ra>
// kernel: frequency_domain_scnn.1
= control target key start
LH: loop header
LB: loop body
LE: loop exit
PB: predicated region body
PF: predicated region fallthrough
CT: control target
= control target key end

     0   :  { %13 = vsyncpa [#allocation4], 0  ;;  %s9550_s0 = inlined_call_operand.vmem [shape: f32[64,128], index: 0, kind: input, shape index: {}]   ;;  %s9551_s1 = inlined_call_operand.hbm [shape: f32[128,512], index: 1, kind: input, shape index: {}]   ;;  %s9552_s2 = inlined_call_operand.vmem [shape: f32[1,512], index: 2, kind: input, shape index: {}]   ;;  %s9553_s3 = inlined_call_operand.hbm [shape: f32[512,256], index: 3, kind: input, shape index: {}]   ;;  %s9554_s4 = inlined_call_operand.vmem [shape: f32[1,256], index: 4, kind: input, shape index: {}]   ;;  %s9555_s5 = inlined_call_operand.hbm [shape: f32[256,1024], index: 5, kind: input, shape index: {}]   ;;  %s9556_s6 = inlined_call_operand.vmem [shape: f32[1,1024], index: 6, kind: input, shape index: {}]   ;;  %s9557_s7 = inlined_call_operand.hbm [shape: f32[256,1024], index: 7, kind: input, shape index: {}]   ;;  %s9558_s8 = inlined_call_operand.vmem [shape: f32[8,256], index: 8, kind: output, shape index: {}]  }
   0x1   :  { %14 = vsyncpa [#allocation6], 0 }
   0x2   :  { %15 = vsyncpa [#allocation9], 0  ;;  %s7537_s27 = smov [#allocation5]   ;;  %s7443_s9 = scalar_lea.hbm %s9553_s3, 16384 }
   0x3   :  { %s37_s28 = sshll.u32 %s7537_s27, 4  ;;  %p7444_p0 = scmp.ne.s32.totalorder %s9553_s3, %s7443_s9  ;;  %s38_s28 = int_to_ptr.vmem [resolvable:$true] %s37_s28 }
   0x4   :  { %p7447_p1 = scmp.lt.u32.totalorder %s7443_s9, %s9553_s3 }
   0x6   :  { %p7449_p2 = pnand %p7447_p1, %p7444_p0 }
   0x8   :  { %7452 = shalt.err (!%p7449_p2)
}
   0x9   :  { %s7453_s14 = scalar_lea.vmem %s38_s28, 16384  ;;  %p7458_p4 = scmp.lt.s32.totalorder %s38_s28, %s38_s28 }
   0xa   :  { %p7454_p3 = scmp.ne.s32.totalorder %s38_s28, %s7453_s14  ;;  %p7459_p5 = scmp.lt.s32.totalorder %s7453_s14, %s7453_s14 }
   0xc   :  { %p7460_p6 = por %p7459_p5, %p7458_p4 }
   0xe   :  { %p7461_p7 = pnand %p7460_p6, %p7454_p3 }
  0x10   :  { %7464 = shalt.err (!%p7461_p7)
}
  0x11   :  { %s7538_s15 = smov 256   ;;  %s7539_s16 = smov 16  }
  0x12   :  { %43 = dma.hbm_to_vmem [thread:$0]  %s9553_s3, 16384, %s38_s28, [#allocation6], %s7538_s15, %s7538_s15, %s7539_s16  }
  0x13   :  { %s7540_s19 = smov [#allocation3]   ;;  %s7465_s23 = scalar_lea.hbm %s9551_s1, 8192 }
  0x14   :  { %s23_s20 = sshll.u32 %s7540_s19, 4  ;;  %p7466_p8 = scmp.ne.s32.totalorder %s9551_s1, %s7465_s23  ;;  %s24_s20 = int_to_ptr.vmem [resolvable:$true] %s23_s20 }
  0x15   :  { %p7469_p9 = scmp.lt.u32.totalorder %s7465_s23, %s9551_s1 }
  0x17   :  { %p7471_p10 = pnand %p7469_p9, %p7466_p8 }
  0x19   :  { %7474 = shalt.err (!%p7471_p10)
}
  0x1a   :  { %s7475_s29 = scalar_lea.vmem %s24_s20, 8192  ;;  %p7480_p12 = scmp.lt.s32.totalorder %s24_s20, %s24_s20 }
  0x1b   :  { %p7476_p11 = scmp.ne.s32.totalorder %s24_s20, %s7475_s29  ;;  %p7481_p13 = scmp.lt.s32.totalorder %s7475_s29, %s7475_s29 }
  0x1d   :  { %p7482_p0 = por %p7481_p13, %p7480_p12 }
  0x1f   :  { %p7483_p1 = pnand %p7482_p0, %p7476_p11 }
  0x21   :  { %7486 = shalt.err (!%p7483_p1)
}
  0x22   :  { %s7541_s3 = smov 512   ;;  %s7542_s28 = smov 32  }
  0x23   :  { %29 = dma.hbm_to_vmem [thread:$0]  %s9551_s1, 8192, %s24_s20, [#allocation4], %s7541_s3, %s7541_s3, %s7542_s28  }
  0x24   :  { %s7543_s10 = smov [#allocation7]   ;;  %s7487_s14 = scalar_lea.hbm %s9555_s5, 32768 }
  0x25   :  { %s51_s11 = sshll.u32 %s7543_s10, 4  ;;  %p7488_p2 = scmp.ne.s32.totalorder %s9555_s5, %s7487_s14  ;;  %s52_s11 = int_to_ptr.vmem [resolvable:$true] %s51_s11 }
  0x26   :  { %p7491_p3 = scmp.lt.u32.totalorder %s7487_s14, %s9555_s5 }
  0x28   :  { %p7493_p4 = pnand %p7491_p3, %p7488_p2 }
  0x2a   :  { %7496 = shalt.err (!%p7493_p4)
}
  0x2b   :  { %s7497_s19 = scalar_lea.vmem %s52_s11, 32768  ;;  %p7502_p6 = scmp.lt.s32.totalorder %s52_s11, %s52_s11 }
  0x2c   :  { %p7498_p5 = scmp.ne.s32.totalorder %s52_s11, %s7497_s19  ;;  %p7503_p7 = scmp.lt.s32.totalorder %s7497_s19, %s7497_s19 }
  0x2e   :  { %p7504_p8 = por %p7503_p7, %p7502_p6 }
  0x30   :  { %p7505_p9 = pnand %p7504_p8, %p7498_p5 }
  0x32   :  { %7508 = shalt.err (!%p7505_p9)
}
  0x33   :  { %s7544_s1 = smov 1024   ;;  %s7545_s20 = smov 64  }
  0x34   :  { %57 = dma.hbm_to_vmem [thread:$0]  %s9555_s5, 32768, %s52_s11, [#allocation6], %s7544_s1, %s7544_s1, %s7545_s20  }
  0x35   :  { %s7546_s23 = smov [#allocation8]   ;;  %s7509_s27 = scalar_lea.hbm %s9557_s7, 32768 }
  0x36   :  { %s65_s24 = sshll.u32 %s7546_s23, 4  ;;  %p7510_p10 = scmp.ne.s32.totalorder %s9557_s7, %s7509_s27  ;;  %s66_s24 = int_to_ptr.vmem [resolvable:$true] %s65_s24 }
  0x37   :  { %p7513_p11 = scmp.lt.u32.totalorder %s7509_s27, %s9557_s7 }
  0x39   :  { %p7515_p12 = pnand %p7513_p11, %p7510_p10 }
  0x3b   :  { %7518 = shalt.err (!%p7515_p12)
}
  0x3c   :  { %s7519_s9 = scalar_lea.vmem %s66_s24, 32768  ;;  %p7524_p0 = scmp.lt.s32.totalorder %s66_s24, %s66_s24 }
  0x3d   :  { %p7520_p13 = scmp.ne.s32.totalorder %s66_s24, %s7519_s9  ;;  %p7525_p1 = scmp.lt.s32.totalorder %s7519_s9, %s7519_s9 }
  0x3f   :  { %p7526_p2 = por %p7525_p1, %p7524_p0 }
  0x41   :  { %p7527_p3 = pnand %p7526_p2, %p7520_p13 }
  0x43   :  { %7530 = shalt.err (!%p7527_p3)
}
  0x44   :  { %71 = dma.hbm_to_vmem [thread:$0]  %s9557_s7, 32768, %s66_s24, [#allocation9], %s7544_s1, %s7544_s1, %s7545_s20  }
  0x45   :  { %7531 = dma.done.wait [#allocation4], 8192  }
  0x46   :  { %7532 = vsyncadd [#allocation4], 4294959104 }
  0x47   :  { %7533 = dma.done.wait [#allocation6], 49152  }
  0x48   :  { %7534 = vsyncadd [#allocation6], 4294918144 }
  0x49   :  { %7535 = dma.done.wait [#allocation9], 32768  }
  0x4a   :  { %7536 = vsyncadd [#allocation9], 4294934528  ;;  %v9561_v0 = vmov 0.0   ;;  %v93_v1 = vld [vmem:[#allocation3 + $0x8] sm:$0xff]  ;;  %v92_v3 = vld [vmem:[#allocation3] sm:$0xff] }
  0x4b   :  { %242 = vmatprep.mubr.f32.mxu0 %v9561_v0  ;;  %355 = vmatprep.mubr.f32.mxu1 %v9561_v0  ;;  %v97_v2 = vld [vmem:[#allocation3 + $0x28] sm:$0xff]  ;;  %v96_v5 = vld [vmem:[#allocation3 + $0x20] sm:$0xff]  ;;  %v95_v28 = vld [vmem:[#allocation3 + $0x18] sm:$0xff] }
  0x4c   :  { %v4616_v4 = vpack.c.bf16 %v97_v2, %v93_v1  ;;  %v101_v6 = vld [vmem:[#allocation3 + $0x48] sm:$0xff]  ;;  %v4618_v8 = vpack.c.bf16 %v96_v5, %v92_v3  ;;  %v100_v10 = vld [vmem:[#allocation3 + $0x40] sm:$0xff]  ;;  %v99_v29 = vld [vmem:[#allocation3 + $0x38] sm:$0xff] }
  0x4d   :  { %v105_v7 = vld [vmem:[#allocation3 + $0x68] sm:$0xff]  ;;  %v104_v11 = vld [vmem:[#allocation3 + $0x60] sm:$0xff]  ;;  %v94_v30 = vld [vmem:[#allocation3 + $0x10] sm:$0xff]  ;;  %v4648_v33 = vpack.c.bf16 %v99_v29, %v95_v28 }
  0x4e   :  { %v4620_v9 = vpack.c.bf16 %v105_v7, %v101_v6  ;;  %v109_v12 = vld [vmem:[#allocation3 + $0x88] sm:$0xff]  ;;  %4617 = vmatprep.subr.bf16.mxu0 %v4616_v4  ;;  %v4622_v14 = vpack.c.bf16 %v104_v11, %v100_v10  ;;  %v108_v16 = vld [vmem:[#allocation3 + $0x80] sm:$0xff]  ;;  %v98_v34 = vld [vmem:[#allocation3 + $0x30] sm:$0xff] }
  0x4f   :  { %v113_v13 = vld [vmem:[#allocation3 + $0xa8] sm:$0xff]  ;;  %4619 = vmatpush1.bf16.msra.mxu0 %v4618_v8  ;;  %v112_v17 = vld [vmem:[#allocation3 + $0xa0] sm:$0xff]  ;;  %v103_v35 = vld [vmem:[#allocation3 + $0x58] sm:$0xff]  ;;  %v4650_v37 = vpack.c.bf16 %v98_v34, %v94_v30  ;;  %4649 = vmatprep.subr.bf16.mxu1 %v4648_v33 }
  0x50   :  { %4621 = vmatprep.subr.bf16.mxu0 %v4620_v9  ;;  %v4624_v15 = vpack.c.bf16 %v113_v13, %v109_v12  ;;  %v117_v18 = vld [vmem:[#allocation3 + $0xc8] sm:$0xff]  ;;  %v4626_v20 = vpack.c.bf16 %v112_v17, %v108_v16  ;;  %v116_v22 = vld [vmem:[#allocation3 + $0xc0] sm:$0xff]  ;;  %v107_v38 = vld [vmem:[#allocation3 + $0x78] sm:$0xff] }
  0x51   :  { %v121_v19 = vld [vmem:[#allocation3 + $0xe8] sm:$0xff]  ;;  %v120_v23 = vld [vmem:[#allocation3 + $0xe0] sm:$0xff]  ;;  %v102_v39 = vld [vmem:[#allocation3 + $0x50] sm:$0xff]  ;;  %v4652_v42 = vpack.c.bf16 %v107_v38, %v103_v35  ;;  %4651 = vmatpush1.bf16.msra.mxu1 %v4650_v37 }
  0x52   :  { %v4628_v21 = vpack.c.bf16 %v121_v19, %v117_v18  ;;  %v125_v24 = vld [vmem:[#allocation3 + $0x108] sm:$0xff]  ;;  %v124_v26 = vld [vmem:[#allocation3 + $0x100] sm:$0xff]  ;;  %v4630_v31 = vpack.c.bf16 %v120_v23, %v116_v22  ;;  %v106_v40 = vld [vmem:[#allocation3 + $0x70] sm:$0xff] }
  0x53   :  { %4623 = vmatpush1.bf16.msra.mxu0 %v4622_v14  ;;  %v129_v25 = vld [vmem:[#allocation3 + $0x128] sm:$0xff]  ;;  %v128_v27 = vld [vmem:[#allocation3 + $0x120] sm:$0xff]  ;;  %v111_v43 = vld [vmem:[#allocation3 + $0x98] sm:$0xff]  ;;  %v4654_v45 = vpack.c.bf16 %v106_v40, %v102_v39  ;;  %4653 = vmatprep.subr.bf16.mxu1 %v4652_v42 }
  0x54   :  { %4625 = vmatprep.subr.bf16.mxu0 %v4624_v15  ;;  %v133_v32 = vld [vmem:[#allocation3 + $0x148] sm:$0xff]  ;;  %v4632_v36 = vpack.c.bf16 %v129_v25, %v125_v24  ;;  %v115_v44 = vld [vmem:[#allocation3 + $0xb8] sm:$0xff]  ;;  %v4634_v46 = vpack.c.bf16 %v128_v27, %v124_v26  ;;  %v132_v47 = vld [vmem:[#allocation3 + $0x140] sm:$0xff] }
  0x55   :  { %v137_v41 = vld [vmem:[#allocation3 + $0x168] sm:$0xff]  ;;  %v4656_v48 = vpack.c.bf16 %v115_v44, %v111_v43  ;;  %v110_v49 = vld [vmem:[#allocation3 + $0x90] sm:$0xff]  ;;  %v136_v52 = vld [vmem:[#allocation3 + $0x160] sm:$0xff]  ;;  %4655 = vmatpush1.bf16.msra.mxu1 %v4654_v45 }
  0x56   :  { %v114_v50 = vld [vmem:[#allocation3 + $0xb0] sm:$0xff]  ;;  %v4636_v51 = vpack.c.bf16 %v137_v41, %v133_v32  ;;  %v119_v53 = vld [vmem:[#allocation3 + $0xd8] sm:$0xff]  ;;  %v141_v55 = vld [vmem:[#allocation3 + $0x188] sm:$0xff]  ;;  %v4638_v58 = vpack.c.bf16 %v136_v52, %v132_v47 }
  0x57   :  { %4627 = vmatpush1.bf16.msra.mxu0 %v4626_v20  ;;  %v123_v54 = vld [vmem:[#allocation3 + $0xf8] sm:$0xff]  ;;  %v145_v56 = vld [vmem:[#allocation3 + $0x1a8] sm:$0xff]  ;;  %v4658_v57 = vpack.c.bf16 %v114_v50, %v110_v49  ;;  %v140_v59 = vld [vmem:[#allocation3 + $0x180] sm:$0xff]  ;;  %4657 = vmatprep.subr.bf16.mxu1 %v4656_v48 }
  0x58   :  { %4629 = vmatprep.subr.bf16.mxu0 %v4628_v21  ;;  %v4660_v60 = vpack.c.bf16 %v123_v54, %v119_v53  ;;  %v118_v61 = vld [vmem:[#allocation3 + $0xd0] sm:$0xff]  ;;  %v4640_v63 = vpack.c.bf16 %v145_v56, %v141_v55  ;;  %v144_v1 = vld [vmem:[#allocation3 + $0x1a0] sm:$0xff]  ;;  %v127_v2 = vld [vmem:[#allocation3 + $0x118] sm:$0xff] }
  0x59   :  { %v122_v62 = vld [vmem:[#allocation3 + $0xf0] sm:$0xff]  ;;  %v131_v3 = vld [vmem:[#allocation3 + $0x138] sm:$0xff]  ;;  %v149_v4 = vld [vmem:[#allocation3 + $0x1c8] sm:$0xff]  ;;  %4659 = vmatpush1.bf16.msra.mxu1 %v4658_v57  ;;  %v4642_v7 = vpack.c.bf16 %v144_v1, %v140_v59 }
  0x5a   :  { %v153_v5 = vld [vmem:[#allocation3 + $0x1e8] sm:$0xff]  ;;  %v4662_v6 = vpack.c.bf16 %v122_v62, %v118_v61  ;;  %v148_v8 = vld [vmem:[#allocation3 + $0x1c0] sm:$0xff]  ;;  %4661 = vmatprep.subr.bf16.mxu1 %v4660_v60  ;;  %v4664_v9 = vpack.c.bf16 %v131_v3, %v127_v2  ;;  %v126_v10 = vld [vmem:[#allocation3 + $0x110] sm:$0xff] }
  0x5b   :  { %4631 = vmatpush1.bf16.msra.mxu0 %v4630_v31  ;;  %v130_v11 = vld [vmem:[#allocation3 + $0x130] sm:$0xff]  ;;  %v4644_v12 = vpack.c.bf16 %v153_v5, %v149_v4  ;;  %v152_v13 = vld [vmem:[#allocation3 + $0x1e0] sm:$0xff]  ;;  %v135_v14 = vld [vmem:[#allocation3 + $0x158] sm:$0xff] }
  0x5c   :  { %4633 = vmatprep.subr.bf16.mxu0 %v4632_v36  ;;  %v139_v15 = vld [vmem:[#allocation3 + $0x178] sm:$0xff]  ;;  %v437_v16 = vld [vmem:[#allocation5 + $0x8] sm:$0xff]  ;;  %v4666_v18 = vpack.c.bf16 %v130_v11, %v126_v10  ;;  %v4646_v19 = vpack.c.bf16 %v152_v13, %v148_v8  ;;  %v134_v21 = vld [vmem:[#allocation3 + $0x150] sm:$0xff] }
  0x5d   :  { %v439_v17 = vld [vmem:[#allocation5 + $0x18] sm:$0xff]  ;;  %4663 = vmatpush1.bf16.msra.mxu1 %v4662_v6  ;;  %v4668_v20 = vpack.c.bf16 %v139_v15, %v135_v14  ;;  %v138_v22 = vld [vmem:[#allocation3 + $0x170] sm:$0xff]  ;;  %v436_v26 = vld [vmem:[#allocation5] sm:$0xff] }
  0x5e   :  { %4665 = vmatprep.subr.bf16.mxu1 %v4664_v9  ;;  %v143_v23 = vld [vmem:[#allocation3 + $0x198] sm:$0xff]  ;;  %v4680_v25 = vpack.c.bf16 %v439_v17, %v437_v16  ;;  %v438_v27 = vld [vmem:[#allocation5 + $0x10] sm:$0xff]  ;;  %v4670_v28 = vpack.c.bf16 %v138_v22, %v134_v21  ;;  %v441_v29 = vld [vmem:[#allocation5 + $0x28] sm:$0xff] }
  0x5f   :  { %4635 = vmatpush1.bf16.msra.mxu0 %v4634_v46  ;;  %v147_v24 = vld [vmem:[#allocation3 + $0x1b8] sm:$0xff]  ;;  %v84_v31 = vld [vmem:[%s9550_s0] sm:$0xff]  ;;  %v142_v33 = vld [vmem:[#allocation3 + $0x190] sm:$0xff]  ;;  %v4682_v37 = vpack.c.bf16 %v438_v27, %v436_v26 }
  0x60   :  { %4637 = vmatprep.subr.bf16.mxu0 %v4636_v51  ;;  %v443_v30 = vld [vmem:[#allocation5 + $0x38] sm:$0xff]  ;;  %v4672_v32 = vpack.c.bf16 %v147_v24, %v143_v23  ;;  %v146_v34 = vld [vmem:[#allocation3 + $0x1b0] sm:$0xff]  ;;  %v440_v39 = vld [vmem:[#allocation5 + $0x20] sm:$0xff] }
  0x61   :  { %4667 = vmatpush1.bf16.msra.mxu1 %v4666_v18  ;;  %v151_v35 = vld [vmem:[#allocation3 + $0x1d8] sm:$0xff]  ;;  %v4684_v38 = vpack.c.bf16 %v443_v30, %v441_v29  ;;  %v442_v40 = vld [vmem:[#allocation5 + $0x30] sm:$0xff]  ;;  %v4674_v41 = vpack.c.bf16 %v146_v34, %v142_v33  ;;  %v445_v42 = vld [vmem:[#allocation5 + $0x48] sm:$0xff] }
  0x62   :  { %4669 = vmatprep.subr.bf16.mxu1 %v4668_v20  ;;  %v155_v36 = vld [vmem:[#allocation3 + $0x1f8] sm:$0xff]  ;;  %v85_v44 = vld [vmem:[%s9550_s0 + $0x8] sm:$0xff]  ;;  %v150_v46 = vld [vmem:[#allocation3 + $0x1d0] sm:$0xff]  ;;  %v4686_v48 = vpack.c.bf16 %v442_v40, %v440_v39 }
  0x63   :  { %4639 = vmatpush1.bf16.msra.mxu0 %v4638_v58  ;;  %v447_v43 = vld [vmem:[#allocation5 + $0x58] sm:$0xff]  ;;  %v4676_v45 = vpack.c.bf16 %v155_v36, %v151_v35  ;;  %v154_v47 = vld [vmem:[#allocation3 + $0x1f0] sm:$0xff]  ;;  %v444_v50 = vld [vmem:[#allocation5 + $0x40] sm:$0xff] }
  0x64   :  { %4641 = vmatprep.subr.bf16.mxu0 %v4640_v63  ;;  %v4688_v49 = vpack.c.bf16 %v447_v43, %v445_v42  ;;  %v446_v51 = vld [vmem:[#allocation5 + $0x50] sm:$0xff]  ;;  %v4678_v52 = vpack.c.bf16 %v154_v47, %v150_v46  ;;  %v449_v53 = vld [vmem:[#allocation5 + $0x68] sm:$0xff]  ;;  %v451_v54 = vld [vmem:[#allocation5 + $0x78] sm:$0xff] }
  0x65   :  { %4671 = vmatpush1.bf16.msra.mxu1 %v4670_v28  ;;  %v86_v55 = vld [vmem:[%s9550_s0 + $0x10] sm:$0xff]  ;;  %v4690_v56 = vpack.c.bf16 %v446_v51, %v444_v50  ;;  %v4692_v57 = vpack.c.bf16 %v451_v54, %v449_v53  ;;  %v448_v58 = vld [vmem:[#allocation5 + $0x60] sm:$0xff]  ;;  %v453_v60 = vld [vmem:[#allocation5 + $0x88] sm:$0xff] }
  0x66   :  { %4673 = vmatprep.subr.bf16.mxu1 %v4672_v32  ;;  %v450_v59 = vld [vmem:[#allocation5 + $0x70] sm:$0xff]  ;;  %v455_v61 = vld [vmem:[#allocation5 + $0x98] sm:$0xff]  ;;  %v452_v2 = vld [vmem:[#allocation5 + $0x80] sm:$0xff] }
  0x67   :  { %4643 = vmatpush1.bf16.msra.mxu0 %v4642_v7  ;;  %v87_v62 = vld [vmem:[%s9550_s0 + $0x18] sm:$0xff]  ;;  %v4694_v63 = vpack.c.bf16 %v450_v59, %v448_v58  ;;  %v4696_v1 = vpack.c.bf16 %v455_v61, %v453_v60  ;;  %v454_v3 = vld [vmem:[#allocation5 + $0x90] sm:$0xff]  ;;  %v457_v4 = vld [vmem:[#allocation5 + $0xa8] sm:$0xff] }
  0x68   :  { %4645 = vmatprep.subr.bf16.mxu0 %v4644_v12  ;;  %v459_v5 = vld [vmem:[#allocation5 + $0xb8] sm:$0xff]  ;;  %v88_v6 = vld [vmem:[%s9550_s0 + $0x20] sm:$0xff]  ;;  %v4698_v7 = vpack.c.bf16 %v454_v3, %v452_v2  ;;  %v458_v10 = vld [vmem:[#allocation5 + $0xb0] sm:$0xff] }
  0x69   :  { %4675 = vmatpush1.bf16.msra.mxu1 %v4674_v41  ;;  %v4700_v8 = vpack.c.bf16 %v459_v5, %v457_v4  ;;  %v456_v9 = vld [vmem:[#allocation5 + $0xa0] sm:$0xff]  ;;  %v461_v11 = vld [vmem:[#allocation5 + $0xc8] sm:$0xff]  ;;  %v463_v12 = vld [vmem:[#allocation5 + $0xd8] sm:$0xff] }
  0x6a   :  { %4677 = vmatprep.subr.bf16.mxu1 %v4676_v45  ;;  %v89_v13 = vld [vmem:[%s9550_s0 + $0x28] sm:$0xff]  ;;  %v4702_v14 = vpack.c.bf16 %v458_v10, %v456_v9  ;;  %v4704_v15 = vpack.c.bf16 %v463_v12, %v461_v11  ;;  %v460_v16 = vld [vmem:[#allocation5 + $0xc0] sm:$0xff]  ;;  %v462_v17 = vld [vmem:[#allocation5 + $0xd0] sm:$0xff] }
  0x6b   :  { %4647 = vmatpush1.bf16.msra.mxu0 %v4646_v19  ;;  %v465_v18 = vld [vmem:[#allocation5 + $0xe8] sm:$0xff]  ;;  %v467_v19 = vld [vmem:[#allocation5 + $0xf8] sm:$0xff]  ;;  %v90_v20 = vld [vmem:[%s9550_s0 + $0x30] sm:$0xff]  ;;  %v4706_v21 = vpack.c.bf16 %v462_v17, %v460_v16 }
  0x6c   :  { %4681 = vmatprep.subr.bf16.mxu0 %v4680_v25  ;;  %v4708_v22 = vpack.c.bf16 %v467_v19, %v465_v18  ;;  %v464_v23 = vld [vmem:[#allocation5 + $0xe0] sm:$0xff]  ;;  %v466_v24 = vld [vmem:[#allocation5 + $0xf0] sm:$0xff]  ;;  %v469_v25 = vld [vmem:[#allocation5 + $0x108] sm:$0xff] }
  0x6d   :  { %4679 = vmatpush1.bf16.msra.mxu1 %v4678_v52  ;;  %v471_v26 = vld [vmem:[#allocation5 + $0x118] sm:$0xff]  ;;  %v4710_v28 = vpack.c.bf16 %v466_v24, %v464_v23  ;;  %v468_v30 = vld [vmem:[#allocation5 + $0x100] sm:$0xff]  ;;  %v473_v32 = vld [vmem:[#allocation5 + $0x128] sm:$0xff] }
  0x6e   :  { %243 = vmatmul.mubr.f32.vlgmr.msra.gmra.mrb[0].mxu0 %v84_v31  ;;  %v91_v27 = vld [vmem:[%s9550_s0 + $0x38] sm:$0xff]  ;;  %v4712_v29 = vpack.c.bf16 %v471_v26, %v469_v25  ;;  %v472_v36 = vld [vmem:[#allocation5 + $0x120] sm:$0xff]  ;;  %v478_v43 = vld [vmem:[#allocation5 + $0x150] sm:$0xff] }
  0x6f   :  { %248 = vmatprep.mubr.f32.mxu0 %v9561_v0  ;;  %4683 = vmatpush1.bf16.msra.mxu0 %v4682_v37  ;;  %v475_v33 = vld [vmem:[#allocation5 + $0x138] sm:$0xff]  ;;  %v474_v37 = vld [vmem:[#allocation5 + $0x130] sm:$0xff]  ;;  %v476_v42 = vld [vmem:[#allocation5 + $0x140] sm:$0xff] }
  0x70   :  { %4685 = vmatprep.subr.bf16.mxu0 %v4684_v38  ;;  %356 = vmatmul.mubr.f32.vlgmr.msra.gmra.mrb[0].mxu1 %v84_v31  ;;  %v470_v31 = vld [vmem:[#allocation5 + $0x110] sm:$0xff]  ;;  %v4716_v35 = vpack.c.bf16 %v475_v33, %v473_v32  ;;  %v477_v38 = vld [vmem:[#allocation5 + $0x148] sm:$0xff]  ;;  %v479_v39 = vld [vmem:[#allocation5 + $0x158] sm:$0xff]  ;;  %v4718_v40 = vpack.c.bf16 %v474_v37, %v472_v36  ;;  %v4722_v46 = vpack.c.bf16 %v478_v43, %v476_v42 }
  0x71   :  { %361 = vmatprep.mubr.f32.mxu1 %v9561_v0  ;;  %v4714_v34 = vpack.c.bf16 %v470_v31, %v468_v30  ;;  %v4720_v41 = vpack.c.bf16 %v479_v39, %v477_v38  ;;  %v483_v45 = vld [vmem:[#allocation5 + $0x178] sm:$0xff]  ;;  %v485_v50 = vld [vmem:[#allocation5 + $0x188] sm:$0xff]  ;;  %v484_v54 = vld [vmem:[#allocation5 + $0x180] sm:$0xff] }
  0x72   :  { %249 = vmatmul.mubr.f32.gmra.mrb[2].mxu0 %v85_v44  ;;  %v487_v51 = vld [vmem:[#allocation5 + $0x198] sm:$0xff]  ;;  %v488_v60 = vld [vmem:[#allocation5 + $0x1a0] sm:$0xff]  ;;  %v490_v61 = vld [vmem:[#allocation5 + $0x1b0] sm:$0xff] }
  0x73   :  { %254 = vmatprep.mubr.f32.mxu0 %v9561_v0  ;;  %4687 = vmatpush1.bf16.msra.mxu0 %v4686_v48  ;;  %v480_v48 = vld [vmem:[#allocation5 + $0x160] sm:$0xff]  ;;  %v4728_v53 = vpack.c.bf16 %v487_v51, %v485_v50  ;;  %v494_v4 = vld [vmem:[#allocation5 + $0x1d0] sm:$0xff]  ;;  %v501_v12 = vld [vmem:[#allocation5 + $0x208] sm:$0xff] }
  0x74   :  { %4689 = vmatprep.subr.bf16.mxu0 %v4688_v49  ;;  %362 = vmatmul.mubr.f32.gmra.mrb[2].mxu1 %v85_v44  ;;  %v481_v44 = vld [vmem:[#allocation5 + $0x168] sm:$0xff]  ;;  %v482_v49 = vld [vmem:[#allocation5 + $0x170] sm:$0xff]  ;;  %v492_v3 = vld [vmem:[#allocation5 + $0x1c0] sm:$0xff] }
  0x75   :  { %367 = vmatprep.mubr.f32.mxu1 %v9561_v0  ;;  %v4724_v47 = vpack.c.bf16 %v483_v45, %v481_v44  ;;  %v4726_v52 = vpack.c.bf16 %v482_v49, %v480_v48  ;;  %v4738_v5 = vpack.c.bf16 %v494_v4, %v492_v3  ;;  %v496_v9 = vld [vmem:[#allocation5 + $0x1e0] sm:$0xff]  ;;  %v498_v10 = vld [vmem:[#allocation5 + $0x1f0] sm:$0xff]  ;;  %v509_v39 = vld [vmem:[#allocation5 + $0x248] sm:$0xff] }
  0x76   :  { %255 = vmatmul.mubr.f32.gmra.mrb[4].mxu0 %v86_v55  ;;  %v4742_v11 = vpack.c.bf16 %v498_v10, %v496_v9  ;;  %v7689_v18 = vld [vmem:[%s9552_s2] sm:$0xf]  ;;  %v502_v26 = vld [vmem:[#allocation5 + $0x210] sm:$0xff]  ;;  %v513_v51 = vld [vmem:[#allocation5 + $0x268] sm:$0xff] }
  0x77   :  { %260 = vmatprep.mubr.f32.mxu0 %v9561_v0  ;;  %4691 = vmatpush1.bf16.msra.mxu0 %v4690_v56  ;;  %v489_v56 = vld [vmem:[#allocation5 + $0x1a8] sm:$0xff]  ;;  %v500_v25 = vld [vmem:[#allocation5 + $0x200] sm:$0xff]  ;;  %v506_v36 = vld [vmem:[#allocation5 + $0x230] sm:$0xff] }
  0x78   :  { %4693 = vmatprep.subr.bf16.mxu0 %v4692_v57  ;;  %368 = vmatmul.mubr.f32.gmra.mrb[4].mxu1 %v86_v55  ;;  %v486_v55 = vld [vmem:[#allocation5 + $0x190] sm:$0xff]  ;;  %v491_v57 = vld [vmem:[#allocation5 + $0x1b8] sm:$0xff]  ;;  %v4746_v31 = vpack.c.bf16 %v502_v26, %v500_v25 }
  0x79   :  { %373 = vmatprep.mubr.f32.mxu1 %v9561_v0  ;;  %v4730_v58 = vpack.c.bf16 %v486_v55, %v484_v54  ;;  %v4732_v59 = vpack.c.bf16 %v491_v57, %v489_v56  ;;  %v510_v48 = vld [vmem:[#allocation5 + $0x250] sm:$0xff]  ;;  %v519_v3 = vld [vmem:[#allocation5 + $0x298] sm:$0xff] }
  0x7a   :  { %261 = vmatmul.mubr.f32.gmra.mrb[6].mxu0 %v87_v62 }
  0x7b   :  { %266 = vmatprep.mubr.f32.mxu0 %v9561_v0  ;;  %4695 = vmatpush1.bf16.msra.mxu0 %v4694_v63  ;;  %v495_v63 = vld [vmem:[#allocation5 + $0x1d8] sm:$0xff] }
  0x7c   :  { %4697 = vmatprep.subr.bf16.mxu0 %v4696_v1  ;;  %374 = vmatmul.mubr.f32.gmra.mrb[6].mxu1 %v87_v62  ;;  %v493_v62 = vld [vmem:[#allocation5 + $0x1c8] sm:$0xff]  ;;  %v4734_v1 = vpack.c.bf16 %v490_v61, %v488_v60  ;;  %v512_v61 = vld [vmem:[#allocation5 + $0x260] sm:$0xff] }
  0x7d   :  { %379 = vmatprep.mubr.f32.mxu1 %v9561_v0  ;;  %v4736_v2 = vpack.c.bf16 %v495_v63, %v493_v62  ;;  %v514_v62 = vld [vmem:[#allocation5 + $0x270] sm:$0xff] }
  0x7e   :  { %267 = vmatmul.mubr.f32.gmra.mrb[8].mxu0 %v88_v6 }
  0x7f   :  { %272 = vmatprep.mubr.f32.mxu0 %v9561_v0  ;;  %4699 = vmatpush1.bf16.msra.mxu0 %v4698_v7  ;;  %v499_v7 = vld [vmem:[#allocation5 + $0x1f8] sm:$0xff] }
  0x80   :  { %4701 = vmatprep.subr.bf16.mxu0 %v4700_v8  ;;  %380 = vmatmul.mubr.f32.gmra.mrb[8].mxu1 %v88_v6  ;;  %v497_v6 = vld [vmem:[#allocation5 + $0x1e8] sm:$0xff] }
  0x81   :  { %385 = vmatprep.mubr.f32.mxu1 %v9561_v0  ;;  %v4740_v8 = vpack.c.bf16 %v499_v7, %v497_v6  ;;  %v4758_v7 = vpack.c.bf16 %v514_v62, %v512_v61 }
  0x82   :  { %273 = vmatmul.mubr.f32.gmra.mrb[10].mxu0 %v89_v13 }
  0x83   :  { %278 = vmatprep.mubr.f32.mxu0 %v9561_v0  ;;  %4703 = vmatpush1.bf16.msra.mxu0 %v4702_v14 }
  0x84   :  { %4705 = vmatprep.subr.bf16.mxu0 %v4704_v15  ;;  %386 = vmatmul.mubr.f32.gmra.mrb[10].mxu1 %v89_v13  ;;  %v503_v13 = vld [vmem:[#allocation5 + $0x218] sm:$0xff]  ;;  %v158_v15 = vlaneseq }
  0x85   :  { %391 = vmatprep.mubr.f32.mxu1 %v9561_v0  ;;  %v4744_v14 = vpack.c.bf16 %v503_v13, %v501_v12  ;;  %v516_v12 = vld [vmem:[#allocation5 + $0x280] sm:$0xff]  ;;  %v518_v13 = vld [vmem:[#allocation5 + $0x290] sm:$0xff] }
  0x86   :  { %279 = vmatmul.mubr.f32.gmra.mrb[12].mxu0 %v90_v20  ;;  %v7681_v16 = vshrl.u32 %v158_v15, 7 }
  0x87   :  { %284 = vmatprep.mubr.f32.mxu0 %v9561_v0  ;;  %4707 = vmatpush1.bf16.msra.mxu0 %v4706_v21 }
  0x88   :  { %4709 = vmatprep.subr.bf16.mxu0 %v4708_v22  ;;  %392 = vmatmul.mubr.f32.gmra.mrb[12].mxu1 %v90_v20  ;;  %9867 = vst [vmem:[#allocation13_spill] sm:$0xff] %v7681_v16  ;;  %v7684_v17 = vsub.s32 0, %v7681_v16  ;;  %v7692_v19 = vsub.s32 1, %v7681_v16 }
  0x89   :  { %397 = vmatprep.mubr.f32.mxu1 %v9561_v0 }
  0x8a   :  { %285 = vmatmul.mubr.f32.gmra.mrb[14].mxu0 %v91_v27  ;;  %9868 = vst [vmem:[#allocation14_spill] sm:$0xff] %v7684_v17  ;;  %9869 = vst [vmem:[#allocation15_spill] sm:$0xff] %v7692_v19  ;;  %v7696_v20 = vrot.slane %v7689_v18, %v7684_v17  ;;  %v7700_v21 = vrot.slane %v7689_v18, %v7692_v19 }
  0x8b   :  { %4711 = vmatpush1.bf16.msra.mxu0 %v4710_v28  ;;  %v505_v28 = vld [vmem:[#allocation5 + $0x228] sm:$0xff] }
  0x8c   :  { %4713 = vmatprep.subr.bf16.mxu0 %v4712_v29  ;;  %398 = vmatmul.mubr.f32.gmra.mrb[14].mxu1 %v91_v27  ;;  %v507_v29 = vld [vmem:[#allocation5 + $0x238] sm:$0xff] }
  0x8f   :  { %4715 = vmatpush1.bf16.msra.mxu0 %v4714_v34  ;;  %v4748_v34 = vpack.c.bf16 %v507_v29, %v505_v28 }
  0x90   :  { %4717 = vmatprep.subr.bf16.mxu0 %v4716_v35  ;;  %v504_v35 = vld [vmem:[#allocation5 + $0x220] sm:$0xff] }
  0x91   :  { %v4750_v43 = vpack.c.bf16 %v506_v36, %v504_v35 }
  0x93   :  { %4719 = vmatpush1.bf16.msra.mxu0 %v4718_v40  ;;  %v511_v40 = vld [vmem:[#allocation5 + $0x258] sm:$0xff] }
  0x94   :  { %4721 = vmatprep.subr.bf16.mxu0 %v4720_v41 }
  0x97   :  { %4723 = vmatpush1.bf16.msra.mxu0 %v4722_v46  ;;  %v4752_v46 = vpack.c.bf16 %v511_v40, %v509_v39 }
  0x98   :  { %4725 = vmatprep.subr.bf16.mxu0 %v4724_v47  ;;  %v508_v47 = vld [vmem:[#allocation5 + $0x240] sm:$0xff] }
  0x99   :  { %v4754_v56 = vpack.c.bf16 %v510_v48, %v508_v47  ;;  %v524_v48 = vld [vmem:[#allocation5 + $0x2c0] sm:$0xff] }
  0x9b   :  { %4727 = vmatpush1.bf16.msra.mxu0 %v4726_v52  ;;  %v515_v52 = vld [vmem:[#allocation5 + $0x278] sm:$0xff] }
  0x9c   :  { %4729 = vmatprep.subr.bf16.mxu0 %v4728_v53  ;;  %v4756_v60 = vpack.c.bf16 %v515_v52, %v513_v51  ;;  %v529_v52 = vld [vmem:[#allocation5 + $0x2e8] sm:$0xff] }
  0x9f   :  { %4731 = vmatpush1.bf16.msra.mxu0 %v4730_v58 }
  0xa0   :  { %4733 = vmatprep.subr.bf16.mxu0 %v4732_v59 }
  0xa3   :  { %4735 = vmatpush1.bf16.msra.mxu0 %v4734_v1 }
  0xa4   :  { %4737 = vmatprep.subr.bf16.mxu0 %v4736_v2  ;;  %v517_v2 = vld [vmem:[#allocation5 + $0x288] sm:$0xff] }
  0xa7   :  { %4739 = vmatpush1.bf16.msra.mxu0 %v4738_v5 }
  0xa8   :  { %4741 = vmatprep.subr.bf16.mxu0 %v4740_v8 }
  0xab   :  { %4743 = vmatpush1.bf16.msra.mxu0 %v4742_v11  ;;  %v4760_v11 = vpack.c.bf16 %v519_v3, %v517_v2  ;;  %v528_v2 = vld [vmem:[#allocation5 + $0x2e0] sm:$0xff]  ;;  %v530_v3 = vld [vmem:[#allocation5 + $0x2f0] sm:$0xff] }
  0xac   :  { %4745 = vmatprep.subr.bf16.mxu0 %v4744_v14 }
 0x141   :  { %v244_v22 = vpop.f32.mrb[0].mxu0 }
 0x142   :  { %v245_v23 = vadd.f32 %v244_v22, %v7696_v20  ;;  %v246_v24 = vpop.f32.mrb[1].mxu0  ;;  %v521_v22 = vld [vmem:[#allocation5 + $0x2a8] sm:$0xff] }
 0x143   :  { %v247_v27 = vadd.f32 %v246_v24, %v7700_v21  ;;  %v7708_v55 = vpop.f32.mrb[0].mxu1 }
 0x144   :  { %v404_v33 = vmax.f32 %v245_v23, 0.0  ;;  %v7710_v59 = vpop.f32.mrb[1].mxu1  ;;  %v523_v23 = vld [vmem:[#allocation5 + $0x2b8] sm:$0xff] }
 0x145   :  { %v405_v30 = vmax.f32 %v247_v27, 0.0  ;;  %v250_v32 = vpop.f32.mrb[2].mxu0  ;;  %v4762_v27 = vpack.c.bf16 %v518_v13, %v516_v12 }
 0x146   :  { %v251_v37 = vadd.f32 %v250_v32, %v7696_v20  ;;  %v252_v38 = vpop.f32.mrb[3].mxu0  ;;  %v4764_v32 = vpack.c.bf16 %v523_v23, %v521_v22  ;;  %v532_v23 = vld [vmem:[#allocation5 + $0x300] sm:$0xff] }
 0x147   :  { %640 = vmatprep.mubr.f32.mxu0 %v405_v30  ;;  %v253_v41 = vadd.f32 %v252_v38, %v7700_v21  ;;  %v7714_v6 = vpop.f32.mrb[2].mxu1  ;;  %v9559_v30 = vsub.s32 3, %v7681_v16  ;;  %v527_v38 = vld [vmem:[#allocation5 + $0x2d8] sm:$0xff] }
 0x148   :  { %641 = vmatmul.mubr.f32.vlgmr.msra.gmra.mrb[16].mxu0 %v404_v33  ;;  %v408_v42 = vmax.f32 %v251_v37, 0.0  ;;  %v7716_v10 = vpop.f32.mrb[3].mxu1  ;;  %v520_v33 = vld [vmem:[#allocation5 + $0x2a0] sm:$0xff]  ;;  %v525_v37 = vld [vmem:[#allocation5 + $0x2c8] sm:$0xff] }
 0x149   :  { %4747 = vmatpush1.bf16.msra.mxu0 %v4746_v31  ;;  %v409_v44 = vmax.f32 %v253_v41, 0.0  ;;  %v256_v45 = vpop.f32.mrb[4].mxu0  ;;  %v4768_v47 = vpack.c.bf16 %v527_v38, %v525_v37 }
 0x14a   :  { %4749 = vmatprep.subr.bf16.mxu0 %v4748_v34  ;;  %v257_v49 = vadd.f32 %v256_v45, %v7696_v20  ;;  %v258_v50 = vpop.f32.mrb[5].mxu0  ;;  %v522_v34 = vld [vmem:[#allocation5 + $0x2b0] sm:$0xff]  ;;  %v7732_v45 = vrot.slane %v7689_v18, %v9559_v30  ;;  %v1678_v30 = vld [vmem:[#allocation8 + $0x118] sm:$0xff] }
 0x14b   :  { %v259_v53 = vadd.f32 %v258_v50, %v7700_v21  ;;  %646 = vmatprep.mubr.f32.mxu0 %v409_v44  ;;  %v7720_v26 = vpop.f32.mrb[4].mxu1 }
 0x14c   :  { %v412_v54 = vmax.f32 %v257_v49, 0.0  ;;  %647 = vmatmul.mubr.f32.gmra.mrb[18].mxu0 %v408_v42  ;;  %v7723_v31 = vpop.f32.mrb[5].mxu1  ;;  %v4766_v42 = vpack.c.bf16 %v522_v34, %v520_v33  ;;  %v526_v49 = vld [vmem:[#allocation5 + $0x2d0] sm:$0xff]  ;;  %v360_v62 = vadd.f32 %v7710_v59, %v7732_v45  ;;  %v4774_v59 = vpack.c.bf16 %v530_v3, %v528_v2  ;;  %v541_v34 = vld [vmem:[#allocation5 + $0x348] sm:$0xff]  ;;  %v552_v2 = vld [vmem:[#allocation5 + $0x3a0] sm:$0xff] }
 0x14d   :  { %4751 = vmatpush1.bf16.msra.mxu0 %v4750_v43  ;;  %v413_v57 = vmax.f32 %v259_v53, 0.0  ;;  %v262_v58 = vpop.f32.mrb[6].mxu0  ;;  %v531_v53 = vld [vmem:[#allocation5 + $0x2f8] sm:$0xff]  ;;  %v538_v33 = vld [vmem:[#allocation5 + $0x330] sm:$0xff] }
 0x14e   :  { %4753 = vmatprep.subr.bf16.mxu0 %v4752_v46  ;;  %v263_v63 = vadd.f32 %v262_v58, %v7696_v20  ;;  %v264_v1 = vpop.f32.mrb[7].mxu0  ;;  %v4770_v58 = vpack.c.bf16 %v526_v49, %v524_v48  ;;  %v544_v49 = vld [vmem:[#allocation5 + $0x360] sm:$0xff]  ;;  %v554_v3 = vld [vmem:[#allocation5 + $0x3b0] sm:$0xff] }
 0x14f   :  { %v265_v4 = vadd.f32 %v264_v1, %v7700_v21  ;;  %652 = vmatprep.mubr.f32.mxu0 %v413_v57  ;;  %v7727_v41 = vpop.f32.mrb[6].mxu1  ;;  %v4772_v1 = vpack.c.bf16 %v531_v53, %v529_v52  ;;  %v551_v52 = vld [vmem:[#allocation5 + $0x398] sm:$0xff] }
 0x150   :  { %v416_v5 = vmax.f32 %v263_v63, 0.0  ;;  %653 = vmatmul.mubr.f32.gmra.mrb[20].mxu0 %v412_v54  ;;  %v7734_v46 = vpop.f32.mrb[7].mxu1 }
 0x151   :  { %4755 = vmatpush1.bf16.msra.mxu0 %v4754_v56  ;;  %v417_v8 = vmax.f32 %v265_v4, 0.0  ;;  %v268_v9 = vpop.f32.mrb[8].mxu0 }
 0x152   :  { %4757 = vmatprep.subr.bf16.mxu0 %v4756_v60  ;;  %v269_v14 = vadd.f32 %v268_v9, %v7696_v20  ;;  %v270_v15 = vpop.f32.mrb[9].mxu0 }
 0x153   :  { %v271_v24 = vadd.f32 %v270_v15, %v7700_v21  ;;  %658 = vmatprep.mubr.f32.mxu0 %v417_v8  ;;  %v7738_v57 = vpop.f32.mrb[8].mxu1  ;;  %v535_v8 = vld [vmem:[#allocation5 + $0x318] sm:$0xff] }
 0x154   :  { %v420_v25 = vmax.f32 %v269_v14, 0.0  ;;  %659 = vmatmul.mubr.f32.gmra.mrb[22].mxu0 %v416_v5  ;;  %v7742_v63 = vpop.f32.mrb[9].mxu1  ;;  %v407_v14 = vmax.f32 %v360_v62, 0.0 }
 0x155   :  { %4759 = vmatpush1.bf16.msra.mxu0 %v4758_v7  ;;  %v421_v28 = vmax.f32 %v271_v24, 0.0  ;;  %v274_v29 = vpop.f32.mrb[10].mxu0  ;;  %v533_v7 = vld [vmem:[#allocation5 + $0x308] sm:$0xff] }
 0x156   :  { %4761 = vmatprep.subr.bf16.mxu0 %v4760_v11  ;;  %v275_v35 = vadd.f32 %v274_v29, %v7696_v20  ;;  %v276_v36 = vpop.f32.mrb[11].mxu0  ;;  %v4776_v22 = vpack.c.bf16 %v535_v8, %v533_v7  ;;  %v537_v24 = vld [vmem:[#allocation5 + $0x328] sm:$0xff]  ;;  %v4798_v7 = vpack.c.bf16 %v554_v3, %v552_v2  ;;  %v9560_v8 = vsub.s32 2, %v7681_v16  ;;  %v1769_v16 = vld [vmem:[#allocation8 + $0x3f0] sm:$0xff] }
 0x157   :  { %v277_v39 = vadd.f32 %v276_v36, %v7700_v21  ;;  %664 = vmatprep.mubr.f32.mxu0 %v421_v28  ;;  %v7746_v12 = vpop.f32.mrb[10].mxu1 }
 0x158   :  { %v424_v40 = vmax.f32 %v275_v35, 0.0  ;;  %665 = vmatmul.mubr.f32.gmra.mrb[24].mxu0 %v420_v25  ;;  %v7748_v15 = vpop.f32.mrb[11].mxu1  ;;  %v539_v25 = vld [vmem:[#allocation5 + $0x338] sm:$0xff] }
 0x159   :  { %4763 = vmatpush1.bf16.msra.mxu0 %v4762_v27  ;;  %v425_v43 = vmax.f32 %v277_v39, 0.0  ;;  %v280_v44 = vpop.f32.mrb[12].mxu0  ;;  %v4780_v29 = vpack.c.bf16 %v539_v25, %v537_v24  ;;  %v543_v35 = vld [vmem:[#allocation5 + $0x358] sm:$0xff]  ;;  %v560_v24 = vld [vmem:[#allocation5 + $0x3e0] sm:$0xff]  ;;  %v562_v25 = vld [vmem:[#allocation5 + $0x3f0] sm:$0xff] }
 0x15a   :  { %4765 = vmatprep.subr.bf16.mxu0 %v4764_v32  ;;  %v281_v50 = vadd.f32 %v280_v44, %v7696_v20  ;;  %v282_v51 = vpop.f32.mrb[13].mxu0  ;;  %v536_v32 = vld [vmem:[#allocation5 + $0x320] sm:$0xff]  ;;  %v4784_v39 = vpack.c.bf16 %v543_v35, %v541_v34  ;;  %v547_v44 = vld [vmem:[#allocation5 + $0x378] sm:$0xff] }
 0x15b   :  { %v283_v54 = vadd.f32 %v282_v51, %v7700_v21  ;;  %670 = vmatprep.mubr.f32.mxu0 %v425_v43  ;;  %v4782_v37 = vpack.c.bf16 %v538_v33, %v536_v32  ;;  %v545_v43 = vld [vmem:[#allocation5 + $0x368] sm:$0xff]  ;;  %v4806_v32 = vpack.c.bf16 %v562_v25, %v560_v24  ;;  %v366_v33 = vadd.f32 %v7716_v10, %v7732_v45  ;;  %v890_v24 = vld [vmem:[#allocation7 + $0x240] sm:$0xff] }
 0x15c   :  { %v428_v56 = vmax.f32 %v281_v50, 0.0  ;;  %671 = vmatmul.mubr.f32.gmra.mrb[26].mxu0 %v424_v40  ;;  %v540_v40 = vld [vmem:[#allocation5 + $0x340] sm:$0xff]  ;;  %v4788_v48 = vpack.c.bf16 %v547_v44, %v545_v43  ;;  %v546_v50 = vld [vmem:[#allocation5 + $0x370] sm:$0xff]  ;;  %v549_v51 = vld [vmem:[#allocation5 + $0x388] sm:$0xff]  ;;  %v372_v44 = vadd.f32 %v7723_v31, %v7732_v45 }
 0x15d   :  { %4767 = vmatpush1.bf16.msra.mxu0 %v4766_v42  ;;  %v429_v60 = vmax.f32 %v283_v54, 0.0  ;;  %v286_v61 = vpop.f32.mrb[14].mxu0  ;;  %v542_v42 = vld [vmem:[#allocation5 + $0x350] sm:$0xff]  ;;  %v4790_v53 = vpack.c.bf16 %v546_v50, %v544_v49  ;;  %v4792_v54 = vpack.c.bf16 %v551_v52, %v549_v51  ;;  %v411_v43 = vmax.f32 %v366_v33, 0.0  ;;  %v834_v49 = vld [vmem:[#allocation7 + $0x80] sm:$0xff]  ;;  %v851_v50 = vld [vmem:[#allocation7 + $0x108] sm:$0xff] }
 0x15e   :  { %4769 = vmatprep.subr.bf16.mxu0 %v4768_v47  ;;  %v287_v4 = vadd.f32 %v286_v61, %v7696_v20  ;;  %v288_v5 = vpop.f32.mrb[15].mxu0  ;;  %v534_v20 = vld [vmem:[#allocation5 + $0x310] sm:$0xff]  ;;  %v4786_v47 = vpack.c.bf16 %v542_v42, %v540_v40  ;;  %v555_v61 = vld [vmem:[#allocation5 + $0x3b8] sm:$0xff]  ;;  %v843_v40 = vld [vmem:[#allocation7 + $0xc8] sm:$0xff] }
 0x15f   :  { %v289_v9 = vadd.f32 %v288_v5, %v7700_v21  ;;  %676 = vmatprep.mubr.f32.mxu0 %v429_v60  ;;  %v7750_v21 = vpop.f32.mrb[12].mxu1  ;;  %v4778_v27 = vpack.c.bf16 %v534_v20, %v532_v23  ;;  %v553_v60 = vld [vmem:[#allocation5 + $0x3a8] sm:$0xff]  ;;  %v559_v5 = vld [vmem:[#allocation5 + $0x3d8] sm:$0xff]  ;;  %v7762_v23 = vrot.slane %v7689_v18, %v9560_v8 }
 0x160   :  { %v432_v11 = vmax.f32 %v287_v4, 0.0  ;;  %677 = vmatmul.mubr.f32.gmra.mrb[28].mxu0 %v428_v56  ;;  %v7752_v28 = vpop.f32.mrb[13].mxu1  ;;  %v548_v56 = vld [vmem:[#allocation5 + $0x380] sm:$0xff]  ;;  %v557_v4 = vld [vmem:[#allocation5 + $0x3c8] sm:$0xff]  ;;  %v1686_v8 = vld [vmem:[#allocation8 + $0x158] sm:$0xff] }
 0x161   :  { %4771 = vmatpush1.bf16.msra.mxu0 %v4770_v58  ;;  %v433_v13 = vmax.f32 %v289_v9, 0.0  ;;  %v7754_v36 = vpop.f32.mrb[14].mxu1  ;;  %v550_v58 = vld [vmem:[#allocation5 + $0x390] sm:$0xff]  ;;  %v4800_v9 = vpack.c.bf16 %v559_v5, %v557_v4  ;;  %v358_v34 = vadd.f32 %v7708_v55, %v7762_v23  ;;  %v835_v18 = vld [vmem:[#allocation7 + $0x88] sm:$0xff]  ;;  %v364_v42 = vadd.f32 %v7714_v6, %v7762_v23  ;;  %v842_v55 = vld [vmem:[#allocation7 + $0xc0] sm:$0xff] }
 0x162   :  { %4773 = vmatprep.subr.bf16.mxu0 %v4772_v1  ;;  %v7756_v38 = vpop.f32.mrb[15].mxu1  ;;  %v4794_v62 = vpack.c.bf16 %v550_v58, %v548_v56  ;;  %v4796_v1 = vpack.c.bf16 %v555_v61, %v553_v60  ;;  %v4812_v10 = vpack.c.bf16 %v843_v40, %v835_v18  ;;  %v859_v51 = vld [vmem:[#allocation7 + $0x148] sm:$0xff]  ;;  %v378_v6 = vadd.f32 %v7734_v46, %v7732_v45  ;;  %v850_v58 = vld [vmem:[#allocation7 + $0x100] sm:$0xff] }
 0x163   :  { %682 = vmatprep.mubr.f32.mxu0 %v433_v13  ;;  %v561_v13 = vld [vmem:[#allocation5 + $0x3e8] sm:$0xff]  ;;  %v410_v52 = vmax.f32 %v364_v42, 0.0  ;;  %v4814_v31 = vpack.c.bf16 %v842_v55, %v834_v49  ;;  %v4816_v56 = vpack.c.bf16 %v859_v51, %v851_v50  ;;  %v858_v60 = vld [vmem:[#allocation7 + $0x140] sm:$0xff]  ;;  %v376_v2 = vadd.f32 %v7727_v41, %v7762_v23 }
 0x164   :  { %683 = vmatmul.mubr.f32.gmra.mrb[30].mxu0 %v432_v11  ;;  %v556_v11 = vld [vmem:[#allocation5 + $0x3c0] sm:$0xff]  ;;  %v867_v61 = vld [vmem:[#allocation7 + $0x188] sm:$0xff]  ;;  %v419_v3 = vmax.f32 %v378_v6, 0.0  ;;  %v4818_v46 = vpack.c.bf16 %v858_v60, %v850_v58  ;;  %v390_v41 = vadd.f32 %v7748_v15, %v7732_v45  ;;  %v394_v42 = vadd.f32 %v7750_v21, %v7762_v23 }
 0x165   :  { %4775 = vmatpush1.bf16.msra.mxu0 %v4774_v59  ;;  %753 = vmatprep.mubr.f32.mxu0 %v407_v14  ;;  %v558_v59 = vld [vmem:[#allocation5 + $0x3d0] sm:$0xff]  ;;  %v563_v14 = vld [vmem:[#allocation5 + $0x3f8] sm:$0xff]  ;;  %v866_v5 = vld [vmem:[#allocation7 + $0x180] sm:$0xff]  ;;  %v400_v50 = vadd.f32 %v7754_v36, %v7762_v23 }
 0x166   :  { %4777 = vmatprep.subr.bf16.mxu0 %v4776_v22  ;;  %v4802_v22 = vpack.c.bf16 %v558_v59, %v556_v11  ;;  %v4804_v20 = vpack.c.bf16 %v563_v14, %v561_v13  ;;  %v891_v11 = vld [vmem:[#allocation7 + $0x248] sm:$0xff]  ;;  %v418_v59 = vmax.f32 %v376_v2, 0.0  ;;  %v382_v13 = vadd.f32 %v7738_v57, %v7762_v23  ;;  %v946_v58 = vld [vmem:[#allocation7 + $0x400] sm:$0xff] }
 0x167   :  { %v899_v25 = vld [vmem:[#allocation7 + $0x288] sm:$0xff]  ;;  %v427_v33 = vmax.f32 %v390_v41, 0.0  ;;  %v396_v57 = vadd.f32 %v7752_v28, %v7732_v45  ;;  %v430_v55 = vmax.f32 %v394_v42, 0.0  ;;  %v434_v6 = vmax.f32 %v400_v50, 0.0  ;;  %v954_v60 = vld [vmem:[#allocation7 + $0x440] sm:$0xff] }
 0x168   :  { %v923_v18 = vld [vmem:[#allocation7 + $0x348] sm:$0xff]  ;;  %v970_v2 = vld [vmem:[#allocation7 + $0x4c0] sm:$0xff] }
 0x169   :  { %4779 = vmatpush1.bf16.msra.mxu0 %v4778_v27  ;;  %v819_v27 = vld [vmem:[#allocation7 + $0x8] sm:$0xff]  ;;  %v1002_v41 = vld [vmem:[#allocation7 + $0x5c0] sm:$0xff] }
 0x16a   :  { %4781 = vmatprep.subr.bf16.mxu0 %v4780_v29  ;;  %v827_v29 = vld [vmem:[#allocation7 + $0x48] sm:$0xff]  ;;  %v1050_v42 = vld [vmem:[#allocation7 + $0x740] sm:$0xff] }
 0x16b   :  { %v4808_v35 = vpack.c.bf16 %v827_v29, %v819_v27  ;;  %v907_v27 = vld [vmem:[#allocation7 + $0x2c8] sm:$0xff]  ;;  %v422_v29 = vmax.f32 %v382_v13, 0.0 }
 0x16c   :  { %v939_v49 = vld [vmem:[#allocation7 + $0x3c8] sm:$0xff] }
 0x16d   :  { %4783 = vmatpush1.bf16.msra.mxu0 %v4782_v37  ;;  %v818_v37 = vld [vmem:[#allocation7] sm:$0xff]  ;;  %v963_v36 = vld [vmem:[#allocation7 + $0x488] sm:$0xff] }
 0x16e   :  { %4785 = vmatprep.subr.bf16.mxu0 %v4784_v39  ;;  %v826_v39 = vld [vmem:[#allocation7 + $0x40] sm:$0xff] }
 0x171   :  { %4787 = vmatpush1.bf16.msra.mxu0 %v4786_v47  ;;  %v4810_v47 = vpack.c.bf16 %v826_v39, %v818_v37  ;;  %v906_v37 = vld [vmem:[#allocation7 + $0x2c0] sm:$0xff]  ;;  %v915_v39 = vld [vmem:[#allocation7 + $0x308] sm:$0xff] }
 0x172   :  { %4789 = vmatprep.subr.bf16.mxu0 %v4788_v48  ;;  %v406_v48 = vmax.f32 %v358_v34, 0.0  ;;  %v4828_v34 = vpack.c.bf16 %v907_v27, %v899_v25  ;;  %v1010_v25 = vld [vmem:[#allocation7 + $0x600] sm:$0xff] }
 0x173   :  { %v1018_v27 = vld [vmem:[#allocation7 + $0x640] sm:$0xff] }
 0x175   :  { %4791 = vmatpush1.bf16.msra.mxu0 %v4790_v53  ;;  %v370_v53 = vadd.f32 %v7720_v26, %v7762_v23  ;;  %v384_v26 = vadd.f32 %v7742_v63, %v7732_v45 }
 0x176   :  { %4793 = vmatprep.subr.bf16.mxu0 %v4792_v54  ;;  %v415_v54 = vmax.f32 %v372_v44, 0.0  ;;  %v4832_v44 = vpack.c.bf16 %v923_v18, %v915_v39 }
 0x177   :  { %v423_v14 = vmax.f32 %v384_v26, 0.0  ;;  %v987_v26 = vld [vmem:[#allocation7 + $0x548] sm:$0xff] }
 0x179   :  { %4795 = vmatpush1.bf16.msra.mxu0 %v4794_v62  ;;  %v875_v62 = vld [vmem:[#allocation7 + $0x1c8] sm:$0xff] }
 0x17a   :  { %4797 = vmatprep.subr.bf16.mxu0 %v4796_v1  ;;  %v414_v1 = vmax.f32 %v370_v53, 0.0  ;;  %v4820_v4 = vpack.c.bf16 %v875_v62, %v867_v61  ;;  %v947_v53 = vld [vmem:[#allocation7 + $0x408] sm:$0xff]  ;;  %v4842_v61 = vpack.c.bf16 %v954_v60, %v946_v58  ;;  %v845_v58 = vld [vmem:[#allocation7 + $0xd8] sm:$0xff] }
 0x17d   :  { %4799 = vmatpush1.bf16.msra.mxu0 %v4798_v7  ;;  %v874_v7 = vld [vmem:[#allocation7 + $0x1c0] sm:$0xff] }
 0x17e   :  { %4801 = vmatprep.subr.bf16.mxu0 %v4800_v9  ;;  %v883_v9 = vld [vmem:[#allocation7 + $0x208] sm:$0xff]  ;;  %v4822_v63 = vpack.c.bf16 %v874_v7, %v866_v5  ;;  %v978_v5 = vld [vmem:[#allocation7 + $0x500] sm:$0xff] }
 0x17f   :  { %v986_v7 = vld [vmem:[#allocation7 + $0x540] sm:$0xff] }
 0x181   :  { %4803 = vmatpush1.bf16.msra.mxu0 %v4802_v22  ;;  %v4824_v22 = vpack.c.bf16 %v891_v11, %v883_v9  ;;  %v995_v9 = vld [vmem:[#allocation7 + $0x588] sm:$0xff] }
 0x182   :  { %4805 = vmatprep.subr.bf16.mxu0 %v4804_v20  ;;  %v882_v20 = vld [vmem:[#allocation7 + $0x200] sm:$0xff]  ;;  %v1003_v11 = vld [vmem:[#allocation7 + $0x5c8] sm:$0xff] }
 0x183   :  { %v4826_v15 = vpack.c.bf16 %v890_v24, %v882_v20  ;;  %v4852_v13 = vpack.c.bf16 %v1003_v11, %v995_v9 }
 0x185   :  { %4807 = vmatpush1.bf16.msra.mxu0 %v4806_v32  ;;  %v388_v32 = vadd.f32 %v7746_v12, %v7762_v23  ;;  %v402_v12 = vadd.f32 %v7756_v38, %v7732_v45  ;;  %v930_v45 = vld [vmem:[#allocation7 + $0x380] sm:$0xff]  ;;  %v971_v23 = vld [vmem:[#allocation7 + $0x4c8] sm:$0xff] }
 0x186   :  { %4809 = vmatprep.subr.bf16.mxu0 %v4808_v35  ;;  %v898_v35 = vld [vmem:[#allocation7 + $0x280] sm:$0xff]  ;;  %v4844_v62 = vpack.c.bf16 %v971_v23, %v963_v36 }
 0x187   :  { %v426_v40 = vmax.f32 %v388_v32, 0.0  ;;  %v4830_v28 = vpack.c.bf16 %v906_v37, %v898_v35  ;;  %v435_v51 = vmax.f32 %v402_v12, 0.0  ;;  %v938_v38 = vld [vmem:[#allocation7 + $0x3c0] sm:$0xff]  ;;  %v1035_v32 = vld [vmem:[#allocation7 + $0x6c8] sm:$0xff] }
 0x188   :  { %754 = vmatmul.mubr.f32.vlgmr.msra.gmra.mrb[16].mxu0 %v406_v48  ;;  %v922_v48 = vld [vmem:[#allocation7 + $0x340] sm:$0xff]  ;;  %v1043_v35 = vld [vmem:[#allocation7 + $0x708] sm:$0xff] }
 0x189   :  { %759 = vmatprep.mubr.f32.mxu0 %v411_v43  ;;  %4811 = vmatpush1.bf16.msra.mxu0 %v4810_v47  ;;  %v431_v43 = vmax.f32 %v396_v57, 0.0  ;;  %v914_v47 = vld [vmem:[#allocation7 + $0x300] sm:$0xff]  ;;  %v1051_v37 = vld [vmem:[#allocation7 + $0x748] sm:$0xff] }
 0x18a   :  { %4813 = vmatprep.subr.bf16.mxu0 %v4812_v10  ;;  %v931_v10 = vld [vmem:[#allocation7 + $0x388] sm:$0xff]  ;;  %v4834_v21 = vpack.c.bf16 %v922_v48, %v914_v47  ;;  %v4864_v18 = vpack.c.bf16 %v1051_v37, %v1043_v35  ;;  %v1058_v47 = vld [vmem:[#allocation7 + $0x780] sm:$0xff]  ;;  %v868_v35 = vld [vmem:[#allocation7 + $0x190] sm:$0xff] }
 0x18b   :  { %v1059_v12 = vld [vmem:[#allocation7 + $0x788] sm:$0xff]  ;;  %v1066_v48 = vld [vmem:[#allocation7 + $0x7c0] sm:$0xff]  ;;  %v876_v37 = vld [vmem:[#allocation7 + $0x1d0] sm:$0xff] }
 0x18c   :  { %760 = vmatmul.mubr.f32.gmra.mrb[18].mxu0 %v410_v52  ;;  %v4836_v52 = vpack.c.bf16 %v939_v49, %v931_v10  ;;  %v4870_v10 = vpack.c.bf16 %v1066_v48, %v1058_v47  ;;  %v821_v49 = vld [vmem:[#allocation7 + $0x18] sm:$0xff] }
 0x18d   :  { %765 = vmatprep.mubr.f32.mxu0 %v415_v54  ;;  %4815 = vmatpush1.bf16.msra.mxu0 %v4814_v31  ;;  %v955_v54 = vld [vmem:[#allocation7 + $0x448] sm:$0xff]  ;;  %v4838_v31 = vpack.c.bf16 %v938_v38, %v930_v45 }
 0x18e   :  { %4817 = vmatprep.subr.bf16.mxu0 %v4816_v56  ;;  %v4840_v56 = vpack.c.bf16 %v955_v54, %v947_v53  ;;  %v820_v54 = vld [vmem:[#allocation7 + $0x10] sm:$0xff] }
 0x190   :  { %766 = vmatmul.mubr.f32.gmra.mrb[20].mxu0 %v414_v1  ;;  %v962_v1 = vld [vmem:[#allocation7 + $0x480] sm:$0xff] }
 0x191   :  { %771 = vmatprep.mubr.f32.mxu0 %v419_v3  ;;  %4819 = vmatpush1.bf16.msra.mxu0 %v4818_v46  ;;  %v979_v3 = vld [vmem:[#allocation7 + $0x508] sm:$0xff]  ;;  %v4846_v46 = vpack.c.bf16 %v970_v2, %v962_v1 }
 0x192   :  { %4821 = vmatprep.subr.bf16.mxu0 %v4820_v4  ;;  %v4848_v4 = vpack.c.bf16 %v987_v26, %v979_v3  ;;  %v836_v3 = vld [vmem:[#allocation7 + $0x90] sm:$0xff] }
 0x193   :  { %v844_v26 = vld [vmem:[#allocation7 + $0xd0] sm:$0xff] }
 0x194   :  { %772 = vmatmul.mubr.f32.gmra.mrb[22].mxu0 %v418_v59  ;;  %v4850_v59 = vpack.c.bf16 %v986_v7, %v978_v5  ;;  %v861_v5 = vld [vmem:[#allocation7 + $0x158] sm:$0xff]  ;;  %v4878_v11 = vpack.c.bf16 %v844_v26, %v836_v3 }
 0x195   :  { %777 = vmatprep.mubr.f32.mxu0 %v423_v14  ;;  %4823 = vmatpush1.bf16.msra.mxu0 %v4822_v63  ;;  %v994_v14 = vld [vmem:[#allocation7 + $0x580] sm:$0xff]  ;;  %v1011_v63 = vld [vmem:[#allocation7 + $0x608] sm:$0xff] }
 0x196   :  { %4825 = vmatprep.subr.bf16.mxu0 %v4824_v22  ;;  %v1019_v22 = vld [vmem:[#allocation7 + $0x648] sm:$0xff]  ;;  %v4854_v20 = vpack.c.bf16 %v1002_v41, %v994_v14 }
 0x197   :  { %v4856_v24 = vpack.c.bf16 %v1019_v22, %v1011_v63  ;;  %v852_v63 = vld [vmem:[#allocation7 + $0x110] sm:$0xff] }
 0x198   :  { %778 = vmatmul.mubr.f32.gmra.mrb[24].mxu0 %v422_v29  ;;  %v1027_v29 = vld [vmem:[#allocation7 + $0x688] sm:$0xff]  ;;  %v860_v22 = vld [vmem:[#allocation7 + $0x150] sm:$0xff] }
 0x199   :  { %783 = vmatprep.mubr.f32.mxu0 %v427_v33  ;;  %4827 = vmatpush1.bf16.msra.mxu0 %v4826_v15  ;;  %v4858_v33 = vpack.c.bf16 %v1018_v27, %v1010_v25  ;;  %v4860_v57 = vpack.c.bf16 %v1035_v32, %v1027_v29  ;;  %v1026_v15 = vld [vmem:[#allocation7 + $0x680] sm:$0xff]  ;;  %v877_v25 = vld [vmem:[#allocation7 + $0x1d8] sm:$0xff]  ;;  %v4882_v32 = vpack.c.bf16 %v860_v22, %v852_v63 }
 0x19a   :  { %4829 = vmatprep.subr.bf16.mxu0 %v4828_v34  ;;  %v1034_v34 = vld [vmem:[#allocation7 + $0x6c0] sm:$0xff]  ;;  %v941_v63 = vld [vmem:[#allocation7 + $0x3d8] sm:$0xff] }
 0x19b   :  { %v4862_v39 = vpack.c.bf16 %v1034_v34, %v1026_v15 }
 0x19c   :  { %784 = vmatmul.mubr.f32.gmra.mrb[26].mxu0 %v426_v40  ;;  %v1042_v40 = vld [vmem:[#allocation7 + $0x700] sm:$0xff] }
 0x19d   :  { %789 = vmatprep.mubr.f32.mxu0 %v431_v43  ;;  %4831 = vmatpush1.bf16.msra.mxu0 %v4830_v28  ;;  %v4866_v43 = vpack.c.bf16 %v1050_v42, %v1042_v40  ;;  %v1067_v28 = vld [vmem:[#allocation7 + $0x7c8] sm:$0xff]  ;;  %v893_v40 = vld [vmem:[#allocation7 + $0x258] sm:$0xff] }
 0x19e   :  { %4833 = vmatprep.subr.bf16.mxu0 %v4832_v44  ;;  %v4868_v44 = vpack.c.bf16 %v1067_v28, %v1059_v12  ;;  %v4886_v12 = vpack.c.bf16 %v876_v37, %v868_v35  ;;  %v949_v37 = vld [vmem:[#allocation7 + $0x418] sm:$0xff] }
 0x1a0   :  { %790 = vmatmul.mubr.f32.gmra.mrb[28].mxu0 %v430_v55  ;;  %v829_v55 = vld [vmem:[#allocation7 + $0x58] sm:$0xff] }
 0x1a1   :  { %795 = vmatprep.mubr.f32.mxu0 %v435_v51  ;;  %4835 = vmatpush1.bf16.msra.mxu0 %v4834_v21  ;;  %v4872_v50 = vpack.c.bf16 %v829_v55, %v821_v49  ;;  %v564_v51 = vld [vmem:[%s9554_s4] sm:$0x3]  ;;  %v892_v49 = vld [vmem:[#allocation7 + $0x250] sm:$0xff] }
 0x1a2   :  { %4837 = vmatprep.subr.bf16.mxu0 %v4836_v52  ;;  %v7798_v21 = vrot.slane %v564_v51, %v7684_v17  ;;  %v7801_v52 = vrot.slane %v564_v51, %v7692_v19  ;;  %v909_v51 = vld [vmem:[#allocation7 + $0x2d8] sm:$0xff]  ;;  %v1753_v19 = vld [vmem:[#allocation8 + $0x370] sm:$0xff] }
 0x1a4   :  { %796 = vmatmul.mubr.f32.gmra.mrb[30].mxu0 %v434_v6  ;;  %v828_v6 = vld [vmem:[#allocation7 + $0x50] sm:$0xff] }
 0x1a5   :  { %4839 = vmatpush1.bf16.msra.mxu0 %v4838_v31  ;;  %v4874_v23 = vpack.c.bf16 %v828_v6, %v820_v54 }
 0x1a6   :  { %4841 = vmatprep.subr.bf16.mxu0 %v4840_v56  ;;  %v837_v56 = vld [vmem:[#allocation7 + $0x98] sm:$0xff] }
 0x1a7   :  { %v4876_v2 = vpack.c.bf16 %v845_v58, %v837_v56  ;;  %v900_v58 = vld [vmem:[#allocation7 + $0x290] sm:$0xff] }
 0x1a9   :  { %4843 = vmatpush1.bf16.msra.mxu0 %v4842_v61 }
 0x1aa   :  { %4845 = vmatprep.subr.bf16.mxu0 %v4844_v62 }
 0x1ad   :  { %4847 = vmatpush1.bf16.msra.mxu0 %v4846_v46 }
 0x1ae   :  { %4849 = vmatprep.subr.bf16.mxu0 %v4848_v4  ;;  %v853_v4 = vld [vmem:[#allocation7 + $0x118] sm:$0xff] }
 0x1af   :  { %v4880_v41 = vpack.c.bf16 %v861_v5, %v853_v4 }
 0x1b1   :  { %4851 = vmatpush1.bf16.msra.mxu0 %v4850_v59 }
 0x1b2   :  { %4853 = vmatprep.subr.bf16.mxu0 %v4852_v13 }
 0x1b5   :  { %4855 = vmatpush1.bf16.msra.mxu0 %v4854_v20 }
 0x1b6   :  { %4857 = vmatprep.subr.bf16.mxu0 %v4856_v24  ;;  %v869_v24 = vld [vmem:[#allocation7 + $0x198] sm:$0xff] }
 0x1b7   :  { %v4884_v34 = vpack.c.bf16 %v877_v25, %v869_v24 }
 0x1b9   :  { %4859 = vmatpush1.bf16.msra.mxu0 %v4858_v33 }
 0x1ba   :  { %4861 = vmatprep.subr.bf16.mxu0 %v4860_v57 }
 0x1bd   :  { %4863 = vmatpush1.bf16.msra.mxu0 %v4862_v39 }
 0x1be   :  { %4865 = vmatprep.subr.bf16.mxu0 %v4864_v18  ;;  %v885_v18 = vld [vmem:[#allocation7 + $0x218] sm:$0xff] }
 0x1bf   :  { %v4888_v48 = vpack.c.bf16 %v893_v40, %v885_v18 }
 0x1c1   :  { %4867 = vmatpush1.bf16.msra.mxu0 %v4866_v43 }
 0x1c2   :  { %4869 = vmatprep.subr.bf16.mxu0 %v4868_v44 }
 0x1c5   :  { %4871 = vmatpush1.bf16.msra.mxu0 %v4870_v10  ;;  %v884_v10 = vld [vmem:[#allocation7 + $0x210] sm:$0xff] }
 0x1c6   :  { %4873 = vmatprep.subr.bf16.mxu0 %v4872_v50  ;;  %v901_v50 = vld [vmem:[#allocation7 + $0x298] sm:$0xff] }
 0x1c7   :  { %v4892_v56 = vpack.c.bf16 %v909_v51, %v901_v50  ;;  %v981_v50 = vld [vmem:[#allocation7 + $0x518] sm:$0xff] }
 0x1c8   :  { %v989_v51 = vld [vmem:[#allocation7 + $0x558] sm:$0xff] }
 0x25b   :  { %v755_v45 = vpop.f32.mrb[16].mxu0 }
 0x25c   :  { %v7112_v38 = vadd.f32 %v755_v45, %v7798_v21  ;;  %v757_v53 = vpop.f32.mrb[17].mxu0 }
 0x25d   :  { %v7113_v31 = vadd.f32 %v757_v53, %v7801_v52  ;;  %v4890_v53 = vpack.c.bf16 %v892_v49, %v884_v10  ;;  %v964_v49 = vld [vmem:[#allocation7 + $0x490] sm:$0xff] }
 0x25e   :  { %v7807_v61 = vmax.f32 %v7112_v38, 0.0 }
 0x25f   :  { %v7805_v60 = vmax.f32 %v7113_v31, 0.0  ;;  %v761_v36 = vpop.f32.mrb[18].mxu0 }
 0x260   :  { %v7114_v62 = vadd.f32 %v761_v36, %v7798_v21  ;;  %v763_v1 = vpop.f32.mrb[19].mxu0  ;;  %v908_v36 = vld [vmem:[#allocation7 + $0x2d0] sm:$0xff] }
 0x261   :  { %v7115_v46 = vadd.f32 %v763_v1, %v7801_v52  ;;  %1180 = vmatprep.mubr.f32.mxu0 %v7805_v60  ;;  %v925_v1 = vld [vmem:[#allocation7 + $0x358] sm:$0xff]  ;;  %v4894_v26 = vpack.c.bf16 %v908_v36, %v900_v58 }
 0x262   :  { %1181 = vmatmul.mubr.f32.vlgmr.msra.gmra.mrb[32].mxu0 %v7807_v61  ;;  %v7815_v59 = vmax.f32 %v7114_v62, 0.0  ;;  %v917_v62 = vld [vmem:[#allocation7 + $0x318] sm:$0xff] }
 0x263   :  { %v7813_v7 = vmax.f32 %v7115_v46, 0.0  ;;  %4875 = vmatpush1.bf16.msra.mxu0 %v4874_v23  ;;  %v767_v9 = vpop.f32.mrb[20].mxu0  ;;  %v1005_v58 = vld [vmem:[#allocation7 + $0x5d8] sm:$0xff] }
 0x264   :  { %v7116_v13 = vadd.f32 %v767_v9, %v7798_v21  ;;  %v769_v14 = vpop.f32.mrb[21].mxu0  ;;  %4877 = vmatprep.subr.bf16.mxu0 %v4876_v2  ;;  %v4896_v9 = vpack.c.bf16 %v925_v1, %v917_v62  ;;  %v996_v62 = vld [vmem:[#allocation7 + $0x590] sm:$0xff] }
 0x265   :  { %v7117_v20 = vadd.f32 %v769_v14, %v7801_v52  ;;  %1186 = vmatprep.mubr.f32.mxu0 %v7813_v7  ;;  %v1004_v1 = vld [vmem:[#allocation7 + $0x5d0] sm:$0xff] }
 0x266   :  { %1187 = vmatmul.mubr.f32.gmra.mrb[34].mxu0 %v7815_v59  ;;  %v7823_v33 = vmax.f32 %v7116_v13, 0.0  ;;  %v924_v13 = vld [vmem:[#allocation7 + $0x350] sm:$0xff] }
 0x267   :  { %v7821_v27 = vmax.f32 %v7117_v20, 0.0  ;;  %4879 = vmatpush1.bf16.msra.mxu0 %v4878_v11  ;;  %v773_v29 = vpop.f32.mrb[22].mxu0  ;;  %v916_v11 = vld [vmem:[#allocation7 + $0x310] sm:$0xff] }
 0x268   :  { %v7118_v57 = vadd.f32 %v773_v29, %v7798_v21  ;;  %v775_v15 = vpop.f32.mrb[23].mxu0  ;;  %4881 = vmatprep.subr.bf16.mxu0 %v4880_v41  ;;  %v933_v41 = vld [vmem:[#allocation7 + $0x398] sm:$0xff]  ;;  %v4898_v24 = vpack.c.bf16 %v924_v13, %v916_v11  ;;  %v1020_v11 = vld [vmem:[#allocation7 + $0x650] sm:$0xff] }
 0x269   :  { %v7119_v39 = vadd.f32 %v775_v15, %v7801_v52  ;;  %1192 = vmatprep.mubr.f32.mxu0 %v7821_v27  ;;  %v932_v15 = vld [vmem:[#allocation7 + $0x390] sm:$0xff]  ;;  %v1029_v13 = vld [vmem:[#allocation7 + $0x698] sm:$0xff] }
 0x26a   :  { %1193 = vmatmul.mubr.f32.gmra.mrb[36].mxu0 %v7823_v33  ;;  %v7831_v28 = vmax.f32 %v7118_v57, 0.0  ;;  %v4900_v57 = vpack.c.bf16 %v941_v63, %v933_v41 }
 0x26b   :  { %v7829_v42 = vmax.f32 %v7119_v39, 0.0  ;;  %4883 = vmatpush1.bf16.msra.mxu0 %v4882_v32  ;;  %v779_v43 = vpop.f32.mrb[24].mxu0  ;;  %v957_v39 = vld [vmem:[#allocation7 + $0x458] sm:$0xff] }
 0x26c   :  { %v7120_v44 = vadd.f32 %v779_v43, %v7798_v21  ;;  %v781_v47 = vpop.f32.mrb[25].mxu0  ;;  %4885 = vmatprep.subr.bf16.mxu0 %v4884_v34  ;;  %v940_v34 = vld [vmem:[#allocation7 + $0x3d0] sm:$0xff] }
 0x26d   :  { %v7121_v55 = vadd.f32 %v781_v47, %v7801_v52  ;;  %1198 = vmatprep.mubr.f32.mxu0 %v7829_v42  ;;  %v4902_v40 = vpack.c.bf16 %v940_v34, %v932_v15  ;;  %v965_v47 = vld [vmem:[#allocation7 + $0x498] sm:$0xff]  ;;  %v1044_v34 = vld [vmem:[#allocation7 + $0x710] sm:$0xff] }
 0x26e   :  { %1199 = vmatmul.mubr.f32.gmra.mrb[38].mxu0 %v7831_v28  ;;  %v7839_v54 = vmax.f32 %v7120_v44, 0.0  ;;  %v956_v44 = vld [vmem:[#allocation7 + $0x450] sm:$0xff] }
 0x26f   :  { %v7837_v45 = vmax.f32 %v7121_v55, 0.0  ;;  %4887 = vmatpush1.bf16.msra.mxu0 %v4886_v12  ;;  %v785_v38 = vpop.f32.mrb[26].mxu0  ;;  %v948_v12 = vld [vmem:[#allocation7 + $0x410] sm:$0xff] }
 0x270   :  { %v7122_v6 = vadd.f32 %v785_v38, %v7798_v21  ;;  %v787_v31 = vpop.f32.mrb[27].mxu0  ;;  %4889 = vmatprep.subr.bf16.mxu0 %v4888_v48  ;;  %v4906_v48 = vpack.c.bf16 %v956_v44, %v948_v12  ;;  %v972_v55 = vld [vmem:[#allocation7 + $0x4d0] sm:$0xff] }
 0x271   :  { %v7123_v23 = vadd.f32 %v787_v31, %v7801_v52  ;;  %1204 = vmatprep.mubr.f32.mxu0 %v7837_v45  ;;  %v4910_v38 = vpack.c.bf16 %v972_v55, %v964_v49  ;;  %v988_v31 = vld [vmem:[#allocation7 + $0x550] sm:$0xff]  ;;  %v822_v49 = vld [vmem:[#allocation7 + $0x20] sm:$0xff] }
 0x272   :  { %1205 = vmatmul.mubr.f32.gmra.mrb[40].mxu0 %v7839_v54  ;;  %v7847_v46 = vmax.f32 %v7122_v6, 0.0  ;;  %v980_v6 = vld [vmem:[#allocation7 + $0x510] sm:$0xff]  ;;  %v830_v55 = vld [vmem:[#allocation7 + $0x60] sm:$0xff] }
 0x273   :  { %v7845_v2 = vmax.f32 %v7123_v23, 0.0  ;;  %4891 = vmatpush1.bf16.msra.mxu0 %v4890_v53  ;;  %v791_v3 = vpop.f32.mrb[28].mxu0  ;;  %v4912_v53 = vpack.c.bf16 %v989_v51, %v981_v50  ;;  %v4914_v36 = vpack.c.bf16 %v988_v31, %v980_v6  ;;  %v1060_v12 = vld [vmem:[#allocation7 + $0x790] sm:$0xff]  ;;  %v839_v50 = vld [vmem:[#allocation7 + $0xa8] sm:$0xff]  ;;  %v838_v6 = vld [vmem:[#allocation7 + $0xa0] sm:$0xff] }
 0x274   :  { %v7124_v4 = vadd.f32 %v791_v3, %v7798_v21  ;;  %v793_v5 = vpop.f32.mrb[29].mxu0  ;;  %4893 = vmatprep.subr.bf16.mxu0 %v4892_v56  ;;  %v997_v56 = vld [vmem:[#allocation7 + $0x598] sm:$0xff]  ;;  %v1068_v44 = vld [vmem:[#allocation7 + $0x7d0] sm:$0xff]  ;;  %v847_v51 = vld [vmem:[#allocation7 + $0xe8] sm:$0xff] }
 0x275   :  { %v7125_v14 = vadd.f32 %v793_v5, %v7801_v52  ;;  %1210 = vmatprep.mubr.f32.mxu0 %v7845_v2  ;;  %v4916_v23 = vpack.c.bf16 %v1005_v58, %v997_v56  ;;  %v1013_v3 = vld [vmem:[#allocation7 + $0x618] sm:$0xff]  ;;  %v846_v31 = vld [vmem:[#allocation7 + $0xe0] sm:$0xff]  ;;  %v855_v56 = vld [vmem:[#allocation7 + $0x128] sm:$0xff] }
 0x276   :  { %1211 = vmatmul.mubr.f32.gmra.mrb[42].mxu0 %v7847_v46  ;;  %v7855_v25 = vmax.f32 %v7124_v4, 0.0  ;;  %v4918_v4 = vpack.c.bf16 %v1004_v1, %v996_v62  ;;  %v863_v58 = vld [vmem:[#allocation7 + $0x168] sm:$0xff]  ;;  %v854_v62 = vld [vmem:[#allocation7 + $0x120] sm:$0xff] }
 0x277   :  { %v7853_v22 = vmax.f32 %v7125_v14, 0.0  ;;  %4895 = vmatpush1.bf16.msra.mxu0 %v4894_v26  ;;  %v797_v20 = vpop.f32.mrb[30].mxu0  ;;  %v1021_v26 = vld [vmem:[#allocation7 + $0x658] sm:$0xff]  ;;  %v862_v1 = vld [vmem:[#allocation7 + $0x160] sm:$0xff] }
 0x278   :  { %v7126_v29 = vadd.f32 %v797_v20, %v7798_v21  ;;  %v799_v32 = vpop.f32.mrb[31].mxu0  ;;  %4897 = vmatprep.subr.bf16.mxu0 %v4896_v9  ;;  %v4904_v21 = vpack.c.bf16 %v957_v39, %v949_v37  ;;  %v4920_v5 = vpack.c.bf16 %v1021_v26, %v1013_v3  ;;  %v1012_v9 = vld [vmem:[#allocation7 + $0x610] sm:$0xff]  ;;  %v1037_v14 = vld [vmem:[#allocation7 + $0x6d8] sm:$0xff]  ;;  %v871_v3 = vld [vmem:[#allocation7 + $0x1a8] sm:$0xff] }
 0x279   :  { %v7127_v35 = vadd.f32 %v799_v32, %v7801_v52  ;;  %1216 = vmatprep.mubr.f32.mxu0 %v7853_v22  ;;  %v973_v52 = vld [vmem:[#allocation7 + $0x4d8] sm:$0xff]  ;;  %v4922_v41 = vpack.c.bf16 %v1020_v11, %v1012_v9  ;;  %v4924_v63 = vpack.c.bf16 %v1037_v14, %v1029_v13  ;;  %v1028_v20 = vld [vmem:[#allocation7 + $0x690] sm:$0xff]  ;;  %v879_v26 = vld [vmem:[#allocation7 + $0x1e8] sm:$0xff] }
 0x27a   :  { %1217 = vmatmul.mubr.f32.gmra.mrb[44].mxu0 %v7855_v25  ;;  %v7863_v43 = vmax.f32 %v7126_v29, 0.0  ;;  %v4908_v10 = vpack.c.bf16 %v973_v52, %v965_v47  ;;  %v1045_v29 = vld [vmem:[#allocation7 + $0x718] sm:$0xff]  ;;  %v823_v47 = vld [vmem:[#allocation7 + $0x28] sm:$0xff]  ;;  %v870_v9 = vld [vmem:[#allocation7 + $0x1a0] sm:$0xff] }
 0x27b   :  { %v7861_v18 = vmax.f32 %v7127_v35, 0.0  ;;  %4899 = vmatpush1.bf16.msra.mxu0 %v4898_v24  ;;  %v1036_v24 = vld [vmem:[#allocation7 + $0x6d0] sm:$0xff]  ;;  %v1053_v32 = vld [vmem:[#allocation7 + $0x758] sm:$0xff]  ;;  %v831_v52 = vld [vmem:[#allocation7 + $0x68] sm:$0xff] }
 0x27c   :  { %4901 = vmatprep.subr.bf16.mxu0 %v4900_v57  ;;  %v4926_v57 = vpack.c.bf16 %v1036_v24, %v1028_v20  ;;  %v4928_v15 = vpack.c.bf16 %v1053_v32, %v1045_v29  ;;  %v1052_v35 = vld [vmem:[#allocation7 + $0x750] sm:$0xff]  ;;  %v1061_v37 = vld [vmem:[#allocation7 + $0x798] sm:$0xff]  ;;  %v878_v11 = vld [vmem:[#allocation7 + $0x1e0] sm:$0xff] }
 0x27d   :  { %1222 = vmatprep.mubr.f32.mxu0 %v7861_v18  ;;  %v1069_v39 = vld [vmem:[#allocation7 + $0x7d8] sm:$0xff]  ;;  %v887_v13 = vld [vmem:[#allocation7 + $0x228] sm:$0xff]  ;;  %v886_v20 = vld [vmem:[#allocation7 + $0x220] sm:$0xff] }
 0x27e   :  { %1223 = vmatmul.mubr.f32.gmra.mrb[46].mxu0 %v7863_v43  ;;  %v895_v14 = vld [vmem:[#allocation7 + $0x268] sm:$0xff]  ;;  %v894_v24 = vld [vmem:[#allocation7 + $0x260] sm:$0xff] }
 0x27f   :  { %4903 = vmatpush1.bf16.msra.mxu0 %v4902_v40  ;;  %1293 = vmatprep.mubr.f32.mxu0 %v7805_v60  ;;  %v4930_v40 = vpack.c.bf16 %v1052_v35, %v1044_v34  ;;  %v903_v29 = vld [vmem:[#allocation7 + $0x2a8] sm:$0xff]  ;;  %v902_v34 = vld [vmem:[#allocation7 + $0x2a0] sm:$0xff] }
 0x280   :  { %4905 = vmatprep.subr.bf16.mxu0 %v4904_v21  ;;  %v4932_v21 = vpack.c.bf16 %v1069_v39, %v1061_v37  ;;  %v911_v32 = vld [vmem:[#allocation7 + $0x2e8] sm:$0xff]  ;;  %v910_v35 = vld [vmem:[#allocation7 + $0x2e0] sm:$0xff] }
 0x281   :  { %v919_v37 = vld [vmem:[#allocation7 + $0x328] sm:$0xff] }
 0x282   :  { %v927_v39 = vld [vmem:[#allocation7 + $0x368] sm:$0xff] }
 0x283   :  { %4907 = vmatpush1.bf16.msra.mxu0 %v4906_v48  ;;  %v4934_v48 = vpack.c.bf16 %v1068_v44, %v1060_v12  ;;  %v918_v12 = vld [vmem:[#allocation7 + $0x320] sm:$0xff] }
 0x284   :  { %4909 = vmatprep.subr.bf16.mxu0 %v4908_v10  ;;  %v4936_v10 = vpack.c.bf16 %v831_v52, %v823_v47  ;;  %v926_v44 = vld [vmem:[#allocation7 + $0x360] sm:$0xff]  ;;  %v935_v47 = vld [vmem:[#allocation7 + $0x3a8] sm:$0xff] }
 0x285   :  { %v943_v52 = vld [vmem:[#allocation7 + $0x3e8] sm:$0xff] }
 0x287   :  { %4911 = vmatpush1.bf16.msra.mxu0 %v4910_v38  ;;  %v4938_v38 = vpack.c.bf16 %v830_v55, %v822_v49  ;;  %v934_v49 = vld [vmem:[#allocation7 + $0x3a0] sm:$0xff] }
 0x288   :  { %4913 = vmatprep.subr.bf16.mxu0 %v4912_v53  ;;  %v4940_v53 = vpack.c.bf16 %v847_v51, %v839_v50  ;;  %v942_v55 = vld [vmem:[#allocation7 + $0x3e0] sm:$0xff]  ;;  %v951_v50 = vld [vmem:[#allocation7 + $0x428] sm:$0xff] }
 0x289   :  { %v959_v51 = vld [vmem:[#allocation7 + $0x468] sm:$0xff] }
 0x28b   :  { %4915 = vmatpush1.bf16.msra.mxu0 %v4914_v36  ;;  %v4942_v36 = vpack.c.bf16 %v846_v31, %v838_v6  ;;  %v950_v6 = vld [vmem:[#allocation7 + $0x420] sm:$0xff] }
 0x28c   :  { %4917 = vmatprep.subr.bf16.mxu0 %v4916_v23  ;;  %v4944_v23 = vpack.c.bf16 %v863_v58, %v855_v56  ;;  %v958_v31 = vld [vmem:[#allocation7 + $0x460] sm:$0xff]  ;;  %v967_v56 = vld [vmem:[#allocation7 + $0x4a8] sm:$0xff] }
 0x28d   :  { %v975_v58 = vld [vmem:[#allocation7 + $0x4e8] sm:$0xff] }
 0x28f   :  { %4919 = vmatpush1.bf16.msra.mxu0 %v4918_v4  ;;  %v4946_v4 = vpack.c.bf16 %v862_v1, %v854_v62  ;;  %v966_v62 = vld [vmem:[#allocation7 + $0x4a0] sm:$0xff] }
 0x290   :  { %4921 = vmatprep.subr.bf16.mxu0 %v4920_v5  ;;  %v4948_v5 = vpack.c.bf16 %v879_v26, %v871_v3  ;;  %v974_v1 = vld [vmem:[#allocation7 + $0x4e0] sm:$0xff]  ;;  %v983_v3 = vld [vmem:[#allocation7 + $0x528] sm:$0xff] }
 0x291   :  { %v991_v26 = vld [vmem:[#allocation7 + $0x568] sm:$0xff] }
 0x293   :  { %4923 = vmatpush1.bf16.msra.mxu0 %v4922_v41  ;;  %v4950_v41 = vpack.c.bf16 %v878_v11, %v870_v9  ;;  %v982_v9 = vld [vmem:[#allocation7 + $0x520] sm:$0xff] }
 0x294   :  { %4925 = vmatprep.subr.bf16.mxu0 %v4924_v63  ;;  %v4952_v63 = vpack.c.bf16 %v895_v14, %v887_v13  ;;  %v990_v11 = vld [vmem:[#allocation7 + $0x560] sm:$0xff]  ;;  %v999_v13 = vld [vmem:[#allocation7 + $0x5a8] sm:$0xff] }
 0x295   :  { %v1007_v14 = vld [vmem:[#allocation7 + $0x5e8] sm:$0xff] }
 0x297   :  { %4927 = vmatpush1.bf16.msra.mxu0 %v4926_v57  ;;  %v4954_v57 = vpack.c.bf16 %v894_v24, %v886_v20  ;;  %v998_v20 = vld [vmem:[#allocation7 + $0x5a0] sm:$0xff] }
 0x298   :  { %4929 = vmatprep.subr.bf16.mxu0 %v4928_v15  ;;  %v4956_v15 = vpack.c.bf16 %v911_v32, %v903_v29  ;;  %v1006_v24 = vld [vmem:[#allocation7 + $0x5e0] sm:$0xff]  ;;  %v1015_v29 = vld [vmem:[#allocation7 + $0x628] sm:$0xff] }
 0x299   :  { %v1023_v32 = vld [vmem:[#allocation7 + $0x668] sm:$0xff] }
 0x29b   :  { %4931 = vmatpush1.bf16.msra.mxu0 %v4930_v40  ;;  %v4958_v40 = vpack.c.bf16 %v910_v35, %v902_v34  ;;  %v1014_v34 = vld [vmem:[#allocation7 + $0x620] sm:$0xff] }
 0x29c   :  { %4933 = vmatprep.subr.bf16.mxu0 %v4932_v21  ;;  %v4960_v21 = vpack.c.bf16 %v927_v39, %v919_v37  ;;  %v1022_v35 = vld [vmem:[#allocation7 + $0x660] sm:$0xff]  ;;  %v1031_v37 = vld [vmem:[#allocation7 + $0x6a8] sm:$0xff] }
 0x29d   :  { %v1039_v39 = vld [vmem:[#allocation7 + $0x6e8] sm:$0xff] }
 0x29f   :  { %4935 = vmatpush1.bf16.msra.mxu0 %v4934_v48  ;;  %v4962_v48 = vpack.c.bf16 %v926_v44, %v918_v12  ;;  %v1030_v12 = vld [vmem:[#allocation7 + $0x6a0] sm:$0xff] }
 0x2a0   :  { %4937 = vmatprep.subr.bf16.mxu0 %v4936_v10  ;;  %v4964_v10 = vpack.c.bf16 %v943_v52, %v935_v47  ;;  %v1038_v44 = vld [vmem:[#allocation7 + $0x6e0] sm:$0xff]  ;;  %v1047_v47 = vld [vmem:[#allocation7 + $0x728] sm:$0xff] }
 0x2a1   :  { %v1055_v52 = vld [vmem:[#allocation7 + $0x768] sm:$0xff] }
 0x2a2   :  { %1294 = vmatmul.mubr.f32.vlgmr.msra.gmra.mrb[48].mxu0 %v7807_v61 }
 0x2a3   :  { %1299 = vmatprep.mubr.f32.mxu0 %v7813_v7  ;;  %4939 = vmatpush1.bf16.msra.mxu0 %v4938_v38  ;;  %v4966_v38 = vpack.c.bf16 %v942_v55, %v934_v49  ;;  %v1046_v49 = vld [vmem:[#allocation7 + $0x720] sm:$0xff] }
 0x2a4   :  { %4941 = vmatprep.subr.bf16.mxu0 %v4940_v53  ;;  %v4968_v53 = vpack.c.bf16 %v959_v51, %v951_v50  ;;  %v1054_v55 = vld [vmem:[#allocation7 + $0x760] sm:$0xff]  ;;  %v1063_v50 = vld [vmem:[#allocation7 + $0x7a8] sm:$0xff] }
 0x2a5   :  { %v1071_v51 = vld [vmem:[#allocation7 + $0x7e8] sm:$0xff] }
 0x2a6   :  { %1300 = vmatmul.mubr.f32.gmra.mrb[50].mxu0 %v7815_v59 }
 0x2a7   :  { %1305 = vmatprep.mubr.f32.mxu0 %v7821_v27  ;;  %4943 = vmatpush1.bf16.msra.mxu0 %v4942_v36  ;;  %v4970_v36 = vpack.c.bf16 %v958_v31, %v950_v6  ;;  %v1062_v6 = vld [vmem:[#allocation7 + $0x7a0] sm:$0xff] }
 0x2a8   :  { %4945 = vmatprep.subr.bf16.mxu0 %v4944_v23  ;;  %v4972_v23 = vpack.c.bf16 %v975_v58, %v967_v56  ;;  %v1070_v31 = vld [vmem:[#allocation7 + $0x7e0] sm:$0xff]  ;;  %v825_v56 = vld [vmem:[#allocation7 + $0x38] sm:$0xff] }
 0x2a9   :  { %v833_v58 = vld [vmem:[#allocation7 + $0x78] sm:$0xff] }
 0x2aa   :  { %1306 = vmatmul.mubr.f32.gmra.mrb[52].mxu0 %v7823_v33 }
 0x2ab   :  { %1311 = vmatprep.mubr.f32.mxu0 %v7829_v42  ;;  %4947 = vmatpush1.bf16.msra.mxu0 %v4946_v4  ;;  %v4974_v4 = vpack.c.bf16 %v974_v1, %v966_v62  ;;  %v824_v62 = vld [vmem:[#allocation7 + $0x30] sm:$0xff] }
 0x2ac   :  { %4949 = vmatprep.subr.bf16.mxu0 %v4948_v5  ;;  %v4976_v5 = vpack.c.bf16 %v991_v26, %v983_v3  ;;  %v832_v1 = vld [vmem:[#allocation7 + $0x70] sm:$0xff]  ;;  %v841_v3 = vld [vmem:[#allocation7 + $0xb8] sm:$0xff] }
 0x2ad   :  { %v849_v26 = vld [vmem:[#allocation7 + $0xf8] sm:$0xff] }
 0x2ae   :  { %1312 = vmatmul.mubr.f32.gmra.mrb[54].mxu0 %v7831_v28 }
 0x2af   :  { %1317 = vmatprep.mubr.f32.mxu0 %v7837_v45  ;;  %4951 = vmatpush1.bf16.msra.mxu0 %v4950_v41  ;;  %v4978_v41 = vpack.c.bf16 %v990_v11, %v982_v9  ;;  %v840_v9 = vld [vmem:[#allocation7 + $0xb0] sm:$0xff] }
 0x2b0   :  { %4953 = vmatprep.subr.bf16.mxu0 %v4952_v63  ;;  %v4980_v63 = vpack.c.bf16 %v1007_v14, %v999_v13  ;;  %v848_v11 = vld [vmem:[#allocation7 + $0xf0] sm:$0xff]  ;;  %v857_v13 = vld [vmem:[#allocation7 + $0x138] sm:$0xff] }
 0x2b1   :  { %v865_v14 = vld [vmem:[#allocation7 + $0x178] sm:$0xff] }
 0x2b2   :  { %1318 = vmatmul.mubr.f32.gmra.mrb[56].mxu0 %v7839_v54 }
 0x2b3   :  { %1323 = vmatprep.mubr.f32.mxu0 %v7845_v2  ;;  %4955 = vmatpush1.bf16.msra.mxu0 %v4954_v57  ;;  %v4982_v57 = vpack.c.bf16 %v1006_v24, %v998_v20  ;;  %v856_v20 = vld [vmem:[#allocation7 + $0x130] sm:$0xff] }
 0x2b4   :  { %4957 = vmatprep.subr.bf16.mxu0 %v4956_v15  ;;  %v4984_v15 = vpack.c.bf16 %v1023_v32, %v1015_v29  ;;  %v864_v24 = vld [vmem:[#allocation7 + $0x170] sm:$0xff]  ;;  %v873_v29 = vld [vmem:[#allocation7 + $0x1b8] sm:$0xff] }
 0x2b5   :  { %v881_v32 = vld [vmem:[#allocation7 + $0x1f8] sm:$0xff] }
 0x2b6   :  { %1324 = vmatmul.mubr.f32.gmra.mrb[58].mxu0 %v7847_v46 }
 0x2b7   :  { %1329 = vmatprep.mubr.f32.mxu0 %v7853_v22  ;;  %4959 = vmatpush1.bf16.msra.mxu0 %v4958_v40  ;;  %v4986_v40 = vpack.c.bf16 %v1022_v35, %v1014_v34  ;;  %v872_v34 = vld [vmem:[#allocation7 + $0x1b0] sm:$0xff] }
 0x2b8   :  { %4961 = vmatprep.subr.bf16.mxu0 %v4960_v21  ;;  %v4988_v21 = vpack.c.bf16 %v1039_v39, %v1031_v37  ;;  %v880_v35 = vld [vmem:[#allocation7 + $0x1f0] sm:$0xff]  ;;  %v889_v37 = vld [vmem:[#allocation7 + $0x238] sm:$0xff] }
 0x2b9   :  { %v897_v39 = vld [vmem:[#allocation7 + $0x278] sm:$0xff] }
 0x2ba   :  { %1330 = vmatmul.mubr.f32.gmra.mrb[60].mxu0 %v7855_v25 }
 0x2bb   :  { %1335 = vmatprep.mubr.f32.mxu0 %v7861_v18  ;;  %4963 = vmatpush1.bf16.msra.mxu0 %v4962_v48  ;;  %v4990_v48 = vpack.c.bf16 %v1038_v44, %v1030_v12  ;;  %v888_v12 = vld [vmem:[#allocation7 + $0x230] sm:$0xff] }
 0x2bc   :  { %4965 = vmatprep.subr.bf16.mxu0 %v4964_v10  ;;  %v4992_v10 = vpack.c.bf16 %v1055_v52, %v1047_v47  ;;  %v896_v44 = vld [vmem:[#allocation7 + $0x270] sm:$0xff]  ;;  %v905_v47 = vld [vmem:[#allocation7 + $0x2b8] sm:$0xff] }
 0x2bd   :  { %v913_v52 = vld [vmem:[#allocation7 + $0x2f8] sm:$0xff] }
 0x2be   :  { %1336 = vmatmul.mubr.f32.gmra.mrb[62].mxu0 %v7863_v43 }
 0x2bf   :  { %4967 = vmatpush1.bf16.msra.mxu0 %v4966_v38  ;;  %1406 = vmatprep.mubr.f32.mxu0 %v7805_v60  ;;  %v4994_v38 = vpack.c.bf16 %v1054_v55, %v1046_v49  ;;  %v904_v49 = vld [vmem:[#allocation7 + $0x2b0] sm:$0xff] }
 0x2c0   :  { %4969 = vmatprep.subr.bf16.mxu0 %v4968_v53  ;;  %v4996_v53 = vpack.c.bf16 %v1071_v51, %v1063_v50  ;;  %v912_v55 = vld [vmem:[#allocation7 + $0x2f0] sm:$0xff]  ;;  %v921_v50 = vld [vmem:[#allocation7 + $0x338] sm:$0xff] }
 0x2c1   :  { %v929_v51 = vld [vmem:[#allocation7 + $0x378] sm:$0xff] }
 0x2c3   :  { %4971 = vmatpush1.bf16.msra.mxu0 %v4970_v36  ;;  %v4998_v36 = vpack.c.bf16 %v1070_v31, %v1062_v6  ;;  %v920_v6 = vld [vmem:[#allocation7 + $0x330] sm:$0xff] }
 0x2c4   :  { %4973 = vmatprep.subr.bf16.mxu0 %v4972_v23  ;;  %v5000_v23 = vpack.c.bf16 %v833_v58, %v825_v56  ;;  %v928_v31 = vld [vmem:[#allocation7 + $0x370] sm:$0xff]  ;;  %v937_v56 = vld [vmem:[#allocation7 + $0x3b8] sm:$0xff] }
 0x2c5   :  { %v945_v58 = vld [vmem:[#allocation7 + $0x3f8] sm:$0xff] }
 0x2c7   :  { %4975 = vmatpush1.bf16.msra.mxu0 %v4974_v4  ;;  %v5002_v4 = vpack.c.bf16 %v832_v1, %v824_v62  ;;  %v936_v62 = vld [vmem:[#allocation7 + $0x3b0] sm:$0xff] }
 0x2c8   :  { %4977 = vmatprep.subr.bf16.mxu0 %v4976_v5  ;;  %v5004_v5 = vpack.c.bf16 %v849_v26, %v841_v3  ;;  %v944_v1 = vld [vmem:[#allocation7 + $0x3f0] sm:$0xff]  ;;  %v953_v3 = vld [vmem:[#allocation7 + $0x438] sm:$0xff] }
 0x2c9   :  { %v961_v26 = vld [vmem:[#allocation7 + $0x478] sm:$0xff] }
 0x2cb   :  { %4979 = vmatpush1.bf16.msra.mxu0 %v4978_v41  ;;  %v5006_v41 = vpack.c.bf16 %v848_v11, %v840_v9  ;;  %v952_v9 = vld [vmem:[#allocation7 + $0x430] sm:$0xff] }
 0x2cc   :  { %4981 = vmatprep.subr.bf16.mxu0 %v4980_v63  ;;  %v5008_v63 = vpack.c.bf16 %v865_v14, %v857_v13  ;;  %v960_v11 = vld [vmem:[#allocation7 + $0x470] sm:$0xff]  ;;  %v969_v13 = vld [vmem:[#allocation7 + $0x4b8] sm:$0xff] }
 0x2cd   :  { %v977_v14 = vld [vmem:[#allocation7 + $0x4f8] sm:$0xff] }
 0x2cf   :  { %4983 = vmatpush1.bf16.msra.mxu0 %v4982_v57  ;;  %v5010_v57 = vpack.c.bf16 %v864_v24, %v856_v20  ;;  %v968_v20 = vld [vmem:[#allocation7 + $0x4b0] sm:$0xff] }
 0x2d0   :  { %4985 = vmatprep.subr.bf16.mxu0 %v4984_v15  ;;  %v5012_v15 = vpack.c.bf16 %v881_v32, %v873_v29  ;;  %v976_v24 = vld [vmem:[#allocation7 + $0x4f0] sm:$0xff]  ;;  %v985_v29 = vld [vmem:[#allocation7 + $0x538] sm:$0xff] }
 0x2d1   :  { %v993_v32 = vld [vmem:[#allocation7 + $0x578] sm:$0xff] }
 0x2d3   :  { %4987 = vmatpush1.bf16.msra.mxu0 %v4986_v40  ;;  %v5014_v40 = vpack.c.bf16 %v880_v35, %v872_v34  ;;  %v984_v34 = vld [vmem:[#allocation7 + $0x530] sm:$0xff] }
 0x2d4   :  { %4989 = vmatprep.subr.bf16.mxu0 %v4988_v21  ;;  %v5016_v21 = vpack.c.bf16 %v897_v39, %v889_v37  ;;  %v992_v35 = vld [vmem:[#allocation7 + $0x570] sm:$0xff]  ;;  %v1001_v37 = vld [vmem:[#allocation7 + $0x5b8] sm:$0xff] }
 0x2d5   :  { %v1009_v39 = vld [vmem:[#allocation7 + $0x5f8] sm:$0xff] }
 0x2d7   :  { %4991 = vmatpush1.bf16.msra.mxu0 %v4990_v48  ;;  %v5018_v48 = vpack.c.bf16 %v896_v44, %v888_v12  ;;  %v1008_v12 = vld [vmem:[#allocation7 + $0x5f0] sm:$0xff]  ;;  %v1017_v44 = vld [vmem:[#allocation7 + $0x638] sm:$0xff] }
 0x2d8   :  { %4993 = vmatprep.subr.bf16.mxu0 %v4992_v10  ;;  %v5020_v10 = vpack.c.bf16 %v913_v52, %v905_v47  ;;  %v1025_v47 = vld [vmem:[#allocation7 + $0x678] sm:$0xff] }
 0x2db   :  { %4995 = vmatpush1.bf16.msra.mxu0 %v4994_v38  ;;  %v5022_v38 = vpack.c.bf16 %v912_v55, %v904_v49  ;;  %v1024_v49 = vld [vmem:[#allocation7 + $0x670] sm:$0xff]  ;;  %v1033_v55 = vld [vmem:[#allocation7 + $0x6b8] sm:$0xff] }
 0x2dc   :  { %4997 = vmatprep.subr.bf16.mxu0 %v4996_v53  ;;  %v5024_v53 = vpack.c.bf16 %v929_v51, %v921_v50  ;;  %v1041_v50 = vld [vmem:[#allocation7 + $0x6f8] sm:$0xff] }
 0x2df   :  { %4999 = vmatpush1.bf16.msra.mxu0 %v4998_v36  ;;  %v5026_v36 = vpack.c.bf16 %v928_v31, %v920_v6  ;;  %v1040_v6 = vld [vmem:[#allocation7 + $0x6f0] sm:$0xff]  ;;  %v1049_v31 = vld [vmem:[#allocation7 + $0x738] sm:$0xff] }
 0x2e0   :  { %5001 = vmatprep.subr.bf16.mxu0 %v5000_v23  ;;  %v5028_v23 = vpack.c.bf16 %v945_v58, %v937_v56  ;;  %v1057_v56 = vld [vmem:[#allocation7 + $0x778] sm:$0xff] }
 0x2e2   :  { %1407 = vmatmul.mubr.f32.vlgmr.msra.gmra.mrb[64].mxu0 %v7807_v61 }
 0x2e3   :  { %1412 = vmatprep.mubr.f32.mxu0 %v7813_v7  ;;  %5003 = vmatpush1.bf16.msra.mxu0 %v5002_v4  ;;  %v5030_v4 = vpack.c.bf16 %v944_v1, %v936_v62  ;;  %v1056_v62 = vld [vmem:[#allocation7 + $0x770] sm:$0xff]  ;;  %v1065_v1 = vld [vmem:[#allocation7 + $0x7b8] sm:$0xff] }
 0x2e4   :  { %5005 = vmatprep.subr.bf16.mxu0 %v5004_v5  ;;  %v5032_v5 = vpack.c.bf16 %v961_v26, %v953_v3  ;;  %v1073_v3 = vld [vmem:[#allocation7 + $0x7f8] sm:$0xff] }
 0x2e6   :  { %1413 = vmatmul.mubr.f32.gmra.mrb[66].mxu0 %v7815_v59 }
 0x2e7   :  { %1418 = vmatprep.mubr.f32.mxu0 %v7821_v27  ;;  %5007 = vmatpush1.bf16.msra.mxu0 %v5006_v41  ;;  %v5034_v41 = vpack.c.bf16 %v960_v11, %v952_v9  ;;  %v1072_v9 = vld [vmem:[#allocation7 + $0x7f0] sm:$0xff]  ;;  %v1644_v11 = vld [vmem:[#allocation8 + $0x8] sm:$0xff] }
 0x2e8   :  { %5009 = vmatprep.subr.bf16.mxu0 %v5008_v63  ;;  %v5036_v63 = vpack.c.bf16 %v977_v14, %v969_v13  ;;  %v1652_v13 = vld [vmem:[#allocation8 + $0x48] sm:$0xff] }
 0x2ea   :  { %1419 = vmatmul.mubr.f32.gmra.mrb[68].mxu0 %v7823_v33 }
 0x2eb   :  { %1424 = vmatprep.mubr.f32.mxu0 %v7829_v42  ;;  %5011 = vmatpush1.bf16.msra.mxu0 %v5010_v57  ;;  %v5038_v57 = vpack.c.bf16 %v976_v24, %v968_v20  ;;  %v1651_v20 = vld [vmem:[#allocation8 + $0x40] sm:$0xff]  ;;  %v1660_v24 = vld [vmem:[#allocation8 + $0x88] sm:$0xff] }
 0x2ec   :  { %5013 = vmatprep.subr.bf16.mxu0 %v5012_v15  ;;  %v5040_v15 = vpack.c.bf16 %v993_v32, %v985_v29  ;;  %v1668_v29 = vld [vmem:[#allocation8 + $0xc8] sm:$0xff] }
 0x2ee   :  { %1425 = vmatmul.mubr.f32.gmra.mrb[70].mxu0 %v7831_v28 }
 0x2ef   :  { %1430 = vmatprep.mubr.f32.mxu0 %v7837_v45  ;;  %5015 = vmatpush1.bf16.msra.mxu0 %v5014_v40  ;;  %v5042_v40 = vpack.c.bf16 %v992_v35, %v984_v34  ;;  %v1667_v34 = vld [vmem:[#allocation8 + $0xc0] sm:$0xff]  ;;  %v1676_v35 = vld [vmem:[#allocation8 + $0x108] sm:$0xff] }
 0x2f0   :  { %5017 = vmatprep.subr.bf16.mxu0 %v5016_v21  ;;  %v5044_v21 = vpack.c.bf16 %v1009_v39, %v1001_v37  ;;  %v1684_v37 = vld [vmem:[#allocation8 + $0x148] sm:$0xff] }
 0x2f2   :  { %1431 = vmatmul.mubr.f32.gmra.mrb[72].mxu0 %v7839_v54 }
 0x2f3   :  { %1436 = vmatprep.mubr.f32.mxu0 %v7845_v2  ;;  %5019 = vmatpush1.bf16.msra.mxu0 %v5018_v48  ;;  %v5048_v48 = vpack.c.bf16 %v1025_v47, %v1017_v44  ;;  %v1700_v44 = vld [vmem:[#allocation8 + $0x1c8] sm:$0xff]  ;;  %v1691_v47 = vld [vmem:[#allocation8 + $0x180] sm:$0xff] }
 0x2f4   :  { %5021 = vmatprep.subr.bf16.mxu0 %v5020_v10  ;;  %v1016_v10 = vld [vmem:[#allocation7 + $0x630] sm:$0xff] }
 0x2f5   :  { %v5050_v51 = vpack.c.bf16 %v1024_v49, %v1016_v10  ;;  %v1716_v10 = vld [vmem:[#allocation8 + $0x248] sm:$0xff]  ;;  %v1707_v49 = vld [vmem:[#allocation8 + $0x200] sm:$0xff] }
 0x2f6   :  { %1437 = vmatmul.mubr.f32.gmra.mrb[74].mxu0 %v7847_v46 }
 0x2f7   :  { %1442 = vmatprep.mubr.f32.mxu0 %v7853_v22  ;;  %5023 = vmatpush1.bf16.msra.mxu0 %v5022_v38  ;;  %v5052_v38 = vpack.c.bf16 %v1041_v50, %v1033_v55  ;;  %v1715_v55 = vld [vmem:[#allocation8 + $0x240] sm:$0xff]  ;;  %v1724_v50 = vld [vmem:[#allocation8 + $0x288] sm:$0xff] }
 0x2f8   :  { %5025 = vmatprep.subr.bf16.mxu0 %v5024_v53  ;;  %v1032_v53 = vld [vmem:[#allocation7 + $0x6b0] sm:$0xff] }
 0x2f9   :  { %v5054_v58 = vpack.c.bf16 %v1040_v6, %v1032_v53  ;;  %v1731_v53 = vld [vmem:[#allocation8 + $0x2c0] sm:$0xff]  ;;  %v1740_v6 = vld [vmem:[#allocation8 + $0x308] sm:$0xff] }
 0x2fa   :  { %1443 = vmatmul.mubr.f32.gmra.mrb[76].mxu0 %v7855_v25 }
 0x2fb   :  { %1448 = vmatprep.mubr.f32.mxu0 %v7861_v18  ;;  %5027 = vmatpush1.bf16.msra.mxu0 %v5026_v36  ;;  %v5056_v36 = vpack.c.bf16 %v1057_v56, %v1049_v31  ;;  %v1748_v31 = vld [vmem:[#allocation8 + $0x348] sm:$0xff]  ;;  %v1739_v56 = vld [vmem:[#allocation8 + $0x300] sm:$0xff] }
 0x2fc   :  { %5029 = vmatprep.subr.bf16.mxu0 %v5028_v23  ;;  %v1048_v23 = vld [vmem:[#allocation7 + $0x730] sm:$0xff] }
 0x2fd   :  { %v5058_v26 = vpack.c.bf16 %v1056_v62, %v1048_v23  ;;  %v1764_v23 = vld [vmem:[#allocation8 + $0x3c8] sm:$0xff]  ;;  %v1755_v62 = vld [vmem:[#allocation8 + $0x380] sm:$0xff] }
 0x2fe   :  { %1449 = vmatmul.mubr.f32.gmra.mrb[78].mxu0 %v7863_v43 }
 0x2ff   :  { %5031 = vmatpush1.bf16.msra.mxu0 %v5030_v4  ;;  %1519 = vmatprep.mubr.f32.mxu0 %v7805_v60  ;;  %v1000_v60 = vld [vmem:[#allocation7 + $0x5b0] sm:$0xff]  ;;  %v5060_v4 = vpack.c.bf16 %v1073_v3, %v1065_v1  ;;  %v1763_v1 = vld [vmem:[#allocation8 + $0x3c0] sm:$0xff]  ;;  %v1772_v3 = vld [vmem:[#allocation8 + $0x408] sm:$0xff] }
 0x300   :  { %5033 = vmatprep.subr.bf16.mxu0 %v5032_v5  ;;  %v5046_v52 = vpack.c.bf16 %v1008_v12, %v1000_v60  ;;  %v1064_v5 = vld [vmem:[#allocation7 + $0x7b0] sm:$0xff]  ;;  %v1683_v60 = vld [vmem:[#allocation8 + $0x140] sm:$0xff]  ;;  %v1692_v12 = vld [vmem:[#allocation8 + $0x188] sm:$0xff] }
 0x301   :  { %v5062_v14 = vpack.c.bf16 %v1072_v9, %v1064_v5  ;;  %v1779_v5 = vld [vmem:[#allocation8 + $0x440] sm:$0xff] }
 0x303   :  { %5035 = vmatpush1.bf16.msra.mxu0 %v5034_v41  ;;  %v7900_v41 = vpack.c.bf16 %v1652_v13, %v1644_v11  ;;  %v1788_v11 = vld [vmem:[#allocation8 + $0x488] sm:$0xff] }
 0x304   :  { %5037 = vmatprep.subr.bf16.mxu0 %v5036_v63  ;;  %v1643_v63 = vld [vmem:[#allocation8] sm:$0xff]  ;;  %v1796_v13 = vld [vmem:[#allocation8 + $0x4c8] sm:$0xff] }
 0x305   :  { %9870 = vst [vmem:[#allocation16_spill] sm:$0xff] %v7900_v41  ;;  %v7902_v32 = vpack.c.bf16 %v1651_v20, %v1643_v63  ;;  %v1787_v63 = vld [vmem:[#allocation8 + $0x480] sm:$0xff] }
 0x306   :  { %v1795_v20 = vld [vmem:[#allocation8 + $0x4c0] sm:$0xff] }
 0x307   :  { %5039 = vmatpush1.bf16.msra.mxu0 %v5038_v57  ;;  %9871 = vst [vmem:[#allocation17_spill] sm:$0xff] %v7902_v32  ;;  %v7905_v57 = vpack.c.bf16 %v1668_v29, %v1660_v24  ;;  %v1804_v29 = vld [vmem:[#allocation8 + $0x508] sm:$0xff] }
 0x308   :  { %5041 = vmatprep.subr.bf16.mxu0 %v5040_v15  ;;  %v1659_v15 = vld [vmem:[#allocation8 + $0x80] sm:$0xff] }
 0x309   :  { %9872 = vst [vmem:[#allocation18_spill] sm:$0xff] %v7905_v57  ;;  %v7910_v39 = vpack.c.bf16 %v1667_v34, %v1659_v15  ;;  %v1812_v15 = vld [vmem:[#allocation8 + $0x548] sm:$0xff] }
 0x30b   :  { %5043 = vmatpush1.bf16.msra.mxu0 %v5042_v40  ;;  %9873 = vst [vmem:[#allocation19_spill] sm:$0xff] %v7910_v39  ;;  %v7913_v40 = vpack.c.bf16 %v1684_v37, %v1676_v35  ;;  %v7983_v35 = vpack.c.bf16 %v1812_v15, %v1804_v29  ;;  %v1803_v37 = vld [vmem:[#allocation8 + $0x500] sm:$0xff] }
 0x30c   :  { %5045 = vmatprep.subr.bf16.mxu0 %v5044_v21  ;;  %v1675_v21 = vld [vmem:[#allocation8 + $0x100] sm:$0xff] }
 0x30d   :  { %9874 = vst [vmem:[#allocation20_spill] sm:$0xff] %v7913_v40  ;;  %9894 = vst [vmem:[#allocation40_spill] sm:$0xff] %v7983_v35  ;;  %v1867_v15 = vld [vmem:[#allocation8 + $0x700] sm:$0xff] }
 0x30f   :  { %5047 = vmatpush1.bf16.msra.mxu0 %v5046_v52  ;;  %v1699_v52 = vld [vmem:[#allocation8 + $0x1c0] sm:$0xff] }
 0x310   :  { %5049 = vmatprep.subr.bf16.mxu0 %v5048_v48  ;;  %v1708_v48 = vld [vmem:[#allocation8 + $0x208] sm:$0xff] }
 0x313   :  { %5051 = vmatpush1.bf16.msra.mxu0 %v5050_v51  ;;  %v1732_v51 = vld [vmem:[#allocation8 + $0x2c8] sm:$0xff] }
 0x314   :  { %5053 = vmatprep.subr.bf16.mxu0 %v5052_v38  ;;  %v1723_v38 = vld [vmem:[#allocation8 + $0x280] sm:$0xff] }
 0x317   :  { %5055 = vmatpush1.bf16.msra.mxu0 %v5054_v58  ;;  %v1747_v58 = vld [vmem:[#allocation8 + $0x340] sm:$0xff] }
 0x318   :  { %5057 = vmatprep.subr.bf16.mxu0 %v5056_v36  ;;  %v1756_v36 = vld [vmem:[#allocation8 + $0x388] sm:$0xff] }
 0x31b   :  { %5059 = vmatpush1.bf16.msra.mxu0 %v5058_v26  ;;  %v1780_v26 = vld [vmem:[#allocation8 + $0x448] sm:$0xff] }
 0x31c   :  { %5061 = vmatprep.subr.bf16.mxu0 %v5060_v4  ;;  %v1771_v4 = vld [vmem:[#allocation8 + $0x400] sm:$0xff] }
 0x31f   :  { %5063 = vmatpush1.bf16.msra.mxu0 %v5062_v14 }
 0x320   :  { %5065 = vmatprep.subr.bf16.mxu0 %v7900_v41 }
 0x322   :  { %1520 = vmatmul.mubr.f32.vlgmr.msra.gmra.mrb[80].mxu0 %v7807_v61  ;;  %v7918_v61 = vpack.c.bf16 %v1683_v60, %v1675_v21  ;;  %v1811_v21 = vld [vmem:[#allocation8 + $0x540] sm:$0xff] }
 0x323   :  { %1525 = vmatprep.mubr.f32.mxu0 %v7813_v7  ;;  %5067 = vmatpush1.bf16.msra.mxu0 %v7902_v32  ;;  %v7921_v7 = vpack.c.bf16 %v1700_v44, %v1692_v12  ;;  %v1820_v12 = vld [vmem:[#allocation8 + $0x588] sm:$0xff] }
 0x324   :  { %5069 = vmatprep.subr.bf16.mxu0 %v7905_v57  ;;  %9875 = vst [vmem:[#allocation21_spill] sm:$0xff] %v7918_v61  ;;  %v1828_v44 = vld [vmem:[#allocation8 + $0x5c8] sm:$0xff] }
 0x325   :  { %9876 = vst [vmem:[#allocation22_spill] sm:$0xff] %v7921_v7 }
 0x326   :  { %1526 = vmatmul.mubr.f32.gmra.mrb[82].mxu0 %v7815_v59  ;;  %v7926_v59 = vpack.c.bf16 %v1699_v52, %v1691_v47  ;;  %v7990_v52 = vpack.c.bf16 %v1811_v21, %v1803_v37  ;;  %v1875_v37 = vld [vmem:[#allocation8 + $0x740] sm:$0xff]  ;;  %v1884_v21 = vld [vmem:[#allocation8 + $0x788] sm:$0xff] }
 0x327   :  { %1531 = vmatprep.mubr.f32.mxu0 %v7821_v27  ;;  %5071 = vmatpush1.bf16.msra.mxu0 %v7910_v39  ;;  %v7929_v27 = vpack.c.bf16 %v1716_v10, %v1708_v48  ;;  %v7993_v48 = vpack.c.bf16 %v1828_v44, %v1820_v12  ;;  %v1819_v10 = vld [vmem:[#allocation8 + $0x580] sm:$0xff]  ;;  %v1892_v12 = vld [vmem:[#allocation8 + $0x7c8] sm:$0xff]  ;;  %v8026_v44 = vpack.c.bf16 %v1875_v37, %v1867_v15  ;;  %v1661_v15 = vld [vmem:[#allocation8 + $0x90] sm:$0xff] }
 0x328   :  { %5073 = vmatprep.subr.bf16.mxu0 %v7913_v40  ;;  %9877 = vst [vmem:[#allocation23_spill] sm:$0xff] %v7926_v59  ;;  %9897 = vst [vmem:[#allocation43_spill] sm:$0xff] %v7990_v52  ;;  %v1650_v37 = vld [vmem:[#allocation8 + $0x38] sm:$0xff] }
 0x329   :  { %9878 = vst [vmem:[#allocation24_spill] sm:$0xff] %v7929_v27  ;;  %9898 = vst [vmem:[#allocation44_spill] sm:$0xff] %v7993_v48 }
 0x32a   :  { %1532 = vmatmul.mubr.f32.gmra.mrb[84].mxu0 %v7823_v33  ;;  %v7934_v33 = vpack.c.bf16 %v1715_v55, %v1707_v49  ;;  %v1827_v49 = vld [vmem:[#allocation8 + $0x5c0] sm:$0xff]  ;;  %9911 = vst [vmem:[#allocation57_spill] sm:$0xff] %v8026_v44 }
 0x32b   :  { %1537 = vmatprep.mubr.f32.mxu0 %v7829_v42  ;;  %5075 = vmatpush1.bf16.msra.mxu0 %v7918_v61  ;;  %v7937_v42 = vpack.c.bf16 %v1732_v51, %v1724_v50  ;;  %v1836_v50 = vld [vmem:[#allocation8 + $0x608] sm:$0xff] }
 0x32c   :  { %5077 = vmatprep.subr.bf16.mxu0 %v7921_v7  ;;  %9879 = vst [vmem:[#allocation25_spill] sm:$0xff] %v7934_v33  ;;  %v1844_v51 = vld [vmem:[#allocation8 + $0x648] sm:$0xff] }
 0x32d   :  { %9880 = vst [vmem:[#allocation26_spill] sm:$0xff] %v7937_v42 }
 0x32e   :  { %1538 = vmatmul.mubr.f32.gmra.mrb[86].mxu0 %v7831_v28  ;;  %v7942_v28 = vpack.c.bf16 %v1731_v53, %v1723_v38  ;;  %v8000_v53 = vpack.c.bf16 %v1827_v49, %v1819_v10  ;;  %v8029_v10 = vpack.c.bf16 %v1892_v12, %v1884_v21  ;;  %v1883_v49 = vld [vmem:[#allocation8 + $0x780] sm:$0xff]  ;;  %v1658_v21 = vld [vmem:[#allocation8 + $0x78] sm:$0xff] }
 0x32f   :  { %1543 = vmatprep.mubr.f32.mxu0 %v7837_v45  ;;  %5079 = vmatpush1.bf16.msra.mxu0 %v7926_v59  ;;  %v7945_v45 = vpack.c.bf16 %v1748_v31, %v1740_v6  ;;  %v8003_v6 = vpack.c.bf16 %v1844_v51, %v1836_v50  ;;  %v1835_v31 = vld [vmem:[#allocation8 + $0x600] sm:$0xff]  ;;  %v1646_v51 = vld [vmem:[#allocation8 + $0x18] sm:$0xff] }
 0x330   :  { %5081 = vmatprep.subr.bf16.mxu0 %v7929_v27  ;;  %9881 = vst [vmem:[#allocation27_spill] sm:$0xff] %v7942_v28  ;;  %9901 = vst [vmem:[#allocation47_spill] sm:$0xff] %v8000_v53  ;;  %v1891_v50 = vld [vmem:[#allocation8 + $0x7c0] sm:$0xff] }
 0x331   :  { %9882 = vst [vmem:[#allocation28_spill] sm:$0xff] %v7945_v45  ;;  %9902 = vst [vmem:[#allocation48_spill] sm:$0xff] %v8003_v6 }
 0x332   :  { %1544 = vmatmul.mubr.f32.gmra.mrb[88].mxu0 %v7839_v54  ;;  %v7950_v54 = vpack.c.bf16 %v1747_v58, %v1739_v56  ;;  %v1843_v56 = vld [vmem:[#allocation8 + $0x640] sm:$0xff]  ;;  %9912 = vst [vmem:[#allocation58_spill] sm:$0xff] %v8029_v10 }
 0x333   :  { %1549 = vmatprep.mubr.f32.mxu0 %v7845_v2  ;;  %5083 = vmatpush1.bf16.msra.mxu0 %v7934_v33  ;;  %v7953_v2 = vpack.c.bf16 %v1764_v23, %v1756_v36  ;;  %v1852_v36 = vld [vmem:[#allocation8 + $0x688] sm:$0xff] }
 0x334   :  { %5085 = vmatprep.subr.bf16.mxu0 %v7937_v42  ;;  %9883 = vst [vmem:[#allocation29_spill] sm:$0xff] %v7950_v54  ;;  %v1860_v23 = vld [vmem:[#allocation8 + $0x6c8] sm:$0xff] }
 0x335   :  { %9884 = vst [vmem:[#allocation30_spill] sm:$0xff] %v7953_v2 }
 0x336   :  { %1550 = vmatmul.mubr.f32.gmra.mrb[90].mxu0 %v7847_v46  ;;  %v7958_v46 = vpack.c.bf16 %v1763_v1, %v1755_v62  ;;  %v8010_v1 = vpack.c.bf16 %v1843_v56, %v1835_v31  ;;  %v1654_v31 = vld [vmem:[#allocation8 + $0x58] sm:$0xff]  ;;  %v8032_v56 = vpack.c.bf16 %v1891_v50, %v1883_v49  ;;  %v1669_v49 = vld [vmem:[#allocation8 + $0xd0] sm:$0xff]  ;;  %v8043_v50 = vpack.c.bf16 %v1658_v21, %v1650_v37 }
 0x337   :  { %1555 = vmatprep.mubr.f32.mxu0 %v7853_v22  ;;  %5087 = vmatpush1.bf16.msra.mxu0 %v7942_v28  ;;  %v7961_v22 = vpack.c.bf16 %v1780_v26, %v1772_v3  ;;  %v8013_v3 = vpack.c.bf16 %v1860_v23, %v1852_v36  ;;  %v1851_v26 = vld [vmem:[#allocation8 + $0x680] sm:$0xff]  ;;  %v8035_v36 = vpack.c.bf16 %v1654_v31, %v1646_v51  ;;  %v1645_v23 = vld [vmem:[#allocation8 + $0x10] sm:$0xff] }
 0x338   :  { %5089 = vmatprep.subr.bf16.mxu0 %v7945_v45  ;;  %9885 = vst [vmem:[#allocation31_spill] sm:$0xff] %v7958_v46  ;;  %9905 = vst [vmem:[#allocation51_spill] sm:$0xff] %v8010_v1  ;;  %v1649_v51 = vld [vmem:[#allocation8 + $0x30] sm:$0xff]  ;;  %5513 = vmatprep.subr.bf16.mxu1 %v8043_v50  ;;  %v8054_v37 = vpack.c.bf16 %v1686_v8, %v1678_v30  ;;  %v1682_v30 = vld [vmem:[#allocation8 + $0x138] sm:$0xff] }
 0x339   :  { %9886 = vst [vmem:[#allocation32_spill] sm:$0xff] %v7961_v22  ;;  %9906 = vst [vmem:[#allocation52_spill] sm:$0xff] %v8013_v3  ;;  %v1657_v31 = vld [vmem:[#allocation8 + $0x70] sm:$0xff]  ;;  %v1690_v8 = vld [vmem:[#allocation8 + $0x178] sm:$0xff] }
 0x33a   :  { %1556 = vmatmul.mubr.f32.gmra.mrb[92].mxu0 %v7855_v25  ;;  %v7969_v25 = vpack.c.bf16 %v1779_v5, %v1771_v4  ;;  %v1859_v4 = vld [vmem:[#allocation8 + $0x6c0] sm:$0xff]  ;;  %9913 = vst [vmem:[#allocation59_spill] sm:$0xff] %v8032_v56  ;;  %9914 = vst [vmem:[#allocation60_spill] sm:$0xff] %v8035_v36  ;;  %v1685_v21 = vld [vmem:[#allocation8 + $0x150] sm:$0xff] }
 0x33b   :  { %1561 = vmatprep.mubr.f32.mxu0 %v7861_v18  ;;  %5091 = vmatpush1.bf16.msra.mxu0 %v7950_v54  ;;  %v7973_v18 = vpack.c.bf16 %v1796_v13, %v1788_v11  ;;  %v1868_v11 = vld [vmem:[#allocation8 + $0x708] sm:$0xff]  ;;  %9917 = vst [vmem:[#allocation63_spill] sm:$0xff] %v8043_v50  ;;  %9920 = vst [vmem:[#allocation66_spill] sm:$0xff] %v8054_v37 }
 0x33c   :  { %5093 = vmatprep.subr.bf16.mxu0 %v7953_v2  ;;  %9889 = vst [vmem:[#allocation35_spill] sm:$0xff] %v7969_v25  ;;  %v1876_v13 = vld [vmem:[#allocation8 + $0x748] sm:$0xff] }
 0x33d   :  { %v7963_v9 = vpop.f32.mrb[36].mxu0  ;;  %9890 = vst [vmem:[#allocation36_spill] sm:$0xff] %v7973_v18  ;;  %v8023_v29 = vpack.c.bf16 %v1876_v13, %v1868_v11  ;;  %v1670_v11 = vld [vmem:[#allocation8 + $0xd8] sm:$0xff] }
 0x33e   :  { %9887 = vst [vmem:[#allocation33_spill] sm:$0xff] %v7963_v9  ;;  %1562 = vmatmul.mubr.f32.gmra.mrb[94].mxu0 %v7863_v43  ;;  %v7966_v14 = vpop.f32.mrb[37].mxu0  ;;  %v7980_v43 = vpack.c.bf16 %v1795_v20, %v1787_v63  ;;  %v8020_v20 = vpack.c.bf16 %v1859_v4, %v1851_v26  ;;  %v1653_v26 = vld [vmem:[#allocation8 + $0x50] sm:$0xff]  ;;  %v1662_v4 = vld [vmem:[#allocation8 + $0x98] sm:$0xff] }
 0x33f   :  { %9888 = vst [vmem:[#allocation34_spill] sm:$0xff] %v7966_v14  ;;  %5095 = vmatpush1.bf16.msra.mxu0 %v7958_v46  ;;  %1963 = vmatprep.mubr.f32.mxu0 %v9561_v0  ;;  %9910 = vst [vmem:[#allocation56_spill] sm:$0xff] %v8023_v29  ;;  %v8038_v13 = vpack.c.bf16 %v1653_v26, %v1645_v23  ;;  %v8041_v12 = vpack.c.bf16 %v1670_v11, %v1662_v4  ;;  %v1677_v26 = vld [vmem:[#allocation8 + $0x110] sm:$0xff]  ;;  %v1666_v4 = vld [vmem:[#allocation8 + $0xb8] sm:$0xff] }
 0x340   :  { %5097 = vmatprep.subr.bf16.mxu0 %v7961_v22  ;;  %9893 = vst [vmem:[#allocation39_spill] sm:$0xff] %v7980_v43  ;;  %9909 = vst [vmem:[#allocation55_spill] sm:$0xff] %v8020_v20  ;;  %v8050_v23 = vpack.c.bf16 %v1669_v49, %v1661_v15  ;;  %v1674_v11 = vld [vmem:[#allocation8 + $0xf8] sm:$0xff]  ;;  %v8063_v49 = vpack.c.bf16 %v1685_v21, %v1677_v26  ;;  %v1709_v21 = vld [vmem:[#allocation8 + $0x210] sm:$0xff] }
 0x341   :  { %v7975_v24 = vpop.f32.mrb[38].mxu0  ;;  %9915 = vst [vmem:[#allocation61_spill] sm:$0xff] %v8038_v13  ;;  %9916 = vst [vmem:[#allocation62_spill] sm:$0xff] %v8041_v12  ;;  %v1705_v14 = vld [vmem:[#allocation8 + $0x1f0] sm:$0xff] }
 0x342   :  { %9891 = vst [vmem:[#allocation37_spill] sm:$0xff] %v7975_v24  ;;  %v7977_v34 = vpop.f32.mrb[39].mxu0  ;;  %9919 = vst [vmem:[#allocation65_spill] sm:$0xff] %v8050_v23  ;;  %v1697_v24 = vld [vmem:[#allocation8 + $0x1b0] sm:$0xff] }
 0x343   :  { %9892 = vst [vmem:[#allocation38_spill] sm:$0xff] %v7977_v34  ;;  %5099 = vmatpush1.bf16.msra.mxu0 %v7969_v25  ;;  %9923 = vst [vmem:[#allocation69_spill] sm:$0xff] %v8063_v49  ;;  %v8083_v9 = vpack.c.bf16 %v1705_v14, %v1697_v24  ;;  %v1742_v14 = vld [vmem:[#allocation8 + $0x318] sm:$0xff]  ;;  %v1897_v25 = vld [vmem:[#allocation8 + $0x7f0] sm:$0xff] }
 0x344   :  { %5101 = vmatprep.subr.bf16.mxu0 %v7973_v18  ;;  %v1750_v24 = vld [vmem:[#allocation8 + $0x358] sm:$0xff] }
 0x345   :  { %v7985_v60 = vpop.f32.mrb[40].mxu0  ;;  %9930 = vst [vmem:[#allocation76_spill] sm:$0xff] %v8083_v9 }
 0x346   :  { %9895 = vst [vmem:[#allocation41_spill] sm:$0xff] %v7985_v60  ;;  %v7987_v47 = vpop.f32.mrb[41].mxu0 }
 0x347   :  { %9896 = vst [vmem:[#allocation42_spill] sm:$0xff] %v7987_v47  ;;  %5103 = vmatpush1.bf16.msra.mxu0 %v7980_v43  ;;  %v1689_v47 = vld [vmem:[#allocation8 + $0x170] sm:$0xff] }
 0x348   :  { %5105 = vmatprep.subr.bf16.mxu0 %v7983_v35  ;;  %v1881_v43 = vld [vmem:[#allocation8 + $0x770] sm:$0xff] }
 0x349   :  { %v7995_v55 = vpop.f32.mrb[42].mxu0 }
 0x34a   :  { %9899 = vst [vmem:[#allocation45_spill] sm:$0xff] %v7995_v55  ;;  %v7997_v38 = vpop.f32.mrb[43].mxu0  ;;  %v1681_v55 = vld [vmem:[#allocation8 + $0x130] sm:$0xff] }
 0x34b   :  { %9900 = vst [vmem:[#allocation46_spill] sm:$0xff] %v7997_v38  ;;  %5107 = vmatpush1.bf16.msra.mxu0 %v7990_v52  ;;  %v8068_v38 = vpack.c.bf16 %v1690_v8, %v1682_v30  ;;  %v8071_v60 = vpack.c.bf16 %v1689_v47, %v1681_v55  ;;  %v1717_v8 = vld [vmem:[#allocation8 + $0x250] sm:$0xff]  ;;  %v1726_v47 = vld [vmem:[#allocation8 + $0x298] sm:$0xff] }
 0x34c   :  { %5109 = vmatprep.subr.bf16.mxu0 %v7993_v48  ;;  %v1734_v55 = vld [vmem:[#allocation8 + $0x2d8] sm:$0xff]  ;;  %v1857_v52 = vld [vmem:[#allocation8 + $0x6b0] sm:$0xff] }
 0x34d   :  { %v8005_v58 = vpop.f32.mrb[44].mxu0  ;;  %9925 = vst [vmem:[#allocation71_spill] sm:$0xff] %v8068_v38  ;;  %9926 = vst [vmem:[#allocation72_spill] sm:$0xff] %v8071_v60 }
 0x34e   :  { %9903 = vst [vmem:[#allocation49_spill] sm:$0xff] %v8005_v58  ;;  %v8007_v62 = vpop.f32.mrb[45].mxu0  ;;  %v1702_v58 = vld [vmem:[#allocation8 + $0x1d8] sm:$0xff] }
 0x34f   :  { %9904 = vst [vmem:[#allocation50_spill] sm:$0xff] %v8007_v62  ;;  %5111 = vmatpush1.bf16.msra.mxu0 %v8000_v53  ;;  %v1694_v62 = vld [vmem:[#allocation8 + $0x198] sm:$0xff]  ;;  %v1841_v53 = vld [vmem:[#allocation8 + $0x630] sm:$0xff] }
 0x350   :  { %5113 = vmatprep.subr.bf16.mxu0 %v8003_v6 }
 0x351   :  { %v8015_v5 = vpop.f32.mrb[46].mxu0 }
 0x352   :  { %9907 = vst [vmem:[#allocation53_spill] sm:$0xff] %v8015_v5  ;;  %v8017_v63 = vpop.f32.mrb[47].mxu0  ;;  %v8056_v5 = vpack.c.bf16 %v1674_v11, %v1666_v4  ;;  %v8066_v4 = vpack.c.bf16 %v1702_v58, %v1694_v62  ;;  %v1701_v11 = vld [vmem:[#allocation8 + $0x1d0] sm:$0xff]  ;;  %v1698_v58 = vld [vmem:[#allocation8 + $0x1b8] sm:$0xff] }
 0x353   :  { %9908 = vst [vmem:[#allocation54_spill] sm:$0xff] %v8017_v63  ;;  %5115 = vmatpush1.bf16.msra.mxu0 %v8010_v1  ;;  %v8046_v63 = vpack.c.bf16 %v1657_v31, %v1649_v51  ;;  %v1665_v51 = vld [vmem:[#allocation8 + $0xb0] sm:$0xff]  ;;  %v1706_v62 = vld [vmem:[#allocation8 + $0x1f8] sm:$0xff] }
 0x354   :  { %5117 = vmatprep.subr.bf16.mxu0 %v8013_v3  ;;  %9921 = vst [vmem:[#allocation67_spill] sm:$0xff] %v8056_v5  ;;  %v1673_v31 = vld [vmem:[#allocation8 + $0xf0] sm:$0xff]  ;;  %9924 = vst [vmem:[#allocation70_spill] sm:$0xff] %v8066_v4  ;;  %v8080_v34 = vpack.c.bf16 %v1706_v62, %v1698_v58  ;;  %v8090_v58 = vpack.c.bf16 %v1734_v55, %v1726_v47  ;;  %v1730_v47 = vld [vmem:[#allocation8 + $0x2b8] sm:$0xff] }
 0x355   :  { %9918 = vst [vmem:[#allocation64_spill] sm:$0xff] %v8046_v63  ;;  %5515 = vmatpush1.bf16.msra.mxu1 %v8046_v63  ;;  %v8059_v15 = vpack.c.bf16 %v1673_v31, %v1665_v51  ;;  %v1710_v51 = vld [vmem:[#allocation8 + $0x218] sm:$0xff]  ;;  %v1733_v62 = vld [vmem:[#allocation8 + $0x2d0] sm:$0xff] }
 0x356   :  { %5517 = vmatprep.subr.bf16.mxu1 %v8056_v5  ;;  %v1718_v31 = vld [vmem:[#allocation8 + $0x258] sm:$0xff]  ;;  %9929 = vst [vmem:[#allocation75_spill] sm:$0xff] %v8080_v34  ;;  %9932 = vst [vmem:[#allocation78_spill] sm:$0xff] %v8090_v58  ;;  %v1825_v1 = vld [vmem:[#allocation8 + $0x5b0] sm:$0xff] }
 0x357   :  { %5119 = vmatpush1.bf16.msra.mxu0 %v8020_v20  ;;  %9922 = vst [vmem:[#allocation68_spill] sm:$0xff] %v8059_v15  ;;  %v8078_v30 = vpack.c.bf16 %v1718_v31, %v1710_v51  ;;  %v1714_v51 = vld [vmem:[#allocation8 + $0x238] sm:$0xff]  ;;  %v1809_v20 = vld [vmem:[#allocation8 + $0x530] sm:$0xff] }
 0x358   :  { %5121 = vmatprep.subr.bf16.mxu0 %v8023_v29  ;;  %v1722_v31 = vld [vmem:[#allocation8 + $0x278] sm:$0xff] }
 0x359   :  { %5519 = vmatpush1.bf16.msra.mxu1 %v8059_v15  ;;  %9928 = vst [vmem:[#allocation74_spill] sm:$0xff] %v8078_v30  ;;  %v1738_v55 = vld [vmem:[#allocation8 + $0x2f8] sm:$0xff] }
 0x35a   :  { %5521 = vmatprep.subr.bf16.mxu1 %v8068_v38 }
 0x35b   :  { %5123 = vmatpush1.bf16.msra.mxu0 %v8026_v44  ;;  %v1793_v44 = vld [vmem:[#allocation8 + $0x4b0] sm:$0xff] }
 0x35c   :  { %5125 = vmatprep.subr.bf16.mxu0 %v8029_v10 }
 0x35d   :  { %5523 = vmatpush1.bf16.msra.mxu1 %v8071_v60 }
 0x35e   :  { %5525 = vmatprep.subr.bf16.mxu1 %v8080_v34 }
 0x35f   :  { %5127 = vmatpush1.bf16.msra.mxu0 %v8032_v56  ;;  %v1777_v56 = vld [vmem:[#allocation8 + $0x430] sm:$0xff] }
 0x360   :  { %5129 = vmatprep.subr.bf16.mxu0 %v8035_v36 }
 0x361   :  { %5527 = vmatpush1.bf16.msra.mxu1 %v8083_v9 }
 0x362   :  { %1964 = vmatmul.mubr.f32.vlgmr.msra.gmra.mrb[32].mxu0 %v9561_v0 }
 0x363   :  { %5131 = vmatpush1.bf16.msra.mxu0 %v8038_v13  ;;  %2034 = vmatprep.mubr.f32.mxu0 %v9561_v0  ;;  %v1693_v0 = vld [vmem:[#allocation8 + $0x190] sm:$0xff] }
 0x364   :  { %5133 = vmatprep.subr.bf16.mxu0 %v8041_v12  ;;  %v8075_v26 = vpack.c.bf16 %v1701_v11, %v1693_v0  ;;  %v8087_v0 = vpack.c.bf16 %v1717_v8, %v1709_v21  ;;  %v1725_v11 = vld [vmem:[#allocation8 + $0x290] sm:$0xff] }
 0x365   :  { %v8099_v21 = vpack.c.bf16 %v1733_v62, %v1725_v11  ;;  %v1741_v8 = vld [vmem:[#allocation8 + $0x310] sm:$0xff] }
 0x366   :  { %9927 = vst [vmem:[#allocation73_spill] sm:$0xff] %v8075_v26  ;;  %9931 = vst [vmem:[#allocation77_spill] sm:$0xff] %v8087_v0  ;;  %v1737_v12 = vld [vmem:[#allocation8 + $0x2f0] sm:$0xff] }
 0x367   :  { %5135 = vmatpush1.bf16.msra.mxu0 %v8050_v23  ;;  %9935 = vst [vmem:[#allocation81_spill] sm:$0xff] %v8099_v21  ;;  %v1757_v62 = vld [vmem:[#allocation8 + $0x390] sm:$0xff] }
 0x368   :  { %5137 = vmatprep.subr.bf16.mxu0 %v8054_v37  ;;  %v1721_v37 = vld [vmem:[#allocation8 + $0x270] sm:$0xff] }
 0x36b   :  { %5139 = vmatpush1.bf16.msra.mxu0 %v8063_v49  ;;  %v1713_v49 = vld [vmem:[#allocation8 + $0x230] sm:$0xff] }
 0x36c   :  { %5141 = vmatprep.subr.bf16.mxu0 %v8066_v4  ;;  %v8092_v4 = vpack.c.bf16 %v1722_v31, %v1714_v51  ;;  %v8095_v23 = vpack.c.bf16 %v1721_v37, %v1713_v49  ;;  %v8102_v51 = vpack.c.bf16 %v1750_v24, %v1742_v14  ;;  %v1749_v31 = vld [vmem:[#allocation8 + $0x350] sm:$0xff]  ;;  %v1758_v37 = vld [vmem:[#allocation8 + $0x398] sm:$0xff] }
 0x36d   :  { %v1766_v49 = vld [vmem:[#allocation8 + $0x3d8] sm:$0xff]  ;;  %v8111_v11 = vpack.c.bf16 %v1749_v31, %v1741_v8  ;;  %v1773_v31 = vld [vmem:[#allocation8 + $0x410] sm:$0xff] }
 0x36e   :  { %9933 = vst [vmem:[#allocation79_spill] sm:$0xff] %v8092_v4  ;;  %9934 = vst [vmem:[#allocation80_spill] sm:$0xff] %v8095_v23  ;;  %5529 = vmatprep.subr.bf16.mxu1 %v8092_v4  ;;  %v1746_v14 = vld [vmem:[#allocation8 + $0x338] sm:$0xff] }
 0x36f   :  { %5143 = vmatpush1.bf16.msra.mxu0 %v8075_v26  ;;  %9936 = vst [vmem:[#allocation82_spill] sm:$0xff] %v8102_v51  ;;  %v1729_v26 = vld [vmem:[#allocation8 + $0x2b0] sm:$0xff]  ;;  %5531 = vmatpush1.bf16.msra.mxu1 %v8095_v23  ;;  %9939 = vst [vmem:[#allocation85_spill] sm:$0xff] %v8111_v11  ;;  %v1754_v24 = vld [vmem:[#allocation8 + $0x378] sm:$0xff] }
 0x370   :  { %5145 = vmatprep.subr.bf16.mxu0 %v8078_v30  ;;  %v8104_v30 = vpack.c.bf16 %v1738_v55, %v1730_v47  ;;  %v8107_v13 = vpack.c.bf16 %v1737_v12, %v1729_v26  ;;  %v8114_v47 = vpack.c.bf16 %v1766_v49, %v1758_v37  ;;  %v1765_v55 = vld [vmem:[#allocation8 + $0x3d0] sm:$0xff]  ;;  %v1774_v12 = vld [vmem:[#allocation8 + $0x418] sm:$0xff] }
 0x371   :  { %v1782_v26 = vld [vmem:[#allocation8 + $0x458] sm:$0xff]  ;;  %v8123_v8 = vpack.c.bf16 %v1765_v55, %v1757_v62 }
 0x372   :  { %9937 = vst [vmem:[#allocation83_spill] sm:$0xff] %v8104_v30  ;;  %9938 = vst [vmem:[#allocation84_spill] sm:$0xff] %v8107_v13  ;;  %5533 = vmatprep.subr.bf16.mxu1 %v8104_v30  ;;  %v1762_v37 = vld [vmem:[#allocation8 + $0x3b8] sm:$0xff] }
 0x373   :  { %5147 = vmatpush1.bf16.msra.mxu0 %v8087_v0  ;;  %9940 = vst [vmem:[#allocation86_spill] sm:$0xff] %v8114_v47  ;;  %v1745_v0 = vld [vmem:[#allocation8 + $0x330] sm:$0xff]  ;;  %5535 = vmatpush1.bf16.msra.mxu1 %v8107_v13  ;;  %9943 = vst [vmem:[#allocation89_spill] sm:$0xff] %v8123_v8  ;;  %v1770_v49 = vld [vmem:[#allocation8 + $0x3f8] sm:$0xff] }
 0x374   :  { %5149 = vmatprep.subr.bf16.mxu0 %v8090_v58  ;;  %v8116_v58 = vpack.c.bf16 %v1754_v24, %v1746_v14  ;;  %v8119_v17 = vpack.c.bf16 %v1753_v19, %v1745_v0  ;;  %v8126_v14 = vpack.c.bf16 %v1782_v26, %v1774_v12  ;;  %v1781_v24 = vld [vmem:[#allocation8 + $0x450] sm:$0xff]  ;;  %v1790_v0 = vld [vmem:[#allocation8 + $0x498] sm:$0xff] }
 0x375   :  { %v8139_v12 = vpack.c.bf16 %v1781_v24, %v1773_v31  ;;  %v1789_v26 = vld [vmem:[#allocation8 + $0x490] sm:$0xff] }
 0x376   :  { %9941 = vst [vmem:[#allocation87_spill] sm:$0xff] %v8116_v58  ;;  %9942 = vst [vmem:[#allocation88_spill] sm:$0xff] %v8119_v17  ;;  %5537 = vmatprep.subr.bf16.mxu1 %v8116_v58 }
 0x377   :  { %5151 = vmatpush1.bf16.msra.mxu0 %v8099_v21  ;;  %9944 = vst [vmem:[#allocation90_spill] sm:$0xff] %v8126_v14  ;;  %v1761_v21 = vld [vmem:[#allocation8 + $0x3b0] sm:$0xff]  ;;  %5539 = vmatpush1.bf16.msra.mxu1 %v8119_v17  ;;  %9949 = vst [vmem:[#allocation95_spill] sm:$0xff] %v8139_v12 }
 0x378   :  { %5153 = vmatprep.subr.bf16.mxu0 %v8102_v51  ;;  %v8128_v51 = vpack.c.bf16 %v1770_v49, %v1762_v37  ;;  %v8135_v55 = vpack.c.bf16 %v1769_v16, %v1761_v21  ;;  %v1778_v37 = vld [vmem:[#allocation8 + $0x438] sm:$0xff] }
 0x379   :  { %v1786_v49 = vld [vmem:[#allocation8 + $0x478] sm:$0xff] }
 0x37a   :  { %9945 = vst [vmem:[#allocation91_spill] sm:$0xff] %v8128_v51  ;;  %9948 = vst [vmem:[#allocation94_spill] sm:$0xff] %v8135_v55  ;;  %5541 = vmatprep.subr.bf16.mxu1 %v8128_v51  ;;  %v8144_v36 = vpack.c.bf16 %v1786_v49, %v1778_v37  ;;  %v1806_v21 = vld [vmem:[#allocation8 + $0x518] sm:$0xff] }
 0x37b   :  { %5155 = vmatpush1.bf16.msra.mxu0 %v8111_v11  ;;  %v1798_v11 = vld [vmem:[#allocation8 + $0x4d8] sm:$0xff]  ;;  %5543 = vmatpush1.bf16.msra.mxu1 %v8135_v55 }
 0x37c   :  { %5157 = vmatprep.subr.bf16.mxu0 %v8114_v47  ;;  %v8142_v47 = vpack.c.bf16 %v1798_v11, %v1790_v0  ;;  %9951 = vst [vmem:[#allocation97_spill] sm:$0xff] %v8144_v36  ;;  %5545 = vmatprep.subr.bf16.mxu1 %v8144_v36  ;;  %v1805_v0 = vld [vmem:[#allocation8 + $0x510] sm:$0xff]  ;;  %v1794_v37 = vld [vmem:[#allocation8 + $0x4b8] sm:$0xff] }
 0x37d   :  { %v8131_v19 = vpop.f32.mrb[52].mxu0  ;;  %v1802_v49 = vld [vmem:[#allocation8 + $0x4f8] sm:$0xff] }
 0x37e   :  { %9946 = vst [vmem:[#allocation92_spill] sm:$0xff] %v8131_v19  ;;  %v8133_v62 = vpop.f32.mrb[53].mxu0  ;;  %9950 = vst [vmem:[#allocation96_spill] sm:$0xff] %v8142_v47  ;;  %v1797_v19 = vld [vmem:[#allocation8 + $0x4d0] sm:$0xff]  ;;  %v8160_v10 = vpack.c.bf16 %v1802_v49, %v1794_v37  ;;  %v1810_v37 = vld [vmem:[#allocation8 + $0x538] sm:$0xff] }
 0x37f   :  { %9947 = vst [vmem:[#allocation93_spill] sm:$0xff] %v8133_v62  ;;  %5159 = vmatpush1.bf16.msra.mxu0 %v8123_v8  ;;  %v1785_v62 = vld [vmem:[#allocation8 + $0x470] sm:$0xff]  ;;  %v1814_v8 = vld [vmem:[#allocation8 + $0x558] sm:$0xff]  ;;  %v8155_v11 = vpack.c.bf16 %v1797_v19, %v1789_v26 }
 0x380   :  { %5161 = vmatprep.subr.bf16.mxu0 %v8126_v14  ;;  %v8151_v24 = vpack.c.bf16 %v1785_v62, %v1777_v56  ;;  %v8158_v14 = vpack.c.bf16 %v1814_v8, %v1806_v21  ;;  %9957 = vst [vmem:[#allocation103_spill] sm:$0xff] %v8160_v10  ;;  %v1822_v62 = vld [vmem:[#allocation8 + $0x598] sm:$0xff]  ;;  %v1821_v21 = vld [vmem:[#allocation8 + $0x590] sm:$0xff] }
 0x381   :  { %v8147_v16 = vpop.f32.mrb[54].mxu0  ;;  %9955 = vst [vmem:[#allocation101_spill] sm:$0xff] %v8155_v11  ;;  %v1818_v49 = vld [vmem:[#allocation8 + $0x578] sm:$0xff] }
 0x382   :  { %9952 = vst [vmem:[#allocation98_spill] sm:$0xff] %v8147_v16  ;;  %v8149_v31 = vpop.f32.mrb[55].mxu0  ;;  %9954 = vst [vmem:[#allocation100_spill] sm:$0xff] %v8151_v24  ;;  %v1813_v16 = vld [vmem:[#allocation8 + $0x550] sm:$0xff]  ;;  %5547 = vmatpush1.bf16.msra.mxu1 %v8151_v24  ;;  %v8176_v29 = vpack.c.bf16 %v1818_v49, %v1810_v37  ;;  %v1826_v37 = vld [vmem:[#allocation8 + $0x5b8] sm:$0xff] }
 0x383   :  { %9953 = vst [vmem:[#allocation99_spill] sm:$0xff] %v8149_v31  ;;  %5163 = vmatpush1.bf16.msra.mxu0 %v8139_v12  ;;  %9956 = vst [vmem:[#allocation102_spill] sm:$0xff] %v8158_v14  ;;  %v1801_v31 = vld [vmem:[#allocation8 + $0x4f0] sm:$0xff]  ;;  %v1830_v12 = vld [vmem:[#allocation8 + $0x5d8] sm:$0xff]  ;;  %5549 = vmatprep.subr.bf16.mxu1 %v8160_v10  ;;  %v8171_v8 = vpack.c.bf16 %v1813_v16, %v1805_v0 }
 0x384   :  { %5165 = vmatprep.subr.bf16.mxu0 %v8142_v47  ;;  %v8167_v26 = vpack.c.bf16 %v1801_v31, %v1793_v44  ;;  %v8174_v47 = vpack.c.bf16 %v1830_v12, %v1822_v62  ;;  %9963 = vst [vmem:[#allocation109_spill] sm:$0xff] %v8176_v29  ;;  %v1838_v31 = vld [vmem:[#allocation8 + $0x618] sm:$0xff]  ;;  %v1837_v62 = vld [vmem:[#allocation8 + $0x610] sm:$0xff] }
 0x385   :  { %v8163_v56 = vpop.f32.mrb[56].mxu0  ;;  %9961 = vst [vmem:[#allocation107_spill] sm:$0xff] %v8171_v8  ;;  %v1834_v49 = vld [vmem:[#allocation8 + $0x5f8] sm:$0xff] }
 0x386   :  { %9958 = vst [vmem:[#allocation104_spill] sm:$0xff] %v8163_v56  ;;  %v8165_v19 = vpop.f32.mrb[57].mxu0  ;;  %9960 = vst [vmem:[#allocation106_spill] sm:$0xff] %v8167_v26  ;;  %v1829_v56 = vld [vmem:[#allocation8 + $0x5d0] sm:$0xff]  ;;  %5551 = vmatpush1.bf16.msra.mxu1 %v8167_v26  ;;  %v8192_v3 = vpack.c.bf16 %v1834_v49, %v1826_v37  ;;  %v1842_v37 = vld [vmem:[#allocation8 + $0x638] sm:$0xff] }
 0x387   :  { %9959 = vst [vmem:[#allocation105_spill] sm:$0xff] %v8165_v19  ;;  %5167 = vmatpush1.bf16.msra.mxu0 %v8155_v11  ;;  %9962 = vst [vmem:[#allocation108_spill] sm:$0xff] %v8174_v47  ;;  %v1817_v19 = vld [vmem:[#allocation8 + $0x570] sm:$0xff]  ;;  %v1846_v11 = vld [vmem:[#allocation8 + $0x658] sm:$0xff]  ;;  %5553 = vmatprep.subr.bf16.mxu1 %v8176_v29  ;;  %v8187_v12 = vpack.c.bf16 %v1829_v56, %v1821_v21 }
 0x388   :  { %5169 = vmatprep.subr.bf16.mxu0 %v8158_v14  ;;  %v8183_v0 = vpack.c.bf16 %v1817_v19, %v1809_v20  ;;  %v8190_v14 = vpack.c.bf16 %v1846_v11, %v1838_v31  ;;  %9969 = vst [vmem:[#allocation115_spill] sm:$0xff] %v8192_v3  ;;  %v1854_v19 = vld [vmem:[#allocation8 + $0x698] sm:$0xff]  ;;  %v1853_v31 = vld [vmem:[#allocation8 + $0x690] sm:$0xff] }
 0x389   :  { %v8179_v44 = vpop.f32.mrb[58].mxu0  ;;  %9967 = vst [vmem:[#allocation113_spill] sm:$0xff] %v8187_v12  ;;  %v1850_v49 = vld [vmem:[#allocation8 + $0x678] sm:$0xff] }
 0x38a   :  { %9964 = vst [vmem:[#allocation110_spill] sm:$0xff] %v8179_v44  ;;  %v8181_v16 = vpop.f32.mrb[59].mxu0  ;;  %9966 = vst [vmem:[#allocation112_spill] sm:$0xff] %v8183_v0  ;;  %v1845_v44 = vld [vmem:[#allocation8 + $0x650] sm:$0xff]  ;;  %5555 = vmatpush1.bf16.msra.mxu1 %v8183_v0  ;;  %v8208_v6 = vpack.c.bf16 %v1850_v49, %v1842_v37  ;;  %v1858_v37 = vld [vmem:[#allocation8 + $0x6b8] sm:$0xff] }
 0x38b   :  { %9965 = vst [vmem:[#allocation111_spill] sm:$0xff] %v8181_v16  ;;  %5171 = vmatpush1.bf16.msra.mxu0 %v8171_v8  ;;  %9968 = vst [vmem:[#allocation114_spill] sm:$0xff] %v8190_v14  ;;  %v1833_v16 = vld [vmem:[#allocation8 + $0x5f0] sm:$0xff]  ;;  %v1862_v8 = vld [vmem:[#allocation8 + $0x6d8] sm:$0xff]  ;;  %5557 = vmatprep.subr.bf16.mxu1 %v8192_v3  ;;  %v8203_v11 = vpack.c.bf16 %v1845_v44, %v1837_v62 }
 0x38c   :  { %5173 = vmatprep.subr.bf16.mxu0 %v8174_v47  ;;  %v8199_v21 = vpack.c.bf16 %v1833_v16, %v1825_v1  ;;  %v8206_v47 = vpack.c.bf16 %v1862_v8, %v1854_v19  ;;  %9975 = vst [vmem:[#allocation121_spill] sm:$0xff] %v8208_v6  ;;  %v1870_v16 = vld [vmem:[#allocation8 + $0x718] sm:$0xff]  ;;  %v1869_v19 = vld [vmem:[#allocation8 + $0x710] sm:$0xff] }
 0x38d   :  { %v8195_v20 = vpop.f32.mrb[60].mxu0  ;;  %9973 = vst [vmem:[#allocation119_spill] sm:$0xff] %v8203_v11  ;;  %v1866_v49 = vld [vmem:[#allocation8 + $0x6f8] sm:$0xff] }
 0x38e   :  { %9970 = vst [vmem:[#allocation116_spill] sm:$0xff] %v8195_v20  ;;  %v8197_v56 = vpop.f32.mrb[61].mxu0  ;;  %9972 = vst [vmem:[#allocation118_spill] sm:$0xff] %v8199_v21  ;;  %v1861_v20 = vld [vmem:[#allocation8 + $0x6d0] sm:$0xff]  ;;  %5559 = vmatpush1.bf16.msra.mxu1 %v8199_v21  ;;  %v8224_v48 = vpack.c.bf16 %v1866_v49, %v1858_v37 }
 0x38f   :  { %9971 = vst [vmem:[#allocation117_spill] sm:$0xff] %v8197_v56  ;;  %5175 = vmatpush1.bf16.msra.mxu0 %v8187_v12  ;;  %9974 = vst [vmem:[#allocation120_spill] sm:$0xff] %v8206_v47  ;;  %v1849_v56 = vld [vmem:[#allocation8 + $0x670] sm:$0xff]  ;;  %v1878_v12 = vld [vmem:[#allocation8 + $0x758] sm:$0xff]  ;;  %5561 = vmatprep.subr.bf16.mxu1 %v8208_v6  ;;  %v8219_v8 = vpack.c.bf16 %v1861_v20, %v1853_v31 }
 0x390   :  { %5177 = vmatprep.subr.bf16.mxu0 %v8190_v14  ;;  %v8215_v62 = vpack.c.bf16 %v1849_v56, %v1841_v53  ;;  %v8222_v14 = vpack.c.bf16 %v1878_v12, %v1870_v16  ;;  %9981 = vst [vmem:[#allocation127_spill] sm:$0xff] %v8224_v48  ;;  %v1886_v53 = vld [vmem:[#allocation8 + $0x798] sm:$0xff]  ;;  %v1885_v31 = vld [vmem:[#allocation8 + $0x790] sm:$0xff] }
 0x391   :  { %v8211_v1 = vpop.f32.mrb[62].mxu0  ;;  %9979 = vst [vmem:[#allocation125_spill] sm:$0xff] %v8219_v8  ;;  %v1894_v56 = vld [vmem:[#allocation8 + $0x7d8] sm:$0xff]  ;;  %v1893_v49 = vld [vmem:[#allocation8 + $0x7d0] sm:$0xff] }
 0x392   :  { %9976 = vst [vmem:[#allocation122_spill] sm:$0xff] %v8211_v1  ;;  %v8213_v44 = vpop.f32.mrb[63].mxu0  ;;  %9978 = vst [vmem:[#allocation124_spill] sm:$0xff] %v8215_v62  ;;  %v1877_v1 = vld [vmem:[#allocation8 + $0x750] sm:$0xff]  ;;  %5563 = vmatpush1.bf16.msra.mxu1 %v8215_v62  ;;  %v1874_v12 = vld [vmem:[#allocation8 + $0x738] sm:$0xff]  ;;  %v8234_v37 = vpack.c.bf16 %v1894_v56, %v1886_v53 }
 0x393   :  { %9977 = vst [vmem:[#allocation123_spill] sm:$0xff] %v8213_v44  ;;  %5179 = vmatpush1.bf16.msra.mxu0 %v8203_v11  ;;  %9980 = vst [vmem:[#allocation126_spill] sm:$0xff] %v8222_v14  ;;  %v1865_v44 = vld [vmem:[#allocation8 + $0x6f0] sm:$0xff]  ;;  %5565 = vmatprep.subr.bf16.mxu1 %v8224_v48  ;;  %v8231_v20 = vpack.c.bf16 %v1877_v1, %v1869_v19  ;;  %v1882_v16 = vld [vmem:[#allocation8 + $0x778] sm:$0xff]  ;;  %v8243_v1 = vpack.c.bf16 %v1893_v49, %v1885_v31 }
 0x394   :  { %5181 = vmatprep.subr.bf16.mxu0 %v8206_v47  ;;  %v8227_v35 = vpack.c.bf16 %v1865_v44, %v1857_v52  ;;  %9984 = vst [vmem:[#allocation130_spill] sm:$0xff] %v8234_v37  ;;  %v8236_v47 = vpack.c.bf16 %v1882_v16, %v1874_v12  ;;  %v1873_v11 = vld [vmem:[#allocation8 + $0x730] sm:$0xff]  ;;  %v1648_v52 = vld [vmem:[#allocation8 + $0x28] sm:$0xff]  ;;  %v1647_v19 = vld [vmem:[#allocation8 + $0x20] sm:$0xff] }
 0x395   :  { %9983 = vst [vmem:[#allocation129_spill] sm:$0xff] %v8231_v20  ;;  %v1656_v44 = vld [vmem:[#allocation8 + $0x68] sm:$0xff]  ;;  %v8239_v18 = vpack.c.bf16 %v1881_v43, %v1873_v11  ;;  %9987 = vst [vmem:[#allocation133_spill] sm:$0xff] %v8243_v1  ;;  %v1890_v53 = vld [vmem:[#allocation8 + $0x7b8] sm:$0xff] }
 0x396   :  { %9982 = vst [vmem:[#allocation128_spill] sm:$0xff] %v8227_v35  ;;  %9985 = vst [vmem:[#allocation131_spill] sm:$0xff] %v8236_v47  ;;  %5567 = vmatpush1.bf16.msra.mxu1 %v8227_v35  ;;  %v1898_v56 = vld [vmem:[#allocation8 + $0x7f8] sm:$0xff]  ;;  %v8246_v12 = vpack.c.bf16 %v1656_v44, %v1648_v52  ;;  %v1655_v16 = vld [vmem:[#allocation8 + $0x60] sm:$0xff] }
 0x397   :  { %5183 = vmatpush1.bf16.msra.mxu0 %v8219_v8  ;;  %9986 = vst [vmem:[#allocation132_spill] sm:$0xff] %v8239_v18  ;;  %5569 = vmatprep.subr.bf16.mxu1 %v8236_v47  ;;  %v1889_v8 = vld [vmem:[#allocation8 + $0x7b0] sm:$0xff]  ;;  %v1664_v43 = vld [vmem:[#allocation8 + $0xa8] sm:$0xff]  ;;  %v8255_v31 = vpack.c.bf16 %v1655_v16, %v1647_v19  ;;  %v1663_v52 = vld [vmem:[#allocation8 + $0xa0] sm:$0xff] }
 0x398   :  { %5185 = vmatprep.subr.bf16.mxu0 %v8222_v14  ;;  %9988 = vst [vmem:[#allocation134_spill] sm:$0xff] %v8246_v12  ;;  %v8248_v14 = vpack.c.bf16 %v1898_v56, %v1890_v53  ;;  %v1672_v11 = vld [vmem:[#allocation8 + $0xe8] sm:$0xff]  ;;  %v8251_v22 = vpack.c.bf16 %v1897_v25, %v1889_v8  ;;  %v1671_v44 = vld [vmem:[#allocation8 + $0xe0] sm:$0xff]  ;;  %v9993_v25 = vmov 0.0  }
 0x399   :  { %9991 = vst [vmem:[#allocation137_spill] sm:$0xff] %v8255_v31  ;;  %v8258_v49 = vpack.c.bf16 %v1672_v11, %v1664_v43  ;;  %v1680_v53 = vld [vmem:[#allocation8 + $0x128] sm:$0xff]  ;;  %v8264_v8 = vpack.c.bf16 %v1671_v44, %v1663_v52  ;;  %v1679_v16 = vld [vmem:[#allocation8 + $0x120] sm:$0xff] }
 0x39a   :  { %9989 = vst [vmem:[#allocation135_spill] sm:$0xff] %v8248_v14  ;;  %5571 = vmatpush1.bf16.msra.mxu1 %v8239_v18  ;;  %9990 = vst [vmem:[#allocation136_spill] sm:$0xff] %v8251_v22  ;;  %v1688_v56 = vld [vmem:[#allocation8 + $0x168] sm:$0xff]  ;;  %v1687_v43 = vld [vmem:[#allocation8 + $0x160] sm:$0xff] }
 0x39b   :  { %5187 = vmatpush1.bf16.msra.mxu0 %v8231_v20  ;;  %5573 = vmatprep.subr.bf16.mxu1 %v8248_v14  ;;  %9992 = vst [vmem:[#allocation138_spill] sm:$0xff] %v8258_v49  ;;  %9994 = vst [vmem:[#allocation139_spill] sm:$0xff] %v8264_v8  ;;  %v8268_v19 = vpack.c.bf16 %v1688_v56, %v1680_v53  ;;  %v1696_v11 = vld [vmem:[#allocation8 + $0x1a8] sm:$0xff]  ;;  %v1695_v52 = vld [vmem:[#allocation8 + $0x1a0] sm:$0xff] }
 0x39c   :  { %5189 = vmatprep.subr.bf16.mxu0 %v8234_v37  ;;  %v1703_v44 = vld [vmem:[#allocation8 + $0x1e0] sm:$0xff]  ;;  %v1720_v20 = vld [vmem:[#allocation8 + $0x268] sm:$0xff] }
 0x39d   :  { %9995 = vst [vmem:[#allocation140_spill] sm:$0xff] %v8268_v19  ;;  %v8277_v53 = vpack.c.bf16 %v1703_v44, %v1695_v52  ;;  %v1744_v52 = vld [vmem:[#allocation8 + $0x328] sm:$0xff] }
 0x39e   :  { %5575 = vmatpush1.bf16.msra.mxu1 %v8251_v22  ;;  %v1752_v44 = vld [vmem:[#allocation8 + $0x368] sm:$0xff] }
 0x39f   :  { %5191 = vmatpush1.bf16.msra.mxu0 %v8243_v1  ;;  %5577 = vmatprep.subr.bf16.mxu1 %v7900_v41  ;;  %v8271_v1 = vpack.c.bf16 %v1687_v43, %v1679_v16  ;;  %9998 = vst [vmem:[#allocation143_spill] sm:$0xff] %v8277_v53  ;;  %v1728_v16 = vld [vmem:[#allocation8 + $0x2a8] sm:$0xff] }
 0x3a0   :  { %5193 = vmatprep.subr.bf16.mxu0 %v8246_v12  ;;  %v1704_v12 = vld [vmem:[#allocation8 + $0x1e8] sm:$0xff] }
 0x3a1   :  { %9996 = vst [vmem:[#allocation141_spill] sm:$0xff] %v8271_v1  ;;  %v8274_v37 = vpack.c.bf16 %v1704_v12, %v1696_v11  ;;  %v1736_v43 = vld [vmem:[#allocation8 + $0x2e8] sm:$0xff] }
 0x3a2   :  { %2035 = vmatmul.mubr.f32.vlgmr.msra.gmra.mrb[48].mxu0 %v9993_v25  ;;  %v8286_v11 = vpack.c.bf16 %v1736_v43, %v1728_v16 }
 0x3a3   :  { %5195 = vmatpush1.bf16.msra.mxu0 %v8255_v31  ;;  %2105 = vmatprep.mubr.f32.mxu0 %v9993_v25  ;;  %9997 = vst [vmem:[#allocation142_spill] sm:$0xff] %v8274_v37  ;;  %v1712_v31 = vld [vmem:[#allocation8 + $0x228] sm:$0xff] }
 0x3a4   :  { %5197 = vmatprep.subr.bf16.mxu0 %v8258_v49  ;;  %v8280_v56 = vpack.c.bf16 %v1720_v20, %v1712_v31  ;;  %v1711_v49 = vld [vmem:[#allocation8 + $0x220] sm:$0xff]  ;;  %10001 = vst [vmem:[#allocation146_spill] sm:$0xff] %v8286_v11  ;;  %v8292_v31 = vpack.c.bf16 %v1752_v44, %v1744_v52 }
 0x3a6   :  { %9999 = vst [vmem:[#allocation144_spill] sm:$0xff] %v8280_v56  ;;  %10003 = vst [vmem:[#allocation148_spill] sm:$0xff] %v8292_v31 }
 0x3a7   :  { %5199 = vmatpush1.bf16.msra.mxu0 %v8264_v8  ;;  %v1719_v8 = vld [vmem:[#allocation8 + $0x260] sm:$0xff] }
 0x3a8   :  { %5201 = vmatprep.subr.bf16.mxu0 %v8268_v19  ;;  %v8283_v12 = vpack.c.bf16 %v1719_v8, %v1711_v49  ;;  %v1727_v19 = vld [vmem:[#allocation8 + $0x2a0] sm:$0xff]  ;;  %v1760_v49 = vld [vmem:[#allocation8 + $0x3a8] sm:$0xff] }
 0x3a9   :  { %v1768_v8 = vld [vmem:[#allocation8 + $0x3e8] sm:$0xff] }
 0x3aa   :  { %10000 = vst [vmem:[#allocation145_spill] sm:$0xff] %v8283_v12  ;;  %v8298_v43 = vpack.c.bf16 %v1768_v8, %v1760_v49 }
 0x3ab   :  { %5203 = vmatpush1.bf16.msra.mxu0 %v8271_v1  ;;  %v1735_v1 = vld [vmem:[#allocation8 + $0x2e0] sm:$0xff] }
 0x3ac   :  { %5205 = vmatprep.subr.bf16.mxu0 %v8274_v37  ;;  %v8289_v20 = vpack.c.bf16 %v1735_v1, %v1727_v19  ;;  %v1743_v37 = vld [vmem:[#allocation8 + $0x320] sm:$0xff]  ;;  %10005 = vst [vmem:[#allocation150_spill] sm:$0xff] %v8298_v43  ;;  %v1776_v1 = vld [vmem:[#allocation8 + $0x428] sm:$0xff] }
 0x3ad   :  { %v1784_v19 = vld [vmem:[#allocation8 + $0x468] sm:$0xff] }
 0x3ae   :  { %10002 = vst [vmem:[#allocation147_spill] sm:$0xff] %v8289_v20  ;;  %v8304_v44 = vpack.c.bf16 %v1784_v19, %v1776_v1 }
 0x3af   :  { %5207 = vmatpush1.bf16.msra.mxu0 %v8277_v53  ;;  %v1751_v53 = vld [vmem:[#allocation8 + $0x360] sm:$0xff] }
 0x3b0   :  { %5209 = vmatprep.subr.bf16.mxu0 %v8280_v56  ;;  %v8295_v16 = vpack.c.bf16 %v1751_v53, %v1743_v37  ;;  %v1759_v56 = vld [vmem:[#allocation8 + $0x3a0] sm:$0xff]  ;;  %10007 = vst [vmem:[#allocation152_spill] sm:$0xff] %v8304_v44  ;;  %v1792_v37 = vld [vmem:[#allocation8 + $0x4a8] sm:$0xff] }
 0x3b1   :  { %v1800_v53 = vld [vmem:[#allocation8 + $0x4e8] sm:$0xff] }
 0x3b2   :  { %10004 = vst [vmem:[#allocation149_spill] sm:$0xff] %v8295_v16  ;;  %v8310_v8 = vpack.c.bf16 %v1800_v53, %v1792_v37 }
 0x3b3   :  { %5211 = vmatpush1.bf16.msra.mxu0 %v8283_v12  ;;  %v1767_v12 = vld [vmem:[#allocation8 + $0x3e0] sm:$0xff] }
 0x3b4   :  { %5213 = vmatprep.subr.bf16.mxu0 %v8286_v11  ;;  %v8301_v52 = vpack.c.bf16 %v1767_v12, %v1759_v56  ;;  %v1775_v11 = vld [vmem:[#allocation8 + $0x420] sm:$0xff]  ;;  %10009 = vst [vmem:[#allocation154_spill] sm:$0xff] %v8310_v8  ;;  %v1808_v56 = vld [vmem:[#allocation8 + $0x528] sm:$0xff] }
 0x3b5   :  { %v1816_v12 = vld [vmem:[#allocation8 + $0x568] sm:$0xff] }
 0x3b6   :  { %10006 = vst [vmem:[#allocation151_spill] sm:$0xff] %v8301_v52  ;;  %v8316_v19 = vpack.c.bf16 %v1816_v12, %v1808_v56 }
 0x3b7   :  { %5215 = vmatpush1.bf16.msra.mxu0 %v8289_v20  ;;  %v1783_v20 = vld [vmem:[#allocation8 + $0x460] sm:$0xff] }
 0x3b8   :  { %5217 = vmatprep.subr.bf16.mxu0 %v8292_v31  ;;  %v8307_v49 = vpack.c.bf16 %v1783_v20, %v1775_v11  ;;  %v1791_v31 = vld [vmem:[#allocation8 + $0x4a0] sm:$0xff]  ;;  %10011 = vst [vmem:[#allocation156_spill] sm:$0xff] %v8316_v19  ;;  %v1824_v11 = vld [vmem:[#allocation8 + $0x5a8] sm:$0xff] }
 0x3b9   :  { %v1832_v20 = vld [vmem:[#allocation8 + $0x5e8] sm:$0xff] }
 0x3ba   :  { %10008 = vst [vmem:[#allocation153_spill] sm:$0xff] %v8307_v49  ;;  %v8322_v53 = vpack.c.bf16 %v1832_v20, %v1824_v11 }
 0x3bb   :  { %5219 = vmatpush1.bf16.msra.mxu0 %v8295_v16  ;;  %v1799_v16 = vld [vmem:[#allocation8 + $0x4e0] sm:$0xff] }
 0x3bc   :  { %5221 = vmatprep.subr.bf16.mxu0 %v8298_v43  ;;  %v8313_v1 = vpack.c.bf16 %v1799_v16, %v1791_v31  ;;  %v1807_v43 = vld [vmem:[#allocation8 + $0x520] sm:$0xff]  ;;  %10013 = vst [vmem:[#allocation158_spill] sm:$0xff] %v8322_v53  ;;  %v1840_v31 = vld [vmem:[#allocation8 + $0x628] sm:$0xff] }
 0x3bd   :  { %v1848_v16 = vld [vmem:[#allocation8 + $0x668] sm:$0xff] }
 0x3be   :  { %10010 = vst [vmem:[#allocation155_spill] sm:$0xff] %v8313_v1  ;;  %v8328_v12 = vpack.c.bf16 %v1848_v16, %v1840_v31 }
 0x3bf   :  { %5223 = vmatpush1.bf16.msra.mxu0 %v8301_v52  ;;  %v1815_v52 = vld [vmem:[#allocation8 + $0x560] sm:$0xff] }
 0x3c0   :  { %5225 = vmatprep.subr.bf16.mxu0 %v8304_v44  ;;  %v8319_v37 = vpack.c.bf16 %v1815_v52, %v1807_v43  ;;  %v1823_v44 = vld [vmem:[#allocation8 + $0x5a0] sm:$0xff]  ;;  %10015 = vst [vmem:[#allocation160_spill] sm:$0xff] %v8328_v12  ;;  %v1856_v43 = vld [vmem:[#allocation8 + $0x6a8] sm:$0xff] }
 0x3c1   :  { %v1864_v52 = vld [vmem:[#allocation8 + $0x6e8] sm:$0xff] }
 0x3c2   :  { %10012 = vst [vmem:[#allocation157_spill] sm:$0xff] %v8319_v37  ;;  %v8334_v20 = vpack.c.bf16 %v1864_v52, %v1856_v43 }
 0x3c3   :  { %5227 = vmatpush1.bf16.msra.mxu0 %v8307_v49  ;;  %v1831_v49 = vld [vmem:[#allocation8 + $0x5e0] sm:$0xff] }
 0x3c4   :  { %5229 = vmatprep.subr.bf16.mxu0 %v8310_v8  ;;  %v8325_v56 = vpack.c.bf16 %v1831_v49, %v1823_v44  ;;  %v1839_v8 = vld [vmem:[#allocation8 + $0x620] sm:$0xff]  ;;  %10017 = vst [vmem:[#allocation162_spill] sm:$0xff] %v8334_v20  ;;  %v1872_v44 = vld [vmem:[#allocation8 + $0x728] sm:$0xff] }
 0x3c5   :  { %v1880_v49 = vld [vmem:[#allocation8 + $0x768] sm:$0xff] }
 0x3c6   :  { %10014 = vst [vmem:[#allocation159_spill] sm:$0xff] %v8325_v56  ;;  %v8340_v16 = vpack.c.bf16 %v1880_v49, %v1872_v44 }
 0x3c7   :  { %5231 = vmatpush1.bf16.msra.mxu0 %v8313_v1  ;;  %v1847_v1 = vld [vmem:[#allocation8 + $0x660] sm:$0xff] }
 0x3c8   :  { %5233 = vmatprep.subr.bf16.mxu0 %v8316_v19  ;;  %v8331_v11 = vpack.c.bf16 %v1847_v1, %v1839_v8  ;;  %v1855_v19 = vld [vmem:[#allocation8 + $0x6a0] sm:$0xff]  ;;  %10019 = vst [vmem:[#allocation164_spill] sm:$0xff] %v8340_v16  ;;  %v1888_v8 = vld [vmem:[#allocation8 + $0x7a8] sm:$0xff] }
 0x3c9   :  { %v1896_v1 = vld [vmem:[#allocation8 + $0x7e8] sm:$0xff] }
 0x3ca   :  { %10016 = vst [vmem:[#allocation161_spill] sm:$0xff] %v8331_v11  ;;  %v8346_v52 = vpack.c.bf16 %v1896_v1, %v1888_v8 }
 0x3cb   :  { %5235 = vmatpush1.bf16.msra.mxu0 %v8319_v37  ;;  %v1863_v37 = vld [vmem:[#allocation8 + $0x6e0] sm:$0xff] }
 0x3cc   :  { %5237 = vmatprep.subr.bf16.mxu0 %v8322_v53  ;;  %v8337_v31 = vpack.c.bf16 %v1863_v37, %v1855_v19  ;;  %v1871_v53 = vld [vmem:[#allocation8 + $0x720] sm:$0xff]  ;;  %10021 = vst [vmem:[#allocation166_spill] sm:$0xff] %v8346_v52 }
 0x3ce   :  { %10018 = vst [vmem:[#allocation163_spill] sm:$0xff] %v8337_v31 }
 0x3cf   :  { %5239 = vmatpush1.bf16.msra.mxu0 %v8325_v56  ;;  %v1879_v56 = vld [vmem:[#allocation8 + $0x760] sm:$0xff] }
 0x3d0   :  { %5241 = vmatprep.subr.bf16.mxu0 %v8328_v12  ;;  %v8343_v43 = vpack.c.bf16 %v1879_v56, %v1871_v53  ;;  %v1887_v12 = vld [vmem:[#allocation8 + $0x7a0] sm:$0xff] }
 0x3d2   :  { %10020 = vst [vmem:[#allocation165_spill] sm:$0xff] %v8343_v43 }
 0x3d3   :  { %5243 = vmatpush1.bf16.msra.mxu0 %v8331_v11  ;;  %v1895_v11 = vld [vmem:[#allocation8 + $0x7e0] sm:$0xff] }
 0x3d4   :  { %5245 = vmatprep.subr.bf16.mxu0 %v8334_v20  ;;  %v8349_v19 = vpack.c.bf16 %v1895_v11, %v1887_v12 }
 0x3d6   :  { %10022 = vst [vmem:[#allocation167_spill] sm:$0xff] %v8349_v19 }
 0x3d7   :  { %5247 = vmatpush1.bf16.msra.mxu0 %v8337_v31 }
 0x3d8   :  { %5249 = vmatprep.subr.bf16.mxu0 %v8340_v16 }
 0x3db   :  { %5251 = vmatpush1.bf16.msra.mxu0 %v8343_v43 }
 0x3dc   :  { %5253 = vmatprep.subr.bf16.mxu0 %v8346_v52 }
 0x3df   :  { %5255 = vmatpush1.bf16.msra.mxu0 %v8349_v19 }
 0x3e0   :  { %5257 = vmatprep.subr.bf16.mxu0 %v8043_v50 }
 0x3e2   :  { %2106 = vmatmul.mubr.f32.vlgmr.msra.gmra.mrb[64].mxu0 %v9993_v25 }
 0x3e3   :  { %5259 = vmatpush1.bf16.msra.mxu0 %v8046_v63  ;;  %2176 = vmatprep.mubr.f32.mxu0 %v9993_v25 }
 0x3e4   :  { %5261 = vmatprep.subr.bf16.mxu0 %v8056_v5 }
 0x3e7   :  { %5263 = vmatpush1.bf16.msra.mxu0 %v8059_v15 }
 0x3e8   :  { %5265 = vmatprep.subr.bf16.mxu0 %v8068_v38 }
 0x3eb   :  { %5267 = vmatpush1.bf16.msra.mxu0 %v8071_v60 }
 0x3ec   :  { %5269 = vmatprep.subr.bf16.mxu0 %v8080_v34 }
 0x3ef   :  { %5271 = vmatpush1.bf16.msra.mxu0 %v8083_v9 }
 0x3f0   :  { %5273 = vmatprep.subr.bf16.mxu0 %v8092_v4 }
 0x3f3   :  { %5275 = vmatpush1.bf16.msra.mxu0 %v8095_v23 }
 0x3f4   :  { %5277 = vmatprep.subr.bf16.mxu0 %v8104_v30  ;;  %v10059_v30 = vld [vmem:[#allocation15_spill] sm:$0xff] }
 0x3f7   :  { %5279 = vmatpush1.bf16.msra.mxu0 %v8107_v13 }
 0x3f8   :  { %5281 = vmatprep.subr.bf16.mxu0 %v8116_v58 }
 0x3f9   :  { %v8368_v37 = vpop.f32.mrb[82].mxu0 }
 0x3fa   :  { %v8370_v53 = vpop.f32.mrb[83].mxu0 }
 0x3fb   :  { %5283 = vmatpush1.bf16.msra.mxu0 %v8119_v17  ;;  %v10057_v17 = vld [vmem:[#allocation14_spill] sm:$0xff] }
 0x3fc   :  { %5285 = vmatprep.subr.bf16.mxu0 %v8128_v51 }
 0x3fd   :  { %v8374_v56 = vpop.f32.mrb[84].mxu0 }
 0x3fe   :  { %10023 = vst [vmem:[#allocation168_spill] sm:$0xff] %v8374_v56  ;;  %v8376_v12 = vpop.f32.mrb[85].mxu0  ;;  %v10040_v56 = vld [vmem:[#allocation43_spill] sm:$0xff] }
 0x3ff   :  { %10024 = vst [vmem:[#allocation169_spill] sm:$0xff] %v8376_v12  ;;  %5287 = vmatpush1.bf16.msra.mxu0 %v8135_v55 }
 0x400   :  { %5289 = vmatprep.subr.bf16.mxu0 %v8144_v36 }
 0x401   :  { %v8380_v11 = vpop.f32.mrb[86].mxu0 }
 0x402   :  { %10025 = vst [vmem:[#allocation170_spill] sm:$0xff] %v8380_v11  ;;  %v8382_v44 = vpop.f32.mrb[87].mxu0 }
 0x403   :  { %10026 = vst [vmem:[#allocation171_spill] sm:$0xff] %v8382_v44  ;;  %5291 = vmatpush1.bf16.msra.mxu0 %v8151_v24 }
 0x404   :  { %5293 = vmatprep.subr.bf16.mxu0 %v8160_v10  ;;  %v10052_v10 = vld [vmem:[#allocation13_spill] sm:$0xff] }
 0x405   :  { %v8386_v49 = vpop.f32.mrb[88].mxu0  ;;  %v10053_v24 = vsub.s32 2, %v10052_v10  ;;  %v10055_v55 = vsub.s32 3, %v10052_v10 }
 0x406   :  { %10027 = vst [vmem:[#allocation172_spill] sm:$0xff] %v8386_v49  ;;  %v8388_v8 = vpop.f32.mrb[89].mxu0 }
 0x407   :  { %10028 = vst [vmem:[#allocation173_spill] sm:$0xff] %v8388_v8  ;;  %5295 = vmatpush1.bf16.msra.mxu0 %v8167_v26  ;;  %v1074_v26 = vld [vmem:[%s9556_s6] sm:$0xff] }
 0x408   :  { %5297 = vmatprep.subr.bf16.mxu0 %v8176_v29  ;;  %v8454_v36 = vrot.slane %v1074_v26, %v10053_v24  ;;  %v8458_v51 = vrot.slane %v1074_v26, %v10055_v55  ;;  %v8461_v58 = vrot.slane %v1074_v26, %v10057_v17  ;;  %v8465_v23 = vrot.slane %v1074_v26, %v10059_v30 }
 0x409   :  { %v8392_v1 = vpop.f32.mrb[90].mxu0  ;;  %v1094_v55 = vsub.s32 4, %v10052_v10  ;;  %v1098_v17 = vsub.s32 5, %v10052_v10 }
 0x40a   :  { %10029 = vst [vmem:[#allocation174_spill] sm:$0xff] %v8392_v1  ;;  %v8394_v12 = vpop.f32.mrb[91].mxu0  ;;  %v10039_v1 = vld [vmem:[#allocation40_spill] sm:$0xff]  ;;  %10054 = vst [vmem:[#allocation13_spill] sm:$0xff] %v8454_v36 }
 0x40b   :  { %10030 = vst [vmem:[#allocation175_spill] sm:$0xff] %v8394_v12  ;;  %5299 = vmatpush1.bf16.msra.mxu0 %v8183_v0  ;;  %v10038_v12 = vld [vmem:[#allocation39_spill] sm:$0xff]  ;;  %10056 = vst [vmem:[#allocation180_spill] sm:$0xff] %v8458_v51  ;;  %v8472_v30 = vrot.slane %v1074_v26, %v1094_v55 }
 0x40c   :  { %5301 = vmatprep.subr.bf16.mxu0 %v8192_v3  ;;  %v10051_v3 = vld [vmem:[#allocation60_spill] sm:$0xff]  ;;  %10058 = vst [vmem:[#allocation14_spill] sm:$0xff] %v8461_v58  ;;  %10060 = vst [vmem:[#allocation15_spill] sm:$0xff] %v8465_v23 }
 0x40d   :  { %v8398_v44 = vpop.f32.mrb[92].mxu0  ;;  %10061 = vst [vmem:[#allocation181_spill] sm:$0xff] %v8472_v30 }
 0x40e   :  { %10031 = vst [vmem:[#allocation176_spill] sm:$0xff] %v8398_v44  ;;  %v8400_v11 = vpop.f32.mrb[93].mxu0  ;;  %v10037_v44 = vld [vmem:[#allocation36_spill] sm:$0xff] }
 0x40f   :  { %10032 = vst [vmem:[#allocation177_spill] sm:$0xff] %v8400_v11  ;;  %5303 = vmatpush1.bf16.msra.mxu0 %v8199_v21  ;;  %v10036_v11 = vld [vmem:[#allocation35_spill] sm:$0xff] }
 0x410   :  { %5305 = vmatprep.subr.bf16.mxu0 %v8208_v6  ;;  %v10049_v6 = vld [vmem:[#allocation58_spill] sm:$0xff]  ;;  %v10050_v21 = vld [vmem:[#allocation59_spill] sm:$0xff] }
 0x411   :  { %v8404_v8 = vpop.f32.mrb[94].mxu0 }
 0x412   :  { %10033 = vst [vmem:[#allocation178_spill] sm:$0xff] %v8404_v8  ;;  %v8406_v49 = vpop.f32.mrb[95].mxu0  ;;  %v10035_v8 = vld [vmem:[#allocation32_spill] sm:$0xff] }
 0x413   :  { %10034 = vst [vmem:[#allocation179_spill] sm:$0xff] %v8406_v49  ;;  %5307 = vmatpush1.bf16.msra.mxu0 %v8215_v62  ;;  %v10048_v62 = vld [vmem:[#allocation57_spill] sm:$0xff] }
 0x414   :  { %5309 = vmatprep.subr.bf16.mxu0 %v8224_v48  ;;  %v10047_v48 = vld [vmem:[#allocation56_spill] sm:$0xff] }
 0x417   :  { %5311 = vmatpush1.bf16.msra.mxu0 %v8227_v35  ;;  %v10046_v35 = vld [vmem:[#allocation55_spill] sm:$0xff] }
 0x418   :  { %5313 = vmatprep.subr.bf16.mxu0 %v8236_v47  ;;  %v10045_v47 = vld [vmem:[#allocation52_spill] sm:$0xff] }
 0x41b   :  { %5315 = vmatpush1.bf16.msra.mxu0 %v8239_v18  ;;  %v10044_v18 = vld [vmem:[#allocation51_spill] sm:$0xff] }
 0x41c   :  { %5317 = vmatprep.subr.bf16.mxu0 %v8248_v14  ;;  %v10043_v14 = vld [vmem:[#allocation48_spill] sm:$0xff] }
 0x41f   :  { %5319 = vmatpush1.bf16.msra.mxu0 %v8251_v22  ;;  %v10042_v22 = vld [vmem:[#allocation47_spill] sm:$0xff] }
 0x420   :  { %5321 = vmatprep.subr.bf16.mxu0 %v7900_v41  ;;  %v10041_v41 = vld [vmem:[#allocation44_spill] sm:$0xff] }
 0x422   :  { %2177 = vmatmul.mubr.f32.vlgmr.msra.gmra.mrb[80].mxu0 %v9993_v25 }
 0x423   :  { %5323 = vmatpush1.bf16.msra.mxu0 %v7902_v32 }
 0x424   :  { %5325 = vmatprep.subr.bf16.mxu0 %v7905_v57 }
 0x427   :  { %5327 = vmatpush1.bf16.msra.mxu0 %v7910_v39 }
 0x428   :  { %5329 = vmatprep.subr.bf16.mxu0 %v7913_v40 }
 0x42b   :  { %5331 = vmatpush1.bf16.msra.mxu0 %v7918_v61 }
 0x42c   :  { %5333 = vmatprep.subr.bf16.mxu0 %v7921_v7 }
 0x42f   :  { %5335 = vmatpush1.bf16.msra.mxu0 %v7926_v59 }
 0x430   :  { %5337 = vmatprep.subr.bf16.mxu0 %v7929_v27 }
 0x433   :  { %5339 = vmatpush1.bf16.msra.mxu0 %v7934_v33 }
 0x434   :  { %5341 = vmatprep.subr.bf16.mxu0 %v7937_v42 }
 0x435   :  { %v1965_v25 = vpop.f32.mrb[32].mxu0 }
 0x436   :  { %v1967_v49 = vpop.f32.mrb[33].mxu0  ;;  %v7128_v9 = vadd.f32 %v1965_v25, %v8461_v58 }
 0x437   :  { %5343 = vmatpush1.bf16.msra.mxu0 %v7942_v28  ;;  %v7129_v34 = vadd.f32 %v1967_v49, %v8465_v23 }
 0x438   :  { %5345 = vmatprep.subr.bf16.mxu0 %v7945_v45  ;;  %v2191_v38 = vmul.f32 0.5, %v7128_v9 }
 0x439   :  { %v2192_v15 = vmul.f32 0.5, %v7129_v34 }
 0x43b   :  { %5347 = vmatpush1.bf16.msra.mxu0 %v7950_v54 }
 0x43c   :  { %5349 = vmatprep.subr.bf16.mxu0 %v7953_v2 }
 0x43f   :  { %5351 = vmatpush1.bf16.msra.mxu0 %v7958_v46 }
 0x440   :  { %5353 = vmatprep.subr.bf16.mxu0 %v10035_v8 }
 0x443   :  { %5355 = vmatpush1.bf16.msra.mxu0 %v10036_v11 }
 0x444   :  { %5357 = vmatprep.subr.bf16.mxu0 %v10037_v44 }
 0x447   :  { %5359 = vmatpush1.bf16.msra.mxu0 %v10038_v12 }
 0x448   :  { %5361 = vmatprep.subr.bf16.mxu0 %v10039_v1 }
 0x44b   :  { %5363 = vmatpush1.bf16.msra.mxu0 %v10040_v56 }
 0x44c   :  { %5365 = vmatprep.subr.bf16.mxu0 %v10041_v41 }
 0x44f   :  { %5367 = vmatpush1.bf16.msra.mxu0 %v10042_v22 }
 0x450   :  { %5369 = vmatprep.subr.bf16.mxu0 %v10043_v14 }
 0x453   :  { %5371 = vmatpush1.bf16.msra.mxu0 %v10044_v18 }
 0x454   :  { %5373 = vmatprep.subr.bf16.mxu0 %v10045_v47 }
 0x457   :  { %5375 = vmatpush1.bf16.msra.mxu0 %v10046_v35 }
 0x458   :  { %5377 = vmatprep.subr.bf16.mxu0 %v10047_v48 }
 0x45b   :  { %5379 = vmatpush1.bf16.msra.mxu0 %v10048_v62 }
 0x45c   :  { %5381 = vmatprep.subr.bf16.mxu0 %v10049_v6 }
 0x45f   :  { %5383 = vmatpush1.bf16.msra.mxu0 %v10050_v21 }
 0x460   :  { %5385 = vmatprep.subr.bf16.mxu0 %v10051_v3 }
 0x475   :  { %v2036_v0 = vpop.f32.mrb[48].mxu0 }
 0x476   :  { %v2038_v29 = vpop.f32.mrb[49].mxu0  ;;  %v7156_v13 = vadd.f32 %v2036_v0, %v8454_v36  ;;  %v8474_v0 = vrot.slane %v1074_v26, %v1098_v17 }
 0x477   :  { %v7157_v4 = vadd.f32 %v2038_v29, %v8458_v51 }
 0x478   :  { %v2199_v24 = vmul.f32 0.5, %v7156_v13  ;;  %10062 = vst [vmem:[#allocation182_spill] sm:$0xff] %v8474_v0 }
 0x479   :  { %v2200_v60 = vmul.f32 0.5, %v7157_v4 }
 0x47a   :  { %7283 = vtanh.f32 %v2199_v24 }
 0x47b   :  { %7285 = vtanh.f32 %v2200_v60 }
 0x47c   :  { %7287 = vtanh.f32 %v2191_v38 }
 0x47d   :  { %7289 = vtanh.f32 %v2192_v15 }
 0x484   :  { %v7284_v9 = vpop.eup %7283 }
 0x485   :  { %v7286_v34 = vpop.eup %7285  ;;  %v2203_v24 = vmul.f32 0.5, %v7284_v9  ;;  %v1106_v9 = vsub.s32 7, %v10052_v10 }
 0x486   :  { %v7288_v4 = vpop.eup %7287  ;;  %v2204_v5 = vmul.f32 0.5, %v7286_v34 }
 0x487   :  { %v7290_v60 = vpop.eup %7289  ;;  %v2195_v38 = vmul.f32 0.5, %v7288_v4  ;;  %v2205_v55 = vadd.f32 0.5, %v2203_v24  ;;  %v8486_v4 = vrot.slane %v1074_v26, %v1106_v9  ;;  %v10067_v9 = vld [vmem:[#allocation65_spill] sm:$0xff] }
 0x488   :  { %v2196_v15 = vmul.f32 0.5, %v7290_v60  ;;  %v2206_v63 = vadd.f32 0.5, %v2204_v5 }
 0x489   :  { %v2197_v17 = vadd.f32 0.5, %v2195_v38  ;;  %10064 = vst [vmem:[#allocation184_spill] sm:$0xff] %v8486_v4 }
 0x48a   :  { %v2198_v23 = vadd.f32 0.5, %v2196_v15  ;;  %v2218_v51 = vmul.f32 0.0, %v2206_v63 }
 0x4b5   :  { %v2107_v29 = vpop.f32.mrb[64].mxu0 }
 0x4b6   :  { %v7184_v25 = vadd.f32 %v2107_v29, %v8472_v30  ;;  %v2109_v49 = vpop.f32.mrb[65].mxu0  ;;  %v2217_v29 = vmul.f32 0.0, %v2205_v55 }
 0x4b7   :  { %v7185_v13 = vadd.f32 %v2109_v49, %v8474_v0 }
 0x4b8   :  { %7291 = vtanh.f32 %v7184_v25 }
 0x4b9   :  { %7293 = vtanh.f32 %v7185_v13  ;;  %v1102_v13 = vsub.s32 6, %v10052_v10 }
 0x4bb   :  { %v8484_v34 = vrot.slane %v1074_v26, %v1102_v13  ;;  %v10066_v13 = vld [vmem:[#allocation62_spill] sm:$0xff] }
 0x4bd   :  { %10063 = vst [vmem:[#allocation183_spill] sm:$0xff] %v8484_v34 }
 0x4c2   :  { %v7292_v50 = vpop.eup %7291 }
 0x4c3   :  { %v7294_v58 = vpop.eup %7293  ;;  %v2219_v30 = vmul.f32 %v7292_v50, %v2197_v17 }
 0x4c4   :  { %v2220_v49 = vmul.f32 %v7294_v58, %v2198_v23 }
 0x4c5   :  { %v8478_v0 = vadd.f32 %v2219_v30, %v2217_v29 }
 0x4c6   :  { %v8480_v25 = vadd.f32 %v2220_v49, %v2218_v51  ;;  %v10065_v49 = vld [vmem:[#allocation61_spill] sm:$0xff] }
 0x4f5   :  { %v2178_v5 = vpop.f32.mrb[80].mxu0 }
 0x4f6   :  { %v7200_v60 = vadd.f32 %v2178_v5, %v8484_v34  ;;  %v2180_v24 = vpop.f32.mrb[81].mxu0  ;;  %v10068_v5 = vld [vmem:[#allocation66_spill] sm:$0xff] }
 0x4f7   :  { %v7201_v50 = vadd.f32 %v2180_v24, %v8486_v4  ;;  %v10070_v24 = vld [vmem:[#allocation70_spill] sm:$0xff] }
 0x4f8   :  { %v2209_v63 = vmul.f32 0.5, %v7200_v60  ;;  %v10069_v60 = vld [vmem:[#allocation69_spill] sm:$0xff] }
 0x4f9   :  { %v2210_v23 = vmul.f32 0.5, %v7201_v50  ;;  %v10071_v50 = vld [vmem:[#allocation73_spill] sm:$0xff] }
 0x4fa   :  { %7295 = vtanh.f32 %v2209_v63  ;;  %v10072_v63 = vld [vmem:[#allocation74_spill] sm:$0xff] }
 0x4fb   :  { %7297 = vtanh.f32 %v2210_v23  ;;  %v10073_v23 = vld [vmem:[#allocation77_spill] sm:$0xff] }
 0x4fc   :  { %7299 = vtanh.f32 %v8480_v25 }
 0x4fd   :  { %7301 = vtanh.f32 %v8478_v0 }
 0x504   :  { %v7296_v58 = vpop.eup %7295 }
 0x505   :  { %v7298_v10 = vpop.eup %7297  ;;  %v2213_v51 = vmul.f32 0.5, %v7296_v58  ;;  %v10074_v58 = vld [vmem:[#allocation78_spill] sm:$0xff] }
 0x506   :  { %v2214_v30 = vmul.f32 0.5, %v7298_v10  ;;  %v7300_v15 = vpop.eup %7299  ;;  %v10075_v10 = vld [vmem:[#allocation81_spill] sm:$0xff] }
 0x507   :  { %v2215_v26 = vadd.f32 0.5, %v2213_v51  ;;  %v7302_v55 = vpop.eup %7301  ;;  %v10076_v51 = vld [vmem:[#allocation82_spill] sm:$0xff] }
 0x508   :  { %v2216_v38 = vadd.f32 0.5, %v2214_v30  ;;  %v10077_v30 = vld [vmem:[#allocation85_spill] sm:$0xff] }
 0x509   :  { %v8494_v29 = vmul.f32 %v7302_v55, %v2215_v26  ;;  %v10078_v26 = vld [vmem:[#allocation86_spill] sm:$0xff]  ;;  %v10081_v55 = vld [vmem:[#allocation95_spill] sm:$0xff] }
 0x50a   :  { %v8492_v17 = vmul.f32 %v7300_v15, %v2216_v38  ;;  %v10079_v38 = vld [vmem:[#allocation89_spill] sm:$0xff]  ;;  %v10080_v15 = vld [vmem:[#allocation90_spill] sm:$0xff] }
 0x50c   :  { %2302 = vmatprep.mubr.f32.mxu0 %v8492_v17  ;;  %2515 = vmatprep.mubr.f32.mxu1 %v8492_v17 }
 0x50d   :  { %2303 = vmatmul.mubr.f32.vlgmr.msra.gmra.mrb[34].mxu0 %v8494_v29  ;;  %2516 = vmatmul.mubr.f32.vlgmr.msra.gmra.mrb[16].mxu1 %v8494_v29 }
 0x50e   :  { %5387 = vmatpush1.bf16.msra.mxu0 %v10065_v49  ;;  %2373 = vmatprep.mubr.f32.mxu0 %v8492_v17 }
 0x50f   :  { %5389 = vmatprep.subr.bf16.mxu0 %v10066_v13  ;;  %5579 = vmatpush1.bf16.msra.mxu1 %v7902_v32  ;;  %v10114_v32 = vld [vmem:[#allocation154_spill] sm:$0xff] }
 0x510   :  { %5581 = vmatprep.subr.bf16.mxu1 %v7905_v57  ;;  %v10113_v57 = vld [vmem:[#allocation153_spill] sm:$0xff] }
 0x512   :  { %5391 = vmatpush1.bf16.msra.mxu0 %v10067_v9 }
 0x513   :  { %5393 = vmatprep.subr.bf16.mxu0 %v10068_v5  ;;  %5583 = vmatpush1.bf16.msra.mxu1 %v7910_v39  ;;  %v10112_v39 = vld [vmem:[#allocation152_spill] sm:$0xff] }
 0x514   :  { %5585 = vmatprep.subr.bf16.mxu1 %v7913_v40  ;;  %v10111_v40 = vld [vmem:[#allocation151_spill] sm:$0xff] }
 0x516   :  { %5395 = vmatpush1.bf16.msra.mxu0 %v10069_v60 }
 0x517   :  { %5397 = vmatprep.subr.bf16.mxu0 %v10070_v24  ;;  %5587 = vmatpush1.bf16.msra.mxu1 %v7918_v61  ;;  %v10110_v61 = vld [vmem:[#allocation150_spill] sm:$0xff] }
 0x518   :  { %5589 = vmatprep.subr.bf16.mxu1 %v7921_v7  ;;  %v10109_v7 = vld [vmem:[#allocation149_spill] sm:$0xff] }
 0x51a   :  { %5399 = vmatpush1.bf16.msra.mxu0 %v10071_v50 }
 0x51b   :  { %5401 = vmatprep.subr.bf16.mxu0 %v10072_v63  ;;  %5591 = vmatpush1.bf16.msra.mxu1 %v7926_v59  ;;  %v10107_v59 = vld [vmem:[#allocation147_spill] sm:$0xff] }
 0x51c   :  { %5593 = vmatprep.subr.bf16.mxu1 %v7929_v27  ;;  %v10106_v27 = vld [vmem:[#allocation146_spill] sm:$0xff] }
 0x51e   :  { %5403 = vmatpush1.bf16.msra.mxu0 %v10073_v23 }
 0x51f   :  { %5405 = vmatprep.subr.bf16.mxu0 %v10074_v58  ;;  %5595 = vmatpush1.bf16.msra.mxu1 %v7934_v33  ;;  %v10103_v33 = vld [vmem:[#allocation143_spill] sm:$0xff] }
 0x520   :  { %5597 = vmatprep.subr.bf16.mxu1 %v7937_v42  ;;  %v10102_v42 = vld [vmem:[#allocation142_spill] sm:$0xff] }
 0x522   :  { %5407 = vmatpush1.bf16.msra.mxu0 %v10075_v10 }
 0x523   :  { %5409 = vmatprep.subr.bf16.mxu0 %v10076_v51  ;;  %5599 = vmatpush1.bf16.msra.mxu1 %v7942_v28  ;;  %v10082_v28 = vld [vmem:[#allocation96_spill] sm:$0xff] }
 0x524   :  { %5601 = vmatprep.subr.bf16.mxu1 %v7945_v45  ;;  %v10083_v45 = vld [vmem:[#allocation101_spill] sm:$0xff] }
 0x526   :  { %5411 = vmatpush1.bf16.msra.mxu0 %v10077_v30 }
 0x527   :  { %5413 = vmatprep.subr.bf16.mxu0 %v10078_v26  ;;  %5603 = vmatpush1.bf16.msra.mxu1 %v7950_v54  ;;  %v10084_v54 = vld [vmem:[#allocation102_spill] sm:$0xff] }
 0x528   :  { %5605 = vmatprep.subr.bf16.mxu1 %v7953_v2  ;;  %v10085_v2 = vld [vmem:[#allocation107_spill] sm:$0xff] }
 0x52a   :  { %5415 = vmatpush1.bf16.msra.mxu0 %v10079_v38 }
 0x52b   :  { %5417 = vmatprep.subr.bf16.mxu0 %v10080_v15  ;;  %5607 = vmatpush1.bf16.msra.mxu1 %v7958_v46  ;;  %v10086_v46 = vld [vmem:[#allocation108_spill] sm:$0xff] }
 0x52c   :  { %5609 = vmatprep.subr.bf16.mxu1 %v10035_v8  ;;  %v10087_v8 = vld [vmem:[#allocation113_spill] sm:$0xff] }
 0x52e   :  { %5419 = vmatpush1.bf16.msra.mxu0 %v10081_v55 }
 0x52f   :  { %5421 = vmatprep.subr.bf16.mxu0 %v10082_v28  ;;  %5611 = vmatpush1.bf16.msra.mxu1 %v10036_v11  ;;  %v10088_v11 = vld [vmem:[#allocation114_spill] sm:$0xff] }
 0x530   :  { %5613 = vmatprep.subr.bf16.mxu1 %v10037_v44  ;;  %v10089_v44 = vld [vmem:[#allocation119_spill] sm:$0xff] }
 0x532   :  { %5423 = vmatpush1.bf16.msra.mxu0 %v10083_v45 }
 0x533   :  { %5425 = vmatprep.subr.bf16.mxu0 %v10084_v54  ;;  %5615 = vmatpush1.bf16.msra.mxu1 %v10038_v12  ;;  %v10090_v12 = vld [vmem:[#allocation120_spill] sm:$0xff] }
 0x534   :  { %5617 = vmatprep.subr.bf16.mxu1 %v10039_v1  ;;  %v10091_v1 = vld [vmem:[#allocation125_spill] sm:$0xff] }
 0x536   :  { %5427 = vmatpush1.bf16.msra.mxu0 %v10085_v2 }
 0x537   :  { %5429 = vmatprep.subr.bf16.mxu0 %v10086_v46  ;;  %5619 = vmatpush1.bf16.msra.mxu1 %v10040_v56  ;;  %v10092_v56 = vld [vmem:[#allocation126_spill] sm:$0xff]  ;;  %v10124_v46 = vld [vmem:[#allocation15_spill] sm:$0xff] }
 0x538   :  { %5621 = vmatprep.subr.bf16.mxu1 %v10041_v41  ;;  %v10093_v41 = vld [vmem:[#allocation129_spill] sm:$0xff] }
 0x53a   :  { %5431 = vmatpush1.bf16.msra.mxu0 %v10087_v8 }
 0x53b   :  { %5433 = vmatprep.subr.bf16.mxu0 %v10088_v11  ;;  %5623 = vmatpush1.bf16.msra.mxu1 %v10042_v22  ;;  %v10094_v22 = vld [vmem:[#allocation130_spill] sm:$0xff] }
 0x53c   :  { %5625 = vmatprep.subr.bf16.mxu1 %v10043_v14  ;;  %v10095_v14 = vld [vmem:[#allocation133_spill] sm:$0xff] }
 0x53e   :  { %5435 = vmatpush1.bf16.msra.mxu0 %v10089_v44  ;;  %v10121_v44 = vld [vmem:[#allocation161_spill] sm:$0xff] }
 0x53f   :  { %5437 = vmatprep.subr.bf16.mxu0 %v10090_v12  ;;  %5627 = vmatpush1.bf16.msra.mxu1 %v10044_v18  ;;  %v10096_v18 = vld [vmem:[#allocation134_spill] sm:$0xff]  ;;  %v10120_v12 = vld [vmem:[#allocation160_spill] sm:$0xff] }
 0x540   :  { %5629 = vmatprep.subr.bf16.mxu1 %v10045_v47  ;;  %v10099_v47 = vld [vmem:[#allocation139_spill] sm:$0xff] }
 0x542   :  { %5439 = vmatpush1.bf16.msra.mxu0 %v10091_v1  ;;  %v10119_v1 = vld [vmem:[#allocation159_spill] sm:$0xff] }
 0x543   :  { %5441 = vmatprep.subr.bf16.mxu0 %v10092_v56  ;;  %5631 = vmatpush1.bf16.msra.mxu1 %v10046_v35  ;;  %v10097_v35 = vld [vmem:[#allocation137_spill] sm:$0xff]  ;;  %v10118_v56 = vld [vmem:[#allocation158_spill] sm:$0xff] }
 0x544   :  { %5633 = vmatprep.subr.bf16.mxu1 %v10047_v48  ;;  %v10098_v48 = vld [vmem:[#allocation138_spill] sm:$0xff] }
 0x546   :  { %5443 = vmatpush1.bf16.msra.mxu0 %v10093_v41  ;;  %v10117_v41 = vld [vmem:[#allocation157_spill] sm:$0xff] }
 0x547   :  { %5445 = vmatprep.subr.bf16.mxu0 %v10094_v22  ;;  %5635 = vmatpush1.bf16.msra.mxu1 %v10048_v62  ;;  %v10100_v62 = vld [vmem:[#allocation140_spill] sm:$0xff] }
 0x548   :  { %5637 = vmatprep.subr.bf16.mxu1 %v10049_v6  ;;  %v10101_v6 = vld [vmem:[#allocation141_spill] sm:$0xff]  ;;  %v10116_v22 = vld [vmem:[#allocation156_spill] sm:$0xff] }
 0x54a   :  { %5447 = vmatpush1.bf16.msra.mxu0 %v10095_v14  ;;  %v10115_v14 = vld [vmem:[#allocation155_spill] sm:$0xff] }
 0x54b   :  { %5449 = vmatprep.subr.bf16.mxu0 %v10096_v18  ;;  %5639 = vmatpush1.bf16.msra.mxu1 %v10050_v21  ;;  %v10104_v21 = vld [vmem:[#allocation144_spill] sm:$0xff] }
 0x54c   :  { %5641 = vmatprep.subr.bf16.mxu1 %v10051_v3  ;;  %v10105_v3 = vld [vmem:[#allocation145_spill] sm:$0xff] }
 0x54d   :  { %2374 = vmatmul.mubr.f32.vlgmr.msra.gmra.mrb[50].mxu0 %v8494_v29 }
 0x54e   :  { %5451 = vmatpush1.bf16.msra.mxu0 %v10097_v35  ;;  %2444 = vmatprep.mubr.f32.mxu0 %v8492_v17  ;;  %v10108_v17 = vld [vmem:[#allocation148_spill] sm:$0xff] }
 0x54f   :  { %5453 = vmatprep.subr.bf16.mxu0 %v10098_v48 }
 0x552   :  { %5455 = vmatpush1.bf16.msra.mxu0 %v10099_v47 }
 0x553   :  { %5457 = vmatprep.subr.bf16.mxu0 %v10100_v62 }
 0x556   :  { %5459 = vmatpush1.bf16.msra.mxu0 %v10101_v6 }
 0x557   :  { %5461 = vmatprep.subr.bf16.mxu0 %v10102_v42 }
 0x55a   :  { %5463 = vmatpush1.bf16.msra.mxu0 %v10103_v33 }
 0x55b   :  { %5465 = vmatprep.subr.bf16.mxu0 %v10104_v21 }
 0x55e   :  { %5467 = vmatpush1.bf16.msra.mxu0 %v10105_v3 }
 0x55f   :  { %5469 = vmatprep.subr.bf16.mxu0 %v10106_v27 }
 0x562   :  { %5471 = vmatpush1.bf16.msra.mxu0 %v10107_v59 }
 0x563   :  { %5473 = vmatprep.subr.bf16.mxu0 %v10108_v17 }
 0x566   :  { %5475 = vmatpush1.bf16.msra.mxu0 %v10109_v7 }
 0x567   :  { %5477 = vmatprep.subr.bf16.mxu0 %v10110_v61 }
 0x56a   :  { %5479 = vmatpush1.bf16.msra.mxu0 %v10111_v40 }
 0x56b   :  { %5481 = vmatprep.subr.bf16.mxu0 %v10112_v39 }
 0x56e   :  { %5483 = vmatpush1.bf16.msra.mxu0 %v10113_v57 }
 0x56f   :  { %5485 = vmatprep.subr.bf16.mxu0 %v10114_v32 }
 0x572   :  { %5487 = vmatpush1.bf16.msra.mxu0 %v10115_v14 }
 0x573   :  { %5489 = vmatprep.subr.bf16.mxu0 %v10116_v22 }
 0x576   :  { %5491 = vmatpush1.bf16.msra.mxu0 %v10117_v41 }
 0x577   :  { %5493 = vmatprep.subr.bf16.mxu0 %v10118_v56 }
 0x57a   :  { %5495 = vmatpush1.bf16.msra.mxu0 %v10119_v1 }
 0x57b   :  { %5497 = vmatprep.subr.bf16.mxu0 %v10120_v12 }
 0x57e   :  { %5499 = vmatpush1.bf16.msra.mxu0 %v10121_v44 }
 0x57f   :  { %5501 = vmatprep.subr.bf16.mxu0 %v8334_v20 }
 0x582   :  { %5503 = vmatpush1.bf16.msra.mxu0 %v8337_v31 }
 0x583   :  { %5505 = vmatprep.subr.bf16.mxu0 %v8340_v16 }
 0x586   :  { %5507 = vmatpush1.bf16.msra.mxu0 %v8343_v43 }
 0x587   :  { %5509 = vmatprep.subr.bf16.mxu0 %v8346_v52 }
 0x58a   :  { %5511 = vmatpush1.bf16.msra.mxu0 %v8349_v19 }
 0x58b   :  { %5705 = vmatprep.subr.bf16.mxu0 %v10096_v18 }
 0x58d   :  { %2445 = vmatmul.mubr.f32.vlgmr.msra.gmra.mrb[66].mxu0 %v8494_v29  ;;  %v1528_v29 = vadd.f32 %v8368_v37, %v8484_v34 }
 0x58e   :  { %5707 = vmatpush1.bf16.msra.mxu0 %v10097_v35 }
 0x58f   :  { %5709 = vmatprep.subr.bf16.mxu0 %v10098_v48 }
 0x592   :  { %5711 = vmatpush1.bf16.msra.mxu0 %v10099_v47 }
 0x593   :  { %5713 = vmatprep.subr.bf16.mxu0 %v10100_v62 }
 0x596   :  { %5715 = vmatpush1.bf16.msra.mxu0 %v10101_v6 }
 0x597   :  { %5717 = vmatprep.subr.bf16.mxu0 %v10102_v42 }
 0x59a   :  { %5719 = vmatpush1.bf16.msra.mxu0 %v10103_v33 }
 0x59b   :  { %5721 = vmatprep.subr.bf16.mxu0 %v10104_v21 }
 0x59e   :  { %5723 = vmatpush1.bf16.msra.mxu0 %v10105_v3 }
 0x59f   :  { %5725 = vmatprep.subr.bf16.mxu0 %v10106_v27 }
 0x5a2   :  { %5727 = vmatpush1.bf16.msra.mxu0 %v10107_v59 }
 0x5a3   :  { %5729 = vmatprep.subr.bf16.mxu0 %v10108_v17 }
 0x5a6   :  { %5731 = vmatpush1.bf16.msra.mxu0 %v10109_v7 }
 0x5a7   :  { %5733 = vmatprep.subr.bf16.mxu0 %v10110_v61 }
 0x5aa   :  { %5735 = vmatpush1.bf16.msra.mxu0 %v10111_v40 }
 0x5ab   :  { %5737 = vmatprep.subr.bf16.mxu0 %v10112_v39 }
 0x5ae   :  { %5739 = vmatpush1.bf16.msra.mxu0 %v10113_v57 }
 0x5af   :  { %5741 = vmatprep.subr.bf16.mxu0 %v10114_v32 }
 0x5b2   :  { %5743 = vmatpush1.bf16.msra.mxu0 %v10115_v14 }
 0x5b3   :  { %5745 = vmatprep.subr.bf16.mxu0 %v10116_v22 }
 0x5b6   :  { %5747 = vmatpush1.bf16.msra.mxu0 %v10117_v41  ;;  %v10123_v41 = vld [vmem:[#allocation14_spill] sm:$0xff] }
 0x5b7   :  { %5749 = vmatprep.subr.bf16.mxu0 %v10118_v56  ;;  %v10122_v56 = vld [vmem:[#allocation180_spill] sm:$0xff] }
 0x5ba   :  { %5751 = vmatpush1.bf16.msra.mxu0 %v10119_v1 }
 0x5bb   :  { %5753 = vmatprep.subr.bf16.mxu0 %v10120_v12 }
 0x5be   :  { %5755 = vmatpush1.bf16.msra.mxu0 %v10121_v44  ;;  %v1530_v44 = vadd.f32 %v8370_v53, %v8486_v4  ;;  %v10126_v4 = vld [vmem:[#allocation182_spill] sm:$0xff] }
 0x5bf   :  { %5757 = vmatprep.subr.bf16.mxu0 %v8334_v20 }
 0x5c2   :  { %5759 = vmatpush1.bf16.msra.mxu0 %v8337_v31 }
 0x5c3   :  { %5761 = vmatprep.subr.bf16.mxu0 %v8340_v16 }
 0x5c6   :  { %5763 = vmatpush1.bf16.msra.mxu0 %v8343_v43 }
 0x5c7   :  { %5765 = vmatprep.subr.bf16.mxu0 %v8346_v52 }
 0x5ca   :  { %5767 = vmatpush1.bf16.msra.mxu0 %v8349_v19 }
 0x5cb   :  { %5961 = vmatprep.subr.bf16.mxu0 %v10096_v18 }
 0x5e0   :  { %v2304_v12 = vpop.f32.mrb[34].mxu0  ;;  %v2517_v20 = vpop.f32.mrb[16].mxu1 }
 0x5e1   :  { %v2528_v1 = vadd.f32 %v2517_v20, %v1528_v29  ;;  %v2306_v31 = vpop.f32.mrb[35].mxu0  ;;  %v2519_v11 = vpop.f32.mrb[17].mxu1  ;;  %v7130_v18 = vadd.f32 %v2304_v12, %v10123_v41 }
 0x5e2   :  { %v2529_v16 = vadd.f32 %v2519_v11, %v1530_v44  ;;  %v7131_v2 = vadd.f32 %v2306_v31, %v10124_v46  ;;  %v10125_v11 = vld [vmem:[#allocation181_spill] sm:$0xff] }
 0x5e3   :  { %v2530_v22 = vmul.f32 0.5, %v7130_v18 }
 0x5e4   :  { %v2531_v53 = vmul.f32 0.5, %v7131_v2 }
 0x620   :  { %v2375_v8 = vpop.f32.mrb[50].mxu0 }
 0x621   :  { %v2377_v43 = vpop.f32.mrb[51].mxu0  ;;  %v7158_v52 = vadd.f32 %v2375_v8, %v8454_v36 }
 0x622   :  { %v7159_v19 = vadd.f32 %v2377_v43, %v10122_v56 }
 0x623   :  { %v2538_v37 = vmul.f32 0.5, %v7158_v52 }
 0x624   :  { %v2539_v34 = vmul.f32 0.5, %v7159_v19  ;;  %v2549_v19 = vmul.f32 0.5, %v2529_v16 }
 0x625   :  { %7303 = vtanh.f32 %v2538_v37  ;;  %v2548_v37 = vmul.f32 0.5, %v2528_v1 }
 0x626   :  { %7305 = vtanh.f32 %v2539_v34 }
 0x627   :  { %7307 = vtanh.f32 %v2530_v22 }
 0x628   :  { %7309 = vtanh.f32 %v2531_v53 }
 0x62f   :  { %v7304_v36 = vpop.eup %7303 }
 0x630   :  { %v7306_v43 = vpop.eup %7305  ;;  %v2542_v52 = vmul.f32 0.5, %v7304_v36 }
 0x631   :  { %v7308_v12 = vpop.eup %7307  ;;  %v2543_v18 = vmul.f32 0.5, %v7306_v43 }
 0x632   :  { %v7310_v31 = vpop.eup %7309  ;;  %v2534_v2 = vmul.f32 0.5, %v7308_v12  ;;  %v2544_v22 = vadd.f32 0.5, %v2542_v52 }
 0x633   :  { %v2535_v34 = vmul.f32 0.5, %v7310_v31  ;;  %v2545_v53 = vadd.f32 0.5, %v2543_v18 }
 0x634   :  { %v2536_v56 = vadd.f32 0.5, %v2534_v2  ;;  %v10130_v2 = vld [vmem:[#allocation157_spill] sm:$0xff] }
 0x660   :  { %v2446_v20 = vpop.f32.mrb[66].mxu0 }
 0x661   :  { %v7186_v44 = vadd.f32 %v2446_v20, %v10125_v11  ;;  %v2448_v29 = vpop.f32.mrb[67].mxu0  ;;  %v2537_v11 = vadd.f32 0.5, %v2535_v34  ;;  %v10132_v34 = vld [vmem:[#allocation113_spill] sm:$0xff] }
 0x662   :  { %v7187_v8 = vadd.f32 %v2448_v29, %v10126_v4 }
 0x663   :  { %7311 = vtanh.f32 %v7186_v44  ;;  %v2556_v44 = vmul.f32 %v2544_v22, %v8478_v0  ;;  %v10133_v22 = vld [vmem:[#allocation114_spill] sm:$0xff] }
 0x664   :  { %7313 = vtanh.f32 %v7187_v8  ;;  %v2557_v8 = vmul.f32 %v2545_v53, %v8480_v25  ;;  %v10134_v53 = vld [vmem:[#allocation159_spill] sm:$0xff] }
 0x665   :  { %7315 = vtanh.f32 %v2549_v19 }
 0x666   :  { %7317 = vtanh.f32 %v2548_v37  ;;  %v10131_v37 = vld [vmem:[#allocation158_spill] sm:$0xff] }
 0x66d   :  { %v7312_v20 = vpop.eup %7311 }
 0x66e   :  { %v7314_v29 = vpop.eup %7313  ;;  %v2558_v4 = vmul.f32 %v7312_v20, %v2536_v56  ;;  %v10135_v20 = vld [vmem:[#allocation160_spill] sm:$0xff] }
 0x66f   :  { %v2559_v46 = vmul.f32 %v7314_v29, %v2537_v11  ;;  %v7316_v1 = vpop.eup %7315  ;;  %v10129_v11 = vld [vmem:[#allocation108_spill] sm:$0xff]  ;;  %v10136_v29 = vld [vmem:[#allocation119_spill] sm:$0xff] }
 0x670   :  { %v8644_v36 = vadd.f32 %v2558_v4, %v2556_v44  ;;  %v7318_v43 = vpop.eup %7317  ;;  %v2553_v12 = vmul.f32 0.5, %v7316_v1  ;;  %v10128_v4 = vld [vmem:[#allocation107_spill] sm:$0xff]  ;;  %v10137_v44 = vld [vmem:[#allocation120_spill] sm:$0xff]  ;;  %v10139_v1 = vld [vmem:[#allocation162_spill] sm:$0xff] }
 0x671   :  { %v8646_v16 = vadd.f32 %v2559_v46, %v2557_v8  ;;  %v2552_v31 = vmul.f32 0.5, %v7318_v43  ;;  %v10127_v46 = vld [vmem:[#allocation156_spill] sm:$0xff]  ;;  %v10138_v8 = vld [vmem:[#allocation161_spill] sm:$0xff] }
 0x672   :  { %7319 = vtanh.f32 %v8644_v36  ;;  %v2555_v19 = vadd.f32 0.5, %v2553_v12  ;;  %v10140_v43 = vld [vmem:[#allocation125_spill] sm:$0xff]  ;;  %v10141_v12 = vld [vmem:[#allocation126_spill] sm:$0xff] }
 0x673   :  { %7321 = vtanh.f32 %v8646_v16  ;;  %v2554_v0 = vadd.f32 0.5, %v2552_v31  ;;  %v10142_v31 = vld [vmem:[#allocation163_spill] sm:$0xff] }
 0x67c   :  { %v7320_v52 = vpop.eup %7319 }
 0x67d   :  { %v7322_v18 = vpop.eup %7321  ;;  %v8652_v25 = vmul.f32 %v7320_v52, %v2554_v0  ;;  %v10143_v52 = vld [vmem:[#allocation164_spill] sm:$0xff]  ;;  %v10146_v0 = vld [vmem:[#allocation165_spill] sm:$0xff] }
 0x67e   :  { %v8650_v56 = vmul.f32 %v7322_v18, %v2555_v19  ;;  %v10144_v19 = vld [vmem:[#allocation129_spill] sm:$0xff]  ;;  %v10145_v18 = vld [vmem:[#allocation130_spill] sm:$0xff] }
 0x680   :  { %2641 = vmatprep.mubr.f32.mxu1 %v8650_v56  ;;  %2783 = vmatprep.mubr.f32.mxu0 %v8650_v56 }
 0x681   :  { %2642 = vmatmul.mubr.f32.vlgmr.msra.gmra.mrb[18].mxu1 %v8652_v25  ;;  %2784 = vmatmul.mubr.f32.vlgmr.msra.gmra.mrb[68].mxu0 %v8652_v25 }
 0x682   :  { %5643 = vmatpush1.bf16.msra.mxu1 %v10065_v49  ;;  %2712 = vmatprep.mubr.f32.mxu1 %v8650_v56 }
 0x683   :  { %5645 = vmatprep.subr.bf16.mxu1 %v10066_v13  ;;  %5963 = vmatpush1.bf16.msra.mxu0 %v10097_v35 }
 0x684   :  { %5965 = vmatprep.subr.bf16.mxu0 %v10098_v48 }
 0x686   :  { %5647 = vmatpush1.bf16.msra.mxu1 %v10067_v9 }
 0x687   :  { %5649 = vmatprep.subr.bf16.mxu1 %v10068_v5  ;;  %5967 = vmatpush1.bf16.msra.mxu0 %v10099_v47 }
 0x688   :  { %5969 = vmatprep.subr.bf16.mxu0 %v10100_v62 }
 0x68a   :  { %5651 = vmatpush1.bf16.msra.mxu1 %v10069_v60 }
 0x68b   :  { %5653 = vmatprep.subr.bf16.mxu1 %v10070_v24  ;;  %5971 = vmatpush1.bf16.msra.mxu0 %v10101_v6 }
 0x68c   :  { %5973 = vmatprep.subr.bf16.mxu0 %v10102_v42 }
 0x68e   :  { %5655 = vmatpush1.bf16.msra.mxu1 %v10071_v50 }
 0x68f   :  { %5657 = vmatprep.subr.bf16.mxu1 %v10072_v63  ;;  %5975 = vmatpush1.bf16.msra.mxu0 %v10103_v33 }
 0x690   :  { %5977 = vmatprep.subr.bf16.mxu0 %v10104_v21 }
 0x692   :  { %5659 = vmatpush1.bf16.msra.mxu1 %v10073_v23 }
 0x693   :  { %5661 = vmatprep.subr.bf16.mxu1 %v10074_v58  ;;  %5979 = vmatpush1.bf16.msra.mxu0 %v10105_v3 }
 0x694   :  { %5981 = vmatprep.subr.bf16.mxu0 %v10106_v27 }
 0x696   :  { %5663 = vmatpush1.bf16.msra.mxu1 %v10075_v10 }
 0x697   :  { %5665 = vmatprep.subr.bf16.mxu1 %v10076_v51  ;;  %5983 = vmatpush1.bf16.msra.mxu0 %v10107_v59 }
 0x698   :  { %5985 = vmatprep.subr.bf16.mxu0 %v10108_v17 }
 0x69a   :  { %5667 = vmatpush1.bf16.msra.mxu1 %v10077_v30 }
 0x69b   :  { %5669 = vmatprep.subr.bf16.mxu1 %v10078_v26  ;;  %5987 = vmatpush1.bf16.msra.mxu0 %v10109_v7 }
 0x69c   :  { %5989 = vmatprep.subr.bf16.mxu0 %v10110_v61 }
 0x69e   :  { %5671 = vmatpush1.bf16.msra.mxu1 %v10079_v38 }
 0x69f   :  { %5673 = vmatprep.subr.bf16.mxu1 %v10080_v15  ;;  %5991 = vmatpush1.bf16.msra.mxu0 %v10111_v40 }
 0x6a0   :  { %5993 = vmatprep.subr.bf16.mxu0 %v10112_v39 }
 0x6a2   :  { %5675 = vmatpush1.bf16.msra.mxu1 %v10081_v55 }
 0x6a3   :  { %5677 = vmatprep.subr.bf16.mxu1 %v10082_v28  ;;  %5995 = vmatpush1.bf16.msra.mxu0 %v10113_v57 }
 0x6a4   :  { %5997 = vmatprep.subr.bf16.mxu0 %v10114_v32 }
 0x6a6   :  { %5679 = vmatpush1.bf16.msra.mxu1 %v10083_v45 }
 0x6a7   :  { %5681 = vmatprep.subr.bf16.mxu1 %v10084_v54  ;;  %5999 = vmatpush1.bf16.msra.mxu0 %v10115_v14 }
 0x6a8   :  { %6001 = vmatprep.subr.bf16.mxu0 %v10127_v46 }
 0x6aa   :  { %5683 = vmatpush1.bf16.msra.mxu1 %v10128_v4 }
 0x6ab   :  { %5685 = vmatprep.subr.bf16.mxu1 %v10129_v11  ;;  %6003 = vmatpush1.bf16.msra.mxu0 %v10130_v2 }
 0x6ac   :  { %6005 = vmatprep.subr.bf16.mxu0 %v10131_v37 }
 0x6ae   :  { %5687 = vmatpush1.bf16.msra.mxu1 %v10132_v34 }
 0x6af   :  { %5689 = vmatprep.subr.bf16.mxu1 %v10133_v22  ;;  %6007 = vmatpush1.bf16.msra.mxu0 %v10134_v53 }
 0x6b0   :  { %6009 = vmatprep.subr.bf16.mxu0 %v10135_v20 }
 0x6b2   :  { %5691 = vmatpush1.bf16.msra.mxu1 %v10136_v29  ;;  %v10147_v29 = vld [vmem:[#allocation166_spill] sm:$0xff] }
 0x6b3   :  { %5693 = vmatprep.subr.bf16.mxu1 %v10137_v44  ;;  %6011 = vmatpush1.bf16.msra.mxu0 %v10138_v8  ;;  %v10148_v44 = vld [vmem:[#allocation133_spill] sm:$0xff]  ;;  %v10149_v8 = vld [vmem:[#allocation63_spill] sm:$0xff] }
 0x6b4   :  { %6013 = vmatprep.subr.bf16.mxu0 %v10139_v1  ;;  %v10150_v1 = vld [vmem:[#allocation167_spill] sm:$0xff] }
 0x6b6   :  { %5695 = vmatpush1.bf16.msra.mxu1 %v10140_v43  ;;  %v10151_v43 = vld [vmem:[#allocation134_spill] sm:$0xff] }
 0x6b7   :  { %5697 = vmatprep.subr.bf16.mxu1 %v10141_v12  ;;  %6015 = vmatpush1.bf16.msra.mxu0 %v10142_v31  ;;  %v10152_v31 = vld [vmem:[#allocation64_spill] sm:$0xff] }
 0x6b8   :  { %6017 = vmatprep.subr.bf16.mxu0 %v10143_v52  ;;  %v10161_v52 = vld [vmem:[#allocation83_spill] sm:$0xff] }
 0x6ba   :  { %5699 = vmatpush1.bf16.msra.mxu1 %v10144_v19  ;;  %v10153_v19 = vld [vmem:[#allocation67_spill] sm:$0xff] }
 0x6bb   :  { %5701 = vmatprep.subr.bf16.mxu1 %v10145_v18  ;;  %6019 = vmatpush1.bf16.msra.mxu0 %v10146_v0  ;;  %v10154_v18 = vld [vmem:[#allocation68_spill] sm:$0xff]  ;;  %v10155_v0 = vld [vmem:[#allocation71_spill] sm:$0xff] }
 0x6bc   :  { %6021 = vmatprep.subr.bf16.mxu0 %v10147_v29  ;;  %v10156_v29 = vld [vmem:[#allocation72_spill] sm:$0xff] }
 0x6be   :  { %5703 = vmatpush1.bf16.msra.mxu1 %v10148_v44  ;;  %v10157_v44 = vld [vmem:[#allocation75_spill] sm:$0xff] }
 0x6bf   :  { %5769 = vmatprep.subr.bf16.mxu1 %v10149_v8  ;;  %6023 = vmatpush1.bf16.msra.mxu0 %v10150_v1  ;;  %v10158_v8 = vld [vmem:[#allocation76_spill] sm:$0xff]  ;;  %v10159_v1 = vld [vmem:[#allocation79_spill] sm:$0xff] }
 0x6c0   :  { %6217 = vmatprep.subr.bf16.mxu0 %v10151_v43  ;;  %v10160_v43 = vld [vmem:[#allocation80_spill] sm:$0xff] }
 0x6c1   :  { %2713 = vmatmul.mubr.f32.vlgmr.msra.gmra.mrb[20].mxu1 %v8652_v25 }
 0x6c2   :  { %5771 = vmatpush1.bf16.msra.mxu1 %v10152_v31  ;;  %2854 = vmatprep.mubr.f32.mxu1 %v8650_v56  ;;  %v10162_v31 = vld [vmem:[#allocation84_spill] sm:$0xff]  ;;  %v10163_v56 = vld [vmem:[#allocation87_spill] sm:$0xff] }
 0x6c3   :  { %5773 = vmatprep.subr.bf16.mxu1 %v10153_v19  ;;  %v10164_v19 = vld [vmem:[#allocation88_spill] sm:$0xff] }
 0x6c6   :  { %5775 = vmatpush1.bf16.msra.mxu1 %v10154_v18  ;;  %v10165_v18 = vld [vmem:[#allocation91_spill] sm:$0xff] }
 0x6c7   :  { %5777 = vmatprep.subr.bf16.mxu1 %v10155_v0  ;;  %v10166_v0 = vld [vmem:[#allocation94_spill] sm:$0xff] }
 0x6ca   :  { %5779 = vmatpush1.bf16.msra.mxu1 %v10156_v29  ;;  %v10167_v29 = vld [vmem:[#allocation97_spill] sm:$0xff] }
 0x6cb   :  { %5781 = vmatprep.subr.bf16.mxu1 %v10157_v44  ;;  %v10168_v44 = vld [vmem:[#allocation100_spill] sm:$0xff] }
 0x6ce   :  { %5783 = vmatpush1.bf16.msra.mxu1 %v10158_v8  ;;  %v10169_v8 = vld [vmem:[#allocation103_spill] sm:$0xff] }
 0x6cf   :  { %5785 = vmatprep.subr.bf16.mxu1 %v10159_v1  ;;  %v10170_v1 = vld [vmem:[#allocation106_spill] sm:$0xff] }
 0x6d2   :  { %5787 = vmatpush1.bf16.msra.mxu1 %v10160_v43  ;;  %v10171_v43 = vld [vmem:[#allocation109_spill] sm:$0xff] }
 0x6d3   :  { %5789 = vmatprep.subr.bf16.mxu1 %v10161_v52  ;;  %v10172_v52 = vld [vmem:[#allocation112_spill] sm:$0xff] }
 0x6d6   :  { %5791 = vmatpush1.bf16.msra.mxu1 %v10162_v31  ;;  %v10173_v31 = vld [vmem:[#allocation115_spill] sm:$0xff] }
 0x6d7   :  { %5793 = vmatprep.subr.bf16.mxu1 %v10163_v56  ;;  %v10174_v56 = vld [vmem:[#allocation118_spill] sm:$0xff] }
 0x6da   :  { %5795 = vmatpush1.bf16.msra.mxu1 %v10164_v19  ;;  %v10175_v19 = vld [vmem:[#allocation121_spill] sm:$0xff] }
 0x6db   :  { %5797 = vmatprep.subr.bf16.mxu1 %v10165_v18  ;;  %v10176_v18 = vld [vmem:[#allocation124_spill] sm:$0xff] }
 0x6de   :  { %5799 = vmatpush1.bf16.msra.mxu1 %v10166_v0  ;;  %v10177_v0 = vld [vmem:[#allocation127_spill] sm:$0xff] }
 0x6df   :  { %5801 = vmatprep.subr.bf16.mxu1 %v10167_v29  ;;  %v10178_v29 = vld [vmem:[#allocation128_spill] sm:$0xff] }
 0x6e2   :  { %5803 = vmatpush1.bf16.msra.mxu1 %v10168_v44  ;;  %v10179_v44 = vld [vmem:[#allocation131_spill] sm:$0xff] }
 0x6e3   :  { %5805 = vmatprep.subr.bf16.mxu1 %v10169_v8  ;;  %v10180_v8 = vld [vmem:[#allocation132_spill] sm:$0xff] }
 0x6e6   :  { %5807 = vmatpush1.bf16.msra.mxu1 %v10170_v1  ;;  %v10181_v1 = vld [vmem:[#allocation135_spill] sm:$0xff] }
 0x6e7   :  { %5809 = vmatprep.subr.bf16.mxu1 %v10171_v43  ;;  %v10182_v43 = vld [vmem:[#allocation136_spill] sm:$0xff] }
 0x6ea   :  { %5811 = vmatpush1.bf16.msra.mxu1 %v10172_v52  ;;  %v10183_v52 = vld [vmem:[#allocation16_spill] sm:$0xff] }
 0x6eb   :  { %5813 = vmatprep.subr.bf16.mxu1 %v10173_v31  ;;  %v10218_v31 = vld [vmem:[#allocation34_spill] sm:$0xff] }
 0x6ee   :  { %5815 = vmatpush1.bf16.msra.mxu1 %v10174_v56  ;;  %v10184_v56 = vld [vmem:[#allocation17_spill] sm:$0xff] }
 0x6ef   :  { %5817 = vmatprep.subr.bf16.mxu1 %v10175_v19  ;;  %v10185_v19 = vld [vmem:[#allocation18_spill] sm:$0xff] }
 0x6f2   :  { %5819 = vmatpush1.bf16.msra.mxu1 %v10176_v18  ;;  %v10186_v18 = vld [vmem:[#allocation19_spill] sm:$0xff] }
 0x6f3   :  { %5821 = vmatprep.subr.bf16.mxu1 %v10177_v0  ;;  %v10187_v0 = vld [vmem:[#allocation20_spill] sm:$0xff] }
 0x6f6   :  { %5823 = vmatpush1.bf16.msra.mxu1 %v10178_v29  ;;  %v10188_v29 = vld [vmem:[#allocation21_spill] sm:$0xff] }
 0x6f7   :  { %5825 = vmatprep.subr.bf16.mxu1 %v10179_v44  ;;  %v10189_v44 = vld [vmem:[#allocation22_spill] sm:$0xff] }
 0x6fa   :  { %5827 = vmatpush1.bf16.msra.mxu1 %v10180_v8  ;;  %v10190_v8 = vld [vmem:[#allocation23_spill] sm:$0xff] }
 0x6fb   :  { %5829 = vmatprep.subr.bf16.mxu1 %v10181_v1  ;;  %v10191_v1 = vld [vmem:[#allocation24_spill] sm:$0xff] }
 0x6fe   :  { %5831 = vmatpush1.bf16.msra.mxu1 %v10182_v43  ;;  %v10192_v43 = vld [vmem:[#allocation25_spill] sm:$0xff] }
 0x6ff   :  { %5833 = vmatprep.subr.bf16.mxu1 %v10183_v52  ;;  %v10193_v52 = vld [vmem:[#allocation26_spill] sm:$0xff] }
 0x701   :  { %2855 = vmatmul.mubr.f32.vlgmr.msra.gmra.mrb[22].mxu1 %v8652_v25  ;;  %v10194_v25 = vld [vmem:[#allocation27_spill] sm:$0xff] }
 0x702   :  { %5835 = vmatpush1.bf16.msra.mxu1 %v10184_v56  ;;  %v10195_v56 = vld [vmem:[#allocation28_spill] sm:$0xff] }
 0x703   :  { %5837 = vmatprep.subr.bf16.mxu1 %v10185_v19  ;;  %v10196_v19 = vld [vmem:[#allocation29_spill] sm:$0xff] }
 0x706   :  { %5839 = vmatpush1.bf16.msra.mxu1 %v10186_v18  ;;  %v10197_v18 = vld [vmem:[#allocation30_spill] sm:$0xff] }
 0x707   :  { %5841 = vmatprep.subr.bf16.mxu1 %v10187_v0  ;;  %v10198_v0 = vld [vmem:[#allocation31_spill] sm:$0xff] }
 0x70a   :  { %5843 = vmatpush1.bf16.msra.mxu1 %v10188_v29  ;;  %v10199_v29 = vld [vmem:[#allocation32_spill] sm:$0xff] }
 0x70b   :  { %5845 = vmatprep.subr.bf16.mxu1 %v10189_v44  ;;  %v10200_v44 = vld [vmem:[#allocation35_spill] sm:$0xff] }
 0x70e   :  { %5847 = vmatpush1.bf16.msra.mxu1 %v10190_v8  ;;  %v10201_v8 = vld [vmem:[#allocation36_spill] sm:$0xff] }
 0x70f   :  { %5849 = vmatprep.subr.bf16.mxu1 %v10191_v1  ;;  %v10202_v1 = vld [vmem:[#allocation39_spill] sm:$0xff] }
 0x712   :  { %5851 = vmatpush1.bf16.msra.mxu1 %v10192_v43  ;;  %v10203_v43 = vld [vmem:[#allocation40_spill] sm:$0xff] }
 0x713   :  { %5853 = vmatprep.subr.bf16.mxu1 %v10193_v52  ;;  %v10204_v52 = vld [vmem:[#allocation43_spill] sm:$0xff] }
 0x716   :  { %5855 = vmatpush1.bf16.msra.mxu1 %v10194_v25  ;;  %v10205_v25 = vld [vmem:[#allocation44_spill] sm:$0xff] }
 0x717   :  { %5857 = vmatprep.subr.bf16.mxu1 %v10195_v56  ;;  %v10206_v56 = vld [vmem:[#allocation47_spill] sm:$0xff] }
 0x71a   :  { %5859 = vmatpush1.bf16.msra.mxu1 %v10196_v19  ;;  %v10207_v19 = vld [vmem:[#allocation48_spill] sm:$0xff] }
 0x71b   :  { %5861 = vmatprep.subr.bf16.mxu1 %v10197_v18  ;;  %v10208_v18 = vld [vmem:[#allocation51_spill] sm:$0xff] }
 0x71e   :  { %5863 = vmatpush1.bf16.msra.mxu1 %v10198_v0  ;;  %v10209_v0 = vld [vmem:[#allocation52_spill] sm:$0xff] }
 0x71f   :  { %5865 = vmatprep.subr.bf16.mxu1 %v10199_v29  ;;  %v10210_v29 = vld [vmem:[#allocation55_spill] sm:$0xff] }
 0x722   :  { %5867 = vmatpush1.bf16.msra.mxu1 %v10200_v44  ;;  %v10211_v44 = vld [vmem:[#allocation56_spill] sm:$0xff] }
 0x723   :  { %5869 = vmatprep.subr.bf16.mxu1 %v10201_v8  ;;  %v10212_v8 = vld [vmem:[#allocation57_spill] sm:$0xff] }
 0x726   :  { %5871 = vmatpush1.bf16.msra.mxu1 %v10202_v1  ;;  %v10213_v1 = vld [vmem:[#allocation58_spill] sm:$0xff] }
 0x727   :  { %5873 = vmatprep.subr.bf16.mxu1 %v10203_v43  ;;  %v10214_v43 = vld [vmem:[#allocation59_spill] sm:$0xff] }
 0x72a   :  { %5875 = vmatpush1.bf16.msra.mxu1 %v10204_v52  ;;  %v10215_v52 = vld [vmem:[#allocation60_spill] sm:$0xff] }
 0x72b   :  { %5877 = vmatprep.subr.bf16.mxu1 %v10205_v25 }
 0x72e   :  { %5879 = vmatpush1.bf16.msra.mxu1 %v10206_v56  ;;  %v10216_v56 = vld [vmem:[#allocation33_spill] sm:$0xff] }
 0x72f   :  { %5881 = vmatprep.subr.bf16.mxu1 %v10207_v19  ;;  %v1195_v25 = vadd.f32 %v10216_v56, %v10123_v41  ;;  %v10217_v19 = vld [vmem:[#allocation15_spill] sm:$0xff] }
 0x732   :  { %5883 = vmatpush1.bf16.msra.mxu1 %v10208_v18  ;;  %v1197_v18 = vadd.f32 %v10218_v31, %v10217_v19 }
 0x733   :  { %5885 = vmatprep.subr.bf16.mxu1 %v10209_v0 }
 0x736   :  { %5887 = vmatpush1.bf16.msra.mxu1 %v10210_v29 }
 0x737   :  { %5889 = vmatprep.subr.bf16.mxu1 %v10211_v44 }
 0x73a   :  { %5891 = vmatpush1.bf16.msra.mxu1 %v10212_v8 }
 0x73b   :  { %5893 = vmatprep.subr.bf16.mxu1 %v10213_v1  ;;  %v10219_v1 = vld [vmem:[#allocation181_spill] sm:$0xff] }
 0x73e   :  { %5895 = vmatpush1.bf16.msra.mxu1 %v10214_v43  ;;  %v10220_v43 = vld [vmem:[#allocation182_spill] sm:$0xff] }
 0x73f   :  { %5897 = vmatprep.subr.bf16.mxu1 %v10215_v52 }
 0x754   :  { %v2643_v12 = vpop.f32.mrb[18].mxu1  ;;  %v2785_v0 = vpop.f32.mrb[68].mxu0 }
 0x755   :  { %v2861_v20 = vadd.f32 %v2643_v12, %v1195_v25  ;;  %v2645_v29 = vpop.f32.mrb[19].mxu1  ;;  %v2787_v53 = vpop.f32.mrb[69].mxu0  ;;  %v7188_v34 = vadd.f32 %v2785_v0, %v10219_v1  ;;  %v10224_v0 = vld [vmem:[#allocation93_spill] sm:$0xff] }
 0x756   :  { %v2862_v44 = vadd.f32 %v2645_v29, %v1197_v18  ;;  %v7189_v52 = vadd.f32 %v2787_v53, %v10220_v43  ;;  %v10223_v18 = vld [vmem:[#allocation180_spill] sm:$0xff] }
 0x757   :  { %v2869_v22 = vmul.f32 0.5, %v2861_v20  ;;  %v10221_v20 = vld [vmem:[#allocation13_spill] sm:$0xff] }
 0x758   :  { %v2870_v8 = vmul.f32 0.5, %v2862_v44  ;;  %v10222_v44 = vld [vmem:[#allocation92_spill] sm:$0xff] }
 0x759   :  { %7323 = vtanh.f32 %v2869_v22  ;;  %v1308_v22 = vadd.f32 %v10222_v44, %v10221_v20 }
 0x75a   :  { %7325 = vtanh.f32 %v2870_v8  ;;  %v1310_v8 = vadd.f32 %v10224_v0, %v10223_v18 }
 0x75b   :  { %7327 = vtanh.f32 %v7188_v34 }
 0x75c   :  { %7329 = vtanh.f32 %v7189_v52 }
 0x763   :  { %v7324_v56 = vpop.eup %7323 }
 0x764   :  { %v7326_v41 = vpop.eup %7325  ;;  %v2873_v37 = vmul.f32 0.5, %v7324_v56 }
 0x765   :  { %v2874_v31 = vmul.f32 0.5, %v7326_v41  ;;  %v7328_v2 = vpop.eup %7327 }
 0x766   :  { %v2875_v19 = vadd.f32 0.5, %v2873_v37  ;;  %v7330_v25 = vpop.eup %7329 }
 0x767   :  { %v2876_v12 = vadd.f32 0.5, %v2874_v31 }
 0x768   :  { %v2897_v11 = vmul.f32 %v7328_v2, %v2875_v19 }
 0x769   :  { %v2898_v29 = vmul.f32 %v7330_v25, %v2876_v12 }
 0x794   :  { %v2714_v1 = vpop.f32.mrb[20].mxu1 }
 0x795   :  { %v2863_v53 = vadd.f32 %v2714_v1, %v1308_v22  ;;  %v2716_v34 = vpop.f32.mrb[21].mxu1  ;;  %v10225_v1 = vld [vmem:[#allocation183_spill] sm:$0xff]  ;;  %v10226_v22 = vld [vmem:[#allocation168_spill] sm:$0xff] }
 0x796   :  { %v2864_v52 = vadd.f32 %v2716_v34, %v1310_v8  ;;  %v1534_v8 = vadd.f32 %v10226_v22, %v10225_v1 }
 0x797   :  { %v2877_v43 = vmul.f32 0.5, %v2863_v53  ;;  %v10227_v53 = vld [vmem:[#allocation184_spill] sm:$0xff] }
 0x798   :  { %v2878_v4 = vmul.f32 0.5, %v2864_v52 }
 0x799   :  { %7331 = vtanh.f32 %v2877_v43  ;;  %v10228_v43 = vld [vmem:[#allocation169_spill] sm:$0xff] }
 0x79a   :  { %7333 = vtanh.f32 %v2878_v4  ;;  %v1536_v4 = vadd.f32 %v10228_v43, %v10227_v53  ;;  %v10229_v43 = vld [vmem:[#allocation107_spill] sm:$0xff] }
 0x7a3   :  { %v7332_v41 = vpop.eup %7331 }
 0x7a4   :  { %v7334_v37 = vpop.eup %7333  ;;  %v2881_v56 = vmul.f32 0.5, %v7332_v41 }
 0x7a5   :  { %v2882_v31 = vmul.f32 0.5, %v7334_v37 }
 0x7a6   :  { %v2883_v2 = vadd.f32 0.5, %v2881_v56 }
 0x7a7   :  { %v2884_v19 = vadd.f32 0.5, %v2882_v31 }
 0x7a8   :  { %v2895_v12 = vmul.f32 %v2883_v2, %v8644_v36 }
 0x7a9   :  { %v2896_v25 = vmul.f32 %v2884_v19, %v8646_v16 }
 0x7aa   :  { %v8802_v44 = vadd.f32 %v2897_v11, %v2895_v12 }
 0x7ab   :  { %v8804_v0 = vadd.f32 %v2898_v29, %v2896_v25 }
 0x7d4   :  { %v2856_v34 = vpop.f32.mrb[22].mxu1 }
 0x7d5   :  { %v2867_v52 = vadd.f32 %v2856_v34, %v1534_v8  ;;  %v2858_v41 = vpop.f32.mrb[23].mxu1  ;;  %v10231_v34 = vld [vmem:[#allocation157_spill] sm:$0xff] }
 0x7d6   :  { %v2868_v37 = vadd.f32 %v2858_v41, %v1536_v4  ;;  %v10230_v4 = vld [vmem:[#allocation108_spill] sm:$0xff]  ;;  %v10233_v41 = vld [vmem:[#allocation113_spill] sm:$0xff] }
 0x7d7   :  { %v2887_v56 = vmul.f32 0.5, %v2867_v52  ;;  %v10232_v52 = vld [vmem:[#allocation158_spill] sm:$0xff] }
 0x7d8   :  { %v2888_v31 = vmul.f32 0.5, %v2868_v37  ;;  %v10234_v37 = vld [vmem:[#allocation114_spill] sm:$0xff] }
 0x7d9   :  { %7335 = vtanh.f32 %v2887_v56  ;;  %v10235_v56 = vld [vmem:[#allocation159_spill] sm:$0xff] }
 0x7da   :  { %7337 = vtanh.f32 %v2888_v31  ;;  %v10236_v31 = vld [vmem:[#allocation160_spill] sm:$0xff] }
 0x7db   :  { %7339 = vtanh.f32 %v8804_v0 }
 0x7dc   :  { %7341 = vtanh.f32 %v8802_v44 }
 0x7e3   :  { %v7336_v36 = vpop.eup %7335 }
 0x7e4   :  { %v7338_v16 = vpop.eup %7337  ;;  %v2891_v11 = vmul.f32 0.5, %v7336_v36  ;;  %v10237_v36 = vld [vmem:[#allocation119_spill] sm:$0xff] }
 0x7e5   :  { %v2892_v29 = vmul.f32 0.5, %v7338_v16  ;;  %v7340_v12 = vpop.eup %7339  ;;  %v10238_v16 = vld [vmem:[#allocation120_spill] sm:$0xff] }
 0x7e6   :  { %v2893_v2 = vadd.f32 0.5, %v2891_v11  ;;  %v7342_v25 = vpop.eup %7341  ;;  %v10239_v11 = vld [vmem:[#allocation161_spill] sm:$0xff] }
 0x7e7   :  { %v2894_v19 = vadd.f32 0.5, %v2892_v29  ;;  %v10240_v29 = vld [vmem:[#allocation162_spill] sm:$0xff] }
 0x7e8   :  { %v8814_v8 = vmul.f32 %v7342_v25, %v2893_v2  ;;  %v10241_v2 = vld [vmem:[#allocation125_spill] sm:$0xff]  ;;  %v10244_v25 = vld [vmem:[#allocation164_spill] sm:$0xff] }
 0x7e9   :  { %v8812_v22 = vmul.f32 %v7340_v12, %v2894_v19  ;;  %v10242_v19 = vld [vmem:[#allocation126_spill] sm:$0xff]  ;;  %v10243_v12 = vld [vmem:[#allocation163_spill] sm:$0xff] }
 0x7eb   :  { %2980 = vmatprep.mubr.f32.mxu1 %v8812_v22  ;;  %3122 = vmatprep.mubr.f32.mxu0 %v8812_v22 }
 0x7ec   :  { %2981 = vmatmul.mubr.f32.vlgmr.msra.gmra.mrb[24].mxu1 %v8814_v8  ;;  %3123 = vmatmul.mubr.f32.vlgmr.msra.gmra.mrb[70].mxu0 %v8814_v8 }
 0x7ed   :  { %5899 = vmatpush1.bf16.msra.mxu1 %v10065_v49  ;;  %3051 = vmatprep.mubr.f32.mxu1 %v8812_v22 }
 0x7ee   :  { %5901 = vmatprep.subr.bf16.mxu1 %v10066_v13  ;;  %6219 = vmatpush1.bf16.msra.mxu0 %v10097_v35 }
 0x7ef   :  { %6221 = vmatprep.subr.bf16.mxu0 %v10098_v48 }
 0x7f1   :  { %5903 = vmatpush1.bf16.msra.mxu1 %v10067_v9 }
 0x7f2   :  { %5905 = vmatprep.subr.bf16.mxu1 %v10068_v5  ;;  %6223 = vmatpush1.bf16.msra.mxu0 %v10099_v47 }
 0x7f3   :  { %6225 = vmatprep.subr.bf16.mxu0 %v10100_v62 }
 0x7f5   :  { %5907 = vmatpush1.bf16.msra.mxu1 %v10069_v60 }
 0x7f6   :  { %5909 = vmatprep.subr.bf16.mxu1 %v10070_v24  ;;  %6227 = vmatpush1.bf16.msra.mxu0 %v10101_v6 }
 0x7f7   :  { %6229 = vmatprep.subr.bf16.mxu0 %v10102_v42 }
 0x7f9   :  { %5911 = vmatpush1.bf16.msra.mxu1 %v10071_v50 }
 0x7fa   :  { %5913 = vmatprep.subr.bf16.mxu1 %v10072_v63  ;;  %6231 = vmatpush1.bf16.msra.mxu0 %v10103_v33 }
 0x7fb   :  { %6233 = vmatprep.subr.bf16.mxu0 %v10104_v21 }
 0x7fd   :  { %5915 = vmatpush1.bf16.msra.mxu1 %v10073_v23 }
 0x7fe   :  { %5917 = vmatprep.subr.bf16.mxu1 %v10074_v58  ;;  %6235 = vmatpush1.bf16.msra.mxu0 %v10105_v3 }
 0x7ff   :  { %6237 = vmatprep.subr.bf16.mxu0 %v10106_v27 }
 0x801   :  { %5919 = vmatpush1.bf16.msra.mxu1 %v10075_v10 }
 0x802   :  { %5921 = vmatprep.subr.bf16.mxu1 %v10076_v51  ;;  %6239 = vmatpush1.bf16.msra.mxu0 %v10107_v59 }
 0x803   :  { %6241 = vmatprep.subr.bf16.mxu0 %v10108_v17 }
 0x805   :  { %5923 = vmatpush1.bf16.msra.mxu1 %v10077_v30 }
 0x806   :  { %5925 = vmatprep.subr.bf16.mxu1 %v10078_v26  ;;  %6243 = vmatpush1.bf16.msra.mxu0 %v10109_v7 }
 0x807   :  { %6245 = vmatprep.subr.bf16.mxu0 %v10110_v61 }
 0x809   :  { %5927 = vmatpush1.bf16.msra.mxu1 %v10079_v38 }
 0x80a   :  { %5929 = vmatprep.subr.bf16.mxu1 %v10080_v15  ;;  %6247 = vmatpush1.bf16.msra.mxu0 %v10111_v40 }
 0x80b   :  { %6249 = vmatprep.subr.bf16.mxu0 %v10112_v39 }
 0x80d   :  { %5931 = vmatpush1.bf16.msra.mxu1 %v10081_v55 }
 0x80e   :  { %5933 = vmatprep.subr.bf16.mxu1 %v10082_v28  ;;  %6251 = vmatpush1.bf16.msra.mxu0 %v10113_v57 }
 0x80f   :  { %6253 = vmatprep.subr.bf16.mxu0 %v10114_v32 }
 0x811   :  { %5935 = vmatpush1.bf16.msra.mxu1 %v10083_v45 }
 0x812   :  { %5937 = vmatprep.subr.bf16.mxu1 %v10084_v54  ;;  %6255 = vmatpush1.bf16.msra.mxu0 %v10115_v14 }
 0x813   :  { %6257 = vmatprep.subr.bf16.mxu0 %v10127_v46 }
 0x815   :  { %5939 = vmatpush1.bf16.msra.mxu1 %v10229_v43 }
 0x816   :  { %5941 = vmatprep.subr.bf16.mxu1 %v10230_v4  ;;  %6259 = vmatpush1.bf16.msra.mxu0 %v10231_v34 }
 0x817   :  { %6261 = vmatprep.subr.bf16.mxu0 %v10232_v52 }
 0x819   :  { %5943 = vmatpush1.bf16.msra.mxu1 %v10233_v41 }
 0x81a   :  { %5945 = vmatprep.subr.bf16.mxu1 %v10234_v37  ;;  %6263 = vmatpush1.bf16.msra.mxu0 %v10235_v56  ;;  %v10245_v37 = vld [vmem:[#allocation129_spill] sm:$0xff]  ;;  %v10246_v56 = vld [vmem:[#allocation130_spill] sm:$0xff] }
 0x81b   :  { %6265 = vmatprep.subr.bf16.mxu0 %v10236_v31  ;;  %v10247_v31 = vld [vmem:[#allocation165_spill] sm:$0xff] }
 0x81d   :  { %5947 = vmatpush1.bf16.msra.mxu1 %v10237_v36  ;;  %v10248_v36 = vld [vmem:[#allocation166_spill] sm:$0xff] }
 0x81e   :  { %5949 = vmatprep.subr.bf16.mxu1 %v10238_v16  ;;  %6267 = vmatpush1.bf16.msra.mxu0 %v10239_v11  ;;  %v10249_v16 = vld [vmem:[#allocation133_spill] sm:$0xff]  ;;  %v10250_v11 = vld [vmem:[#allocation63_spill] sm:$0xff] }
 0x81f   :  { %6269 = vmatprep.subr.bf16.mxu0 %v10240_v29  ;;  %v10251_v29 = vld [vmem:[#allocation167_spill] sm:$0xff] }
 0x821   :  { %5951 = vmatpush1.bf16.msra.mxu1 %v10241_v2  ;;  %v10252_v2 = vld [vmem:[#allocation134_spill] sm:$0xff] }
 0x822   :  { %5953 = vmatprep.subr.bf16.mxu1 %v10242_v19  ;;  %6271 = vmatpush1.bf16.msra.mxu0 %v10243_v12  ;;  %v10253_v12 = vld [vmem:[#allocation64_spill] sm:$0xff]  ;;  %v10320_v19 = vld [vmem:[#allocation38_spill] sm:$0xff] }
 0x823   :  { %6273 = vmatprep.subr.bf16.mxu0 %v10244_v25  ;;  %v10262_v25 = vld [vmem:[#allocation83_spill] sm:$0xff] }
 0x825   :  { %5955 = vmatpush1.bf16.msra.mxu1 %v10245_v37  ;;  %v10254_v37 = vld [vmem:[#allocation67_spill] sm:$0xff] }
 0x826   :  { %5957 = vmatprep.subr.bf16.mxu1 %v10246_v56  ;;  %6275 = vmatpush1.bf16.msra.mxu0 %v10247_v31  ;;  %v10255_v56 = vld [vmem:[#allocation68_spill] sm:$0xff]  ;;  %v10256_v31 = vld [vmem:[#allocation71_spill] sm:$0xff] }
 0x827   :  { %6277 = vmatprep.subr.bf16.mxu0 %v10248_v36  ;;  %v10257_v36 = vld [vmem:[#allocation72_spill] sm:$0xff] }
 0x829   :  { %5959 = vmatpush1.bf16.msra.mxu1 %v10249_v16  ;;  %v10258_v16 = vld [vmem:[#allocation75_spill] sm:$0xff] }
 0x82a   :  { %6025 = vmatprep.subr.bf16.mxu1 %v10250_v11  ;;  %6279 = vmatpush1.bf16.msra.mxu0 %v10251_v29  ;;  %v10259_v11 = vld [vmem:[#allocation76_spill] sm:$0xff]  ;;  %v10260_v29 = vld [vmem:[#allocation79_spill] sm:$0xff] }
 0x82b   :  { %6473 = vmatprep.subr.bf16.mxu0 %v10252_v2  ;;  %v10261_v2 = vld [vmem:[#allocation80_spill] sm:$0xff] }
 0x82c   :  { %3052 = vmatmul.mubr.f32.vlgmr.msra.gmra.mrb[26].mxu1 %v8814_v8 }
 0x82d   :  { %6027 = vmatpush1.bf16.msra.mxu1 %v10253_v12  ;;  %3193 = vmatprep.mubr.f32.mxu1 %v8812_v22  ;;  %v10263_v12 = vld [vmem:[#allocation84_spill] sm:$0xff]  ;;  %v10264_v22 = vld [vmem:[#allocation87_spill] sm:$0xff] }
 0x82e   :  { %6029 = vmatprep.subr.bf16.mxu1 %v10254_v37  ;;  %v10265_v37 = vld [vmem:[#allocation88_spill] sm:$0xff] }
 0x831   :  { %6031 = vmatpush1.bf16.msra.mxu1 %v10255_v56  ;;  %v10266_v56 = vld [vmem:[#allocation91_spill] sm:$0xff] }
 0x832   :  { %6033 = vmatprep.subr.bf16.mxu1 %v10256_v31  ;;  %v10267_v31 = vld [vmem:[#allocation94_spill] sm:$0xff] }
 0x835   :  { %6035 = vmatpush1.bf16.msra.mxu1 %v10257_v36  ;;  %v10268_v36 = vld [vmem:[#allocation97_spill] sm:$0xff] }
 0x836   :  { %6037 = vmatprep.subr.bf16.mxu1 %v10258_v16  ;;  %v10269_v16 = vld [vmem:[#allocation100_spill] sm:$0xff] }
 0x839   :  { %6039 = vmatpush1.bf16.msra.mxu1 %v10259_v11  ;;  %v10270_v11 = vld [vmem:[#allocation103_spill] sm:$0xff] }
 0x83a   :  { %6041 = vmatprep.subr.bf16.mxu1 %v10260_v29  ;;  %v10271_v29 = vld [vmem:[#allocation106_spill] sm:$0xff] }
 0x83d   :  { %6043 = vmatpush1.bf16.msra.mxu1 %v10261_v2  ;;  %v10272_v2 = vld [vmem:[#allocation109_spill] sm:$0xff] }
 0x83e   :  { %6045 = vmatprep.subr.bf16.mxu1 %v10262_v25  ;;  %v10273_v25 = vld [vmem:[#allocation112_spill] sm:$0xff] }
 0x841   :  { %6047 = vmatpush1.bf16.msra.mxu1 %v10263_v12  ;;  %v10274_v12 = vld [vmem:[#allocation115_spill] sm:$0xff] }
 0x842   :  { %6049 = vmatprep.subr.bf16.mxu1 %v10264_v22  ;;  %v10275_v22 = vld [vmem:[#allocation118_spill] sm:$0xff] }
 0x845   :  { %6051 = vmatpush1.bf16.msra.mxu1 %v10265_v37  ;;  %v10276_v37 = vld [vmem:[#allocation121_spill] sm:$0xff] }
 0x846   :  { %6053 = vmatprep.subr.bf16.mxu1 %v10266_v56  ;;  %v10277_v56 = vld [vmem:[#allocation124_spill] sm:$0xff] }
 0x849   :  { %6055 = vmatpush1.bf16.msra.mxu1 %v10267_v31  ;;  %v10278_v31 = vld [vmem:[#allocation127_spill] sm:$0xff] }
 0x84a   :  { %6057 = vmatprep.subr.bf16.mxu1 %v10268_v36  ;;  %v10279_v36 = vld [vmem:[#allocation128_spill] sm:$0xff] }
 0x84d   :  { %6059 = vmatpush1.bf16.msra.mxu1 %v10269_v16  ;;  %v10280_v16 = vld [vmem:[#allocation131_spill] sm:$0xff] }
 0x84e   :  { %6061 = vmatprep.subr.bf16.mxu1 %v10270_v11  ;;  %v10281_v11 = vld [vmem:[#allocation132_spill] sm:$0xff] }
 0x851   :  { %6063 = vmatpush1.bf16.msra.mxu1 %v10271_v29  ;;  %v10282_v29 = vld [vmem:[#allocation135_spill] sm:$0xff] }
 0x852   :  { %6065 = vmatprep.subr.bf16.mxu1 %v10272_v2  ;;  %v10283_v2 = vld [vmem:[#allocation136_spill] sm:$0xff] }
 0x855   :  { %6067 = vmatpush1.bf16.msra.mxu1 %v10273_v25  ;;  %v10284_v25 = vld [vmem:[#allocation16_spill] sm:$0xff] }
 0x856   :  { %6069 = vmatprep.subr.bf16.mxu1 %v10274_v12 }
 0x859   :  { %6071 = vmatpush1.bf16.msra.mxu1 %v10275_v22  ;;  %v10285_v22 = vld [vmem:[#allocation17_spill] sm:$0xff] }
 0x85a   :  { %6073 = vmatprep.subr.bf16.mxu1 %v10276_v37  ;;  %v10286_v37 = vld [vmem:[#allocation18_spill] sm:$0xff] }
 0x85d   :  { %6075 = vmatpush1.bf16.msra.mxu1 %v10277_v56  ;;  %v10287_v56 = vld [vmem:[#allocation19_spill] sm:$0xff] }
 0x85e   :  { %6077 = vmatprep.subr.bf16.mxu1 %v10278_v31  ;;  %v10288_v31 = vld [vmem:[#allocation20_spill] sm:$0xff] }
 0x861   :  { %6079 = vmatpush1.bf16.msra.mxu1 %v10279_v36  ;;  %v10289_v36 = vld [vmem:[#allocation21_spill] sm:$0xff] }
 0x862   :  { %6081 = vmatprep.subr.bf16.mxu1 %v10280_v16  ;;  %v10290_v16 = vld [vmem:[#allocation22_spill] sm:$0xff] }
 0x865   :  { %6083 = vmatpush1.bf16.msra.mxu1 %v10281_v11  ;;  %v10291_v11 = vld [vmem:[#allocation23_spill] sm:$0xff] }
 0x866   :  { %6085 = vmatprep.subr.bf16.mxu1 %v10282_v29  ;;  %v10292_v29 = vld [vmem:[#allocation24_spill] sm:$0xff] }
 0x869   :  { %6087 = vmatpush1.bf16.msra.mxu1 %v10283_v2  ;;  %v10293_v2 = vld [vmem:[#allocation25_spill] sm:$0xff] }
 0x86a   :  { %6089 = vmatprep.subr.bf16.mxu1 %v10284_v25  ;;  %v10294_v25 = vld [vmem:[#allocation26_spill] sm:$0xff] }
 0x86c   :  { %3194 = vmatmul.mubr.f32.vlgmr.msra.gmra.mrb[28].mxu1 %v8814_v8  ;;  %v10295_v8 = vld [vmem:[#allocation27_spill] sm:$0xff] }
 0x86d   :  { %6091 = vmatpush1.bf16.msra.mxu1 %v10285_v22  ;;  %v10296_v22 = vld [vmem:[#allocation28_spill] sm:$0xff] }
 0x86e   :  { %6093 = vmatprep.subr.bf16.mxu1 %v10286_v37  ;;  %v10297_v37 = vld [vmem:[#allocation29_spill] sm:$0xff] }
 0x871   :  { %6095 = vmatpush1.bf16.msra.mxu1 %v10287_v56  ;;  %v10298_v56 = vld [vmem:[#allocation30_spill] sm:$0xff] }
 0x872   :  { %6097 = vmatprep.subr.bf16.mxu1 %v10288_v31  ;;  %v10299_v31 = vld [vmem:[#allocation31_spill] sm:$0xff] }
 0x875   :  { %6099 = vmatpush1.bf16.msra.mxu1 %v10289_v36  ;;  %v10300_v36 = vld [vmem:[#allocation32_spill] sm:$0xff] }
 0x876   :  { %6101 = vmatprep.subr.bf16.mxu1 %v10290_v16  ;;  %v10301_v16 = vld [vmem:[#allocation35_spill] sm:$0xff] }
 0x879   :  { %6103 = vmatpush1.bf16.msra.mxu1 %v10291_v11  ;;  %v10302_v11 = vld [vmem:[#allocation36_spill] sm:$0xff] }
 0x87a   :  { %6105 = vmatprep.subr.bf16.mxu1 %v10292_v29  ;;  %v10303_v29 = vld [vmem:[#allocation39_spill] sm:$0xff] }
 0x87d   :  { %6107 = vmatpush1.bf16.msra.mxu1 %v10293_v2  ;;  %v10304_v2 = vld [vmem:[#allocation40_spill] sm:$0xff] }
 0x87e   :  { %6109 = vmatprep.subr.bf16.mxu1 %v10294_v25  ;;  %v10305_v25 = vld [vmem:[#allocation43_spill] sm:$0xff] }
 0x881   :  { %6111 = vmatpush1.bf16.msra.mxu1 %v10295_v8  ;;  %v10306_v8 = vld [vmem:[#allocation44_spill] sm:$0xff] }
 0x882   :  { %6113 = vmatprep.subr.bf16.mxu1 %v10296_v22  ;;  %v10307_v22 = vld [vmem:[#allocation47_spill] sm:$0xff] }
 0x885   :  { %6115 = vmatpush1.bf16.msra.mxu1 %v10297_v37  ;;  %v10308_v37 = vld [vmem:[#allocation48_spill] sm:$0xff] }
 0x886   :  { %6117 = vmatprep.subr.bf16.mxu1 %v10298_v56  ;;  %v10309_v56 = vld [vmem:[#allocation51_spill] sm:$0xff] }
 0x889   :  { %6119 = vmatpush1.bf16.msra.mxu1 %v10299_v31  ;;  %v10310_v31 = vld [vmem:[#allocation52_spill] sm:$0xff] }
 0x88a   :  { %6121 = vmatprep.subr.bf16.mxu1 %v10300_v36  ;;  %v10311_v36 = vld [vmem:[#allocation55_spill] sm:$0xff] }
 0x88d   :  { %6123 = vmatpush1.bf16.msra.mxu1 %v10301_v16  ;;  %v10312_v16 = vld [vmem:[#allocation56_spill] sm:$0xff] }
 0x88e   :  { %6125 = vmatprep.subr.bf16.mxu1 %v10302_v11  ;;  %v10313_v11 = vld [vmem:[#allocation57_spill] sm:$0xff] }
 0x891   :  { %6127 = vmatpush1.bf16.msra.mxu1 %v10303_v29  ;;  %v10314_v29 = vld [vmem:[#allocation58_spill] sm:$0xff] }
 0x892   :  { %6129 = vmatprep.subr.bf16.mxu1 %v10304_v2  ;;  %v10315_v2 = vld [vmem:[#allocation59_spill] sm:$0xff] }
 0x895   :  { %6131 = vmatpush1.bf16.msra.mxu1 %v10305_v25  ;;  %v10316_v25 = vld [vmem:[#allocation60_spill] sm:$0xff] }
 0x896   :  { %6133 = vmatprep.subr.bf16.mxu1 %v10306_v8  ;;  %v10317_v8 = vld [vmem:[#allocation14_spill] sm:$0xff] }
 0x899   :  { %6135 = vmatpush1.bf16.msra.mxu1 %v10307_v22  ;;  %v10318_v22 = vld [vmem:[#allocation37_spill] sm:$0xff] }
 0x89a   :  { %6137 = vmatprep.subr.bf16.mxu1 %v10308_v37  ;;  %v1201_v12 = vadd.f32 %v10318_v22, %v10317_v8  ;;  %v10319_v37 = vld [vmem:[#allocation15_spill] sm:$0xff] }
 0x89d   :  { %6139 = vmatpush1.bf16.msra.mxu1 %v10309_v56  ;;  %v1203_v56 = vadd.f32 %v10320_v19, %v10319_v37 }
 0x89e   :  { %6141 = vmatprep.subr.bf16.mxu1 %v10310_v31 }
 0x8a1   :  { %6143 = vmatpush1.bf16.msra.mxu1 %v10311_v36 }
 0x8a2   :  { %6145 = vmatprep.subr.bf16.mxu1 %v10312_v16 }
 0x8a5   :  { %6147 = vmatpush1.bf16.msra.mxu1 %v10313_v11 }
 0x8a6   :  { %6149 = vmatprep.subr.bf16.mxu1 %v10314_v29  ;;  %v10321_v29 = vld [vmem:[#allocation181_spill] sm:$0xff] }
 0x8a9   :  { %6151 = vmatpush1.bf16.msra.mxu1 %v10315_v2  ;;  %v10322_v2 = vld [vmem:[#allocation182_spill] sm:$0xff] }
 0x8aa   :  { %6153 = vmatprep.subr.bf16.mxu1 %v10316_v25 }
 0x8bf   :  { %v2982_v41 = vpop.f32.mrb[24].mxu1  ;;  %v3124_v31 = vpop.f32.mrb[70].mxu0 }
 0x8c0   :  { %v3200_v52 = vadd.f32 %v2982_v41, %v1201_v12  ;;  %v2984_v36 = vpop.f32.mrb[25].mxu1  ;;  %v3126_v34 = vpop.f32.mrb[71].mxu0  ;;  %v7190_v43 = vadd.f32 %v3124_v31, %v10321_v29  ;;  %v10324_v31 = vld [vmem:[#allocation99_spill] sm:$0xff] }
 0x8c1   :  { %v3201_v16 = vadd.f32 %v2984_v36, %v1203_v56  ;;  %v7191_v25 = vadd.f32 %v3126_v34, %v10322_v2  ;;  %v1316_v36 = vadd.f32 %v10324_v31, %v10223_v18 }
 0x8c2   :  { %v3208_v4 = vmul.f32 0.5, %v3200_v52  ;;  %v10323_v52 = vld [vmem:[#allocation98_spill] sm:$0xff] }
 0x8c3   :  { %v3209_v11 = vmul.f32 0.5, %v3201_v16 }
 0x8c4   :  { %7343 = vtanh.f32 %v3208_v4  ;;  %v1314_v4 = vadd.f32 %v10323_v52, %v10221_v20 }
 0x8c5   :  { %7345 = vtanh.f32 %v3209_v11 }
 0x8c6   :  { %7347 = vtanh.f32 %v7190_v43 }
 0x8c7   :  { %7349 = vtanh.f32 %v7191_v25 }
 0x8ce   :  { %v7344_v22 = vpop.eup %7343 }
 0x8cf   :  { %v7346_v8 = vpop.eup %7345  ;;  %v3212_v46 = vmul.f32 0.5, %v7344_v22 }
 0x8d0   :  { %v3213_v19 = vmul.f32 0.5, %v7346_v8  ;;  %v7348_v14 = vpop.eup %7347 }
 0x8d1   :  { %v3214_v37 = vadd.f32 0.5, %v3212_v46  ;;  %v7350_v12 = vpop.eup %7349 }
 0x8d2   :  { %v3215_v41 = vadd.f32 0.5, %v3213_v19 }
 0x8d3   :  { %v3236_v54 = vmul.f32 %v7348_v14, %v3214_v37 }
 0x8d4   :  { %v3237_v56 = vmul.f32 %v7350_v12, %v3215_v41 }
 0x8ff   :  { %v3053_v16 = vpop.f32.mrb[26].mxu1 }
 0x900   :  { %v3202_v34 = vadd.f32 %v3053_v16, %v1314_v4  ;;  %v3055_v43 = vpop.f32.mrb[27].mxu1  ;;  %v10325_v4 = vld [vmem:[#allocation170_spill] sm:$0xff]  ;;  %v10326_v16 = vld [vmem:[#allocation171_spill] sm:$0xff] }
 0x901   :  { %v3203_v11 = vadd.f32 %v3055_v43, %v1316_v36  ;;  %v1540_v36 = vadd.f32 %v10325_v4, %v10225_v1  ;;  %v10327_v4 = vld [vmem:[#allocation102_spill] sm:$0xff] }
 0x902   :  { %v3216_v25 = vmul.f32 0.5, %v3202_v34 }
 0x903   :  { %v3217_v2 = vmul.f32 0.5, %v3203_v11 }
 0x904   :  { %7351 = vtanh.f32 %v3216_v25 }
 0x905   :  { %7353 = vtanh.f32 %v3217_v2  ;;  %v1542_v2 = vadd.f32 %v10326_v16, %v10227_v53  ;;  %v10329_v16 = vld [vmem:[#allocation156_spill] sm:$0xff] }
 0x90e   :  { %v7352_v46 = vpop.eup %7351 }
 0x90f   :  { %v7354_v8 = vpop.eup %7353  ;;  %v3220_v22 = vmul.f32 0.5, %v7352_v46 }
 0x910   :  { %v3221_v19 = vmul.f32 0.5, %v7354_v8 }
 0x911   :  { %v3222_v14 = vadd.f32 0.5, %v3220_v22 }
 0x912   :  { %v3223_v37 = vadd.f32 0.5, %v3221_v19 }
 0x913   :  { %v3234_v41 = vmul.f32 %v3222_v14, %v8802_v44 }
 0x914   :  { %v3235_v12 = vmul.f32 %v3223_v37, %v8804_v0 }
 0x915   :  { %v8964_v52 = vadd.f32 %v3236_v54, %v3234_v41 }
 0x916   :  { %v8966_v31 = vadd.f32 %v3237_v56, %v3235_v12 }
 0x93f   :  { %v3195_v34 = vpop.f32.mrb[28].mxu1 }
 0x940   :  { %v3206_v43 = vadd.f32 %v3195_v34, %v1540_v36  ;;  %v3197_v11 = vpop.f32.mrb[29].mxu1  ;;  %v10328_v36 = vld [vmem:[#allocation155_spill] sm:$0xff]  ;;  %v10331_v34 = vld [vmem:[#allocation108_spill] sm:$0xff] }
 0x941   :  { %v3207_v25 = vadd.f32 %v3197_v11, %v1542_v2  ;;  %v10330_v2 = vld [vmem:[#allocation107_spill] sm:$0xff]  ;;  %v10333_v11 = vld [vmem:[#allocation158_spill] sm:$0xff] }
 0x942   :  { %v3226_v46 = vmul.f32 0.5, %v3206_v43  ;;  %v10332_v43 = vld [vmem:[#allocation157_spill] sm:$0xff] }
 0x943   :  { %v3227_v8 = vmul.f32 0.5, %v3207_v25  ;;  %v10334_v25 = vld [vmem:[#allocation113_spill] sm:$0xff] }
 0x944   :  { %7355 = vtanh.f32 %v3226_v46  ;;  %v10335_v46 = vld [vmem:[#allocation114_spill] sm:$0xff] }
 0x945   :  { %7357 = vtanh.f32 %v3227_v8  ;;  %v10336_v8 = vld [vmem:[#allocation159_spill] sm:$0xff] }
 0x946   :  { %7359 = vtanh.f32 %v8966_v31 }
 0x947   :  { %7361 = vtanh.f32 %v8964_v52 }
 0x94e   :  { %v7356_v54 = vpop.eup %7355 }
 0x94f   :  { %v7358_v44 = vpop.eup %7357  ;;  %v3230_v0 = vmul.f32 0.5, %v7356_v54  ;;  %v10337_v54 = vld [vmem:[#allocation160_spill] sm:$0xff] }
 0x950   :  { %v3231_v56 = vmul.f32 0.5, %v7358_v44  ;;  %v7360_v14 = vpop.eup %7359  ;;  %v10338_v44 = vld [vmem:[#allocation119_spill] sm:$0xff] }
 0x951   :  { %v3232_v22 = vadd.f32 0.5, %v3230_v0  ;;  %v7362_v37 = vpop.eup %7361  ;;  %v10339_v0 = vld [vmem:[#allocation120_spill] sm:$0xff] }
 0x952   :  { %v3233_v19 = vadd.f32 0.5, %v3231_v56  ;;  %v10340_v56 = vld [vmem:[#allocation161_spill] sm:$0xff] }
 0x953   :  { %v8976_v12 = vmul.f32 %v7362_v37, %v3232_v22  ;;  %v10341_v22 = vld [vmem:[#allocation162_spill] sm:$0xff]  ;;  %v10344_v37 = vld [vmem:[#allocation163_spill] sm:$0xff] }
 0x954   :  { %v8974_v41 = vmul.f32 %v7360_v14, %v3233_v19  ;;  %v10342_v19 = vld [vmem:[#allocation125_spill] sm:$0xff]  ;;  %v10343_v14 = vld [vmem:[#allocation126_spill] sm:$0xff] }
 0x956   :  { %3319 = vmatprep.mubr.f32.mxu1 %v8974_v41  ;;  %3461 = vmatprep.mubr.f32.mxu0 %v8974_v41 }
 0x957   :  { %3320 = vmatmul.mubr.f32.vlgmr.msra.gmra.mrb[30].mxu1 %v8976_v12  ;;  %3462 = vmatmul.mubr.f32.vlgmr.msra.gmra.mrb[72].mxu0 %v8976_v12 }
 0x958   :  { %6155 = vmatpush1.bf16.msra.mxu1 %v10065_v49  ;;  %3390 = vmatprep.mubr.f32.mxu1 %v8974_v41 }
 0x959   :  { %6157 = vmatprep.subr.bf16.mxu1 %v10066_v13  ;;  %6475 = vmatpush1.bf16.msra.mxu0 %v10097_v35 }
 0x95a   :  { %6477 = vmatprep.subr.bf16.mxu0 %v10098_v48 }
 0x95c   :  { %6159 = vmatpush1.bf16.msra.mxu1 %v10067_v9 }
 0x95d   :  { %6161 = vmatprep.subr.bf16.mxu1 %v10068_v5  ;;  %6479 = vmatpush1.bf16.msra.mxu0 %v10099_v47 }
 0x95e   :  { %6481 = vmatprep.subr.bf16.mxu0 %v10100_v62 }
 0x960   :  { %6163 = vmatpush1.bf16.msra.mxu1 %v10069_v60 }
 0x961   :  { %6165 = vmatprep.subr.bf16.mxu1 %v10070_v24  ;;  %6483 = vmatpush1.bf16.msra.mxu0 %v10101_v6 }
 0x962   :  { %6485 = vmatprep.subr.bf16.mxu0 %v10102_v42 }
 0x964   :  { %6167 = vmatpush1.bf16.msra.mxu1 %v10071_v50 }
 0x965   :  { %6169 = vmatprep.subr.bf16.mxu1 %v10072_v63  ;;  %6487 = vmatpush1.bf16.msra.mxu0 %v10103_v33 }
 0x966   :  { %6489 = vmatprep.subr.bf16.mxu0 %v10104_v21 }
 0x968   :  { %6171 = vmatpush1.bf16.msra.mxu1 %v10073_v23 }
 0x969   :  { %6173 = vmatprep.subr.bf16.mxu1 %v10074_v58  ;;  %6491 = vmatpush1.bf16.msra.mxu0 %v10105_v3 }
 0x96a   :  { %6493 = vmatprep.subr.bf16.mxu0 %v10106_v27 }
 0x96c   :  { %6175 = vmatpush1.bf16.msra.mxu1 %v10075_v10 }
 0x96d   :  { %6177 = vmatprep.subr.bf16.mxu1 %v10076_v51  ;;  %6495 = vmatpush1.bf16.msra.mxu0 %v10107_v59 }
 0x96e   :  { %6497 = vmatprep.subr.bf16.mxu0 %v10108_v17 }
 0x970   :  { %6179 = vmatpush1.bf16.msra.mxu1 %v10077_v30 }
 0x971   :  { %6181 = vmatprep.subr.bf16.mxu1 %v10078_v26  ;;  %6499 = vmatpush1.bf16.msra.mxu0 %v10109_v7 }
 0x972   :  { %6501 = vmatprep.subr.bf16.mxu0 %v10110_v61 }
 0x974   :  { %6183 = vmatpush1.bf16.msra.mxu1 %v10079_v38 }
 0x975   :  { %6185 = vmatprep.subr.bf16.mxu1 %v10080_v15  ;;  %6503 = vmatpush1.bf16.msra.mxu0 %v10111_v40 }
 0x976   :  { %6505 = vmatprep.subr.bf16.mxu0 %v10112_v39 }
 0x978   :  { %6187 = vmatpush1.bf16.msra.mxu1 %v10081_v55 }
 0x979   :  { %6189 = vmatprep.subr.bf16.mxu1 %v10082_v28  ;;  %6507 = vmatpush1.bf16.msra.mxu0 %v10113_v57 }
 0x97a   :  { %6509 = vmatprep.subr.bf16.mxu0 %v10114_v32 }
 0x97c   :  { %6191 = vmatpush1.bf16.msra.mxu1 %v10083_v45 }
 0x97d   :  { %6193 = vmatprep.subr.bf16.mxu1 %v10327_v4  ;;  %6511 = vmatpush1.bf16.msra.mxu0 %v10328_v36 }
 0x97e   :  { %6513 = vmatprep.subr.bf16.mxu0 %v10329_v16 }
 0x980   :  { %6195 = vmatpush1.bf16.msra.mxu1 %v10330_v2 }
 0x981   :  { %6197 = vmatprep.subr.bf16.mxu1 %v10331_v34  ;;  %6515 = vmatpush1.bf16.msra.mxu0 %v10332_v43 }
 0x982   :  { %6517 = vmatprep.subr.bf16.mxu0 %v10333_v11 }
 0x984   :  { %6199 = vmatpush1.bf16.msra.mxu1 %v10334_v25  ;;  %v10345_v25 = vld [vmem:[#allocation164_spill] sm:$0xff] }
 0x985   :  { %6201 = vmatprep.subr.bf16.mxu1 %v10335_v46  ;;  %6519 = vmatpush1.bf16.msra.mxu0 %v10336_v8  ;;  %v10346_v46 = vld [vmem:[#allocation129_spill] sm:$0xff]  ;;  %v10347_v8 = vld [vmem:[#allocation130_spill] sm:$0xff] }
 0x986   :  { %6521 = vmatprep.subr.bf16.mxu0 %v10337_v54  ;;  %v10348_v54 = vld [vmem:[#allocation165_spill] sm:$0xff] }
 0x988   :  { %6203 = vmatpush1.bf16.msra.mxu1 %v10338_v44  ;;  %v10349_v44 = vld [vmem:[#allocation166_spill] sm:$0xff] }
 0x989   :  { %6205 = vmatprep.subr.bf16.mxu1 %v10339_v0  ;;  %6523 = vmatpush1.bf16.msra.mxu0 %v10340_v56  ;;  %v10350_v0 = vld [vmem:[#allocation133_spill] sm:$0xff]  ;;  %v10351_v56 = vld [vmem:[#allocation63_spill] sm:$0xff] }
 0x98a   :  { %6525 = vmatprep.subr.bf16.mxu0 %v10341_v22  ;;  %v10352_v22 = vld [vmem:[#allocation167_spill] sm:$0xff] }
 0x98c   :  { %6207 = vmatpush1.bf16.msra.mxu1 %v10342_v19  ;;  %v10353_v19 = vld [vmem:[#allocation134_spill] sm:$0xff] }
 0x98d   :  { %6209 = vmatprep.subr.bf16.mxu1 %v10343_v14  ;;  %6527 = vmatpush1.bf16.msra.mxu0 %v10344_v37  ;;  %v10354_v37 = vld [vmem:[#allocation64_spill] sm:$0xff]  ;;  %v10421_v14 = vld [vmem:[#allocation42_spill] sm:$0xff] }
 0x98e   :  { %6529 = vmatprep.subr.bf16.mxu0 %v10345_v25  ;;  %v10363_v25 = vld [vmem:[#allocation83_spill] sm:$0xff] }
 0x990   :  { %6211 = vmatpush1.bf16.msra.mxu1 %v10346_v46  ;;  %v10355_v46 = vld [vmem:[#allocation67_spill] sm:$0xff] }
 0x991   :  { %6213 = vmatprep.subr.bf16.mxu1 %v10347_v8  ;;  %6531 = vmatpush1.bf16.msra.mxu0 %v10348_v54  ;;  %v10356_v8 = vld [vmem:[#allocation68_spill] sm:$0xff]  ;;  %v10357_v54 = vld [vmem:[#allocation71_spill] sm:$0xff] }
 0x992   :  { %6533 = vmatprep.subr.bf16.mxu0 %v10349_v44  ;;  %v10358_v44 = vld [vmem:[#allocation72_spill] sm:$0xff] }
 0x994   :  { %6215 = vmatpush1.bf16.msra.mxu1 %v10350_v0  ;;  %v10359_v0 = vld [vmem:[#allocation75_spill] sm:$0xff] }
 0x995   :  { %6281 = vmatprep.subr.bf16.mxu1 %v10351_v56  ;;  %6535 = vmatpush1.bf16.msra.mxu0 %v10352_v22  ;;  %v10360_v56 = vld [vmem:[#allocation76_spill] sm:$0xff]  ;;  %v10361_v22 = vld [vmem:[#allocation79_spill] sm:$0xff] }
 0x996   :  { %6729 = vmatprep.subr.bf16.mxu0 %v10353_v19  ;;  %v10362_v19 = vld [vmem:[#allocation80_spill] sm:$0xff] }
 0x997   :  { %3391 = vmatmul.mubr.f32.vlgmr.msra.gmra.mrb[32].mxu1 %v8976_v12 }
 0x998   :  { %6283 = vmatpush1.bf16.msra.mxu1 %v10354_v37  ;;  %3532 = vmatprep.mubr.f32.mxu1 %v8974_v41  ;;  %v10364_v37 = vld [vmem:[#allocation84_spill] sm:$0xff]  ;;  %v10365_v41 = vld [vmem:[#allocation87_spill] sm:$0xff] }
 0x999   :  { %6285 = vmatprep.subr.bf16.mxu1 %v10355_v46  ;;  %v10366_v46 = vld [vmem:[#allocation88_spill] sm:$0xff] }
 0x99c   :  { %6287 = vmatpush1.bf16.msra.mxu1 %v10356_v8  ;;  %v10367_v8 = vld [vmem:[#allocation91_spill] sm:$0xff] }
 0x99d   :  { %6289 = vmatprep.subr.bf16.mxu1 %v10357_v54  ;;  %v10368_v54 = vld [vmem:[#allocation94_spill] sm:$0xff] }
 0x9a0   :  { %6291 = vmatpush1.bf16.msra.mxu1 %v10358_v44  ;;  %v10369_v44 = vld [vmem:[#allocation97_spill] sm:$0xff] }
 0x9a1   :  { %6293 = vmatprep.subr.bf16.mxu1 %v10359_v0  ;;  %v10370_v0 = vld [vmem:[#allocation100_spill] sm:$0xff] }
 0x9a4   :  { %6295 = vmatpush1.bf16.msra.mxu1 %v10360_v56  ;;  %v10371_v56 = vld [vmem:[#allocation103_spill] sm:$0xff] }
 0x9a5   :  { %6297 = vmatprep.subr.bf16.mxu1 %v10361_v22  ;;  %v10372_v22 = vld [vmem:[#allocation106_spill] sm:$0xff] }
 0x9a8   :  { %6299 = vmatpush1.bf16.msra.mxu1 %v10362_v19  ;;  %v10373_v19 = vld [vmem:[#allocation109_spill] sm:$0xff] }
 0x9a9   :  { %6301 = vmatprep.subr.bf16.mxu1 %v10363_v25  ;;  %v10374_v25 = vld [vmem:[#allocation112_spill] sm:$0xff] }
 0x9ac   :  { %6303 = vmatpush1.bf16.msra.mxu1 %v10364_v37  ;;  %v10375_v37 = vld [vmem:[#allocation115_spill] sm:$0xff] }
 0x9ad   :  { %6305 = vmatprep.subr.bf16.mxu1 %v10365_v41  ;;  %v10376_v41 = vld [vmem:[#allocation118_spill] sm:$0xff] }
 0x9b0   :  { %6307 = vmatpush1.bf16.msra.mxu1 %v10366_v46  ;;  %v10377_v46 = vld [vmem:[#allocation121_spill] sm:$0xff] }
 0x9b1   :  { %6309 = vmatprep.subr.bf16.mxu1 %v10367_v8  ;;  %v10378_v8 = vld [vmem:[#allocation124_spill] sm:$0xff] }
 0x9b4   :  { %6311 = vmatpush1.bf16.msra.mxu1 %v10368_v54  ;;  %v10379_v54 = vld [vmem:[#allocation127_spill] sm:$0xff] }
 0x9b5   :  { %6313 = vmatprep.subr.bf16.mxu1 %v10369_v44  ;;  %v10380_v44 = vld [vmem:[#allocation128_spill] sm:$0xff] }
 0x9b8   :  { %6315 = vmatpush1.bf16.msra.mxu1 %v10370_v0  ;;  %v10381_v0 = vld [vmem:[#allocation131_spill] sm:$0xff] }
 0x9b9   :  { %6317 = vmatprep.subr.bf16.mxu1 %v10371_v56  ;;  %v10382_v56 = vld [vmem:[#allocation132_spill] sm:$0xff] }
 0x9bc   :  { %6319 = vmatpush1.bf16.msra.mxu1 %v10372_v22  ;;  %v10383_v22 = vld [vmem:[#allocation135_spill] sm:$0xff] }
 0x9bd   :  { %6321 = vmatprep.subr.bf16.mxu1 %v10373_v19  ;;  %v10384_v19 = vld [vmem:[#allocation136_spill] sm:$0xff] }
 0x9c0   :  { %6323 = vmatpush1.bf16.msra.mxu1 %v10374_v25  ;;  %v10385_v25 = vld [vmem:[#allocation16_spill] sm:$0xff] }
 0x9c1   :  { %6325 = vmatprep.subr.bf16.mxu1 %v10375_v37 }
 0x9c4   :  { %6327 = vmatpush1.bf16.msra.mxu1 %v10376_v41  ;;  %v10386_v41 = vld [vmem:[#allocation17_spill] sm:$0xff] }
 0x9c5   :  { %6329 = vmatprep.subr.bf16.mxu1 %v10377_v46  ;;  %v10387_v46 = vld [vmem:[#allocation18_spill] sm:$0xff] }
 0x9c8   :  { %6331 = vmatpush1.bf16.msra.mxu1 %v10378_v8  ;;  %v10388_v8 = vld [vmem:[#allocation19_spill] sm:$0xff] }
 0x9c9   :  { %6333 = vmatprep.subr.bf16.mxu1 %v10379_v54  ;;  %v10389_v54 = vld [vmem:[#allocation20_spill] sm:$0xff] }
 0x9cc   :  { %6335 = vmatpush1.bf16.msra.mxu1 %v10380_v44  ;;  %v10390_v44 = vld [vmem:[#allocation21_spill] sm:$0xff] }
 0x9cd   :  { %6337 = vmatprep.subr.bf16.mxu1 %v10381_v0  ;;  %v10391_v0 = vld [vmem:[#allocation22_spill] sm:$0xff] }
 0x9d0   :  { %6339 = vmatpush1.bf16.msra.mxu1 %v10382_v56  ;;  %v10392_v56 = vld [vmem:[#allocation23_spill] sm:$0xff] }
 0x9d1   :  { %6341 = vmatprep.subr.bf16.mxu1 %v10383_v22  ;;  %v10393_v22 = vld [vmem:[#allocation24_spill] sm:$0xff] }
 0x9d4   :  { %6343 = vmatpush1.bf16.msra.mxu1 %v10384_v19  ;;  %v10394_v19 = vld [vmem:[#allocation25_spill] sm:$0xff] }
 0x9d5   :  { %6345 = vmatprep.subr.bf16.mxu1 %v10385_v25  ;;  %v10395_v25 = vld [vmem:[#allocation26_spill] sm:$0xff] }
 0x9d7   :  { %3533 = vmatmul.mubr.f32.vlgmr.msra.gmra.mrb[34].mxu1 %v8976_v12  ;;  %v10396_v12 = vld [vmem:[#allocation27_spill] sm:$0xff] }
 0x9d8   :  { %6347 = vmatpush1.bf16.msra.mxu1 %v10386_v41  ;;  %v10397_v41 = vld [vmem:[#allocation28_spill] sm:$0xff] }
 0x9d9   :  { %6349 = vmatprep.subr.bf16.mxu1 %v10387_v46  ;;  %v10398_v46 = vld [vmem:[#allocation29_spill] sm:$0xff] }
 0x9dc   :  { %6351 = vmatpush1.bf16.msra.mxu1 %v10388_v8  ;;  %v10399_v8 = vld [vmem:[#allocation30_spill] sm:$0xff] }
 0x9dd   :  { %6353 = vmatprep.subr.bf16.mxu1 %v10389_v54  ;;  %v10400_v54 = vld [vmem:[#allocation31_spill] sm:$0xff] }
 0x9e0   :  { %6355 = vmatpush1.bf16.msra.mxu1 %v10390_v44  ;;  %v10401_v44 = vld [vmem:[#allocation32_spill] sm:$0xff] }
 0x9e1   :  { %6357 = vmatprep.subr.bf16.mxu1 %v10391_v0  ;;  %v10402_v0 = vld [vmem:[#allocation35_spill] sm:$0xff] }
 0x9e4   :  { %6359 = vmatpush1.bf16.msra.mxu1 %v10392_v56  ;;  %v10403_v56 = vld [vmem:[#allocation36_spill] sm:$0xff] }
 0x9e5   :  { %6361 = vmatprep.subr.bf16.mxu1 %v10393_v22  ;;  %v10404_v22 = vld [vmem:[#allocation39_spill] sm:$0xff] }
 0x9e8   :  { %6363 = vmatpush1.bf16.msra.mxu1 %v10394_v19  ;;  %v10405_v19 = vld [vmem:[#allocation40_spill] sm:$0xff] }
 0x9e9   :  { %6365 = vmatprep.subr.bf16.mxu1 %v10395_v25  ;;  %v10406_v25 = vld [vmem:[#allocation43_spill] sm:$0xff] }
 0x9ec   :  { %6367 = vmatpush1.bf16.msra.mxu1 %v10396_v12  ;;  %v10407_v12 = vld [vmem:[#allocation44_spill] sm:$0xff] }
 0x9ed   :  { %6369 = vmatprep.subr.bf16.mxu1 %v10397_v41  ;;  %v10408_v41 = vld [vmem:[#allocation47_spill] sm:$0xff] }
 0x9f0   :  { %6371 = vmatpush1.bf16.msra.mxu1 %v10398_v46  ;;  %v10409_v46 = vld [vmem:[#allocation48_spill] sm:$0xff] }
 0x9f1   :  { %6373 = vmatprep.subr.bf16.mxu1 %v10399_v8  ;;  %v10410_v8 = vld [vmem:[#allocation51_spill] sm:$0xff] }
 0x9f4   :  { %6375 = vmatpush1.bf16.msra.mxu1 %v10400_v54  ;;  %v10411_v54 = vld [vmem:[#allocation52_spill] sm:$0xff] }
 0x9f5   :  { %6377 = vmatprep.subr.bf16.mxu1 %v10401_v44  ;;  %v10412_v44 = vld [vmem:[#allocation55_spill] sm:$0xff] }
 0x9f8   :  { %6379 = vmatpush1.bf16.msra.mxu1 %v10402_v0  ;;  %v10413_v0 = vld [vmem:[#allocation56_spill] sm:$0xff] }
 0x9f9   :  { %6381 = vmatprep.subr.bf16.mxu1 %v10403_v56  ;;  %v10414_v56 = vld [vmem:[#allocation57_spill] sm:$0xff] }
 0x9fc   :  { %6383 = vmatpush1.bf16.msra.mxu1 %v10404_v22  ;;  %v10415_v22 = vld [vmem:[#allocation58_spill] sm:$0xff] }
 0x9fd   :  { %6385 = vmatprep.subr.bf16.mxu1 %v10405_v19  ;;  %v10416_v19 = vld [vmem:[#allocation59_spill] sm:$0xff] }
 0xa00   :  { %6387 = vmatpush1.bf16.msra.mxu1 %v10406_v25  ;;  %v10417_v25 = vld [vmem:[#allocation60_spill] sm:$0xff] }
 0xa01   :  { %6389 = vmatprep.subr.bf16.mxu1 %v10407_v12  ;;  %v10418_v12 = vld [vmem:[#allocation14_spill] sm:$0xff] }
 0xa04   :  { %6391 = vmatpush1.bf16.msra.mxu1 %v10408_v41  ;;  %v10419_v41 = vld [vmem:[#allocation41_spill] sm:$0xff] }
 0xa05   :  { %6393 = vmatprep.subr.bf16.mxu1 %v10409_v46  ;;  %v1207_v37 = vadd.f32 %v10419_v41, %v10418_v12  ;;  %v10420_v46 = vld [vmem:[#allocation15_spill] sm:$0xff] }
 0xa08   :  { %6395 = vmatpush1.bf16.msra.mxu1 %v10410_v8  ;;  %v1209_v8 = vadd.f32 %v10421_v14, %v10420_v46 }
 0xa09   :  { %6397 = vmatprep.subr.bf16.mxu1 %v10411_v54 }
 0xa0c   :  { %6399 = vmatpush1.bf16.msra.mxu1 %v10412_v44 }
 0xa0d   :  { %6401 = vmatprep.subr.bf16.mxu1 %v10413_v0 }
 0xa10   :  { %6403 = vmatpush1.bf16.msra.mxu1 %v10414_v56 }
 0xa11   :  { %6405 = vmatprep.subr.bf16.mxu1 %v10415_v22 }
 0xa14   :  { %6407 = vmatpush1.bf16.msra.mxu1 %v10416_v19  ;;  %v10422_v19 = vld [vmem:[#allocation182_spill] sm:$0xff] }
 0xa15   :  { %6409 = vmatprep.subr.bf16.mxu1 %v10417_v25 }
 0xa2a   :  { %v3321_v11 = vpop.f32.mrb[30].mxu1  ;;  %v3463_v54 = vpop.f32.mrb[72].mxu0 }
 0xa2b   :  { %v3539_v43 = vadd.f32 %v3321_v11, %v1207_v37  ;;  %v3323_v44 = vpop.f32.mrb[31].mxu1  ;;  %v3465_v34 = vpop.f32.mrb[73].mxu0  ;;  %v7192_v22 = vadd.f32 %v3463_v54, %v10321_v29  ;;  %v10424_v54 = vld [vmem:[#allocation105_spill] sm:$0xff] }
 0xa2c   :  { %v3540_v0 = vadd.f32 %v3323_v44, %v1209_v8  ;;  %v7193_v25 = vadd.f32 %v3465_v34, %v10422_v19  ;;  %v1322_v44 = vadd.f32 %v10424_v54, %v10223_v18 }
 0xa2d   :  { %v3547_v2 = vmul.f32 0.5, %v3539_v43  ;;  %v10423_v43 = vld [vmem:[#allocation104_spill] sm:$0xff] }
 0xa2e   :  { %v3548_v56 = vmul.f32 0.5, %v3540_v0 }
 0xa2f   :  { %7363 = vtanh.f32 %v3547_v2  ;;  %v1320_v2 = vadd.f32 %v10423_v43, %v10221_v20 }
 0xa30   :  { %7365 = vtanh.f32 %v3548_v56 }
 0xa31   :  { %7367 = vtanh.f32 %v7192_v22 }
 0xa32   :  { %7369 = vtanh.f32 %v7193_v25 }
 0xa39   :  { %v7364_v41 = vpop.eup %7363 }
 0xa3a   :  { %v7366_v12 = vpop.eup %7365  ;;  %v3551_v16 = vmul.f32 0.5, %v7364_v41 }
 0xa3b   :  { %v3552_v14 = vmul.f32 0.5, %v7366_v12  ;;  %v7368_v36 = vpop.eup %7367 }
 0xa3c   :  { %v3553_v46 = vadd.f32 0.5, %v3551_v16  ;;  %v7370_v37 = vpop.eup %7369 }
 0xa3d   :  { %v3554_v11 = vadd.f32 0.5, %v3552_v14 }
 0xa3e   :  { %v3575_v4 = vmul.f32 %v7368_v36, %v3553_v46 }
 0xa3f   :  { %v3576_v8 = vmul.f32 %v7370_v37, %v3554_v11 }
 0xa6a   :  { %v3392_v0 = vpop.f32.mrb[32].mxu1 }
 0xa6b   :  { %v3541_v34 = vadd.f32 %v3392_v0, %v1320_v2  ;;  %v3394_v56 = vpop.f32.mrb[33].mxu1  ;;  %v10425_v2 = vld [vmem:[#allocation172_spill] sm:$0xff]  ;;  %v10426_v0 = vld [vmem:[#allocation173_spill] sm:$0xff] }
 0xa6c   :  { %v3542_v25 = vadd.f32 %v3394_v56, %v1322_v44  ;;  %v1546_v44 = vadd.f32 %v10425_v2, %v10225_v1  ;;  %v10427_v2 = vld [vmem:[#allocation102_spill] sm:$0xff] }
 0xa6d   :  { %v3555_v22 = vmul.f32 0.5, %v3541_v34 }
 0xa6e   :  { %v3556_v19 = vmul.f32 0.5, %v3542_v25 }
 0xa6f   :  { %7371 = vtanh.f32 %v3555_v22 }
 0xa70   :  { %7373 = vtanh.f32 %v3556_v19  ;;  %v1548_v19 = vadd.f32 %v10426_v0, %v10227_v53  ;;  %v10429_v0 = vld [vmem:[#allocation156_spill] sm:$0xff] }
 0xa79   :  { %v7372_v16 = vpop.eup %7371 }
 0xa7a   :  { %v7374_v12 = vpop.eup %7373  ;;  %v3559_v41 = vmul.f32 0.5, %v7372_v16 }
 0xa7b   :  { %v3560_v14 = vmul.f32 0.5, %v7374_v12 }
 0xa7c   :  { %v3561_v36 = vadd.f32 0.5, %v3559_v41 }
 0xa7d   :  { %v3562_v46 = vadd.f32 0.5, %v3560_v14 }
 0xa7e   :  { %v3573_v11 = vmul.f32 %v3561_v36, %v8964_v52 }
 0xa7f   :  { %v3574_v37 = vmul.f32 %v3562_v46, %v8966_v31 }
 0xa80   :  { %v9126_v43 = vadd.f32 %v3575_v4, %v3573_v11 }
 0xa81   :  { %v9128_v54 = vadd.f32 %v3576_v8, %v3574_v37 }
 0xaaa   :  { %v3534_v34 = vpop.f32.mrb[34].mxu1 }
 0xaab   :  { %v3545_v56 = vadd.f32 %v3534_v34, %v1546_v44  ;;  %v3536_v25 = vpop.f32.mrb[35].mxu1  ;;  %v10428_v44 = vld [vmem:[#allocation155_spill] sm:$0xff]  ;;  %v10431_v34 = vld [vmem:[#allocation108_spill] sm:$0xff] }
 0xaac   :  { %v3546_v22 = vadd.f32 %v3536_v25, %v1548_v19  ;;  %v10430_v19 = vld [vmem:[#allocation107_spill] sm:$0xff]  ;;  %v10433_v25 = vld [vmem:[#allocation158_spill] sm:$0xff] }
 0xaad   :  { %v3565_v16 = vmul.f32 0.5, %v3545_v56  ;;  %v10432_v56 = vld [vmem:[#allocation157_spill] sm:$0xff] }
 0xaae   :  { %v3566_v12 = vmul.f32 0.5, %v3546_v22  ;;  %v10434_v22 = vld [vmem:[#allocation113_spill] sm:$0xff] }
 0xaaf   :  { %7375 = vtanh.f32 %v3565_v16  ;;  %v10435_v16 = vld [vmem:[#allocation114_spill] sm:$0xff] }
 0xab0   :  { %7377 = vtanh.f32 %v3566_v12  ;;  %v10436_v12 = vld [vmem:[#allocation159_spill] sm:$0xff] }
 0xab1   :  { %7379 = vtanh.f32 %v9128_v54 }
 0xab2   :  { %7381 = vtanh.f32 %v9126_v43 }
 0xab9   :  { %v7376_v52 = vpop.eup %7375 }
 0xaba   :  { %v7378_v31 = vpop.eup %7377  ;;  %v3569_v4 = vmul.f32 0.5, %v7376_v52  ;;  %v10437_v52 = vld [vmem:[#allocation160_spill] sm:$0xff] }
 0xabb   :  { %v3570_v8 = vmul.f32 0.5, %v7378_v31  ;;  %v7380_v36 = vpop.eup %7379  ;;  %v10438_v31 = vld [vmem:[#allocation119_spill] sm:$0xff] }
 0xabc   :  { %v3571_v41 = vadd.f32 0.5, %v3569_v4  ;;  %v7382_v46 = vpop.eup %7381  ;;  %v10439_v4 = vld [vmem:[#allocation120_spill] sm:$0xff] }
 0xabd   :  { %v3572_v14 = vadd.f32 0.5, %v3570_v8  ;;  %v10440_v8 = vld [vmem:[#allocation161_spill] sm:$0xff] }
 0xabe   :  { %v9138_v37 = vmul.f32 %v7382_v46, %v3571_v41  ;;  %v10441_v41 = vld [vmem:[#allocation162_spill] sm:$0xff]  ;;  %v10444_v46 = vld [vmem:[#allocation163_spill] sm:$0xff] }
 0xabf   :  { %v9136_v11 = vmul.f32 %v7380_v36, %v3572_v14  ;;  %v10442_v14 = vld [vmem:[#allocation125_spill] sm:$0xff]  ;;  %v10443_v36 = vld [vmem:[#allocation126_spill] sm:$0xff] }
 0xac1   :  { %3658 = vmatprep.mubr.f32.mxu1 %v9136_v11  ;;  %3800 = vmatprep.mubr.f32.mxu0 %v9136_v11 }
 0xac2   :  { %3659 = vmatmul.mubr.f32.vlgmr.msra.gmra.mrb[36].mxu1 %v9138_v37  ;;  %3801 = vmatmul.mubr.f32.vlgmr.msra.gmra.mrb[74].mxu0 %v9138_v37 }
 0xac3   :  { %6411 = vmatpush1.bf16.msra.mxu1 %v10065_v49  ;;  %3729 = vmatprep.mubr.f32.mxu1 %v9136_v11 }
 0xac4   :  { %6413 = vmatprep.subr.bf16.mxu1 %v10066_v13  ;;  %6731 = vmatpush1.bf16.msra.mxu0 %v10097_v35 }
 0xac5   :  { %6733 = vmatprep.subr.bf16.mxu0 %v10098_v48 }
 0xac7   :  { %6415 = vmatpush1.bf16.msra.mxu1 %v10067_v9 }
 0xac8   :  { %6417 = vmatprep.subr.bf16.mxu1 %v10068_v5  ;;  %6735 = vmatpush1.bf16.msra.mxu0 %v10099_v47 }
 0xac9   :  { %6737 = vmatprep.subr.bf16.mxu0 %v10100_v62 }
 0xacb   :  { %6419 = vmatpush1.bf16.msra.mxu1 %v10069_v60 }
 0xacc   :  { %6421 = vmatprep.subr.bf16.mxu1 %v10070_v24  ;;  %6739 = vmatpush1.bf16.msra.mxu0 %v10101_v6 }
 0xacd   :  { %6741 = vmatprep.subr.bf16.mxu0 %v10102_v42 }
 0xacf   :  { %6423 = vmatpush1.bf16.msra.mxu1 %v10071_v50 }
 0xad0   :  { %6425 = vmatprep.subr.bf16.mxu1 %v10072_v63  ;;  %6743 = vmatpush1.bf16.msra.mxu0 %v10103_v33 }
 0xad1   :  { %6745 = vmatprep.subr.bf16.mxu0 %v10104_v21 }
 0xad3   :  { %6427 = vmatpush1.bf16.msra.mxu1 %v10073_v23 }
 0xad4   :  { %6429 = vmatprep.subr.bf16.mxu1 %v10074_v58  ;;  %6747 = vmatpush1.bf16.msra.mxu0 %v10105_v3 }
 0xad5   :  { %6749 = vmatprep.subr.bf16.mxu0 %v10106_v27 }
 0xad7   :  { %6431 = vmatpush1.bf16.msra.mxu1 %v10075_v10 }
 0xad8   :  { %6433 = vmatprep.subr.bf16.mxu1 %v10076_v51  ;;  %6751 = vmatpush1.bf16.msra.mxu0 %v10107_v59 }
 0xad9   :  { %6753 = vmatprep.subr.bf16.mxu0 %v10108_v17 }
 0xadb   :  { %6435 = vmatpush1.bf16.msra.mxu1 %v10077_v30 }
 0xadc   :  { %6437 = vmatprep.subr.bf16.mxu1 %v10078_v26  ;;  %6755 = vmatpush1.bf16.msra.mxu0 %v10109_v7 }
 0xadd   :  { %6757 = vmatprep.subr.bf16.mxu0 %v10110_v61 }
 0xadf   :  { %6439 = vmatpush1.bf16.msra.mxu1 %v10079_v38 }
 0xae0   :  { %6441 = vmatprep.subr.bf16.mxu1 %v10080_v15  ;;  %6759 = vmatpush1.bf16.msra.mxu0 %v10111_v40 }
 0xae1   :  { %6761 = vmatprep.subr.bf16.mxu0 %v10112_v39 }
 0xae3   :  { %6443 = vmatpush1.bf16.msra.mxu1 %v10081_v55 }
 0xae4   :  { %6445 = vmatprep.subr.bf16.mxu1 %v10082_v28  ;;  %6763 = vmatpush1.bf16.msra.mxu0 %v10113_v57 }
 0xae5   :  { %6765 = vmatprep.subr.bf16.mxu0 %v10114_v32 }
 0xae7   :  { %6447 = vmatpush1.bf16.msra.mxu1 %v10083_v45 }
 0xae8   :  { %6449 = vmatprep.subr.bf16.mxu1 %v10427_v2  ;;  %6767 = vmatpush1.bf16.msra.mxu0 %v10428_v44 }
 0xae9   :  { %6769 = vmatprep.subr.bf16.mxu0 %v10429_v0 }
 0xaeb   :  { %6451 = vmatpush1.bf16.msra.mxu1 %v10430_v19 }
 0xaec   :  { %6453 = vmatprep.subr.bf16.mxu1 %v10431_v34  ;;  %6771 = vmatpush1.bf16.msra.mxu0 %v10432_v56 }
 0xaed   :  { %6773 = vmatprep.subr.bf16.mxu0 %v10433_v25 }
 0xaef   :  { %6455 = vmatpush1.bf16.msra.mxu1 %v10434_v22  ;;  %v10445_v22 = vld [vmem:[#allocation164_spill] sm:$0xff] }
 0xaf0   :  { %6457 = vmatprep.subr.bf16.mxu1 %v10435_v16  ;;  %6775 = vmatpush1.bf16.msra.mxu0 %v10436_v12  ;;  %v10446_v16 = vld [vmem:[#allocation129_spill] sm:$0xff]  ;;  %v10447_v12 = vld [vmem:[#allocation130_spill] sm:$0xff] }
 0xaf1   :  { %6777 = vmatprep.subr.bf16.mxu0 %v10437_v52  ;;  %v10448_v52 = vld [vmem:[#allocation165_spill] sm:$0xff] }
 0xaf3   :  { %6459 = vmatpush1.bf16.msra.mxu1 %v10438_v31  ;;  %v10449_v31 = vld [vmem:[#allocation166_spill] sm:$0xff] }
 0xaf4   :  { %6461 = vmatprep.subr.bf16.mxu1 %v10439_v4  ;;  %6779 = vmatpush1.bf16.msra.mxu0 %v10440_v8  ;;  %v10450_v4 = vld [vmem:[#allocation133_spill] sm:$0xff]  ;;  %v10451_v8 = vld [vmem:[#allocation63_spill] sm:$0xff] }
 0xaf5   :  { %6781 = vmatprep.subr.bf16.mxu0 %v10441_v41  ;;  %v10452_v41 = vld [vmem:[#allocation167_spill] sm:$0xff] }
 0xaf7   :  { %6463 = vmatpush1.bf16.msra.mxu1 %v10442_v14  ;;  %v10453_v14 = vld [vmem:[#allocation134_spill] sm:$0xff] }
 0xaf8   :  { %6465 = vmatprep.subr.bf16.mxu1 %v10443_v36  ;;  %6783 = vmatpush1.bf16.msra.mxu0 %v10444_v46  ;;  %v10454_v46 = vld [vmem:[#allocation64_spill] sm:$0xff]  ;;  %v10521_v36 = vld [vmem:[#allocation46_spill] sm:$0xff] }
 0xaf9   :  { %6785 = vmatprep.subr.bf16.mxu0 %v10445_v22  ;;  %v10463_v22 = vld [vmem:[#allocation83_spill] sm:$0xff] }
 0xafb   :  { %6467 = vmatpush1.bf16.msra.mxu1 %v10446_v16  ;;  %v10455_v16 = vld [vmem:[#allocation67_spill] sm:$0xff] }
 0xafc   :  { %6469 = vmatprep.subr.bf16.mxu1 %v10447_v12  ;;  %6787 = vmatpush1.bf16.msra.mxu0 %v10448_v52  ;;  %v10456_v12 = vld [vmem:[#allocation68_spill] sm:$0xff]  ;;  %v10457_v52 = vld [vmem:[#allocation71_spill] sm:$0xff] }
 0xafd   :  { %6789 = vmatprep.subr.bf16.mxu0 %v10449_v31  ;;  %v10458_v31 = vld [vmem:[#allocation72_spill] sm:$0xff] }
 0xaff   :  { %6471 = vmatpush1.bf16.msra.mxu1 %v10450_v4  ;;  %v10459_v4 = vld [vmem:[#allocation75_spill] sm:$0xff] }
 0xb00   :  { %6537 = vmatprep.subr.bf16.mxu1 %v10451_v8  ;;  %6791 = vmatpush1.bf16.msra.mxu0 %v10452_v41  ;;  %v10460_v8 = vld [vmem:[#allocation76_spill] sm:$0xff]  ;;  %v10461_v41 = vld [vmem:[#allocation79_spill] sm:$0xff] }
 0xb01   :  { %6985 = vmatprep.subr.bf16.mxu0 %v10453_v14  ;;  %v10462_v14 = vld [vmem:[#allocation80_spill] sm:$0xff] }
 0xb02   :  { %3730 = vmatmul.mubr.f32.vlgmr.msra.gmra.mrb[38].mxu1 %v9138_v37 }
 0xb03   :  { %6539 = vmatpush1.bf16.msra.mxu1 %v10454_v46  ;;  %3871 = vmatprep.mubr.f32.mxu1 %v9136_v11  ;;  %v10464_v46 = vld [vmem:[#allocation84_spill] sm:$0xff]  ;;  %v10465_v11 = vld [vmem:[#allocation87_spill] sm:$0xff] }
 0xb04   :  { %6541 = vmatprep.subr.bf16.mxu1 %v10455_v16  ;;  %v10466_v16 = vld [vmem:[#allocation88_spill] sm:$0xff] }
 0xb07   :  { %6543 = vmatpush1.bf16.msra.mxu1 %v10456_v12  ;;  %v10467_v12 = vld [vmem:[#allocation91_spill] sm:$0xff] }
 0xb08   :  { %6545 = vmatprep.subr.bf16.mxu1 %v10457_v52  ;;  %v10468_v52 = vld [vmem:[#allocation94_spill] sm:$0xff] }
 0xb0b   :  { %6547 = vmatpush1.bf16.msra.mxu1 %v10458_v31  ;;  %v10469_v31 = vld [vmem:[#allocation97_spill] sm:$0xff] }
 0xb0c   :  { %6549 = vmatprep.subr.bf16.mxu1 %v10459_v4  ;;  %v10470_v4 = vld [vmem:[#allocation100_spill] sm:$0xff] }
 0xb0f   :  { %6551 = vmatpush1.bf16.msra.mxu1 %v10460_v8  ;;  %v10471_v8 = vld [vmem:[#allocation103_spill] sm:$0xff] }
 0xb10   :  { %6553 = vmatprep.subr.bf16.mxu1 %v10461_v41  ;;  %v10472_v41 = vld [vmem:[#allocation106_spill] sm:$0xff] }
 0xb13   :  { %6555 = vmatpush1.bf16.msra.mxu1 %v10462_v14  ;;  %v10473_v14 = vld [vmem:[#allocation109_spill] sm:$0xff] }
 0xb14   :  { %6557 = vmatprep.subr.bf16.mxu1 %v10463_v22  ;;  %v10474_v22 = vld [vmem:[#allocation112_spill] sm:$0xff] }
 0xb17   :  { %6559 = vmatpush1.bf16.msra.mxu1 %v10464_v46  ;;  %v10475_v46 = vld [vmem:[#allocation115_spill] sm:$0xff] }
 0xb18   :  { %6561 = vmatprep.subr.bf16.mxu1 %v10465_v11  ;;  %v10476_v11 = vld [vmem:[#allocation118_spill] sm:$0xff] }
 0xb1b   :  { %6563 = vmatpush1.bf16.msra.mxu1 %v10466_v16  ;;  %v10477_v16 = vld [vmem:[#allocation121_spill] sm:$0xff] }
 0xb1c   :  { %6565 = vmatprep.subr.bf16.mxu1 %v10467_v12  ;;  %v10478_v12 = vld [vmem:[#allocation124_spill] sm:$0xff] }
 0xb1f   :  { %6567 = vmatpush1.bf16.msra.mxu1 %v10468_v52  ;;  %v10479_v52 = vld [vmem:[#allocation127_spill] sm:$0xff] }
 0xb20   :  { %6569 = vmatprep.subr.bf16.mxu1 %v10469_v31  ;;  %v10480_v31 = vld [vmem:[#allocation128_spill] sm:$0xff] }
 0xb23   :  { %6571 = vmatpush1.bf16.msra.mxu1 %v10470_v4  ;;  %v10481_v4 = vld [vmem:[#allocation131_spill] sm:$0xff] }
 0xb24   :  { %6573 = vmatprep.subr.bf16.mxu1 %v10471_v8  ;;  %v10482_v8 = vld [vmem:[#allocation132_spill] sm:$0xff] }
 0xb27   :  { %6575 = vmatpush1.bf16.msra.mxu1 %v10472_v41  ;;  %v10483_v41 = vld [vmem:[#allocation135_spill] sm:$0xff] }
 0xb28   :  { %6577 = vmatprep.subr.bf16.mxu1 %v10473_v14  ;;  %v10484_v14 = vld [vmem:[#allocation136_spill] sm:$0xff] }
 0xb2b   :  { %6579 = vmatpush1.bf16.msra.mxu1 %v10474_v22  ;;  %v10485_v22 = vld [vmem:[#allocation16_spill] sm:$0xff] }
 0xb2c   :  { %6581 = vmatprep.subr.bf16.mxu1 %v10475_v46 }
 0xb2f   :  { %6583 = vmatpush1.bf16.msra.mxu1 %v10476_v11  ;;  %v10486_v11 = vld [vmem:[#allocation17_spill] sm:$0xff] }
 0xb30   :  { %6585 = vmatprep.subr.bf16.mxu1 %v10477_v16  ;;  %v10487_v16 = vld [vmem:[#allocation18_spill] sm:$0xff] }
 0xb33   :  { %6587 = vmatpush1.bf16.msra.mxu1 %v10478_v12  ;;  %v10488_v12 = vld [vmem:[#allocation19_spill] sm:$0xff] }
 0xb34   :  { %6589 = vmatprep.subr.bf16.mxu1 %v10479_v52  ;;  %v10489_v52 = vld [vmem:[#allocation20_spill] sm:$0xff] }
 0xb37   :  { %6591 = vmatpush1.bf16.msra.mxu1 %v10480_v31  ;;  %v10490_v31 = vld [vmem:[#allocation21_spill] sm:$0xff] }
 0xb38   :  { %6593 = vmatprep.subr.bf16.mxu1 %v10481_v4  ;;  %v10491_v4 = vld [vmem:[#allocation22_spill] sm:$0xff] }
 0xb3b   :  { %6595 = vmatpush1.bf16.msra.mxu1 %v10482_v8  ;;  %v10492_v8 = vld [vmem:[#allocation23_spill] sm:$0xff] }
 0xb3c   :  { %6597 = vmatprep.subr.bf16.mxu1 %v10483_v41  ;;  %v10493_v41 = vld [vmem:[#allocation24_spill] sm:$0xff] }
 0xb3f   :  { %6599 = vmatpush1.bf16.msra.mxu1 %v10484_v14  ;;  %v10494_v14 = vld [vmem:[#allocation25_spill] sm:$0xff] }
 0xb40   :  { %6601 = vmatprep.subr.bf16.mxu1 %v10485_v22  ;;  %v10495_v22 = vld [vmem:[#allocation26_spill] sm:$0xff] }
 0xb42   :  { %3872 = vmatmul.mubr.f32.vlgmr.msra.gmra.mrb[40].mxu1 %v9138_v37  ;;  %v10496_v37 = vld [vmem:[#allocation27_spill] sm:$0xff] }
 0xb43   :  { %6603 = vmatpush1.bf16.msra.mxu1 %v10486_v11  ;;  %v10497_v11 = vld [vmem:[#allocation28_spill] sm:$0xff] }
 0xb44   :  { %6605 = vmatprep.subr.bf16.mxu1 %v10487_v16  ;;  %v10498_v16 = vld [vmem:[#allocation29_spill] sm:$0xff] }
 0xb47   :  { %6607 = vmatpush1.bf16.msra.mxu1 %v10488_v12  ;;  %v10499_v12 = vld [vmem:[#allocation30_spill] sm:$0xff] }
 0xb48   :  { %6609 = vmatprep.subr.bf16.mxu1 %v10489_v52  ;;  %v10500_v52 = vld [vmem:[#allocation31_spill] sm:$0xff] }
 0xb4b   :  { %6611 = vmatpush1.bf16.msra.mxu1 %v10490_v31  ;;  %v10501_v31 = vld [vmem:[#allocation32_spill] sm:$0xff] }
 0xb4c   :  { %6613 = vmatprep.subr.bf16.mxu1 %v10491_v4  ;;  %v10502_v4 = vld [vmem:[#allocation35_spill] sm:$0xff] }
 0xb4f   :  { %6615 = vmatpush1.bf16.msra.mxu1 %v10492_v8  ;;  %v10503_v8 = vld [vmem:[#allocation36_spill] sm:$0xff] }
 0xb50   :  { %6617 = vmatprep.subr.bf16.mxu1 %v10493_v41  ;;  %v10504_v41 = vld [vmem:[#allocation39_spill] sm:$0xff] }
 0xb53   :  { %6619 = vmatpush1.bf16.msra.mxu1 %v10494_v14  ;;  %v10505_v14 = vld [vmem:[#allocation40_spill] sm:$0xff] }
 0xb54   :  { %6621 = vmatprep.subr.bf16.mxu1 %v10495_v22  ;;  %v10506_v22 = vld [vmem:[#allocation43_spill] sm:$0xff] }
 0xb57   :  { %6623 = vmatpush1.bf16.msra.mxu1 %v10496_v37  ;;  %v10507_v37 = vld [vmem:[#allocation44_spill] sm:$0xff] }
 0xb58   :  { %6625 = vmatprep.subr.bf16.mxu1 %v10497_v11  ;;  %v10508_v11 = vld [vmem:[#allocation47_spill] sm:$0xff] }
 0xb5b   :  { %6627 = vmatpush1.bf16.msra.mxu1 %v10498_v16  ;;  %v10509_v16 = vld [vmem:[#allocation48_spill] sm:$0xff] }
 0xb5c   :  { %6629 = vmatprep.subr.bf16.mxu1 %v10499_v12  ;;  %v10510_v12 = vld [vmem:[#allocation51_spill] sm:$0xff] }
 0xb5f   :  { %6631 = vmatpush1.bf16.msra.mxu1 %v10500_v52  ;;  %v10511_v52 = vld [vmem:[#allocation52_spill] sm:$0xff] }
 0xb60   :  { %6633 = vmatprep.subr.bf16.mxu1 %v10501_v31  ;;  %v10512_v31 = vld [vmem:[#allocation55_spill] sm:$0xff] }
 0xb63   :  { %6635 = vmatpush1.bf16.msra.mxu1 %v10502_v4  ;;  %v10513_v4 = vld [vmem:[#allocation56_spill] sm:$0xff] }
 0xb64   :  { %6637 = vmatprep.subr.bf16.mxu1 %v10503_v8  ;;  %v10514_v8 = vld [vmem:[#allocation57_spill] sm:$0xff] }
 0xb67   :  { %6639 = vmatpush1.bf16.msra.mxu1 %v10504_v41  ;;  %v10515_v41 = vld [vmem:[#allocation58_spill] sm:$0xff] }
 0xb68   :  { %6641 = vmatprep.subr.bf16.mxu1 %v10505_v14  ;;  %v10516_v14 = vld [vmem:[#allocation59_spill] sm:$0xff] }
 0xb6b   :  { %6643 = vmatpush1.bf16.msra.mxu1 %v10506_v22  ;;  %v10517_v22 = vld [vmem:[#allocation60_spill] sm:$0xff] }
 0xb6c   :  { %6645 = vmatprep.subr.bf16.mxu1 %v10507_v37  ;;  %v10518_v37 = vld [vmem:[#allocation14_spill] sm:$0xff] }
 0xb6f   :  { %6647 = vmatpush1.bf16.msra.mxu1 %v10508_v11  ;;  %v10519_v11 = vld [vmem:[#allocation45_spill] sm:$0xff] }
 0xb70   :  { %6649 = vmatprep.subr.bf16.mxu1 %v10509_v16  ;;  %v1213_v46 = vadd.f32 %v10519_v11, %v10518_v37  ;;  %v10520_v16 = vld [vmem:[#allocation15_spill] sm:$0xff] }
 0xb73   :  { %6651 = vmatpush1.bf16.msra.mxu1 %v10510_v12  ;;  %v1215_v12 = vadd.f32 %v10521_v36, %v10520_v16 }
 0xb74   :  { %6653 = vmatprep.subr.bf16.mxu1 %v10511_v52 }
 0xb77   :  { %6655 = vmatpush1.bf16.msra.mxu1 %v10512_v31 }
 0xb78   :  { %6657 = vmatprep.subr.bf16.mxu1 %v10513_v4 }
 0xb7b   :  { %6659 = vmatpush1.bf16.msra.mxu1 %v10514_v8 }
 0xb7c   :  { %6661 = vmatprep.subr.bf16.mxu1 %v10515_v41 }
 0xb7f   :  { %6663 = vmatpush1.bf16.msra.mxu1 %v10516_v14  ;;  %v10522_v14 = vld [vmem:[#allocation182_spill] sm:$0xff] }
 0xb80   :  { %6665 = vmatprep.subr.bf16.mxu1 %v10517_v22 }
 0xb95   :  { %v3660_v25 = vpop.f32.mrb[36].mxu1  ;;  %v3802_v52 = vpop.f32.mrb[74].mxu0 }
 0xb96   :  { %v3878_v56 = vadd.f32 %v3660_v25, %v1213_v46  ;;  %v3662_v31 = vpop.f32.mrb[37].mxu1  ;;  %v3804_v34 = vpop.f32.mrb[75].mxu0  ;;  %v7194_v41 = vadd.f32 %v3802_v52, %v10321_v29  ;;  %v10524_v52 = vld [vmem:[#allocation111_spill] sm:$0xff] }
 0xb97   :  { %v3879_v4 = vadd.f32 %v3662_v31, %v1215_v12  ;;  %v7195_v22 = vadd.f32 %v3804_v34, %v10522_v14  ;;  %v1328_v31 = vadd.f32 %v10524_v52, %v10223_v18 }
 0xb98   :  { %v3886_v19 = vmul.f32 0.5, %v3878_v56  ;;  %v10523_v56 = vld [vmem:[#allocation110_spill] sm:$0xff] }
 0xb99   :  { %v3887_v8 = vmul.f32 0.5, %v3879_v4 }
 0xb9a   :  { %7383 = vtanh.f32 %v3886_v19  ;;  %v1326_v19 = vadd.f32 %v10523_v56, %v10221_v20 }
 0xb9b   :  { %7385 = vtanh.f32 %v3887_v8 }
 0xb9c   :  { %7387 = vtanh.f32 %v7194_v41 }
 0xb9d   :  { %7389 = vtanh.f32 %v7195_v22 }
 0xba4   :  { %v7384_v11 = vpop.eup %7383 }
 0xba5   :  { %v7386_v37 = vpop.eup %7385  ;;  %v3890_v0 = vmul.f32 0.5, %v7384_v11 }
 0xba6   :  { %v3891_v36 = vmul.f32 0.5, %v7386_v37  ;;  %v7388_v44 = vpop.eup %7387 }
 0xba7   :  { %v3892_v16 = vadd.f32 0.5, %v3890_v0  ;;  %v7390_v46 = vpop.eup %7389 }
 0xba8   :  { %v3893_v25 = vadd.f32 0.5, %v3891_v36 }
 0xba9   :  { %v3914_v2 = vmul.f32 %v7388_v44, %v3892_v16 }
 0xbaa   :  { %v3915_v12 = vmul.f32 %v7390_v46, %v3893_v25 }
 0xbd5   :  { %v3731_v4 = vpop.f32.mrb[38].mxu1 }
 0xbd6   :  { %v3880_v34 = vadd.f32 %v3731_v4, %v1326_v19  ;;  %v3733_v8 = vpop.f32.mrb[39].mxu1  ;;  %v10525_v19 = vld [vmem:[#allocation174_spill] sm:$0xff]  ;;  %v10526_v4 = vld [vmem:[#allocation175_spill] sm:$0xff] }
 0xbd7   :  { %v3881_v22 = vadd.f32 %v3733_v8, %v1328_v31  ;;  %v1552_v31 = vadd.f32 %v10525_v19, %v10225_v1  ;;  %v10545_v19 = vld [vmem:[#allocation164_spill] sm:$0xff] }
 0xbd8   :  { %v3894_v41 = vmul.f32 0.5, %v3880_v34 }
 0xbd9   :  { %v3895_v14 = vmul.f32 0.5, %v3881_v22 }
 0xbda   :  { %7391 = vtanh.f32 %v3894_v41 }
 0xbdb   :  { %7393 = vtanh.f32 %v3895_v14  ;;  %v1554_v14 = vadd.f32 %v10526_v4, %v10227_v53  ;;  %v10547_v4 = vld [vmem:[#allocation130_spill] sm:$0xff] }
 0xbe4   :  { %v7392_v0 = vpop.eup %7391 }
 0xbe5   :  { %v7394_v37 = vpop.eup %7393  ;;  %v3898_v11 = vmul.f32 0.5, %v7392_v0 }
 0xbe6   :  { %v3899_v36 = vmul.f32 0.5, %v7394_v37 }
 0xbe7   :  { %v3900_v44 = vadd.f32 0.5, %v3898_v11 }
 0xbe8   :  { %v3901_v16 = vadd.f32 0.5, %v3899_v36 }
 0xbe9   :  { %v3912_v25 = vmul.f32 %v3900_v44, %v9126_v43 }
 0xbea   :  { %v3913_v46 = vmul.f32 %v3901_v16, %v9128_v54 }
 0xbeb   :  { %v9288_v56 = vadd.f32 %v3914_v2, %v3912_v25 }
 0xbec   :  { %v9290_v52 = vadd.f32 %v3915_v12, %v3913_v46 }
 0xc15   :  { %v3873_v34 = vpop.f32.mrb[40].mxu1 }
 0xc16   :  { %v3884_v8 = vadd.f32 %v3873_v34, %v1552_v31  ;;  %v3875_v22 = vpop.f32.mrb[41].mxu1  ;;  %v10546_v31 = vld [vmem:[#allocation129_spill] sm:$0xff]  ;;  %v10549_v34 = vld [vmem:[#allocation166_spill] sm:$0xff] }
 0xc17   :  { %v3885_v41 = vadd.f32 %v3875_v22, %v1554_v14  ;;  %v10548_v14 = vld [vmem:[#allocation165_spill] sm:$0xff]  ;;  %v10551_v22 = vld [vmem:[#allocation63_spill] sm:$0xff] }
 0xc18   :  { %v3904_v0 = vmul.f32 0.5, %v3884_v8  ;;  %v10550_v8 = vld [vmem:[#allocation133_spill] sm:$0xff] }
 0xc19   :  { %v3905_v37 = vmul.f32 0.5, %v3885_v41  ;;  %v10552_v41 = vld [vmem:[#allocation167_spill] sm:$0xff] }
 0xc1a   :  { %7395 = vtanh.f32 %v3904_v0  ;;  %v10553_v0 = vld [vmem:[#allocation64_spill] sm:$0xff] }
 0xc1b   :  { %7397 = vtanh.f32 %v3905_v37  ;;  %v10554_v37 = vld [vmem:[#allocation67_spill] sm:$0xff] }
 0xc1c   :  { %7399 = vtanh.f32 %v9290_v52 }
 0xc1d   :  { %7401 = vtanh.f32 %v9288_v56 }
 0xc24   :  { %v7396_v43 = vpop.eup %7395 }
 0xc25   :  { %v7398_v54 = vpop.eup %7397  ;;  %v3908_v2 = vmul.f32 0.5, %v7396_v43  ;;  %v10555_v43 = vld [vmem:[#allocation68_spill] sm:$0xff] }
 0xc26   :  { %v3909_v12 = vmul.f32 0.5, %v7398_v54  ;;  %v7400_v44 = vpop.eup %7399  ;;  %v10556_v54 = vld [vmem:[#allocation71_spill] sm:$0xff] }
 0xc27   :  { %v3910_v11 = vadd.f32 0.5, %v3908_v2  ;;  %v7402_v16 = vpop.eup %7401  ;;  %v10557_v2 = vld [vmem:[#allocation72_spill] sm:$0xff] }
 0xc28   :  { %v3911_v36 = vadd.f32 0.5, %v3909_v12  ;;  %v10558_v12 = vld [vmem:[#allocation75_spill] sm:$0xff] }
 0xc29   :  { %v9300_v46 = vmul.f32 %v7402_v16, %v3910_v11  ;;  %v10559_v11 = vld [vmem:[#allocation76_spill] sm:$0xff]  ;;  %v10562_v16 = vld [vmem:[#allocation83_spill] sm:$0xff] }
 0xc2a   :  { %v9298_v25 = vmul.f32 %v7400_v44, %v3911_v36  ;;  %v10560_v36 = vld [vmem:[#allocation79_spill] sm:$0xff]  ;;  %v10561_v44 = vld [vmem:[#allocation80_spill] sm:$0xff] }
 0xc2c   :  { %3997 = vmatprep.mubr.f32.mxu1 %v9298_v25  ;;  %4139 = vmatprep.mubr.f32.mxu0 %v9298_v25 }
 0xc2d   :  { %3998 = vmatmul.mubr.f32.vlgmr.msra.gmra.mrb[42].mxu1 %v9300_v46  ;;  %4140 = vmatmul.mubr.f32.vlgmr.msra.gmra.mrb[76].mxu0 %v9300_v46 }
 0xc2e   :  { %6667 = vmatpush1.bf16.msra.mxu1 %v10065_v49  ;;  %4068 = vmatprep.mubr.f32.mxu1 %v9298_v25 }
 0xc2f   :  { %6669 = vmatprep.subr.bf16.mxu1 %v10066_v13  ;;  %6987 = vmatpush1.bf16.msra.mxu0 %v10097_v35  ;;  %v10537_v35 = vld [vmem:[#allocation160_spill] sm:$0xff] }
 0xc30   :  { %6989 = vmatprep.subr.bf16.mxu0 %v10098_v48  ;;  %v10538_v48 = vld [vmem:[#allocation119_spill] sm:$0xff] }
 0xc32   :  { %6671 = vmatpush1.bf16.msra.mxu1 %v10067_v9 }
 0xc33   :  { %6673 = vmatprep.subr.bf16.mxu1 %v10068_v5  ;;  %6991 = vmatpush1.bf16.msra.mxu0 %v10099_v47  ;;  %v10541_v47 = vld [vmem:[#allocation162_spill] sm:$0xff] }
 0xc34   :  { %6993 = vmatprep.subr.bf16.mxu0 %v10100_v62  ;;  %v10543_v62 = vld [vmem:[#allocation126_spill] sm:$0xff] }
 0xc36   :  { %6675 = vmatpush1.bf16.msra.mxu1 %v10069_v60 }
 0xc37   :  { %6677 = vmatprep.subr.bf16.mxu1 %v10070_v24  ;;  %6995 = vmatpush1.bf16.msra.mxu0 %v10101_v6  ;;  %v10539_v6 = vld [vmem:[#allocation120_spill] sm:$0xff] }
 0xc38   :  { %6997 = vmatprep.subr.bf16.mxu0 %v10102_v42  ;;  %v10534_v42 = vld [vmem:[#allocation113_spill] sm:$0xff] }
 0xc3a   :  { %6679 = vmatpush1.bf16.msra.mxu1 %v10071_v50 }
 0xc3b   :  { %6681 = vmatprep.subr.bf16.mxu1 %v10072_v63  ;;  %6999 = vmatpush1.bf16.msra.mxu0 %v10103_v33  ;;  %v10533_v33 = vld [vmem:[#allocation158_spill] sm:$0xff] }
 0xc3c   :  { %7001 = vmatprep.subr.bf16.mxu0 %v10104_v21  ;;  %v10542_v21 = vld [vmem:[#allocation125_spill] sm:$0xff] }
 0xc3e   :  { %6683 = vmatpush1.bf16.msra.mxu1 %v10073_v23 }
 0xc3f   :  { %6685 = vmatprep.subr.bf16.mxu1 %v10074_v58  ;;  %7003 = vmatpush1.bf16.msra.mxu0 %v10105_v3  ;;  %v10540_v3 = vld [vmem:[#allocation161_spill] sm:$0xff] }
 0xc40   :  { %7005 = vmatprep.subr.bf16.mxu0 %v10106_v27  ;;  %v10530_v27 = vld [vmem:[#allocation107_spill] sm:$0xff] }
 0xc42   :  { %6687 = vmatpush1.bf16.msra.mxu1 %v10075_v10 }
 0xc43   :  { %6689 = vmatprep.subr.bf16.mxu1 %v10076_v51  ;;  %7007 = vmatpush1.bf16.msra.mxu0 %v10107_v59  ;;  %v10529_v59 = vld [vmem:[#allocation156_spill] sm:$0xff] }
 0xc44   :  { %7009 = vmatprep.subr.bf16.mxu0 %v10108_v17  ;;  %v10544_v17 = vld [vmem:[#allocation163_spill] sm:$0xff] }
 0xc46   :  { %6691 = vmatpush1.bf16.msra.mxu1 %v10077_v30 }
 0xc47   :  { %6693 = vmatprep.subr.bf16.mxu1 %v10078_v26  ;;  %7011 = vmatpush1.bf16.msra.mxu0 %v10109_v7  ;;  %v10527_v7 = vld [vmem:[#allocation102_spill] sm:$0xff] }
 0xc48   :  { %7013 = vmatprep.subr.bf16.mxu0 %v10110_v61  ;;  %v10528_v61 = vld [vmem:[#allocation155_spill] sm:$0xff] }
 0xc4a   :  { %6695 = vmatpush1.bf16.msra.mxu1 %v10079_v38 }
 0xc4b   :  { %6697 = vmatprep.subr.bf16.mxu1 %v10080_v15  ;;  %7015 = vmatpush1.bf16.msra.mxu0 %v10111_v40  ;;  %v10531_v40 = vld [vmem:[#allocation108_spill] sm:$0xff] }
 0xc4c   :  { %7017 = vmatprep.subr.bf16.mxu0 %v10112_v39  ;;  %v10532_v39 = vld [vmem:[#allocation157_spill] sm:$0xff] }
 0xc4e   :  { %6699 = vmatpush1.bf16.msra.mxu1 %v10081_v55 }
 0xc4f   :  { %6701 = vmatprep.subr.bf16.mxu1 %v10082_v28  ;;  %7019 = vmatpush1.bf16.msra.mxu0 %v10113_v57  ;;  %v10535_v57 = vld [vmem:[#allocation114_spill] sm:$0xff] }
 0xc50   :  { %7021 = vmatprep.subr.bf16.mxu0 %v10114_v32  ;;  %v10536_v32 = vld [vmem:[#allocation159_spill] sm:$0xff] }
 0xc52   :  { %6703 = vmatpush1.bf16.msra.mxu1 %v10083_v45 }
 0xc53   :  { %6705 = vmatprep.subr.bf16.mxu1 %v10527_v7  ;;  %7023 = vmatpush1.bf16.msra.mxu0 %v10528_v61  ;;  %v10563_v61 = vld [vmem:[#allocation84_spill] sm:$0xff] }
 0xc54   :  { %7025 = vmatprep.subr.bf16.mxu0 %v10529_v59  ;;  %v10565_v59 = vld [vmem:[#allocation88_spill] sm:$0xff] }
 0xc56   :  { %6707 = vmatpush1.bf16.msra.mxu1 %v10530_v27 }
 0xc57   :  { %6709 = vmatprep.subr.bf16.mxu1 %v10531_v40  ;;  %7027 = vmatpush1.bf16.msra.mxu0 %v10532_v39  ;;  %v10566_v39 = vld [vmem:[#allocation91_spill] sm:$0xff] }
 0xc58   :  { %7029 = vmatprep.subr.bf16.mxu0 %v10533_v33  ;;  %v10567_v33 = vld [vmem:[#allocation94_spill] sm:$0xff] }
 0xc5a   :  { %6711 = vmatpush1.bf16.msra.mxu1 %v10534_v42 }
 0xc5b   :  { %6713 = vmatprep.subr.bf16.mxu1 %v10535_v57  ;;  %7031 = vmatpush1.bf16.msra.mxu0 %v10536_v32  ;;  %v10568_v32 = vld [vmem:[#allocation97_spill] sm:$0xff] }
 0xc5c   :  { %7033 = vmatprep.subr.bf16.mxu0 %v10537_v35  ;;  %v10569_v35 = vld [vmem:[#allocation100_spill] sm:$0xff] }
 0xc5e   :  { %6715 = vmatpush1.bf16.msra.mxu1 %v10538_v48 }
 0xc5f   :  { %6717 = vmatprep.subr.bf16.mxu1 %v10539_v6  ;;  %7035 = vmatpush1.bf16.msra.mxu0 %v10540_v3  ;;  %v10570_v3 = vld [vmem:[#allocation103_spill] sm:$0xff] }
 0xc60   :  { %7037 = vmatprep.subr.bf16.mxu0 %v10541_v47  ;;  %v10571_v47 = vld [vmem:[#allocation106_spill] sm:$0xff] }
 0xc62   :  { %6719 = vmatpush1.bf16.msra.mxu1 %v10542_v21 }
 0xc63   :  { %6721 = vmatprep.subr.bf16.mxu1 %v10543_v62  ;;  %7039 = vmatpush1.bf16.msra.mxu0 %v10544_v17  ;;  %v10572_v17 = vld [vmem:[#allocation109_spill] sm:$0xff] }
 0xc64   :  { %7041 = vmatprep.subr.bf16.mxu0 %v10545_v19  ;;  %v10573_v19 = vld [vmem:[#allocation112_spill] sm:$0xff] }
 0xc66   :  { %6723 = vmatpush1.bf16.msra.mxu1 %v10546_v31 }
 0xc67   :  { %6725 = vmatprep.subr.bf16.mxu1 %v10547_v4  ;;  %7043 = vmatpush1.bf16.msra.mxu0 %v10548_v14  ;;  %v10574_v14 = vld [vmem:[#allocation115_spill] sm:$0xff] }
 0xc68   :  { %7045 = vmatprep.subr.bf16.mxu0 %v10549_v34  ;;  %v10575_v34 = vld [vmem:[#allocation118_spill] sm:$0xff] }
 0xc6a   :  { %6727 = vmatpush1.bf16.msra.mxu1 %v10550_v8 }
 0xc6b   :  { %6793 = vmatprep.subr.bf16.mxu1 %v10551_v22  ;;  %7047 = vmatpush1.bf16.msra.mxu0 %v10552_v41  ;;  %v10576_v41 = vld [vmem:[#allocation121_spill] sm:$0xff] }
 0xc6d   :  { %4069 = vmatmul.mubr.f32.vlgmr.msra.gmra.mrb[44].mxu1 %v9300_v46 }
 0xc6e   :  { %6795 = vmatpush1.bf16.msra.mxu1 %v10553_v0  ;;  %4210 = vmatprep.mubr.f32.mxu1 %v9298_v25  ;;  %v10564_v25 = vld [vmem:[#allocation87_spill] sm:$0xff] }
 0xc6f   :  { %6797 = vmatprep.subr.bf16.mxu1 %v10554_v37 }
 0xc72   :  { %6799 = vmatpush1.bf16.msra.mxu1 %v10555_v43 }
 0xc73   :  { %6801 = vmatprep.subr.bf16.mxu1 %v10556_v54 }
 0xc76   :  { %6803 = vmatpush1.bf16.msra.mxu1 %v10557_v2 }
 0xc77   :  { %6805 = vmatprep.subr.bf16.mxu1 %v10558_v12 }
 0xc7a   :  { %6807 = vmatpush1.bf16.msra.mxu1 %v10559_v11 }
 0xc7b   :  { %6809 = vmatprep.subr.bf16.mxu1 %v10560_v36 }
 0xc7e   :  { %6811 = vmatpush1.bf16.msra.mxu1 %v10561_v44 }
 0xc7f   :  { %6813 = vmatprep.subr.bf16.mxu1 %v10562_v16 }
 0xc82   :  { %6815 = vmatpush1.bf16.msra.mxu1 %v10563_v61 }
 0xc83   :  { %6817 = vmatprep.subr.bf16.mxu1 %v10564_v25 }
 0xc86   :  { %6819 = vmatpush1.bf16.msra.mxu1 %v10565_v59  ;;  %v10620_v59 = vld [vmem:[#allocation50_spill] sm:$0xff] }
 0xc87   :  { %6821 = vmatprep.subr.bf16.mxu1 %v10566_v39  ;;  %v10577_v39 = vld [vmem:[#allocation124_spill] sm:$0xff] }
 0xc8a   :  { %6823 = vmatpush1.bf16.msra.mxu1 %v10567_v33  ;;  %v10578_v33 = vld [vmem:[#allocation127_spill] sm:$0xff] }
 0xc8b   :  { %6825 = vmatprep.subr.bf16.mxu1 %v10568_v32  ;;  %v10579_v32 = vld [vmem:[#allocation128_spill] sm:$0xff] }
 0xc8e   :  { %6827 = vmatpush1.bf16.msra.mxu1 %v10569_v35  ;;  %v10580_v35 = vld [vmem:[#allocation131_spill] sm:$0xff] }
 0xc8f   :  { %6829 = vmatprep.subr.bf16.mxu1 %v10570_v3  ;;  %v10581_v3 = vld [vmem:[#allocation132_spill] sm:$0xff] }
 0xc92   :  { %6831 = vmatpush1.bf16.msra.mxu1 %v10571_v47  ;;  %v10582_v47 = vld [vmem:[#allocation135_spill] sm:$0xff] }
 0xc93   :  { %6833 = vmatprep.subr.bf16.mxu1 %v10572_v17  ;;  %v10583_v17 = vld [vmem:[#allocation136_spill] sm:$0xff] }
 0xc96   :  { %6835 = vmatpush1.bf16.msra.mxu1 %v10573_v19  ;;  %v10584_v19 = vld [vmem:[#allocation16_spill] sm:$0xff] }
 0xc97   :  { %6837 = vmatprep.subr.bf16.mxu1 %v10574_v14 }
 0xc9a   :  { %6839 = vmatpush1.bf16.msra.mxu1 %v10575_v34  ;;  %v10585_v34 = vld [vmem:[#allocation17_spill] sm:$0xff] }
 0xc9b   :  { %6841 = vmatprep.subr.bf16.mxu1 %v10576_v41  ;;  %v10586_v41 = vld [vmem:[#allocation18_spill] sm:$0xff] }
 0xc9e   :  { %6843 = vmatpush1.bf16.msra.mxu1 %v10577_v39  ;;  %v10587_v39 = vld [vmem:[#allocation19_spill] sm:$0xff] }
 0xc9f   :  { %6845 = vmatprep.subr.bf16.mxu1 %v10578_v33  ;;  %v10588_v33 = vld [vmem:[#allocation20_spill] sm:$0xff] }
 0xca2   :  { %6847 = vmatpush1.bf16.msra.mxu1 %v10579_v32  ;;  %v10589_v32 = vld [vmem:[#allocation21_spill] sm:$0xff] }
 0xca3   :  { %6849 = vmatprep.subr.bf16.mxu1 %v10580_v35  ;;  %v10590_v35 = vld [vmem:[#allocation22_spill] sm:$0xff] }
 0xca6   :  { %6851 = vmatpush1.bf16.msra.mxu1 %v10581_v3  ;;  %v10591_v3 = vld [vmem:[#allocation23_spill] sm:$0xff] }
 0xca7   :  { %6853 = vmatprep.subr.bf16.mxu1 %v10582_v47  ;;  %v10592_v47 = vld [vmem:[#allocation24_spill] sm:$0xff] }
 0xcaa   :  { %6855 = vmatpush1.bf16.msra.mxu1 %v10583_v17  ;;  %v10593_v17 = vld [vmem:[#allocation25_spill] sm:$0xff] }
 0xcab   :  { %6857 = vmatprep.subr.bf16.mxu1 %v10584_v19  ;;  %v10594_v19 = vld [vmem:[#allocation26_spill] sm:$0xff] }
 0xcad   :  { %4211 = vmatmul.mubr.f32.vlgmr.msra.gmra.mrb[46].mxu1 %v9300_v46  ;;  %v10595_v46 = vld [vmem:[#allocation27_spill] sm:$0xff] }
 0xcae   :  { %6859 = vmatpush1.bf16.msra.mxu1 %v10585_v34  ;;  %v10596_v34 = vld [vmem:[#allocation28_spill] sm:$0xff] }
 0xcaf   :  { %6861 = vmatprep.subr.bf16.mxu1 %v10586_v41  ;;  %v10597_v41 = vld [vmem:[#allocation29_spill] sm:$0xff] }
 0xcb2   :  { %6863 = vmatpush1.bf16.msra.mxu1 %v10587_v39  ;;  %v10598_v39 = vld [vmem:[#allocation30_spill] sm:$0xff] }
 0xcb3   :  { %6865 = vmatprep.subr.bf16.mxu1 %v10588_v33  ;;  %v10599_v33 = vld [vmem:[#allocation31_spill] sm:$0xff] }
 0xcb6   :  { %6867 = vmatpush1.bf16.msra.mxu1 %v10589_v32  ;;  %v10600_v32 = vld [vmem:[#allocation32_spill] sm:$0xff] }
 0xcb7   :  { %6869 = vmatprep.subr.bf16.mxu1 %v10590_v35  ;;  %v10601_v35 = vld [vmem:[#allocation35_spill] sm:$0xff] }
 0xcba   :  { %6871 = vmatpush1.bf16.msra.mxu1 %v10591_v3  ;;  %v10602_v3 = vld [vmem:[#allocation36_spill] sm:$0xff] }
 0xcbb   :  { %6873 = vmatprep.subr.bf16.mxu1 %v10592_v47  ;;  %v10603_v47 = vld [vmem:[#allocation39_spill] sm:$0xff] }
 0xcbe   :  { %6875 = vmatpush1.bf16.msra.mxu1 %v10593_v17  ;;  %v10604_v17 = vld [vmem:[#allocation40_spill] sm:$0xff] }
 0xcbf   :  { %6877 = vmatprep.subr.bf16.mxu1 %v10594_v19  ;;  %v10605_v19 = vld [vmem:[#allocation43_spill] sm:$0xff] }
 0xcc2   :  { %6879 = vmatpush1.bf16.msra.mxu1 %v10595_v46  ;;  %v10606_v46 = vld [vmem:[#allocation44_spill] sm:$0xff] }
 0xcc3   :  { %6881 = vmatprep.subr.bf16.mxu1 %v10596_v34  ;;  %v10607_v34 = vld [vmem:[#allocation47_spill] sm:$0xff] }
 0xcc6   :  { %6883 = vmatpush1.bf16.msra.mxu1 %v10597_v41  ;;  %v10608_v41 = vld [vmem:[#allocation48_spill] sm:$0xff] }
 0xcc7   :  { %6885 = vmatprep.subr.bf16.mxu1 %v10598_v39  ;;  %v10609_v39 = vld [vmem:[#allocation51_spill] sm:$0xff] }
 0xcca   :  { %6887 = vmatpush1.bf16.msra.mxu1 %v10599_v33  ;;  %v10610_v33 = vld [vmem:[#allocation52_spill] sm:$0xff] }
 0xccb   :  { %6889 = vmatprep.subr.bf16.mxu1 %v10600_v32  ;;  %v10611_v32 = vld [vmem:[#allocation55_spill] sm:$0xff] }
 0xcce   :  { %6891 = vmatpush1.bf16.msra.mxu1 %v10601_v35  ;;  %v10612_v35 = vld [vmem:[#allocation56_spill] sm:$0xff] }
 0xccf   :  { %6893 = vmatprep.subr.bf16.mxu1 %v10602_v3  ;;  %v10613_v3 = vld [vmem:[#allocation57_spill] sm:$0xff] }
 0xcd2   :  { %6895 = vmatpush1.bf16.msra.mxu1 %v10603_v47  ;;  %v10614_v47 = vld [vmem:[#allocation58_spill] sm:$0xff] }
 0xcd3   :  { %6897 = vmatprep.subr.bf16.mxu1 %v10604_v17  ;;  %v10615_v17 = vld [vmem:[#allocation59_spill] sm:$0xff] }
 0xcd6   :  { %6899 = vmatpush1.bf16.msra.mxu1 %v10605_v19  ;;  %v10616_v19 = vld [vmem:[#allocation60_spill] sm:$0xff] }
 0xcd7   :  { %6901 = vmatprep.subr.bf16.mxu1 %v10606_v46  ;;  %v10617_v46 = vld [vmem:[#allocation14_spill] sm:$0xff] }
 0xcda   :  { %6903 = vmatpush1.bf16.msra.mxu1 %v10607_v34  ;;  %v10618_v34 = vld [vmem:[#allocation49_spill] sm:$0xff] }
 0xcdb   :  { %6905 = vmatprep.subr.bf16.mxu1 %v10608_v41  ;;  %v1219_v14 = vadd.f32 %v10618_v34, %v10617_v46  ;;  %v10619_v41 = vld [vmem:[#allocation15_spill] sm:$0xff] }
 0xcde   :  { %6907 = vmatpush1.bf16.msra.mxu1 %v10609_v39  ;;  %v1221_v39 = vadd.f32 %v10620_v59, %v10619_v41 }
 0xcdf   :  { %6909 = vmatprep.subr.bf16.mxu1 %v10610_v33 }
 0xce2   :  { %6911 = vmatpush1.bf16.msra.mxu1 %v10611_v32 }
 0xce3   :  { %6913 = vmatprep.subr.bf16.mxu1 %v10612_v35 }
 0xce6   :  { %6915 = vmatpush1.bf16.msra.mxu1 %v10613_v3 }
 0xce7   :  { %6917 = vmatprep.subr.bf16.mxu1 %v10614_v47 }
 0xcea   :  { %6919 = vmatpush1.bf16.msra.mxu1 %v10615_v17  ;;  %v10621_v17 = vld [vmem:[#allocation182_spill] sm:$0xff] }
 0xceb   :  { %6921 = vmatprep.subr.bf16.mxu1 %v10616_v19 }
 0xd00   :  { %v3999_v25 = vpop.f32.mrb[42].mxu1  ;;  %v4141_v33 = vpop.f32.mrb[76].mxu0 }
 0xd01   :  { %v4217_v61 = vadd.f32 %v3999_v25, %v1219_v14  ;;  %v4001_v32 = vpop.f32.mrb[43].mxu1  ;;  %v4143_v16 = vpop.f32.mrb[77].mxu0  ;;  %v7196_v47 = vadd.f32 %v4141_v33, %v10321_v29  ;;  %v10623_v33 = vld [vmem:[#allocation117_spill] sm:$0xff] }
 0xd02   :  { %v4218_v35 = vadd.f32 %v4001_v32, %v1221_v39  ;;  %v7197_v19 = vadd.f32 %v4143_v16, %v10621_v17  ;;  %v1334_v32 = vadd.f32 %v10623_v33, %v10223_v18 }
 0xd03   :  { %v4225_v44 = vmul.f32 0.5, %v4217_v61  ;;  %v10622_v61 = vld [vmem:[#allocation116_spill] sm:$0xff] }
 0xd04   :  { %v4226_v3 = vmul.f32 0.5, %v4218_v35 }
 0xd05   :  { %7403 = vtanh.f32 %v4225_v44  ;;  %v1332_v44 = vadd.f32 %v10622_v61, %v10221_v20 }
 0xd06   :  { %7405 = vtanh.f32 %v4226_v3 }
 0xd07   :  { %7407 = vtanh.f32 %v7196_v47 }
 0xd08   :  { %7409 = vtanh.f32 %v7197_v19 }
 0xd0f   :  { %v7404_v34 = vpop.eup %7403 }
 0xd10   :  { %v7406_v46 = vpop.eup %7405  ;;  %v4229_v36 = vmul.f32 0.5, %v7404_v34 }
 0xd11   :  { %v4230_v59 = vmul.f32 0.5, %v7406_v46  ;;  %v7408_v11 = vpop.eup %7407 }
 0xd12   :  { %v4231_v41 = vadd.f32 0.5, %v4229_v36  ;;  %v7410_v14 = vpop.eup %7409 }
 0xd13   :  { %v4232_v25 = vadd.f32 0.5, %v4230_v59 }
 0xd14   :  { %v4253_v12 = vmul.f32 %v7408_v11, %v4231_v41 }
 0xd15   :  { %v4254_v39 = vmul.f32 %v7410_v14, %v4232_v25 }
 0xd40   :  { %v4070_v35 = vpop.f32.mrb[44].mxu1 }
 0xd41   :  { %v4219_v16 = vadd.f32 %v4070_v35, %v1332_v44  ;;  %v4072_v3 = vpop.f32.mrb[45].mxu1  ;;  %v10624_v44 = vld [vmem:[#allocation176_spill] sm:$0xff]  ;;  %v10625_v35 = vld [vmem:[#allocation177_spill] sm:$0xff] }
 0xd42   :  { %v4220_v47 = vadd.f32 %v4072_v3, %v1334_v32  ;;  %v1558_v32 = vadd.f32 %v10624_v44, %v10225_v1 }
 0xd43   :  { %v4233_v19 = vmul.f32 0.5, %v4219_v16 }
 0xd44   :  { %v4234_v17 = vmul.f32 0.5, %v4220_v47 }
 0xd45   :  { %7411 = vtanh.f32 %v4233_v19 }
 0xd46   :  { %7413 = vtanh.f32 %v4234_v17  ;;  %v1560_v17 = vadd.f32 %v10625_v35, %v10227_v53 }
 0xd4f   :  { %v7412_v36 = vpop.eup %7411 }
 0xd50   :  { %v7414_v46 = vpop.eup %7413  ;;  %v4237_v34 = vmul.f32 0.5, %v7412_v36 }
 0xd51   :  { %v4238_v59 = vmul.f32 0.5, %v7414_v46 }
 0xd52   :  { %v4239_v11 = vadd.f32 0.5, %v4237_v34 }
 0xd53   :  { %v4240_v41 = vadd.f32 0.5, %v4238_v59 }
 0xd54   :  { %v4251_v25 = vmul.f32 %v4239_v11, %v9288_v56 }
 0xd55   :  { %v4252_v14 = vmul.f32 %v4240_v41, %v9290_v52 }
 0xd56   :  { %v9449_v61 = vadd.f32 %v4253_v12, %v4251_v25 }
 0xd57   :  { %v9451_v33 = vadd.f32 %v4254_v39, %v4252_v14 }
 0xd80   :  { %v4212_v16 = vpop.f32.mrb[46].mxu1 }
 0xd81   :  { %v4223_v3 = vadd.f32 %v4212_v16, %v1558_v32  ;;  %v4214_v47 = vpop.f32.mrb[47].mxu1  ;;  %v10656_v16 = vld [vmem:[#allocation182_spill] sm:$0xff] }
 0xd82   :  { %v4224_v19 = vadd.f32 %v4214_v47, %v1560_v17 }
 0xd83   :  { %v4243_v36 = vmul.f32 0.5, %v4223_v3 }
 0xd84   :  { %v4244_v46 = vmul.f32 0.5, %v4224_v19 }
 0xd85   :  { %7415 = vtanh.f32 %v4243_v36 }
 0xd86   :  { %7417 = vtanh.f32 %v4244_v46 }
 0xd87   :  { %7419 = vtanh.f32 %v9451_v33 }
 0xd88   :  { %7421 = vtanh.f32 %v9449_v61 }
 0xd8f   :  { %v7416_v56 = vpop.eup %7415 }
 0xd90   :  { %v7418_v52 = vpop.eup %7417  ;;  %v4247_v12 = vmul.f32 0.5, %v7416_v56 }
 0xd91   :  { %v4248_v39 = vmul.f32 0.5, %v7418_v52  ;;  %v7420_v11 = vpop.eup %7419 }
 0xd92   :  { %v4249_v34 = vadd.f32 0.5, %v4247_v12  ;;  %v7422_v41 = vpop.eup %7421 }
 0xd93   :  { %v4250_v59 = vadd.f32 0.5, %v4248_v39 }
 0xd94   :  { %v9459_v14 = vmul.f32 %v7422_v41, %v4249_v34 }
 0xd95   :  { %v4260_v25 = vmul.f32 %v7420_v11, %v4250_v59  ;;  %v10657_v11 = vld [vmem:[#allocation122_spill] sm:$0xff] }
 0xd96   :  { %v1338_v41 = vadd.f32 %v10657_v11, %v10221_v20 }
 0xd97   :  { %4336 = vmatprep.mubr.f32.mxu1 %v4260_v25  ;;  %4478 = vmatprep.mubr.f32.mxu0 %v4260_v25 }
 0xd98   :  { %4337 = vmatmul.mubr.f32.vlgmr.msra.gmra.mrb[48].mxu1 %v9459_v14  ;;  %4479 = vmatmul.mubr.f32.vlgmr.msra.gmra.mrb[78].mxu0 %v9459_v14 }
 0xd99   :  { %6923 = vmatpush1.bf16.msra.mxu1 %v10065_v49  ;;  %4407 = vmatprep.mubr.f32.mxu1 %v4260_v25  ;;  %v10628_v49 = vld [vmem:[#allocation79_spill] sm:$0xff] }
 0xd9a   :  { %6925 = vmatprep.subr.bf16.mxu1 %v10066_v13  ;;  %v10629_v13 = vld [vmem:[#allocation80_spill] sm:$0xff] }
 0xd9d   :  { %6927 = vmatpush1.bf16.msra.mxu1 %v10067_v9  ;;  %v10630_v9 = vld [vmem:[#allocation83_spill] sm:$0xff] }
 0xd9e   :  { %6929 = vmatprep.subr.bf16.mxu1 %v10068_v5  ;;  %v10631_v5 = vld [vmem:[#allocation84_spill] sm:$0xff] }
 0xda1   :  { %6931 = vmatpush1.bf16.msra.mxu1 %v10069_v60  ;;  %v10632_v60 = vld [vmem:[#allocation87_spill] sm:$0xff] }
 0xda2   :  { %6933 = vmatprep.subr.bf16.mxu1 %v10070_v24  ;;  %v10633_v24 = vld [vmem:[#allocation88_spill] sm:$0xff] }
 0xda5   :  { %6935 = vmatpush1.bf16.msra.mxu1 %v10071_v50  ;;  %v10634_v50 = vld [vmem:[#allocation91_spill] sm:$0xff] }
 0xda6   :  { %6937 = vmatprep.subr.bf16.mxu1 %v10072_v63  ;;  %v10635_v63 = vld [vmem:[#allocation94_spill] sm:$0xff] }
 0xda9   :  { %6939 = vmatpush1.bf16.msra.mxu1 %v10073_v23  ;;  %v10636_v23 = vld [vmem:[#allocation97_spill] sm:$0xff] }
 0xdaa   :  { %6941 = vmatprep.subr.bf16.mxu1 %v10074_v58  ;;  %v10637_v58 = vld [vmem:[#allocation100_spill] sm:$0xff] }
 0xdad   :  { %6943 = vmatpush1.bf16.msra.mxu1 %v10075_v10  ;;  %v10638_v10 = vld [vmem:[#allocation103_spill] sm:$0xff] }
 0xdae   :  { %6945 = vmatprep.subr.bf16.mxu1 %v10076_v51  ;;  %v10639_v51 = vld [vmem:[#allocation106_spill] sm:$0xff] }
 0xdb1   :  { %6947 = vmatpush1.bf16.msra.mxu1 %v10077_v30  ;;  %v10640_v30 = vld [vmem:[#allocation109_spill] sm:$0xff] }
 0xdb2   :  { %6949 = vmatprep.subr.bf16.mxu1 %v10078_v26  ;;  %v10641_v26 = vld [vmem:[#allocation112_spill] sm:$0xff] }
 0xdb5   :  { %6951 = vmatpush1.bf16.msra.mxu1 %v10079_v38  ;;  %v10642_v38 = vld [vmem:[#allocation115_spill] sm:$0xff] }
 0xdb6   :  { %6953 = vmatprep.subr.bf16.mxu1 %v10080_v15  ;;  %v10643_v15 = vld [vmem:[#allocation118_spill] sm:$0xff] }
 0xdb9   :  { %6955 = vmatpush1.bf16.msra.mxu1 %v10081_v55  ;;  %v10644_v55 = vld [vmem:[#allocation121_spill] sm:$0xff] }
 0xdba   :  { %6957 = vmatprep.subr.bf16.mxu1 %v10082_v28  ;;  %v10626_v28 = vld [vmem:[#allocation75_spill] sm:$0xff] }
 0xdbd   :  { %6959 = vmatpush1.bf16.msra.mxu1 %v10083_v45  ;;  %v10627_v45 = vld [vmem:[#allocation76_spill] sm:$0xff] }
 0xdbe   :  { %6961 = vmatprep.subr.bf16.mxu1 %v10527_v7  ;;  %v10645_v7 = vld [vmem:[#allocation124_spill] sm:$0xff] }
 0xdc1   :  { %6963 = vmatpush1.bf16.msra.mxu1 %v10530_v27  ;;  %v10646_v27 = vld [vmem:[#allocation127_spill] sm:$0xff] }
 0xdc2   :  { %6965 = vmatprep.subr.bf16.mxu1 %v10531_v40  ;;  %v10647_v40 = vld [vmem:[#allocation128_spill] sm:$0xff] }
 0xdc5   :  { %6967 = vmatpush1.bf16.msra.mxu1 %v10534_v42  ;;  %v10648_v42 = vld [vmem:[#allocation131_spill] sm:$0xff] }
 0xdc6   :  { %6969 = vmatprep.subr.bf16.mxu1 %v10535_v57  ;;  %v10649_v57 = vld [vmem:[#allocation132_spill] sm:$0xff] }
 0xdc9   :  { %6971 = vmatpush1.bf16.msra.mxu1 %v10538_v48  ;;  %v10650_v48 = vld [vmem:[#allocation135_spill] sm:$0xff] }
 0xdca   :  { %6973 = vmatprep.subr.bf16.mxu1 %v10539_v6  ;;  %v10651_v6 = vld [vmem:[#allocation136_spill] sm:$0xff] }
 0xdcd   :  { %6975 = vmatpush1.bf16.msra.mxu1 %v10542_v21  ;;  %v10652_v21 = vld [vmem:[#allocation14_spill] sm:$0xff] }
 0xdce   :  { %6977 = vmatprep.subr.bf16.mxu1 %v10543_v62  ;;  %v10653_v62 = vld [vmem:[#allocation53_spill] sm:$0xff] }
 0xdd1   :  { %6979 = vmatpush1.bf16.msra.mxu1 %v10546_v31  ;;  %v1225_v31 = vadd.f32 %v10653_v62, %v10652_v21 }
 0xdd2   :  { %6981 = vmatprep.subr.bf16.mxu1 %v10547_v4  ;;  %v10654_v4 = vld [vmem:[#allocation15_spill] sm:$0xff] }
 0xdd5   :  { %6983 = vmatpush1.bf16.msra.mxu1 %v10550_v8  ;;  %v10655_v8 = vld [vmem:[#allocation54_spill] sm:$0xff] }
 0xdd6   :  { %7049 = vmatprep.subr.bf16.mxu1 %v10551_v22  ;;  %v1227_v22 = vadd.f32 %v10655_v8, %v10654_v4 }
 0xdd8   :  { %4408 = vmatmul.mubr.f32.vlgmr.msra.gmra.mrb[50].mxu1 %v9459_v14 }
 0xdd9   :  { %7051 = vmatpush1.bf16.msra.mxu1 %v10553_v0  ;;  %4549 = vmatprep.mubr.f32.mxu1 %v4260_v25 }
 0xdda   :  { %7053 = vmatprep.subr.bf16.mxu1 %v10554_v37 }
 0xddd   :  { %7055 = vmatpush1.bf16.msra.mxu1 %v10555_v43 }
 0xdde   :  { %7057 = vmatprep.subr.bf16.mxu1 %v10556_v54 }
 0xde1   :  { %7059 = vmatpush1.bf16.msra.mxu1 %v10557_v2 }
 0xde2   :  { %7061 = vmatprep.subr.bf16.mxu1 %v10626_v28 }
 0xde5   :  { %7063 = vmatpush1.bf16.msra.mxu1 %v10627_v45 }
 0xde6   :  { %7065 = vmatprep.subr.bf16.mxu1 %v10628_v49 }
 0xde9   :  { %7067 = vmatpush1.bf16.msra.mxu1 %v10629_v13 }
 0xdea   :  { %7069 = vmatprep.subr.bf16.mxu1 %v10630_v9 }
 0xded   :  { %7071 = vmatpush1.bf16.msra.mxu1 %v10631_v5 }
 0xdee   :  { %7073 = vmatprep.subr.bf16.mxu1 %v10632_v60 }
 0xdf1   :  { %7075 = vmatpush1.bf16.msra.mxu1 %v10633_v24 }
 0xdf2   :  { %7077 = vmatprep.subr.bf16.mxu1 %v10634_v50 }
 0xdf5   :  { %7079 = vmatpush1.bf16.msra.mxu1 %v10635_v63 }
 0xdf6   :  { %7081 = vmatprep.subr.bf16.mxu1 %v10636_v23 }
 0xdf9   :  { %7083 = vmatpush1.bf16.msra.mxu1 %v10637_v58 }
 0xdfa   :  { %7085 = vmatprep.subr.bf16.mxu1 %v10638_v10 }
 0xdfd   :  { %7087 = vmatpush1.bf16.msra.mxu1 %v10639_v51  ;;  %v10659_v51 = vld [vmem:[#allocation178_spill] sm:$0xff] }
 0xdfe   :  { %7089 = vmatprep.subr.bf16.mxu1 %v10640_v30  ;;  %v1564_v30 = vadd.f32 %v10659_v51, %v10225_v1 }
 0xe01   :  { %7091 = vmatpush1.bf16.msra.mxu1 %v10641_v26  ;;  %v10660_v26 = vld [vmem:[#allocation179_spill] sm:$0xff] }
 0xe02   :  { %7093 = vmatprep.subr.bf16.mxu1 %v10642_v38  ;;  %v1566_v38 = vadd.f32 %v10660_v26, %v10227_v53 }
 0xe05   :  { %7095 = vmatpush1.bf16.msra.mxu1 %v10643_v15 }
 0xe06   :  { %7097 = vmatprep.subr.bf16.mxu1 %v10644_v55 }
 0xe09   :  { %7099 = vmatpush1.bf16.msra.mxu1 %v10645_v7 }
 0xe0a   :  { %7101 = vmatprep.subr.bf16.mxu1 %v10646_v27 }
 0xe0d   :  { %7103 = vmatpush1.bf16.msra.mxu1 %v10647_v40 }
 0xe0e   :  { %7105 = vmatprep.subr.bf16.mxu1 %v10648_v42 }
 0xe11   :  { %7107 = vmatpush1.bf16.msra.mxu1 %v10649_v57 }
 0xe12   :  { %7109 = vmatprep.subr.bf16.mxu1 %v10650_v48 }
 0xe15   :  { %7111 = vmatpush1.bf16.msra.mxu1 %v10651_v6 }
 0xe18   :  { %4550 = vmatmul.mubr.f32.vlgmr.msra.gmra.mrb[52].mxu1 %v9459_v14 }
 0xe6b   :  { %v4338_v0 = vpop.f32.mrb[48].mxu1  ;;  %v4480_v37 = vpop.f32.mrb[78].mxu0 }
 0xe6c   :  { %v4556_v43 = vadd.f32 %v4338_v0, %v1225_v31  ;;  %v4340_v54 = vpop.f32.mrb[49].mxu1  ;;  %v4482_v2 = vpop.f32.mrb[79].mxu0  ;;  %v7198_v17 = vadd.f32 %v4480_v37, %v10321_v29  ;;  %v10658_v29 = vld [vmem:[#allocation123_spill] sm:$0xff] }
 0xe6d   :  { %v4557_v44 = vadd.f32 %v4340_v54, %v1227_v22  ;;  %v7199_v3 = vadd.f32 %v4482_v2, %v10656_v16  ;;  %v1340_v25 = vadd.f32 %v10658_v29, %v10223_v18 }
 0xe6e   :  { %v4564_v32 = vmul.f32 0.5, %v4556_v43 }
 0xe6f   :  { %v4565_v35 = vmul.f32 0.5, %v4557_v44 }
 0xe70   :  { %7423 = vtanh.f32 %v4564_v32 }
 0xe71   :  { %7425 = vtanh.f32 %v4565_v35 }
 0xe72   :  { %7427 = vtanh.f32 %v7198_v17 }
 0xe73   :  { %7429 = vtanh.f32 %v7199_v3 }
 0xe7a   :  { %v7424_v47 = vpop.eup %7423 }
 0xe7b   :  { %v7426_v19 = vpop.eup %7425  ;;  %v4568_v36 = vmul.f32 0.5, %v7424_v47 }
 0xe7c   :  { %v4569_v46 = vmul.f32 0.5, %v7426_v19  ;;  %v7428_v52 = vpop.eup %7427 }
 0xe7d   :  { %v4570_v56 = vadd.f32 0.5, %v4568_v36  ;;  %v7430_v39 = vpop.eup %7429 }
 0xe7e   :  { %v4571_v12 = vadd.f32 0.5, %v4569_v46 }
 0xe7f   :  { %v4592_v34 = vmul.f32 %v7428_v52, %v4570_v56 }
 0xe80   :  { %v4593_v59 = vmul.f32 %v7430_v39, %v4571_v12 }
 0xeab   :  { %v4409_v14 = vpop.f32.mrb[50].mxu1 }
 0xeac   :  { %v4558_v28 = vadd.f32 %v4409_v14, %v1338_v41  ;;  %v4411_v45 = vpop.f32.mrb[51].mxu1 }
 0xead   :  { %v4559_v49 = vadd.f32 %v4411_v45, %v1340_v25 }
 0xeae   :  { %v4572_v13 = vmul.f32 0.5, %v4558_v28 }
 0xeaf   :  { %v4573_v9 = vmul.f32 0.5, %v4559_v49 }
 0xeb0   :  { %7431 = vtanh.f32 %v4572_v13 }
 0xeb1   :  { %7433 = vtanh.f32 %v4573_v9 }
 0xeba   :  { %v7432_v5 = vpop.eup %7431 }
 0xebb   :  { %v7434_v60 = vpop.eup %7433  ;;  %v4576_v24 = vmul.f32 0.5, %v7432_v5 }
 0xebc   :  { %v4577_v50 = vmul.f32 0.5, %v7434_v60 }
 0xebd   :  { %v4578_v63 = vadd.f32 0.5, %v4576_v24 }
 0xebe   :  { %v4579_v23 = vadd.f32 0.5, %v4577_v50 }
 0xebf   :  { %v4590_v58 = vmul.f32 %v4578_v63, %v9449_v61 }
 0xec0   :  { %v4591_v20 = vmul.f32 %v4579_v23, %v9451_v33 }
 0xec1   :  { %v4594_v10 = vadd.f32 %v4592_v34, %v4590_v58 }
 0xec2   :  { %v4595_v18 = vadd.f32 %v4593_v59, %v4591_v20 }
 0xeeb   :  { %v4551_v15 = vpop.f32.mrb[52].mxu1 }
 0xeec   :  { %v4562_v55 = vadd.f32 %v4551_v15, %v1564_v30  ;;  %v4553_v7 = vpop.f32.mrb[53].mxu1 }
 0xeed   :  { %v4563_v27 = vadd.f32 %v4553_v7, %v1566_v38 }
 0xeee   :  { %v4582_v40 = vmul.f32 0.5, %v4562_v55 }
 0xeef   :  { %v4583_v42 = vmul.f32 0.5, %v4563_v27 }
 0xef0   :  { %7435 = vtanh.f32 %v4582_v40 }
 0xef1   :  { %7437 = vtanh.f32 %v4583_v42 }
 0xef2   :  { %7439 = vtanh.f32 %v4594_v10 }
 0xef3   :  { %7441 = vtanh.f32 %v4595_v18 }
 0xefa   :  { %v7436_v61 = vpop.eup %7435 }
 0xefb   :  { %v7438_v33 = vpop.eup %7437  ;;  %v4586_v57 = vmul.f32 0.5, %v7436_v61 }
 0xefc   :  { %v4587_v48 = vmul.f32 0.5, %v7438_v33  ;;  %v7440_v21 = vpop.eup %7439 }
 0xefd   :  { %v4588_v6 = vadd.f32 0.5, %v4586_v57  ;;  %v7442_v62 = vpop.eup %7441 }
 0xefe   :  { %v4589_v1 = vadd.f32 0.5, %v4587_v48 }
 0xeff   :  { %v4598_v31 = vmul.f32 %v7440_v21, %v4588_v6 }
 0xf00   :  { %v4599_v53 = vmul.f32 %v7442_v62, %v4589_v1 }
 0xf01   :  { %4600 = vst [vmem:[%s9558_s8] sm:$0xff] %v4598_v31 }
 0xf02   :  { %4601 = vst [vmem:[%s9558_s8 + $0x8] sm:$0xff] %v4599_v53 }
 0xf03   :  { %4606 = vsyncpa [#allocation4], 1 }
 0xf04   :  { %4607 = vsyncpa [#allocation6], 1 }
 0xf05   :  { %4608 = vsyncpa [#allocation9], 1 }

</bundles_post_ra>
